<compile_context>
chip_gen: v6e
topology: v6e:2x2x1
jax: 0.10.0
libtpu: 0.0.40
codegen_flags: <defaults>
</compile_context>

<pallas_src>
import functools

import jax
import jax.numpy as jnp
from jax.experimental import pallas as pl
from jax.experimental.pallas import tpu as pltpu


# ----------------------------------------------------------------------------
# Pallas kernel: one block of `block_n` main nodes and their K neighbours.
# ----------------------------------------------------------------------------
def _gat_head_kernel(main_ref, neigh_ref, wx_ref, wn2_ref, bias_ref, out_ref):
    bn, E = out_ref.shape
    K = neigh_ref.shape[0] // bn

    # Fused neighbour matmul: [projected_neigh | pn @ A_n^T] = neigh @ [W^T | W^T A_n^T]
    proj = jnp.dot(neigh_ref[...], wn2_ref[...],
                   preferred_element_type=jnp.float32)           # (bn*K, 2E) f32
    pn = proj[:, :E].reshape(bn, K, E)                           # projected_neigh
    en = proj[:, E:].reshape(bn, K, E)                           # neighbour part of e_ij

    # Main-node contribution, algebraically fused: (main @ W^T) @ A_x^T = main @ (W^T A_x^T)
    # Bias is folded in here at (bn, E) instead of broadcast over (bn, K, E).
    em = jnp.dot(main_ref[...], wx_ref[...],
                 preferred_element_type=jnp.float32) + bias_ref[...]   # (bn, E) f32

    # attentionDense(concat([px, pn])) + bias, then LeakyReLU(negative_slope=0.01)
    e = en + em[:, None, :]                                      # (bn, K, E)
    e = jnp.maximum(e, 0.01 * e)                                 # LeakyReLU, 2 VPU ops/elt

    # softmax over the neighbour axis (dim=1)
    m = jnp.max(e, axis=1, keepdims=True)
    p = jnp.exp(e - m)
    inv = pl.reciprocal(jnp.sum(p, axis=1, keepdims=True), approx=True)
    a = p * inv

    # weighted sum of projected neighbours; numHeads == 1 so the head-mean is identity
    out_ref[...] = jnp.sum(a * pn, axis=1).astype(out_ref.dtype)


# ----------------------------------------------------------------------------
# Wrapper: multiHeadAttention.forward (numHeads=1, mode='repeat')
# ----------------------------------------------------------------------------
def multi_head_attention(main, neigh, w_weight, attn_weight, attn_bias,
                         *, block_n=None, out_dtype=jnp.bfloat16, interpret=False):
    """
    main:        (N, E)     mainNodeEmbed
    neigh:       (N, K, E)  neighbourNodesEmbeds
    w_weight:    (E, E)     selfAttention.w.weight          (Linear(E, E, bias=False))
    attn_weight: (E, 2E)    selfAttention.attentionDense.weight
    attn_bias:   (E,)       selfAttention.attentionDense.bias
    """
    N, E = main.shape
    K = neigh.shape[1]

    if block_n is None:
        # Large node tiles amortize per-step overhead / reach HBM roofline; keep the
        # grid >= 2 so "parallel" shards across v7x's 2 TensorCores, and cap at 512
        # rows so f32 intermediates stay comfortably under v7x's 64 MiB VMEM.
        block_n = min(512, max(16, N // 2))
    block_n = min(block_n, N)

    # Layout guards: bf16 operand blocks tile as (16,128); K % 8 == 0 keeps the
    # (bn*K, E) -> (bn, K, E) reshape a sublane-aligned layout no-op.
    assert N % block_n == 0 and block_n % 16 == 0
    assert E % 128 == 0 and K % 8 == 0

    # torch Linear: y = x @ W.T. In the reference, concat order is [projected_x | projected_neigh],
    # so input-columns [:E] of attentionDense.weight act on px and [E:] on pn.
    wT = w_weight.T.astype(jnp.float32)                      # (E, E)
    AxT = attn_weight[:, :E].T.astype(jnp.float32)           # (E, E)
    AnT = attn_weight[:, E:].T.astype(jnp.float32)           # (E, E)

    # Pre-fused weights (computed once in f32, cast to bf16 for the MXU).
    wx_fused = jnp.dot(wT, AxT).astype(jnp.bfloat16)                                   # (E, E)
    wn2_fused = jnp.concatenate([wT, jnp.dot(wT, AnT)], axis=1).astype(jnp.bfloat16)   # (E, 2E)
    bias = attn_bias.reshape(1, E).astype(jnp.float32)

    main_bf = main.astype(jnp.bfloat16)
    neigh_bf = neigh.reshape(N * K, E).astype(jnp.bfloat16)  # flatten in the wrapper (no in-kernel relayout)

    bk = block_n * K
    return pl.pallas_call(
        _gat_head_kernel,
        out_shape=jax.ShapeDtypeStruct((N, E), out_dtype),
        grid=(N // block_n,),
        in_specs=[
            pl.BlockSpec((block_n, E), lambda i: (i, 0)),     # main rows
            pl.BlockSpec((bk, E), lambda i: (i, 0)),          # K neighbour rows per main row
            pl.BlockSpec((E, E), lambda i: (0, 0)),           # fused main weight
            pl.BlockSpec((E, 2 * E), lambda i: (0, 0)),       # fused neighbour weight
            pl.BlockSpec((1, E), lambda i: (0, 0)),           # attentionDense bias
        ],
        out_specs=pl.BlockSpec((block_n, E), lambda i: (i, 0)),
        compiler_params=pltpu.CompilerParams(
            dimension_semantics=("parallel",),
            # Headroom for block_n sweeps up to ~512 rows; still < v7x's 64 MiB physical VMEM.
            vmem_limit_bytes=48 * 1024 * 1024,
        ),
        interpret=interpret,
    )(main_bf, neigh_bf, wx_fused, wn2_fused, bias)


# ----------------------------------------------------------------------------
# Pure-JAX f32 transcription of the PyTorch module (sanity reference)
# ----------------------------------------------------------------------------
def _reference(main, neigh, w_weight, attn_weight, attn_bias):
    wT = w_weight.T
    px = main @ wT                                        # (N, E)
    pn = neigh @ wT                                       # (N, K, E)
    px_rep = jnp.broadcast_to(px[:, None, :], pn.shape)   # mode='repeat'
    concat = jnp.concatenate([px_rep, pn], axis=2)        # (N, K, 2E)
    e = concat @ attn_weight.T + attn_bias                # (N, K, E)
    e = jnp.where(e > 0, e, 0.01 * e)                     # LeakyReLU(0.01)
    a = jax.nn.softmax(e, axis=1)
    return jnp.sum(a * pn, axis=1)                        # numHeads=1 -> mean is identity


# ----------------------------------------------------------------------------
# Main
# ----------------------------------------------------------------------------
if __name__ == "__main__":
    # N nodes (e.g. batch*time positions), K neighbours, embedding_dim E
    N, K, E = 256, 8, 128

    key = jax.random.PRNGKey(0)
    k_m, k_n, k_w, k_a, k_b = jax.random.split(key, 5)

    main = jax.random.normal(k_m, (N, E), jnp.float32)
    neigh = jax.random.normal(k_n, (N, K, E), jnp.float32)
    w_weight = jax.random.normal(k_w, (E, E), jnp.float32) / jnp.sqrt(E)
    attn_weight = jax.random.normal(k_a, (E, 2 * E), jnp.float32) / jnp.sqrt(2 * E)
    attn_bias = 0.1 * jax.random.normal(k_b, (E,), jnp.float32)

    # block_n=None -> min(512, N // 2) = 128 here, giving grid=(2,) (v7x 2-TC friendly).
    fwd = jax.jit(functools.partial(multi_head_attention, block_n=None))
    out = jax.block_until_ready(fwd(main, neigh, w_weight, attn_weight, attn_bias))

    assert out.shape == (N, E)
    assert bool(jnp.all(jnp.isfinite(out)))

    # Compare against the straightforward f32 reference (bf16 matmuls + bf16 output
    # + approx softmax reciprocal -> loose tolerance).
    ref = _reference(main, neigh, w_weight, attn_weight, attn_bias)
    max_err = float(jnp.max(jnp.abs(out.astype(jnp.float32) - ref)))
    assert max_err < 1e-1, f"max abs err {max_err}"

    print("KERNEL_OK")
</pallas_src>

<mosaic_0001>
module attributes {stable_mosaic.version = 11 : i64} {
  func.func @_gat_head_kernel(%arg0: i32, %arg1: memref<128x128xbf16, #tpu.memory_space<vmem>>, %arg2: memref<1024x128xbf16, #tpu.memory_space<vmem>>, %arg3: memref<128x128xbf16, #tpu.memory_space<vmem>>, %arg4: memref<128x256xbf16, #tpu.memory_space<vmem>>, %arg5: memref<1x128xf32, #tpu.memory_space<vmem>>, %arg6: memref<128x128xbf16, #tpu.memory_space<vmem>>) attributes {dimension_semantics = [#tpu.dimension_semantics<parallel>], iteration_bounds = array<i64: 2>, scalar_prefetch = 0 : i64, scratch_operands = 0 : i64, tpu.core_type = #tpu.core_type<tc>, window_params = [{transform_indices = @transform_0, window_bounds = array<i64: 128, 128>}, {transform_indices = @transform_1, window_bounds = array<i64: 1024, 128>}, {pipeline_mode = #tpu.pipeline_mode<synchronous>, transform_indices = @transform_2, window_bounds = array<i64: 128, 128>}, {pipeline_mode = #tpu.pipeline_mode<synchronous>, transform_indices = @transform_3, window_bounds = array<i64: 128, 256>}, {pipeline_mode = #tpu.pipeline_mode<synchronous>, transform_indices = @transform_4, window_bounds = array<i64: 1, 128>}, {transform_indices = @transform_5, window_bounds = array<i64: 128, 128>}]} {
    %c0 = arith.constant 0 : index
    %c0_0 = arith.constant 0 : index
    %0 = vector.load %arg2[%c0, %c0_0] : memref<1024x128xbf16, #tpu.memory_space<vmem>>, vector<1024x128xbf16>
    %c0_1 = arith.constant 0 : index
    %c0_2 = arith.constant 0 : index
    %1 = vector.load %arg4[%c0_1, %c0_2] : memref<128x256xbf16, #tpu.memory_space<vmem>>, vector<128x256xbf16>
    %cst = arith.constant dense<0.000000e+00> : vector<1024x256xf32>
    %2 = tpu.matmul %0, %1, %cst {dimension_numbers = #tpu.dot_dimension_numbers<[1], [0], [0], [1], [0, 0, 1, 1], [], []>} : vector<1024x128xbf16>, vector<128x256xbf16>, vector<1024x256xf32> -> vector<1024x256xf32>
    %3 = vector.extract_strided_slice %2 {offsets = [0, 0], sizes = [1024, 128], strides = [1, 1]} : vector<1024x256xf32> to vector<1024x128xf32>
    %4 = vector.shape_cast %3 : vector<1024x128xf32> to vector<128x8x128xf32>
    %5 = vector.extract_strided_slice %2 {offsets = [0, 128], sizes = [1024, 128], strides = [1, 1]} : vector<1024x256xf32> to vector<1024x128xf32>
    %6 = vector.shape_cast %5 : vector<1024x128xf32> to vector<128x8x128xf32>
    %c0_3 = arith.constant 0 : index
    %c0_4 = arith.constant 0 : index
    %7 = vector.load %arg1[%c0_3, %c0_4] : memref<128x128xbf16, #tpu.memory_space<vmem>>, vector<128x128xbf16>
    %c0_5 = arith.constant 0 : index
    %c0_6 = arith.constant 0 : index
    %8 = vector.load %arg3[%c0_5, %c0_6] : memref<128x128xbf16, #tpu.memory_space<vmem>>, vector<128x128xbf16>
    %cst_7 = arith.constant dense<0.000000e+00> : vector<128x128xf32>
    %9 = tpu.matmul %7, %8, %cst_7 {dimension_numbers = #tpu.dot_dimension_numbers<[1], [0], [0], [1], [0, 0, 1, 1], [], []>} : vector<128x128xbf16>, vector<128x128xbf16>, vector<128x128xf32> -> vector<128x128xf32>
    %c0_8 = arith.constant 0 : index
    %c0_9 = arith.constant 0 : index
    %10 = vector.load %arg5[%c0_8, %c0_9] : memref<1x128xf32, #tpu.memory_space<vmem>>, vector<1x128xf32>
    %11 = vector.broadcast %10 : vector<1x128xf32> to vector<128x128xf32>
    %12 = arith.addf %9, %11 : vector<128x128xf32>
    %13 = vector.shape_cast %12 : vector<128x128xf32> to vector<128x1x128xf32>
    %14 = vector.broadcast %13 : vector<128x1x128xf32> to vector<128x8x128xf32>
    %15 = arith.addf %6, %14 : vector<128x8x128xf32>
    %cst_10 = arith.constant 0.00999999977 : f32
    %16 = vector.broadcast %cst_10 : f32 to vector<128x8x128xf32>
    %17 = arith.mulf %16, %15 : vector<128x8x128xf32>
    %18 = arith.maximumf %15, %17 : vector<128x8x128xf32>
    %cst_11 = arith.constant dense<0xFF800000> : vector<128x128xf32>
    %19 = vector.multi_reduction <maximumf>, %18, %cst_11 [1] : vector<128x8x128xf32> to vector<128x128xf32>
    %20 = vector.shape_cast %19 : vector<128x128xf32> to vector<128x1x128xf32>
    %21 = vector.broadcast %20 : vector<128x1x128xf32> to vector<128x8x128xf32>
    %22 = arith.subf %18, %21 : vector<128x8x128xf32>
    %23 = math.exp %22 : vector<128x8x128xf32>
    %cst_12 = arith.constant dense<0.000000e+00> : vector<128x128xf32>
    %24 = vector.multi_reduction <add>, %23, %cst_12 [1] : vector<128x8x128xf32> to vector<128x128xf32>
    %25 = vector.shape_cast %24 : vector<128x128xf32> to vector<128x1x128xf32>
    %26 = tpu.reciprocal %25 {approx = true} : vector<128x1x128xf32> -> vector<128x1x128xf32>
    %27 = vector.broadcast %26 : vector<128x1x128xf32> to vector<128x8x128xf32>
    %28 = arith.mulf %23, %27 : vector<128x8x128xf32>
    %29 = arith.mulf %28, %4 : vector<128x8x128xf32>
    %cst_13 = arith.constant dense<0.000000e+00> : vector<128x128xf32>
    %30 = vector.multi_reduction <add>, %29, %cst_13 [1] : vector<128x8x128xf32> to vector<128x128xf32>
    %31 = arith.truncf %30 : vector<128x128xf32> to vector<128x128xbf16>
    %c0_14 = arith.constant 0 : index
    %c0_15 = arith.constant 0 : index
    %32 = vector.load %arg6[%c0_14, %c0_15] : memref<128x128xbf16, #tpu.memory_space<vmem>>, vector<128x128xbf16>
    tpu.vector_store %arg6[%c0_14, %c0_15], %31 {strides = array<i32>} : memref<128x128xbf16, #tpu.memory_space<vmem>>, vector<128x128xbf16>,
    return
  }
  func.func @transform_0(%arg0: i32) -> (i32, i32) {
    %c0_i32 = arith.constant 0 : i32
    %c0_i32_0 = arith.constant 0 : i32
    return %arg0, %c0_i32 : i32, i32
  }
  func.func @transform_1(%arg0: i32) -> (i32, i32) {
    %c0_i32 = arith.constant 0 : i32
    %c0_i32_0 = arith.constant 0 : i32
    return %arg0, %c0_i32 : i32, i32
  }
  func.func @transform_2(%arg0: i32) -> (i32, i32) {
    %c0_i32 = arith.constant 0 : i32
    %c0_i32_0 = arith.constant 0 : i32
    %c0_i32_1 = arith.constant 0 : i32
    return %c0_i32, %c0_i32_0 : i32, i32
  }
  func.func @transform_3(%arg0: i32) -> (i32, i32) {
    %c0_i32 = arith.constant 0 : i32
    %c0_i32_0 = arith.constant 0 : i32
    %c0_i32_1 = arith.constant 0 : i32
    return %c0_i32, %c0_i32_0 : i32, i32
  }
  func.func @transform_4(%arg0: i32) -> (i32, i32) {
    %c0_i32 = arith.constant 0 : i32
    %c0_i32_0 = arith.constant 0 : i32
    %c0_i32_1 = arith.constant 0 : i32
    return %c0_i32, %c0_i32_0 : i32, i32
  }
  func.func @transform_5(%arg0: i32) -> (i32, i32) {
    %c0_i32 = arith.constant 0 : i32
    %c0_i32_0 = arith.constant 0 : i32
    return %arg0, %c0_i32 : i32, i32
  }
}

</mosaic_0001>

<bundles_post_ra>
// kernel: multi_head_attention.1
= control target key start
LH: loop header
LB: loop body
LE: loop exit
PB: predicated region body
PF: predicated region fallthrough
CT: control target
= control target key end

     0   :  { %10 = vsyncpa [#allocation3], 0  ;;  %s12204_s0 = inlined_call_operand.vmem [shape: bf16[256,128], index: 0, kind: input, shape index: {}]   ;;  %s12205_s1 = inlined_call_operand.vmem [shape: bf16[2048,128], index: 1, kind: input, shape index: {}]   ;;  %s12206_s2 = inlined_call_operand.vmem [shape: bf16[128,128], index: 2, kind: input, shape index: {}]   ;;  %s12207_s3 = inlined_call_operand.vmem [shape: bf16[128,256], index: 3, kind: input, shape index: {}]   ;;  %s12208_s4 = inlined_call_operand.vmem [shape: f32[1,128], index: 4, kind: input, shape index: {}]   ;;  %s12209_s5 = inlined_call_operand.hbm [shape: bf16[256,128], index: 5, kind: output, shape index: {}]  }
   0x1   :  { %12 = vsyncpa [#allocation3 + $0x1], 0  ;;  %s8746_s18 = smov 0   ;;  %s8748_s19 = smov 0  }
   0x2   :  { %s8750_s20 = smov 0   ;;  %s8752_s21 = smov 0  }
   0x3 LB: > { %s8767_s22 = sadd.s32 4294967295, %s8709_s21   ;;  %s7553_s23 = sadd.s32 4294967294, %s8709_s21   ;;  %s8709_s21 = sphi %s8752_s21, %s12603_s21   ;;  %s8705_s20 = sphi %s8750_s20, %s12602_s20   ;;  %s8701_s19 = sphi %s8748_s19, %s12601_s19   ;;  %s8697_s18 = sphi %s8746_s18, %s12600_s18  }
   0x4   : > { %s8771_s24 = sadd.s32 1, %s8709_s21   ;;  %s140_s25 = sadd.s32 1, %s8705_s20 }
   0x5   : > { %s137_s26 = ssub.s32 %s8709_s21, %s8771_s24  ;;  %p150_p0 = scmp.ne.s32.totalorder %s8705_s20, %s8701_s19 }
   0x6   : > { %p138_p1 = scmp.eq.s32.totalorder %s137_s26, 0  ;;  %p151_p2 = scmp.eq.s32.totalorder %s8767_s22, 1 }
   0x7   : > { %p156_p3 = scmp.ne.s32.totalorder %s8701_s19, %s8697_s18  ;;  %p157_p4 = scmp.eq.s32.totalorder %s7553_s23, 1 }
   0x8   : > { %s8782_s27 = scalar_select %p138_p1, %s8705_s20, %s140_s25  }
   0x9   : > { %p8784_p5 = por %p151_p2, %p150_p0  ;;  %p8788_p6 = por %p157_p4, %p156_p3 }
   0xa   : > { %p7556_p7 = scmp.ge.s32.totalorder %s8709_s21, 1  ;;  %p202_p8 = scmp.lt.s32.totalorder %s8709_s21, 3 }
   0xc   : > { %p203_p9 = pnand %p7556_p7, %p202_p8 }
   0xe   : > { %206 = sbr.rel (%p203_p9) target bundleno = 1589 (0x635), region = 40 }
  0x13   : > { %v8028_v0 = vld [vmem:[%s12207_s3 + $0x74] ss:$8 sps:$4 sm:$0xff]   ;;  %s7560_s7 = sshll.u32 %s8767_s22, 7  ;;  %v8030_v1 = vld [vmem:[%s12207_s3 + $0x70] ss:$8 sps:$4 sm:$0xff]   ;;  %v8711_v2 = vmov 0  }
  0x14   : > { %889 = vmatprep.mubr.bf16.mxu0 %v8711_v2  ;;  %1229 = vmatprep.mubr.bf16.mxu1 %v8711_v2  ;;  %p242_p10 = scmp.lt.s32.totalorder %s7560_s7, 255  ;;  %v8031_v3 = vld [vmem:[%s12207_s3 + $0x64] ss:$8 sps:$4 sm:$0xff]   ;;  %v8033_v4 = vld [vmem:[%s12207_s3 + $0x60] ss:$8 sps:$4 sm:$0xff]   ;;  %v8054_v17 = vld [vmem:[%s12206_s2 + $0x38] sm:$0xff]  }
  0x15   : > { %857 = vmatprep.subr.bf16.mxu0 %v8028_v0  ;;  %7969 = vmatprep.subr.bf16.mxu1 %v8028_v0  ;;  %v8034_v5 = vld [vmem:[%s12207_s3 + $0x54] ss:$8 sps:$4 sm:$0xff]   ;;  %v8036_v6 = vld [vmem:[%s12207_s3 + $0x50] ss:$8 sps:$4 sm:$0xff]   ;;  %v8037_v7 = vld [vmem:[%s12207_s3 + $0x44] ss:$8 sps:$4 sm:$0xff]  }
  0x16   : > { %858 = vmatpush1.bf16.msra.mxu0 %v8030_v1  ;;  %7977 = vmatpush1.bf16.msra.mxu1 %v8030_v1  ;;  %s12605_s7 = smov (!%p242_p10, %s7560_s7), 255  ;;  %v8039_v8 = vld [vmem:[%s12207_s3 + $0x40] ss:$8 sps:$4 sm:$0xff]   ;;  %v8040_v9 = vld [vmem:[%s12207_s3 + $0x34] ss:$8 sps:$4 sm:$0xff]   ;;  %s7558_s12 = sshll.u32 %s8767_s22, 4 }
  0x17   : > { %859 = vmatprep.subr.bf16.mxu0 %v8031_v3  ;;  %7970 = vmatprep.subr.bf16.mxu1 %v8031_v3  ;;  %s7561_s16 = sshll.u32 %s12605_s7, 2  ;;  %v8042_v10 = vld [vmem:[%s12207_s3 + $0x30] ss:$8 sps:$4 sm:$0xff]   ;;  %v8043_v11 = vld [vmem:[%s12207_s3 + $0x24] ss:$8 sps:$4 sm:$0xff]   ;;  %p236_p11 = scmp.lt.s32.totalorder %s7558_s12, 31 }
  0x18   : > { %s8821_s8 = scalar_lea.vmem %s12205_s1, %s7561_s16  ;;  %v8045_v12 = vld [vmem:[%s12207_s3 + $0x20] ss:$8 sps:$4 sm:$0xff]   ;;  %v8046_v13 = vld [vmem:[%s12207_s3 + $0x14] ss:$8 sps:$4 sm:$0xff]   ;;  %v8048_v14 = vld [vmem:[%s12207_s3 + $0x10] ss:$8 sps:$4 sm:$0xff]  }
  0x19   : > { %v8049_v15 = vld [vmem:[%s12207_s3 + $0x4] ss:$8 sps:$4 sm:$0xff]   ;;  %v8051_v16 = vld [vmem:[%s12207_s3] ss:$8 sps:$4 sm:$0xff]   ;;  %v8053_v19 = vld [vmem:[%s8821_s8 + $0x110] sm:$0xff]   ;;  %s12607_s12 = smov (!%p236_p11, %s7558_s12), 31 }
  0x1a   : > { %860 = vmatpush1.bf16.msra.mxu0 %v8033_v4  ;;  %7978 = vmatpush1.bf16.msra.mxu1 %v8033_v4  ;;  %v8052_v18 = vld [vmem:[%s8821_s8] sm:$0xff]   ;;  %v8061_v20 = vld [vmem:[%s12206_s2 + $0x30] sm:$0xff]   ;;  %v8070_v21 = vld [vmem:[%s12206_s2 + $0x28] sm:$0xff]   ;;  %s7559_s13 = sshll.u32 %s12607_s12, 2  ;;  %vm7298_vm0 = vcmask 1041409   ;;  %vm7300_vm1 = vcmask 1042434  }
  0x1b   : > { %861 = vmatprep.subr.bf16.mxu0 %v8034_v5  ;;  %7971 = vmatprep.subr.bf16.mxu1 %v8034_v5  ;;  %v8055_v22 = vld [vmem:[%s8821_s8 + $0x8] sm:$0xff]   ;;  %v8056_v23 = vld [vmem:[%s8821_s8 + $0x118] sm:$0xff]   ;;  %v8079_v24 = vld [vmem:[%s12206_s2 + $0x20] sm:$0xff]   ;;  %s8936_s16 = scalar_lea.vmem %s12204_s0, %s7559_s13  ;;  %vm7302_vm2 = vcmask 1043459   ;;  %vm7304_vm3 = vcmask 1044484   ;;  %vm7306_vm4 = vcmask 1045509  }
  0x1c   : > { %v8057_v25 = vld [vmem:[%s8821_s8 + $0x10] sm:$0xff]   ;;  %v8058_v26 = vld [vmem:[%s8821_s8 + $0x120] sm:$0xff]   ;;  %v8088_v27 = vld [vmem:[%s12206_s2 + $0x18] sm:$0xff]   ;;  %vm7308_vm5 = vcmask 1046534   ;;  %vm7310_vm6 = vcmask 1047559   ;;  %s232_s23 = sand.u32 1, %s8701_s19  }
  0x1d   : > { %v8059_v28 = vld [vmem:[%s8821_s8 + $0x18] sm:$0xff]   ;;  %v8060_v29 = vld [vmem:[%s8821_s8 + $0x128] sm:$0xff]   ;;  %v8095_v30 = vld [vmem:[%s12206_s2 + $0x10] sm:$0xff]   ;;  %s7557_s25 = sshll.u32 %s232_s23, 6  ;;  %s12164_s6 = scalar_lea.sflag [#allocation3], %s232_s23 }
  0x1e   : > { %862 = vmatpush1.bf16.msra.mxu0 %v8036_v6  ;;  %7979 = vmatpush1.bf16.msra.mxu1 %v8036_v6  ;;  %v8062_v31 = vld [vmem:[%s8821_s8 + $0x20] sm:$0xff]   ;;  %v8063_v32 = vld [vmem:[%s8821_s8 + $0x130] sm:$0xff]   ;;  %v8064_v33 = vld [vmem:[%s8821_s8 + $0x28] sm:$0xff]   ;;  %s9683_s26 = scalar_lea.vmem [#allocation2], %s7557_s25  ;;  %s8713_s7 = smov [#allocation2]  }
  0x1f   : > { %863 = vmatprep.subr.bf16.mxu0 %v8037_v7  ;;  %7972 = vmatprep.subr.bf16.mxu1 %v8037_v7  ;;  %v8065_v34 = vld [vmem:[%s8821_s8 + $0x138] sm:$0xff]   ;;  %v8066_v35 = vld [vmem:[%s8821_s8 + $0x30] sm:$0xff]   ;;  %v8067_v36 = vld [vmem:[%s8821_s8 + $0x140] sm:$0xff]   ;;  %s8653_s9 = sshll.u32 %s8713_s7, 4  ;;  %s8654_s9 = int_to_ptr.vmem [resolvable:$false] %s8653_s9 }
  0x20   : > { %v8104_v37 = vld [vmem:[%s12206_s2 + $0x8] sm:$0xff]   ;;  %v8068_v38 = vld [vmem:[%s8821_s8 + $0x38] sm:$0xff]   ;;  %v8071_v40 = vld [vmem:[%s8821_s8 + $0x40] sm:$0xff]   ;;  %s8655_s10 = scalar_lea.vmem %s8654_s9, 2048 }
  0x21   : > { %v8069_v39 = vld [vmem:[%s8821_s8 + $0x148] sm:$0xff]   ;;  %v8072_v41 = vld [vmem:[%s8821_s8 + $0x150] sm:$0xff]   ;;  %v8074_v43 = vld [vmem:[%s8821_s8 + $0x158] sm:$0xff]  }
  0x22   : > { %864 = vmatpush1.bf16.msra.mxu0 %v8039_v8  ;;  %7980 = vmatpush1.bf16.msra.mxu1 %v8039_v8  ;;  %v8073_v42 = vld [vmem:[%s8821_s8 + $0x48] sm:$0xff]   ;;  %v8075_v44 = vld [vmem:[%s8821_s8 + $0x50] sm:$0xff]   ;;  %v8076_v45 = vld [vmem:[%s8821_s8 + $0x160] sm:$0xff]  }
  0x23   : > { %865 = vmatprep.subr.bf16.mxu0 %v8040_v9  ;;  %7973 = vmatprep.subr.bf16.mxu1 %v8040_v9  ;;  %v8113_v46 = vld [vmem:[%s12206_s2] sm:$0xff]   ;;  %v8077_v47 = vld [vmem:[%s8821_s8 + $0x58] sm:$0xff]   ;;  %v8078_v48 = vld [vmem:[%s8821_s8 + $0x168] sm:$0xff]  }
  0x24   : > { %v8080_v49 = vld [vmem:[%s8821_s8 + $0x60] sm:$0xff]   ;;  %v8081_v50 = vld [vmem:[%s8821_s8 + $0x170] sm:$0xff]   ;;  %v8082_v51 = vld [vmem:[%s8821_s8 + $0x68] sm:$0xff]  }
  0x25   : > { %v8083_v52 = vld [vmem:[%s8821_s8 + $0x178] sm:$0xff]   ;;  %v8084_v53 = vld [vmem:[%s8821_s8 + $0x70] sm:$0xff]   ;;  %v8085_v54 = vld [vmem:[%s8821_s8 + $0x180] sm:$0xff]  }
  0x26   : > { %866 = vmatpush1.bf16.msra.mxu0 %v8042_v10  ;;  %7981 = vmatpush1.bf16.msra.mxu1 %v8042_v10  ;;  %v8086_v55 = vld [vmem:[%s8821_s8 + $0x78] sm:$0xff]   ;;  %v8087_v56 = vld [vmem:[%s8821_s8 + $0x188] sm:$0xff]   ;;  %v8089_v57 = vld [vmem:[%s8821_s8 + $0x80] sm:$0xff]  }
  0x27   : > { %867 = vmatprep.subr.bf16.mxu0 %v8043_v11  ;;  %7974 = vmatprep.subr.bf16.mxu1 %v8043_v11  ;;  %v8090_v58 = vld [vmem:[%s8821_s8 + $0x190] sm:$0xff]   ;;  %v8091_v59 = vld [vmem:[%s8821_s8 + $0x88] sm:$0xff]   ;;  %v8092_v60 = vld [vmem:[%s8821_s8 + $0x198] sm:$0xff]  }
  0x28   : > { %v8093_v61 = vld [vmem:[%s8821_s8 + $0x90] sm:$0xff]   ;;  %v8094_v62 = vld [vmem:[%s8821_s8 + $0x1a0] sm:$0xff]   ;;  %v8096_v63 = vld [vmem:[%s8821_s8 + $0x98] sm:$0xff]  }
  0x29   : > { %v8097_v0 = vld [vmem:[%s8821_s8 + $0x1a8] sm:$0xff]   ;;  %v8098_v1 = vld [vmem:[%s8821_s8 + $0xa0] sm:$0xff]   ;;  %v8099_v3 = vld [vmem:[%s8821_s8 + $0x1b0] sm:$0xff]  }
  0x2a   : > { %868 = vmatpush1.bf16.msra.mxu0 %v8045_v12  ;;  %7982 = vmatpush1.bf16.msra.mxu1 %v8045_v12  ;;  %v8100_v4 = vld [vmem:[%s8821_s8 + $0xa8] sm:$0xff]   ;;  %v8101_v5 = vld [vmem:[%s8821_s8 + $0x1b8] sm:$0xff]   ;;  %v8102_v6 = vld [vmem:[%s8821_s8 + $0xb0] sm:$0xff]  }
  0x2b   : > { %869 = vmatprep.subr.bf16.mxu0 %v8046_v13  ;;  %7975 = vmatprep.subr.bf16.mxu1 %v8046_v13  ;;  %v8103_v7 = vld [vmem:[%s8821_s8 + $0x1c0] sm:$0xff]   ;;  %v8105_v8 = vld [vmem:[%s8821_s8 + $0xb8] sm:$0xff]   ;;  %v8106_v9 = vld [vmem:[%s8821_s8 + $0x1c8] sm:$0xff]  }
  0x2c   : > { %v8107_v10 = vld [vmem:[%s8821_s8 + $0xc0] sm:$0xff]   ;;  %v8108_v11 = vld [vmem:[%s8821_s8 + $0x1d0] sm:$0xff]  }
  0x2e   : > { %870 = vmatpush1.bf16.msra.mxu0 %v8048_v14  ;;  %7983 = vmatpush1.bf16.msra.mxu1 %v8048_v14 }
  0x2f   : > { %871 = vmatprep.subr.bf16.mxu0 %v8049_v15  ;;  %7976 = vmatprep.subr.bf16.mxu1 %v8049_v15 }
  0x32   : > { %872 = vmatpush1.bf16.msra.mxu0 %v8051_v16  ;;  %7984 = vmatpush1.bf16.msra.mxu1 %v8051_v16 }
  0x33   : > { %7937 = vmatprep.subr.bf16.mxu1 %v8054_v17 }
  0x35   : > { %890 = vmatmul.mubr.bf16.vlgmr.msra.gmra.mxu0 %v8052_v18  ;;  %1230 = vmatmul.mubr.bf16.vlgmr.msra.gmra.mxu1 %v8053_v19  ;;  %v8109_v18 = vld [vmem:[%s8821_s8 + $0xc8] sm:$0xff]   ;;  %v8110_v19 = vld [vmem:[%s8821_s8 + $0x1d8] sm:$0xff]  }
  0x36   : > { %7938 = vmatpush3.bf16.msra.mxu1 %v8054_v17  ;;  %899 = vmatprep.mubr.bf16.mxu0 %v8711_v2 }
  0x37   : > { %1239 = vmatprep.mubr.bf16.mxu1 %v8711_v2  ;;  %7939 = vmatprep.subr.bf16.mxu1 %v8061_v20 }
  0x3a   : > { %7940 = vmatpush3.bf16.msra.mxu1 %v8061_v20 }
  0x3b   : > { %7941 = vmatprep.subr.bf16.mxu1 %v8070_v21 }
  0x3d   : > { %900 = vmatmul.mubr.bf16.gmra.mxu0 %v8055_v22  ;;  %1240 = vmatmul.mubr.bf16.gmra.mxu1 %v8056_v23 }
  0x3e   : > { %909 = vmatprep.mubr.bf16.mxu0 %v8711_v2  ;;  %1249 = vmatprep.mubr.bf16.mxu1 %v8711_v2 }
  0x3f   : > { %7942 = vmatpush3.bf16.msra.mxu1 %v8070_v21 }
  0x40   : > { %7943 = vmatprep.subr.bf16.mxu1 %v8079_v24 }
  0x43   : > { %7944 = vmatpush3.bf16.msra.mxu1 %v8079_v24 }
  0x44   : > { %7945 = vmatprep.subr.bf16.mxu1 %v8088_v27 }
  0x45   : > { %910 = vmatmul.mubr.bf16.gmra.mxu0 %v8057_v25  ;;  %1250 = vmatmul.mubr.bf16.gmra.mxu1 %v8058_v26 }
  0x46   : > { %919 = vmatprep.mubr.bf16.mxu0 %v8711_v2  ;;  %1259 = vmatprep.mubr.bf16.mxu1 %v8711_v2 }
  0x47   : > { %7946 = vmatpush3.bf16.msra.mxu1 %v8088_v27 }
  0x48   : > { %7947 = vmatprep.subr.bf16.mxu1 %v8095_v30 }
  0x4b   : > { %7948 = vmatpush3.bf16.msra.mxu1 %v8095_v30 }
  0x4c   : > { %7949 = vmatprep.subr.bf16.mxu1 %v8104_v37 }
  0x4d   : > { %920 = vmatmul.mubr.bf16.gmra.mxu0 %v8059_v28  ;;  %1260 = vmatmul.mubr.bf16.gmra.mxu1 %v8060_v29  ;;  %v8111_v28 = vld [vmem:[%s8821_s8 + $0xd0] sm:$0xff]   ;;  %v8112_v29 = vld [vmem:[%s8821_s8 + $0x1e0] sm:$0xff]  }
  0x4e   : > { %929 = vmatprep.mubr.bf16.mxu0 %v8711_v2  ;;  %1269 = vmatprep.mubr.bf16.mxu1 %v8711_v2 }
  0x4f   : > { %7950 = vmatpush3.bf16.msra.mxu1 %v8104_v37 }
  0x50   : > { %7951 = vmatprep.subr.bf16.mxu1 %v8113_v46 }
  0x53   : > { %7952 = vmatpush3.bf16.msra.mxu1 %v8113_v46  ;;  %v8116_v46 = vld [vmem:[%s8821_s8 + $0xe0] sm:$0xff]  }
  0x55   : > { %930 = vmatmul.mubr.bf16.gmra.mxu0 %v8062_v31  ;;  %1270 = vmatmul.mubr.bf16.gmra.mxu1 %v8063_v32 }
  0x56   : > { %939 = vmatprep.mubr.bf16.mxu0 %v8711_v2  ;;  %1279 = vmatprep.mubr.bf16.mxu1 %v8711_v2 }
  0x5d   : > { %940 = vmatmul.mubr.bf16.gmra.mxu0 %v8064_v33  ;;  %1280 = vmatmul.mubr.bf16.gmra.mxu1 %v8065_v34 }
  0x5e   : > { %949 = vmatprep.mubr.bf16.mxu0 %v8711_v2  ;;  %1289 = vmatprep.mubr.bf16.mxu1 %v8711_v2 }
  0x65   : > { %950 = vmatmul.mubr.bf16.gmra.mxu0 %v8066_v35  ;;  %1290 = vmatmul.mubr.bf16.gmra.mxu1 %v8067_v36 }
  0x66   : > { %959 = vmatprep.mubr.bf16.mxu0 %v8711_v2  ;;  %1299 = vmatprep.mubr.bf16.mxu1 %v8711_v2 }
  0x6d   : > { %960 = vmatmul.mubr.bf16.gmra.mxu0 %v8068_v38  ;;  %1300 = vmatmul.mubr.bf16.gmra.mxu1 %v8069_v39  ;;  %v8114_v38 = vld [vmem:[%s8821_s8 + $0xd8] sm:$0xff]   ;;  %v8115_v39 = vld [vmem:[%s8821_s8 + $0x1e8] sm:$0xff]  }
  0x6e   : > { %969 = vmatprep.mubr.bf16.mxu0 %v8711_v2  ;;  %1309 = vmatprep.mubr.bf16.mxu1 %v8711_v2 }
  0x75   : > { %970 = vmatmul.mubr.bf16.gmra.mxu0 %v8071_v40  ;;  %1310 = vmatmul.mubr.bf16.gmra.mxu1 %v8072_v41 }
  0x76   : > { %979 = vmatprep.mubr.bf16.mxu0 %v8711_v2  ;;  %1319 = vmatprep.mubr.bf16.mxu1 %v8711_v2 }
  0x7d   : > { %980 = vmatmul.mubr.bf16.gmra.mxu0 %v8073_v42  ;;  %1320 = vmatmul.mubr.bf16.gmra.mxu1 %v8074_v43 }
  0x7e   : > { %989 = vmatprep.mubr.bf16.mxu0 %v8711_v2  ;;  %1329 = vmatprep.mubr.bf16.mxu1 %v8711_v2 }
  0x85   : > { %990 = vmatmul.mubr.bf16.gmra.mxu0 %v8075_v44  ;;  %1330 = vmatmul.mubr.bf16.gmra.mxu1 %v8076_v45 }
  0x86   : > { %999 = vmatprep.mubr.bf16.mxu0 %v8711_v2  ;;  %1339 = vmatprep.mubr.bf16.mxu1 %v8711_v2 }
  0x8d   : > { %1000 = vmatmul.mubr.bf16.gmra.mxu0 %v8077_v47  ;;  %1340 = vmatmul.mubr.bf16.gmra.mxu1 %v8078_v48  ;;  %v8117_v47 = vld [vmem:[%s8821_s8 + $0x1f0] sm:$0xff]  }
  0x8e   : > { %1009 = vmatprep.mubr.bf16.mxu0 %v8711_v2  ;;  %1349 = vmatprep.mubr.bf16.mxu1 %v8711_v2 }
  0x95   : > { %1010 = vmatmul.mubr.bf16.gmra.mxu0 %v8080_v49  ;;  %1350 = vmatmul.mubr.bf16.gmra.mxu1 %v8081_v50 }
  0x96   : > { %1019 = vmatprep.mubr.bf16.mxu0 %v8711_v2  ;;  %1359 = vmatprep.mubr.bf16.mxu1 %v8711_v2 }
  0x9d   : > { %1020 = vmatmul.mubr.bf16.gmra.mxu0 %v8082_v51  ;;  %1360 = vmatmul.mubr.bf16.gmra.mxu1 %v8083_v52 }
  0x9e   : > { %1029 = vmatprep.mubr.bf16.mxu0 %v8711_v2  ;;  %1369 = vmatprep.mubr.bf16.mxu1 %v8711_v2 }
  0xa5   : > { %1030 = vmatmul.mubr.bf16.gmra.mxu0 %v8084_v53  ;;  %1370 = vmatmul.mubr.bf16.gmra.mxu1 %v8085_v54  ;;  %v8118_v54 = vld [vmem:[%s8821_s8 + $0xe8] sm:$0xff]  }
  0xa6   : > { %1039 = vmatprep.mubr.bf16.mxu0 %v8711_v2  ;;  %1379 = vmatprep.mubr.bf16.mxu1 %v8711_v2 }
  0xad   : > { %1040 = vmatmul.mubr.bf16.gmra.mxu0 %v8086_v55  ;;  %1380 = vmatmul.mubr.bf16.gmra.mxu1 %v8087_v56  ;;  %v8119_v55 = vld [vmem:[%s8821_s8 + $0x1f8] sm:$0xff]   ;;  %v8120_v56 = vld [vmem:[%s8936_s16] sm:$0xff]  }
  0xae   : > { %1049 = vmatprep.mubr.bf16.mxu0 %v8711_v2  ;;  %1389 = vmatprep.mubr.bf16.mxu1 %v8711_v2 }
  0xb5   : > { %1050 = vmatmul.mubr.bf16.gmra.mxu0 %v8089_v57  ;;  %1390 = vmatmul.mubr.bf16.gmra.mxu1 %v8090_v58 }
  0xb6   : > { %1059 = vmatprep.mubr.bf16.mxu0 %v8711_v2  ;;  %1399 = vmatprep.mubr.bf16.mxu1 %v8711_v2 }
  0xbd   : > { %1060 = vmatmul.mubr.bf16.gmra.mxu0 %v8091_v59  ;;  %1400 = vmatmul.mubr.bf16.gmra.mxu1 %v8092_v60 }
  0xbe   : > { %1069 = vmatprep.mubr.bf16.mxu0 %v8711_v2  ;;  %1409 = vmatprep.mubr.bf16.mxu1 %v8711_v2 }
  0xc5   : > { %1070 = vmatmul.mubr.bf16.gmra.mxu0 %v8093_v61  ;;  %1410 = vmatmul.mubr.bf16.gmra.mxu1 %v8094_v62 }
  0xc6   : > { %1079 = vmatprep.mubr.bf16.mxu0 %v8711_v2  ;;  %1419 = vmatprep.mubr.bf16.mxu1 %v8711_v2 }
  0xcd   : > { %1080 = vmatmul.mubr.bf16.gmra.mxu0 %v8096_v63  ;;  %1420 = vmatmul.mubr.bf16.gmra.mxu1 %v8097_v0  ;;  %v8121_v63 = vld [vmem:[%s8821_s8 + $0xf0] sm:$0xff]   ;;  %v8122_v0 = vld [vmem:[%s8936_s16 + $0x8] sm:$0xff]  }
  0xce   : > { %1089 = vmatprep.mubr.bf16.mxu0 %v8711_v2  ;;  %1429 = vmatprep.mubr.bf16.mxu1 %v8711_v2 }
  0xd5   : > { %1090 = vmatmul.mubr.bf16.gmra.mxu0 %v8098_v1  ;;  %1430 = vmatmul.mubr.bf16.gmra.mxu1 %v8099_v3  ;;  %v8123_v1 = vld [vmem:[%s8936_s16 + $0x10] sm:$0xff]  }
  0xd6   : > { %1099 = vmatprep.mubr.bf16.mxu0 %v8711_v2  ;;  %1439 = vmatprep.mubr.bf16.mxu1 %v8711_v2 }
  0xdd   : > { %1100 = vmatmul.mubr.bf16.gmra.mxu0 %v8100_v4  ;;  %1440 = vmatmul.mubr.bf16.gmra.mxu1 %v8101_v5 }
  0xde   : > { %1109 = vmatprep.mubr.bf16.mxu0 %v8711_v2  ;;  %1449 = vmatprep.mubr.bf16.mxu1 %v8711_v2 }
  0xe5   : > { %1110 = vmatmul.mubr.bf16.gmra.mxu0 %v8102_v6  ;;  %1450 = vmatmul.mubr.bf16.gmra.mxu1 %v8103_v7 }
  0xe6   : > { %1119 = vmatprep.mubr.bf16.mxu0 %v8711_v2  ;;  %1459 = vmatprep.mubr.bf16.mxu1 %v8711_v2 }
  0xed   : > { %1120 = vmatmul.mubr.bf16.gmra.mxu0 %v8105_v8  ;;  %1460 = vmatmul.mubr.bf16.gmra.mxu1 %v8106_v9  ;;  %v8124_v9 = vld [vmem:[%s8821_s8 + $0xf8] sm:$0xff]  }
  0xee   : > { %1129 = vmatprep.mubr.bf16.mxu0 %v8711_v2  ;;  %1469 = vmatprep.mubr.bf16.mxu1 %v8711_v2 }
  0xf5   : > { %v8978_v12 = vpop.f32.mrf.mxu0  ;;  %1130 = vmatmul.mubr.bf16.gmra.mxu0 %v8107_v10  ;;  %v8980_v13 = vpop.f32.mrf.mxu1  ;;  %1470 = vmatmul.mubr.bf16.gmra.mxu1 %v8108_v11  ;;  %v8125_v10 = vld [vmem:[%s8936_s16 + $0x18] sm:$0xff]   ;;  %v8126_v11 = vld [vmem:[%s8936_s16 + $0x20] sm:$0xff]  }
  0xf6   : > { %12212 = vst [vmem:[#allocation5_spill] sm:$0xff] %v8978_v12  ;;  %12213 = vst [vmem:[#allocation6_spill] sm:$0xff] %v8980_v13  ;;  %1139 = vmatprep.mubr.bf16.mxu0 %v8711_v2  ;;  %1479 = vmatprep.mubr.bf16.mxu1 %v8711_v2 }
  0xf7   : > { %v8984_v14 = vpop.f32.mrf.mxu0  ;;  %v8986_v15 = vpop.f32.mrf.mxu1 }
  0xf8   : > { %12214 = vst [vmem:[#allocation7_spill] sm:$0xff] %v8986_v15 }
  0xf9   : > { %v8988_v16 = vpop.f32.mrf.mxu0  ;;  %v8990_v17 = vpop.f32.mrf.mxu1 }
  0xfa   : > { %12215 = vst [vmem:[#allocation8_spill] sm:$0xff] %v8988_v16  ;;  %12216 = vst [vmem:[#allocation9_spill] sm:$0xff] %v8990_v17 }
  0xfb   : > { %v8994_v20 = vpop.f32.mrf.mxu0  ;;  %v8996_v21 = vpop.f32.mrf.mxu1 }
  0xfc   : > { %12217 = vst [vmem:[#allocation10_spill] sm:$0xff] %v8996_v21 }
  0xfd   : > { %v8998_v22 = vpop.f32.mrf.mxu0  ;;  %1140 = vmatmul.mubr.bf16.gmra.mxu0 %v8109_v18  ;;  %v9000_v23 = vpop.f32.mrf.mxu1  ;;  %1480 = vmatmul.mubr.bf16.gmra.mxu1 %v8110_v19 }
  0xfe   : > { %12218 = vst [vmem:[#allocation11_spill] sm:$0xff] %v8998_v22  ;;  %12219 = vst [vmem:[#allocation12_spill] sm:$0xff] %v9000_v23  ;;  %1149 = vmatprep.mubr.bf16.mxu0 %v8711_v2  ;;  %1489 = vmatprep.mubr.bf16.mxu1 %v8711_v2 }
  0xff   : > { %v9004_v24 = vpop.f32.mrf.mxu0  ;;  %v9006_v25 = vpop.f32.mrf.mxu1 }
 0x100   : > { %12220 = vst [vmem:[#allocation13_spill] sm:$0xff] %v9006_v25 }
 0x101   : > { %v9008_v26 = vpop.f32.mrf.mxu0  ;;  %v9010_v27 = vpop.f32.mrf.mxu1 }
 0x102   : > { %12221 = vst [vmem:[#allocation14_spill] sm:$0xff] %v9008_v26  ;;  %12222 = vst [vmem:[#allocation15_spill] sm:$0xff] %v9010_v27 }
 0x103   : > { %v9014_v30 = vpop.f32.mrf.mxu0  ;;  %v9016_v31 = vpop.f32.mrf.mxu1 }
 0x104   : > { %12223 = vst [vmem:[#allocation16_spill] sm:$0xff] %v9016_v31 }
 0x105   : > { %v9018_v32 = vpop.f32.mrf.mxu0  ;;  %1150 = vmatmul.mubr.bf16.gmra.mxu0 %v8111_v28  ;;  %v9020_v33 = vpop.f32.mrf.mxu1  ;;  %1490 = vmatmul.mubr.bf16.gmra.mxu1 %v8112_v29 }
 0x106   : > { %12224 = vst [vmem:[#allocation17_spill] sm:$0xff] %v9018_v32  ;;  %12225 = vst [vmem:[#allocation18_spill] sm:$0xff] %v9020_v33  ;;  %1159 = vmatprep.mubr.bf16.mxu0 %v8711_v2  ;;  %1499 = vmatprep.mubr.bf16.mxu1 %v8711_v2 }
 0x107   : > { %v9024_v34 = vpop.f32.mrf.mxu0  ;;  %v9026_v35 = vpop.f32.mrf.mxu1 }
 0x108   : > { %12226 = vst [vmem:[#allocation19_spill] sm:$0xff] %v9026_v35 }
 0x109   : > { %v9028_v36 = vpop.f32.mrf.mxu0  ;;  %v9030_v37 = vpop.f32.mrf.mxu1 }
 0x10a   : > { %12227 = vst [vmem:[#allocation20_spill] sm:$0xff] %v9028_v36  ;;  %12228 = vst [vmem:[#allocation21_spill] sm:$0xff] %v9030_v37 }
 0x10b   : > { %v9034_v40 = vpop.f32.mrf.mxu1  ;;  %v9036_v41 = vpop.f32.mrf.mxu0 }
 0x10c   : > { %12229 = vst [vmem:[#allocation22_spill] sm:$0xff] %v9034_v40 }
 0x10d   : > { %1160 = vmatmul.mubr.bf16.gmra.mxu0 %v8114_v38  ;;  %v9038_v42 = vpop.f32.mrf.mxu1  ;;  %1500 = vmatmul.mubr.bf16.gmra.mxu1 %v8115_v39  ;;  %v9044_v44 = vpop.f32.mrf.mxu0 }
 0x10e   : > { %12230 = vst [vmem:[#allocation23_spill] sm:$0xff] %v9038_v42  ;;  %1169 = vmatprep.mubr.bf16.mxu0 %v8711_v2  ;;  %1509 = vmatprep.mubr.bf16.mxu1 %v8711_v2  ;;  %12232 = vst [vmem:[#allocation25_spill] sm:$0xff] %v9044_v44 }
 0x10f   : > { %v9042_v43 = vpop.f32.mrf.mxu1  ;;  %v9052_v49 = vpop.f32.mrf.mxu0 }
 0x110   : > { %12231 = vst [vmem:[#allocation24_spill] sm:$0xff] %v9042_v43 }
 0x111   : > { %v9046_v45 = vpop.f32.mrf.mxu1  ;;  %v9060_v52 = vpop.f32.mrf.mxu0 }
 0x112   : > { %12233 = vst [vmem:[#allocation26_spill] sm:$0xff] %v9046_v45  ;;  %12237 = vst [vmem:[#allocation30_spill] sm:$0xff] %v9060_v52 }
 0x113   : > { %v9050_v48 = vpop.f32.mrf.mxu1  ;;  %v9069_v58 = vpop.f32.mrf.mxu0 }
 0x114   : > { %12234 = vst [vmem:[#allocation27_spill] sm:$0xff] %v9050_v48 }
 0x115   : > { %1170 = vmatmul.mubr.bf16.gmra.mxu0 %v8116_v46  ;;  %v9054_v50 = vpop.f32.mrf.mxu1  ;;  %1510 = vmatmul.mubr.bf16.gmra.mxu1 %v8117_v47  ;;  %v9076_v61 = vpop.f32.mrf.mxu0  ;;  %v8127_v46 = vld [vmem:[%s8821_s8 + $0x100] sm:$0xff]   ;;  %v8128_v47 = vld [vmem:[%s8936_s16 + $0x28] sm:$0xff]  }
 0x116   : > { %12235 = vst [vmem:[#allocation28_spill] sm:$0xff] %v9054_v50  ;;  %1179 = vmatprep.mubr.bf16.mxu0 %v8711_v2  ;;  %1519 = vmatprep.mubr.bf16.mxu1 %v8711_v2  ;;  %12242 = vst [vmem:[#allocation35_spill] sm:$0xff] %v9076_v61 }
 0x117   : > { %v9058_v51 = vpop.f32.mrf.mxu1  ;;  %v9085_v4 = vpop.f32.mrf.mxu0 }
 0x118   : > { %12236 = vst [vmem:[#allocation29_spill] sm:$0xff] %v9058_v51  ;;  %12245 = vst [vmem:[#allocation38_spill] sm:$0xff] %v9085_v4 }
 0x119   : > { %v9062_v53 = vpop.f32.mrf.mxu1  ;;  %v9092_v7 = vpop.f32.mrf.mxu0 }
 0x11a   : > { %12238 = vst [vmem:[#allocation31_spill] sm:$0xff] %v9062_v53  ;;  %12248 = vst [vmem:[#allocation41_spill] sm:$0xff] %v9092_v7 }
 0x11b   : > { %v9067_v57 = vpop.f32.mrf.mxu1  ;;  %v9101_v19 = vpop.f32.mrf.mxu0 }
 0x11c   : > { %12239 = vst [vmem:[#allocation32_spill] sm:$0xff] %v9067_v57  ;;  %12251 = vst [vmem:[#allocation44_spill] sm:$0xff] %v9101_v19 }
 0x11d   : > { %1180 = vmatmul.mubr.bf16.gmra.mxu0 %v8118_v54  ;;  %v9071_v59 = vpop.f32.mrf.mxu1  ;;  %1520 = vmatmul.mubr.bf16.gmra.mxu1 %v8119_v55  ;;  %v9108_v38 = vpop.f32.mrf.mxu0  ;;  %v8129_v54 = vld [vmem:[%s8936_s16 + $0x30] sm:$0xff]  }
 0x11e   : > { %12240 = vst [vmem:[#allocation33_spill] sm:$0xff] %v9071_v59  ;;  %1189 = vmatprep.mubr.bf16.mxu0 %v8711_v2  ;;  %7953 = vmatprep.mubr.bf16.mxu1 %v8120_v56  ;;  %12254 = vst [vmem:[#allocation47_spill] sm:$0xff] %v9108_v38 }
 0x11f   : > { %v9074_v60 = vpop.f32.mrf.mxu1  ;;  %v9117_v56 = vpop.f32.mrf.mxu0 }
 0x120   : > { %12241 = vst [vmem:[#allocation34_spill] sm:$0xff] %v9074_v60  ;;  %12257 = vst [vmem:[#allocation50_spill] sm:$0xff] %v9117_v56 }
 0x121   : > { %v9078_v62 = vpop.f32.mrf.mxu1 }
 0x122   : > { %12243 = vst [vmem:[#allocation36_spill] sm:$0xff] %v9078_v62 }
 0x123   : > { %v9083_v3 = vpop.f32.mrf.mxu1 }
 0x124   : > { %12244 = vst [vmem:[#allocation37_spill] sm:$0xff] %v9083_v3 }
 0x125   : > { %1190 = vmatmul.mubr.bf16.gmra.mxu0 %v8121_v63  ;;  %v9087_v5 = vpop.f32.mrf.mxu1  ;;  %7954 = vmatmul.mubr.bf16.vlgmr.msra.gmra.mxu1 %v8122_v0 }
 0x126   : > { %12246 = vst [vmem:[#allocation39_spill] sm:$0xff] %v9087_v5  ;;  %1199 = vmatprep.mubr.bf16.mxu0 %v8711_v2  ;;  %7957 = vmatprep.mubr.bf16.mxu1 %v8123_v1  ;;  %v9124_v1 = vpop.f32.mrf.mxu0 }
 0x127   : > { %v9090_v6 = vpop.f32.mrf.mxu1  ;;  %12260 = vst [vmem:[#allocation53_spill] sm:$0xff] %v9124_v1 }
 0x128   : > { %12247 = vst [vmem:[#allocation40_spill] sm:$0xff] %v9090_v6  ;;  %v9132_v59 = vpop.f32.mrf.mxu0 }
 0x129   : > { %v9094_v8 = vpop.f32.mrf.mxu1  ;;  %12263 = vst [vmem:[#allocation56_spill] sm:$0xff] %v9132_v59 }
 0x12a   : > { %12249 = vst [vmem:[#allocation42_spill] sm:$0xff] %v9094_v8  ;;  %v9194_v17 = vpop.f32.mrf.mxu0 }
 0x12b   : > { %v9099_v18 = vpop.f32.mrf.mxu1  ;;  %12294 = vst [vmem:[#allocation87_spill] sm:$0xff] %v9194_v17 }
 0x12c   : > { %12250 = vst [vmem:[#allocation43_spill] sm:$0xff] %v9099_v18 }
 0x12d   : > { %1200 = vmatmul.mubr.bf16.gmra.mxu0 %v8124_v9  ;;  %v9103_v28 = vpop.f32.mrf.mxu1  ;;  %7958 = vmatmul.mubr.bf16.gmra.mxu1 %v8125_v10  ;;  %v8130_v10 = vld [vmem:[%s8821_s8 + $0x108] sm:$0xff]   ;;  %s7479_s8 = sshll.u32 %s9683_s26, 4  ;;  %s12159_s8 = int_to_ptr.vmem [resolvable:$true] %s7479_s8 }
 0x12e   : > { %12252 = vst [vmem:[#allocation45_spill] sm:$0xff] %v9103_v28  ;;  %1209 = vmatprep.mubr.bf16.mxu0 %v8711_v2  ;;  %7961 = vmatprep.mubr.bf16.mxu1 %v8126_v11  ;;  %v8131_v11 = vld [vmem:[%s8936_s16 + $0x38] sm:$0xff]   ;;  %s7920_s16 = sshll.u32 %s8767_s22, 10  ;;  %s8649_s22 = scalar_lea.vmem %s12159_s8, 1024 }
 0x12f   : > { %v9106_v29 = vpop.f32.mrf.mxu1  ;;  %s12157_s30 = scalar_lea.hbm %s12209_s5, %s7920_s16  ;;  %p8650_p12 = scmp.ne.s32.totalorder %s12159_s8, %s8649_s22 }
 0x130   : > { %12253 = vst [vmem:[#allocation46_spill] sm:$0xff] %v9106_v29  ;;  %p8656_p1 = scmp.lt.s32.totalorder %s12159_s8, %s8654_s9  ;;  %p8657_p2 = scmp.lt.s32.totalorder %s8655_s10, %s8649_s22 }
 0x131   : > { %v9110_v39 = vpop.f32.mrf.mxu1  ;;  %p8651_p13 = pnand %p8650_p12, %p8784_p5 }
 0x132   : > { %12255 = vst [vmem:[#allocation48_spill] sm:$0xff] %v9110_v39  ;;  %p8658_p3 = por %p8657_p2, %p8656_p1 }
 0x133   : > { %v9115_v55 = vpop.f32.mrf.mxu1  ;;  %p8652_p0 = pneg %p8651_p13 }
 0x134   : > { %12256 = vst [vmem:[#allocation49_spill] sm:$0xff] %v9115_v55 }
 0x135   : > { %1210 = vmatmul.mubr.bf16.gmra.mxu0 %v8127_v46  ;;  %v9119_v63 = vpop.f32.mrf.mxu1  ;;  %7962 = vmatmul.mubr.bf16.gmra.mxu1 %v8128_v47  ;;  %p8659_p4 = pnand %p8658_p3, %p8652_p0 }
 0x136   : > { %12258 = vst [vmem:[#allocation51_spill] sm:$0xff] %v9119_v63  ;;  %1219 = vmatprep.mubr.bf16.mxu0 %v8711_v2  ;;  %7965 = vmatprep.mubr.bf16.mxu1 %v8129_v54 }
 0x137   : > { %v9122_v0 = vpop.f32.mrf.mxu1 }
 0x138   : > { %12259 = vst [vmem:[#allocation52_spill] sm:$0xff] %v9122_v0 }
 0x139   : > { %v9126_v9 = vpop.f32.mrf.mxu1 }
 0x13a   : > { %12261 = vst [vmem:[#allocation54_spill] sm:$0xff] %v9126_v9 }
 0x13b   : > { %v9130_v62 = vpop.f32.mrf.mxu1 }
 0x13c   : > { %12262 = vst [vmem:[#allocation55_spill] sm:$0xff] %v9130_v62  ;;  %v1782_v62 = vlaneseq }
 0x13d   : > { %1220 = vmatmul.mubr.bf16.gmra.mxu0 %v8130_v10  ;;  %v9134_v46 = vpop.f32.mrf.mxu1  ;;  %7966 = vmatmul.mubr.bf16.gmra.mxu1 %v8131_v11 }
 0x13e   : > { %12264 = vst [vmem:[#allocation57_spill] sm:$0xff] %v9134_v46  ;;  %v1783_v55 = vshrl.u32 %v1782_v62, 7 }
 0x13f   : > { %v9136_v47 = vpop.f32.mrf.mxu1 }
 0x140   : > { %12265 = vst [vmem:[#allocation58_spill] sm:$0xff] %v9136_v47 }
 0x141   : > { %v9138_v2 = vpop.f32.mrf.mxu1 }
 0x142   : > { %12266 = vst [vmem:[#allocation59_spill] sm:$0xff] %v9138_v2 }
 0x143   : > { %v9140_v54 = vpop.f32.mrf.mxu1 }
 0x144   : > { %12267 = vst [vmem:[#allocation60_spill] sm:$0xff] %v9140_v54 }
 0x145   : > { %v9142_v53 = vpop.f32.mrf.mxu1 }
 0x146   : > { %12268 = vst [vmem:[#allocation61_spill] sm:$0xff] %v9142_v53 }
 0x147   : > { %v9144_v50 = vpop.f32.mrf.mxu1 }
 0x148   : > { %12269 = vst [vmem:[#allocation62_spill] sm:$0xff] %v9144_v50 }
 0x149   : > { %v9146_v45 = vpop.f32.mrf.mxu1 }
 0x14a   : > { %12270 = vst [vmem:[#allocation63_spill] sm:$0xff] %v9146_v45 }
 0x14b   : > { %v9148_v42 = vpop.f32.mrf.mxu1 }
 0x14c   : > { %12271 = vst [vmem:[#allocation64_spill] sm:$0xff] %v9148_v42 }
 0x14d   : > { %v9150_v37 = vpop.f32.mrf.mxu1 }
 0x14e   : > { %12272 = vst [vmem:[#allocation65_spill] sm:$0xff] %v9150_v37 }
 0x14f   : > { %v9152_v10 = vpop.f32.mrf.mxu1 }
 0x150   : > { %12273 = vst [vmem:[#allocation66_spill] sm:$0xff] %v9152_v10 }
 0x151   : > { %v9154_v33 = vpop.f32.mrf.mxu1 }
 0x152   : > { %12274 = vst [vmem:[#allocation67_spill] sm:$0xff] %v9154_v33 }
 0x153   : > { %v9156_v11 = vpop.f32.mrf.mxu1 }
 0x154   : > { %12275 = vst [vmem:[#allocation68_spill] sm:$0xff] %v9156_v11 }
 0x155   : > { %v9158_v3 = vpop.f32.mrf.mxu1 }
 0x156   : > { %12276 = vst [vmem:[#allocation69_spill] sm:$0xff] %v9158_v3 }
 0x157   : > { %v9160_v60 = vpop.f32.mrf.mxu1 }
 0x158   : > { %12277 = vst [vmem:[#allocation70_spill] sm:$0xff] %v9160_v60 }
 0x159   : > { %v9162_v57 = vpop.f32.mrf.mxu1 }
 0x15a   : > { %12278 = vst [vmem:[#allocation71_spill] sm:$0xff] %v9162_v57 }
 0x15b   : > { %v9164_v53 = vpop.f32.mrf.mxu1 }
 0x15c   : > { %12279 = vst [vmem:[#allocation72_spill] sm:$0xff] %v9164_v53 }
 0x15d   : > { %v9166_v51 = vpop.f32.mrf.mxu1 }
 0x15e   : > { %12280 = vst [vmem:[#allocation73_spill] sm:$0xff] %v9166_v51 }
 0x15f   : > { %v9168_v45 = vpop.f32.mrf.mxu1 }
 0x160   : > { %12281 = vst [vmem:[#allocation74_spill] sm:$0xff] %v9168_v45 }
 0x161   : > { %v9170_v48 = vpop.f32.mrf.mxu1 }
 0x162   : > { %12282 = vst [vmem:[#allocation75_spill] sm:$0xff] %v9170_v48 }
 0x163   : > { %v9172_v37 = vpop.f32.mrf.mxu1 }
 0x164   : > { %12283 = vst [vmem:[#allocation76_spill] sm:$0xff] %v9172_v37 }
 0x165   : > { %v9174_v43 = vpop.f32.mrf.mxu1 }
 0x166   : > { %12284 = vst [vmem:[#allocation77_spill] sm:$0xff] %v9174_v43 }
 0x167   : > { %v9176_v33 = vpop.f32.mrf.mxu1 }
 0x168   : > { %12285 = vst [vmem:[#allocation78_spill] sm:$0xff] %v9176_v33 }
 0x169   : > { %v9178_v40 = vpop.f32.mrf.mxu1 }
 0x16a   : > { %12286 = vst [vmem:[#allocation79_spill] sm:$0xff] %v9178_v40  ;;  %v9200_v40 = vpop.f32.mrf.mxu0 }
 0x16b   : > { %v9180_v3 = vpop.f32.mrf.mxu1  ;;  %12297 = vst [vmem:[#allocation90_spill] sm:$0xff] %v9200_v40 }
 0x16c   : > { %12287 = vst [vmem:[#allocation80_spill] sm:$0xff] %v9180_v3 }
 0x16d   : > { %v9182_v35 = vpop.f32.mrf.mxu1 }
 0x16e   : > { %12288 = vst [vmem:[#allocation81_spill] sm:$0xff] %v9182_v35 }
 0x16f   : > { %v9184_v57 = vpop.f32.mrf.mxu1 }
 0x170   : > { %12289 = vst [vmem:[#allocation82_spill] sm:$0xff] %v9184_v57  ;;  %v9206_v57 = vpop.f32.mrf.mxu0 }
 0x171   : > { %v9186_v27 = vpop.f32.mrf.mxu1  ;;  %12300 = vst [vmem:[#allocation93_spill] sm:$0xff] %v9206_v57 }
 0x172   : > { %12290 = vst [vmem:[#allocation83_spill] sm:$0xff] %v9186_v27 }
 0x173   : > { %v9188_v51 = vpop.f32.mrf.mxu1 }
 0x174   : > { %12291 = vst [vmem:[#allocation84_spill] sm:$0xff] %v9188_v51 }
 0x175   : > { %v9190_v23 = vpop.f32.mrf.mxu1 }
 0x176   : > { %12292 = vst [vmem:[#allocation85_spill] sm:$0xff] %v9190_v23  ;;  %v9212_v23 = vpop.f32.mrf.mxu0 }
 0x177   : > { %v9192_v48 = vpop.f32.mrf.mxu1  ;;  %12303 = vst [vmem:[#allocation96_spill] sm:$0xff] %v9212_v23 }
 0x178   : > { %12293 = vst [vmem:[#allocation86_spill] sm:$0xff] %v9192_v48 }
 0x179   : > { %v9196_v43 = vpop.f32.mrf.mxu1 }
 0x17a   : > { %12295 = vst [vmem:[#allocation88_spill] sm:$0xff] %v9196_v43  ;;  %v9218_v43 = vpop.f32.mrf.mxu0 }
 0x17b   : > { %v9198_v33 = vpop.f32.mrf.mxu1  ;;  %12306 = vst [vmem:[#allocation99_spill] sm:$0xff] %v9218_v43 }
 0x17c   : > { %12296 = vst [vmem:[#allocation89_spill] sm:$0xff] %v9198_v33 }
 0x17d   : > { %v9202_v3 = vpop.f32.mrf.mxu1 }
 0x17e   : > { %12298 = vst [vmem:[#allocation91_spill] sm:$0xff] %v9202_v3  ;;  %v9224_v3 = vpop.f32.mrf.mxu0 }
 0x17f   : > { %v9204_v35 = vpop.f32.mrf.mxu1  ;;  %12309 = vst [vmem:[#allocation102_spill] sm:$0xff] %v9224_v3 }
 0x180   : > { %12299 = vst [vmem:[#allocation92_spill] sm:$0xff] %v9204_v35 }
 0x181   : > { %v9208_v27 = vpop.f32.mrf.mxu1 }
 0x182   : > { %12301 = vst [vmem:[#allocation94_spill] sm:$0xff] %v9208_v27  ;;  %v9230_v27 = vpop.f32.mrf.mxu0 }
 0x183   : > { %v9210_v51 = vpop.f32.mrf.mxu1  ;;  %12312 = vst [vmem:[#allocation105_spill] sm:$0xff] %v9230_v27 }
 0x184   : > { %12302 = vst [vmem:[#allocation95_spill] sm:$0xff] %v9210_v51 }
 0x185   : > { %v9214_v48 = vpop.f32.mrf.mxu1 }
 0x186   : > { %12304 = vst [vmem:[#allocation97_spill] sm:$0xff] %v9214_v48  ;;  %v9236_v48 = vpop.f32.mrf.mxu0 }
 0x187   : > { %v9216_v13 = vpop.f32.mrf.mxu1  ;;  %12315 = vst [vmem:[#allocation108_spill] sm:$0xff] %v9236_v48 }
 0x188   : > { %12305 = vst [vmem:[#allocation98_spill] sm:$0xff] %v9216_v13 }
 0x189   : > { %v9220_v33 = vpop.f32.mrf.mxu1 }
 0x18a   : > { %12307 = vst [vmem:[#allocation100_spill] sm:$0xff] %v9220_v33  ;;  %v9242_v33 = vpop.f32.mrf.mxu0 }
 0x18b   : > { %v9222_v37 = vpop.f32.mrf.mxu1 }
 0x18c   : > { %12308 = vst [vmem:[#allocation101_spill] sm:$0xff] %v9222_v37 }
 0x18d   : > { %v9226_v35 = vpop.f32.mrf.mxu1 }
 0x18e   : > { %12310 = vst [vmem:[#allocation103_spill] sm:$0xff] %v9226_v35  ;;  %v9248_v35 = vpop.f32.mrf.mxu0 }
 0x18f   : > { %v9228_v45 = vpop.f32.mrf.mxu1 }
 0x190   : > { %12311 = vst [vmem:[#allocation104_spill] sm:$0xff] %v9228_v45 }
 0x191   : > { %v9232_v51 = vpop.f32.mrf.mxu1 }
 0x192   : > { %12313 = vst [vmem:[#allocation106_spill] sm:$0xff] %v9232_v51  ;;  %v9254_v51 = vpop.f32.mrf.mxu0 }
 0x193   : > { %v9234_v53 = vpop.f32.mrf.mxu1 }
 0x194   : > { %12314 = vst [vmem:[#allocation107_spill] sm:$0xff] %v9234_v53 }
 0x195   : > { %v9238_v13 = vpop.f32.mrf.mxu1 }
 0x196   : > { %12316 = vst [vmem:[#allocation109_spill] sm:$0xff] %v9238_v13  ;;  %v9260_v13 = vpop.f32.mrf.mxu0 }
 0x197   : > { %v9240_v60 = vpop.f32.mrf.mxu1 }
 0x198   : > { %12317 = vst [vmem:[#allocation110_spill] sm:$0xff] %v9240_v60 }
 0x199   : > { %v9244_v37 = vpop.f32.mrf.mxu1 }
 0x19a   : > { %12318 = vst [vmem:[#allocation111_spill] sm:$0xff] %v9244_v37  ;;  %v9266_v37 = vpop.f32.mrf.mxu0 }
 0x19b   : > { %v9246_v2 = vpop.f32.mrf.mxu1 }
 0x19c   : > { %12319 = vst [vmem:[#allocation112_spill] sm:$0xff] %v9246_v2 }
 0x19d   : > { %v9250_v45 = vpop.f32.mrf.mxu1 }
 0x19e   : > { %12320 = vst [vmem:[#allocation113_spill] sm:$0xff] %v9250_v45  ;;  %v9272_v45 = vpop.f32.mrf.mxu0 }
 0x19f   : > { %v9252_v46 = vpop.f32.mrf.mxu1 }
 0x1a0   : > { %12321 = vst [vmem:[#allocation114_spill] sm:$0xff] %v9252_v46 }
 0x1a1   : > { %v9256_v53 = vpop.f32.mrf.mxu1 }
 0x1a2   : > { %12322 = vst [vmem:[#allocation115_spill] sm:$0xff] %v9256_v53  ;;  %v9278_v53 = vpop.f32.mrf.mxu0 }
 0x1a3   : > { %v9258_v9 = vpop.f32.mrf.mxu1 }
 0x1a4   : > { %12323 = vst [vmem:[#allocation116_spill] sm:$0xff] %v9258_v9 }
 0x1a5   : > { %v9262_v60 = vpop.f32.mrf.mxu1 }
 0x1a6   : > { %12324 = vst [vmem:[#allocation117_spill] sm:$0xff] %v9262_v60  ;;  %v9284_v60 = vpop.f32.mrf.mxu0 }
 0x1a7   : > { %v9264_v63 = vpop.f32.mrf.mxu1 }
 0x1a8   : > { %12325 = vst [vmem:[#allocation118_spill] sm:$0xff] %v9264_v63 }
 0x1a9   : > { %v9268_v2 = vpop.f32.mrf.mxu1 }
 0x1aa   : > { %12326 = vst [vmem:[#allocation119_spill] sm:$0xff] %v9268_v2  ;;  %v9290_v2 = vpop.f32.mrf.mxu0 }
 0x1ab   : > { %v9270_v39 = vpop.f32.mrf.mxu1 }
 0x1ac   : > { %12327 = vst [vmem:[#allocation120_spill] sm:$0xff] %v9270_v39 }
 0x1ad   : > { %v9274_v46 = vpop.f32.mrf.mxu1 }
 0x1ae   : > { %12328 = vst [vmem:[#allocation121_spill] sm:$0xff] %v9274_v46  ;;  %v9296_v46 = vpop.f32.mrf.mxu0 }
 0x1af   : > { %v9276_v28 = vpop.f32.mrf.mxu1 }
 0x1b0   : > { %12329 = vst [vmem:[#allocation122_spill] sm:$0xff] %v9276_v28 }
 0x1b1   : > { %v9280_v9 = vpop.f32.mrf.mxu1 }
 0x1b2   : > { %12330 = vst [vmem:[#allocation123_spill] sm:$0xff] %v9280_v9  ;;  %v9302_v9 = vpop.f32.mrf.mxu0 }
 0x1b3   : > { %v9282_v11 = vpop.f32.mrf.mxu1 }
 0x1b4   : > { %12331 = vst [vmem:[#allocation124_spill] sm:$0xff] %v9282_v11 }
 0x1b5   : > { %v9286_v63 = vpop.f32.mrf.mxu1 }
 0x1b6   : > { %12332 = vst [vmem:[#allocation125_spill] sm:$0xff] %v9286_v63  ;;  %v9308_v63 = vpop.f32.mrf.mxu0 }
 0x1b7   : > { %v9288_v8 = vpop.f32.mrf.mxu1 }
 0x1b8   : > { %12333 = vst [vmem:[#allocation126_spill] sm:$0xff] %v9288_v8 }
 0x1b9   : > { %v9292_v39 = vpop.f32.mrf.mxu1 }
 0x1ba   : > { %12334 = vst [vmem:[#allocation127_spill] sm:$0xff] %v9292_v39  ;;  %v9314_v39 = vpop.f32.mrf.mxu0 }
 0x1bb   : > { %v9294_v5 = vpop.f32.mrf.mxu1 }
 0x1bc   : > { %12335 = vst [vmem:[#allocation128_spill] sm:$0xff] %v9294_v5 }
 0x1bd   : > { %v9298_v28 = vpop.f32.mrf.mxu1 }
 0x1be   : > { %12336 = vst [vmem:[#allocation129_spill] sm:$0xff] %v9298_v28  ;;  %v9320_v28 = vpop.f32.mrf.mxu0 }
 0x1bf   : > { %v9300_v10 = vpop.f32.mrf.mxu1 }
 0x1c0   : > { %12337 = vst [vmem:[#allocation130_spill] sm:$0xff] %v9300_v10 }
 0x1c1   : > { %v9304_v11 = vpop.f32.mrf.mxu1 }
 0x1c2   : > { %12338 = vst [vmem:[#allocation131_spill] sm:$0xff] %v9304_v11  ;;  %v9326_v11 = vpop.f32.mrf.mxu0 }
 0x1c3   : > { %v9306_v42 = vpop.f32.mrf.mxu1 }
 0x1c4   : > { %12339 = vst [vmem:[#allocation132_spill] sm:$0xff] %v9306_v42 }
 0x1c5   : > { %v9310_v8 = vpop.f32.mrf.mxu1 }
 0x1c6   : > { %12340 = vst [vmem:[#allocation133_spill] sm:$0xff] %v9310_v8  ;;  %v9332_v8 = vpop.f32.mrf.mxu0 }
 0x1c7   : > { %v9312_v50 = vpop.f32.mrf.mxu1 }
 0x1c8   : > { %12341 = vst [vmem:[#allocation134_spill] sm:$0xff] %v9312_v50 }
 0x1c9   : > { %v9316_v5 = vpop.f32.mrf.mxu1 }
 0x1ca   : > { %12342 = vst [vmem:[#allocation135_spill] sm:$0xff] %v9316_v5  ;;  %v9338_v5 = vpop.f32.mrf.mxu0 }
 0x1cb   : > { %v9318_v31 = vpop.f32.mrf.mxu1  ;;  %12350 = vst [vmem:[#allocation143_spill] sm:$0xff] %v9338_v5 }
 0x1cc   : > { %12343 = vst [vmem:[#allocation136_spill] sm:$0xff] %v9318_v31 }
 0x1cd   : > { %v9322_v10 = vpop.f32.mrf.mxu1 }
 0x1ce   : > { %12344 = vst [vmem:[#allocation137_spill] sm:$0xff] %v9322_v10  ;;  %v9344_v10 = vpop.f32.mrf.mxu0 }
 0x1cf   : > { %v9324_v25 = vpop.f32.mrf.mxu1  ;;  %12353 = vst [vmem:[#allocation146_spill] sm:$0xff] %v9344_v10 }
 0x1d0   : > { %12345 = vst [vmem:[#allocation138_spill] sm:$0xff] %v9324_v25  ;;  %v8712_v25 = vmov 1966171168   ;;  %v9350_v0 = vpop.f32.mrf.mxu0 }
 0x1d1   : > { %v9328_v42 = vpop.f32.mrf.mxu1  ;;  %v1780_v47 = vunpack.c.l.s4 %v8712_v25  ;;  %12356 = vst [vmem:[#allocation149_spill] sm:$0xff] %v9350_v0 }
 0x1d2   : > { %12346 = vst [vmem:[#allocation139_spill] sm:$0xff] %v9328_v42 }
 0x1d3   : > { %v9330_v21 = vpop.f32.mrf.mxu1 }
 0x1d4   : > { %12347 = vst [vmem:[#allocation140_spill] sm:$0xff] %v9330_v21 }
 0x1d5   : > { %v9334_v50 = vpop.f32.mrf.mxu1 }
 0x1d6   : > { %12348 = vst [vmem:[#allocation141_spill] sm:$0xff] %v9334_v50  ;;  %v1781_v50 = vunpack.c.0.s8 %v1780_v47 }
 0x1d7   : > { %v9336_v15 = vpop.f32.mrf.mxu1 }
 0x1d8   : > { %12349 = vst [vmem:[#allocation142_spill] sm:$0xff] %v9336_v15  ;;  %v9361_v25 = vsub.s32 %v1781_v50, %v1783_v55 }
 0x1d9   : > { %v9340_v31 = vpop.f32.mrf.mxu1 }
 0x1da   : > { %12351 = vst [vmem:[#allocation144_spill] sm:$0xff] %v9340_v31  ;;  %v7642_v31 = vld [vmem:[%s12208_s4] ss:$0 sm:$0xff] }
 0x1db   : > { %v9342_v54 = vpop.f32.mrf.mxu1 }
 0x1dc   : > { %12352 = vst [vmem:[#allocation145_spill] sm:$0xff] %v9342_v54  ;;  %v9359_v54 = vpop.f32.mrf.mxu0 }
 0x1dd   : > { %v9346_v42 = vpop.f32.mrf.mxu1  ;;  %12359 = vst [vmem:[#allocation152_spill] sm:$0xff] %v9359_v54 }
 0x1de   : > { %12354 = vst [vmem:[#allocation147_spill] sm:$0xff] %v9346_v42 }
 0x1df   : > { %v9348_v21 = vpop.f32.mrf.mxu1 }
 0x1e0   : > { %12355 = vst [vmem:[#allocation148_spill] sm:$0xff] %v9348_v21  ;;  %v9363_v21 = vpop.f32.mrf.mxu0 }
 0x1e1   : > { %v9352_v15 = vpop.f32.mrf.mxu1  ;;  %12360 = vst [vmem:[#allocation153_spill] sm:$0xff] %v9363_v21 }
 0x1e2   : > { %12357 = vst [vmem:[#allocation150_spill] sm:$0xff] %v9352_v15  ;;  %v9366_v15 = vsub.s32 0, %v1783_v55  ;;  %v9375_v38 = vpop.f32.mrf.mxu0 }
 0x1e3   : > { %v9354_v29 = vpop.f32.mrf.mxu1  ;;  %12361 = vst [vmem:[#allocation154_spill] sm:$0xff] %v9375_v38 }
 0x1e4   : > { %12358 = vst [vmem:[#allocation151_spill] sm:$0xff] %v9354_v29 }
 0x1e5   : > { %v7955_v18 = vpop.f32.mrf.mxu1 }
 0x1e6   : > { %v1708_v42 = vadd.f32 %v7955_v18, %v7642_v31 }
 0x1e7   : > { %v1699_v6 = vpop.f32.mrf.mxu1 }
 0x1e8   : > { %v1876_v27 = vcombine.high %v1708_v42, %v1708_v42  ;;  %v1883_v62 = vrot.slane %v1708_v42, %v9361_v25  ;;  %v1700_v47 = vadd.f32 %v7642_v31, %v1699_v6 }
 0x1e9   : > { %v7956_v29 = vpop.f32.mrf.mxu1 }
 0x1ea   : > { %v1890_v43 = vrot.slane %v1876_v27, %v9361_v25  ;;  %v1891_v57 = vcombine.high %v1883_v62, %v1883_v62  ;;  %v1899_v17 = vrot.slane %v1883_v62, %v9361_v25  ;;  %v1778_v1 = vcombine.high %v1700_v47, %v1700_v47  ;;  %v9396_v62 = vpop.f32.mrf.mxu0 }
 0x1eb   : > { %v9371_v50 = vrot.slane %v1700_v47, %v9361_v25  ;;  %v9373_v18 = vadd.f32 %v7956_v29, %v7642_v31  ;;  %12362 = vst [vmem:[#allocation155_spill] sm:$0xff] %v9396_v62 }
 0x1ec   : > { %v1892_v7 = vcombine.high %v1890_v43, %v1890_v43  ;;  %v1906_v42 = vrot.slane %v1890_v43, %v9361_v25  ;;  %v1913_v6 = vrot.slane %v1891_v57, %v9361_v25  ;;  %v1921_v55 = vcombine.high %v1899_v17, %v1899_v17 }
 0x1ed   : > { %v2629_v61 = vrot.slane %v1899_v17, %v9366_v15  ;;  %v9381_v27 = vrot.slane %v1778_v1, %v9361_v25  ;;  %v9387_v31 = vrot.slane %v9371_v50, %v9361_v25 }
 0x1ee   : > { %v1920_v29 = vrot.slane %v1892_v7, %v9361_v25  ;;  %v1922_v47 = vcombine.high %v1906_v42, %v1906_v42  ;;  %v1923_v21 = vcombine.high %v1913_v6, %v1913_v6  ;;  %v2633_v43 = vrot.slane %v1913_v6, %v9366_v15 }
 0x1ef   : > { %v2637_v57 = vrot.slane %v1921_v55, %v9366_v15  ;;  %v2645_v17 = vrot.slane %v1906_v42, %v9366_v15  ;;  %v3218_v1 = vadd.f32 %v2629_v61, %v9248_v35 }
 0x1f0   : > { %v1924_v5 = vcombine.high %v1920_v29, %v1920_v29  ;;  %v2641_v48 = vrot.slane %v1923_v21, %v9366_v15  ;;  %v2649_v7 = vrot.slane %v1920_v29, %v9366_v15  ;;  %v2653_v59 = vrot.slane %v1922_v47, %v9366_v15  ;;  %v9410_v47 = vpop.f32.mrf.mxu0 }
 0x1f1   : > { %v3219_v6 = vadd.f32 %v2633_v43, %v9260_v13  ;;  %v3220_v55 = vadd.f32 %v2637_v57, %v9272_v45  ;;  %v3222_v42 = vadd.f32 %v2645_v17, %v9296_v46  ;;  %v3346_v3 = vmul.f32 0.01, %v3218_v1  ;;  %12363 = vst [vmem:[#allocation156_spill] sm:$0xff] %v9410_v47 }
 0x1f2   : > { %v2657_v35 = vrot.slane %v1924_v5, %v9366_v15  ;;  %v3221_v61 = vadd.f32 %v2641_v48, %v9284_v60  ;;  %v3223_v0 = vadd.f32 %v2649_v7, %v9308_v63  ;;  %v3224_v62 = vadd.f32 %v2653_v59, %v9320_v28  ;;  %v9430_v7 = vpop.f32.mrf.mxu0 }
 0x1f3   : > { %v3347_v21 = vmul.f32 0.01, %v3219_v6  ;;  %v3348_v23 = vmul.f32 0.01, %v3220_v55  ;;  %v3350_v29 = vmul.f32 0.01, %v3222_v42  ;;  %v9408_v56 = vmax.f32 %v3218_v1, %v3346_v3 }
 0x1f4   : > { %v3225_v13 = vadd.f32 %v2657_v35, %v9332_v8  ;;  %v3349_v45 = vmul.f32 0.01, %v3221_v61  ;;  %v3351_v46 = vmul.f32 0.01, %v3223_v0  ;;  %v3352_v43 = vmul.f32 0.01, %v3224_v62  ;;  %v9444_v19 = vpop.f32.mrf.mxu0 }
 0x1f5   : > { %v9413_v57 = vmax.f32 %v3219_v6, %v3347_v21  ;;  %v9415_v5 = vmax.f32 %v3220_v55, %v3348_v23  ;;  %v9417_v48 = vmax.f32 %v3222_v42, %v3350_v29  ;;  %v3682_v59 = vrot.slane %v9408_v56, 4  ;;  %12364 = vst [vmem:[#allocation157_spill] sm:$0xff] %v9430_v7  ;;  %12365 = vst [vmem:[#allocation158_spill] sm:$0xff] %v9444_v19 }
 0x1f6   : > { %v3353_v60 = vmul.f32 0.01, %v3225_v13  ;;  %v9420_v28 = vmax.f32 %v3221_v61, %v3349_v45  ;;  %v9422_v3 = vmax.f32 %v3223_v0, %v3351_v46  ;;  %v9424_v63 = vmax.f32 %v3224_v62, %v3352_v43  ;;  %v9447_v16 = vpop.f32.mrf.mxu0 }
 0x1f7   : > { %v3683_v8 = vmax.f32 %v9408_v56, %v3682_v59  ;;  %v3688_v17 = vrot.slane %v9413_v57, 4  ;;  %v3694_v1 = vrot.slane %v9415_v5, 4  ;;  %v3706_v23 = vrot.slane %v9417_v48, 4  ;;  %12366 = vst [vmem:[#allocation159_spill] sm:$0xff] %v9447_v16 }
 0x1f8   : > { %v9432_v6 = vmax.f32 %v3225_v13, %v3353_v60  ;;  %v3700_v55 = vrot.slane %v9420_v28, 4  ;;  %v3712_v42 = vrot.slane %v9422_v3, 4  ;;  %v3718_v0 = vrot.slane %v9424_v63, 4 }
 0x1f9   : > { %v3684_v62 = vrot.slane %v3683_v8, 2  ;;  %v3689_v35 = vmax.f32 %v9413_v57, %v3688_v17  ;;  %v3695_v61 = vmax.f32 %v9415_v5, %v3694_v1  ;;  %v3707_v21 = vmax.f32 %v9417_v48, %v3706_v23 }
 0x1fa   : > { %v3701_v29 = vmax.f32 %v9420_v28, %v3700_v55  ;;  %v3713_v45 = vmax.f32 %v9422_v3, %v3712_v42  ;;  %v3719_v13 = vmax.f32 %v9424_v63, %v3718_v0  ;;  %v3724_v46 = vrot.slane %v9432_v6, 4 }
 0x1fb   : > { %v3685_v43 = vmax.f32 %v3683_v8, %v3684_v62  ;;  %v3690_v59 = vrot.slane %v3689_v35, 2  ;;  %v3696_v60 = vrot.slane %v3695_v61, 2  ;;  %v3708_v7 = vrot.slane %v3707_v21, 2 }
 0x1fc   : > { %v3702_v40 = vrot.slane %v3701_v29, 2  ;;  %v3714_v17 = vrot.slane %v3713_v45, 2  ;;  %v3720_v4 = vrot.slane %v3719_v13, 2  ;;  %v3725_v1 = vmax.f32 %v9432_v6, %v3724_v46 }
 0x1fd   : > { %v3686_v23 = vrot.slane %v3685_v43, 1  ;;  %v3691_v52 = vmax.f32 %v3689_v35, %v3690_v59  ;;  %v3697_v55 = vmax.f32 %v3695_v61, %v3696_v60  ;;  %v3709_v44 = vmax.f32 %v3707_v21, %v3708_v7 }
 0x1fe   : > { %v3703_v42 = vmax.f32 %v3701_v29, %v3702_v40  ;;  %v3715_v36 = vmax.f32 %v3713_v45, %v3714_v17  ;;  %v3721_v0 = vmax.f32 %v3719_v13, %v3720_v4  ;;  %v3726_v32 = vrot.slane %v3725_v1, 2 }
 0x1ff   : > { %v3687_v26 = vmax.f32 %v3685_v43, %v3686_v23  ;;  %v3692_v8 = vrot.slane %v3691_v52, 1  ;;  %v3698_v62 = vrot.slane %v3697_v55, 1  ;;  %v3710_v22 = vrot.slane %v3709_v44, 1  ;;  %v9453_v43 = vpop.f32.mrf.mxu0 }
 0x200   : > { %v3704_v12 = vrot.slane %v3703_v42, 1  ;;  %v3716_v19 = vrot.slane %v3715_v36, 1  ;;  %v3722_v47 = vrot.slane %v3721_v0, 1  ;;  %v3727_v38 = vmax.f32 %v3725_v1, %v3726_v32 }
 0x201   : > { %v3693_v54 = vmax.f32 %v3691_v52, %v3692_v8  ;;  %v3699_v46 = vmax.f32 %v3697_v55, %v3698_v62  ;;  %v3711_v10 = vmax.f32 %v3709_v44, %v3710_v22  ;;  %v4370_v35 = vsub.f32 %v9408_v56, %v3687_v26 }
 0x202   : > { %v3705_v7 = vmax.f32 %v3703_v42, %v3704_v12  ;;  %v3717_v40 = vmax.f32 %v3715_v36, %v3716_v19  ;;  %v3723_v61 = vmax.f32 %v3721_v0, %v3722_v47  ;;  %v3728_v4 = vrot.slane %v3727_v38, 1 }
 0x203   : > { %v4371_v21 = vsub.f32 %v9413_v57, %v3693_v54  ;;  %v4372_v29 = vsub.f32 %v9415_v5, %v3699_v46  ;;  %v4374_v45 = vsub.f32 %v9417_v48, %v3711_v10  ;;  %v4514_v13 = vmul.f32 1.442695, %v4370_v35  ;;  %v9469_v48 = vpop.f32.mrf.mxu0 }
 0x204   : > { %v3729_v59 = vmax.f32 %v3727_v38, %v3728_v4  ;;  %v4373_v32 = vsub.f32 %v9420_v28, %v3705_v7  ;;  %v4375_v22 = vsub.f32 %v9422_v3, %v3717_v40  ;;  %v4376_v26 = vsub.f32 %v9424_v63, %v3723_v61  ;;  %12369 = vst [vmem:[#allocation160_spill] sm:$0xff] %v9469_v48 }
 0x205   : > { %8132 = vpow2.f32 %v4514_v13  ;;  %v4516_v12 = vmul.f32 1.442695, %v4371_v21  ;;  %v4518_v36 = vmul.f32 1.442695, %v4372_v29  ;;  %v4522_v44 = vmul.f32 1.442695, %v4374_v45  ;;  %v9481_v0 = vpop.f32.mrf.mxu0 }
 0x206   : > { %v4377_v52 = vsub.f32 %v9432_v6, %v3729_v59  ;;  %v4520_v19 = vmul.f32 1.442695, %v4373_v32  ;;  %v4524_v56 = vmul.f32 1.442695, %v4375_v22  ;;  %v4526_v54 = vmul.f32 1.442695, %v4376_v26 }
 0x207   : > { %8134 = vpow2.f32 %v4516_v12  ;;  %v1808_v10 = vrot.slane %v9381_v27, %v9361_v25  ;;  %v12367_v38 = vcombine.high %v9371_v50, %v9371_v50  ;;  %v12368_v57 = vcombine.high %v9381_v27, %v9381_v27  ;;  %12370 = vst [vmem:[#allocation161_spill] sm:$0xff] %v9481_v0 }
 0x208   : > { %8136 = vpow2.f32 %v4518_v36  ;;  %v4528_v28 = vmul.f32 1.442695, %v4377_v52  ;;  %v1823_v3 = vcombine.high %v9387_v31, %v9387_v31  ;;  %v2565_v63 = vrot.slane %v9387_v31, %v9366_v15 }
 0x209   : > { %v1815_v47 = vrot.slane %v12367_v38, %v9361_v25  ;;  %v1822_v5 = vrot.slane %v12368_v57, %v9361_v25  ;;  %8138 = vpow2.f32 %v4520_v19  ;;  %v1824_v6 = vcombine.high %v1808_v10, %v1808_v10 }
 0x20a   : > { %8140 = vpow2.f32 %v4522_v44  ;;  %v2573_v27 = vrot.slane %v1823_v3, %v9366_v15  ;;  %v2581_v1 = vrot.slane %v1808_v10, %v9366_v15  ;;  %v3202_v8 = vadd.f32 %v2565_v63, %v8984_v14 }
 0x20b   : > { %v1825_v60 = vcombine.high %v1815_v47, %v1815_v47  ;;  %v1826_v50 = vcombine.high %v1822_v5, %v1822_v5  ;;  %v2569_v17 = vrot.slane %v1815_v47, %v9366_v15  ;;  %8142 = vpow2.f32 %v4524_v56 }
 0x20c   : > { %v2585_v55 = vrot.slane %v1822_v5, %v9366_v15  ;;  %v2589_v42 = vrot.slane %v1824_v6, %v9366_v15  ;;  %8144 = vpow2.f32 %v4526_v54  ;;  %v3204_v46 = vadd.f32 %v2573_v27, %v9004_v24 }
 0x20d   : > { %v2577_v23 = vrot.slane %v1825_v60, %v9366_v15  ;;  %v2593_v31 = vrot.slane %v1826_v50, %v9366_v15  ;;  %v3203_v62 = vadd.f32 %v2569_v17, %v8994_v20  ;;  %8146 = vpow2.f32 %v4528_v28  ;;  %v9494_v20 = vpop.f32.mrf.mxu0 }
 0x20e   : > { %v3206_v7 = vadd.f32 %v2581_v1, %v9024_v34  ;;  %v3207_v40 = vadd.f32 %v2585_v55, %v9036_v41  ;;  %v3208_v61 = vadd.f32 %v2589_v42, %v9052_v49  ;;  %v3330_v21 = vmul.f32 0.01, %v3202_v8  ;;  %12371 = vst [vmem:[#allocation162_spill] sm:$0xff] %v9494_v20 }
 0x20f   : > { %v3205_v35 = vadd.f32 %v2577_v23, %v9014_v30  ;;  %v3209_v4 = vadd.f32 %v2593_v31, %v9069_v58  ;;  %v3331_v29 = vmul.f32 0.01, %v3203_v62  ;;  %v3332_v45 = vmul.f32 0.01, %v3204_v46  ;;  %v9520_v38 = vpop.f32.mrf.mxu0 }
 0x210   : > { %v3334_v24 = vmul.f32 0.01, %v3206_v7  ;;  %v3335_v59 = vmul.f32 0.01, %v3207_v40  ;;  %v3336_v30 = vmul.f32 0.01, %v3208_v61  ;;  %v9496_v32 = vmax.f32 %v3202_v8, %v3330_v21 }
 0x211   : > { %v3333_v13 = vmul.f32 0.01, %v3205_v35  ;;  %v3337_v34 = vmul.f32 0.01, %v3209_v4  ;;  %v9498_v41 = vmax.f32 %v3203_v62, %v3331_v29  ;;  %v9500_v49 = vmax.f32 %v3204_v46, %v3332_v45  ;;  %12372 = vst [vmem:[#allocation163_spill] sm:$0xff] %v9520_v38 }
 0x212   : > { %v9504_v22 = vpop.eup %8132  ;;  %v9506_v26 = vmax.f32 %v3206_v7, %v3334_v24  ;;  %v9508_v12 = vmax.f32 %v3207_v40, %v3335_v59  ;;  %v9510_v36 = vmax.f32 %v3208_v61, %v3336_v30  ;;  %v3586_v44 = vrot.slane %v9496_v32, 4  ;;  %v9552_v7 = vpop.f32.mrf.mxu0 }
 0x213   : > { %v9502_v58 = vmax.f32 %v3205_v35, %v3333_v13  ;;  %v4834_v52 = vrot.slane %v9504_v22, 4  ;;  %v9514_v19 = vmax.f32 %v3209_v4, %v3337_v34  ;;  %v3592_v56 = vrot.slane %v9498_v41, 4  ;;  %12373 = vst [vmem:[#allocation164_spill] sm:$0xff] %v9552_v7 }
 0x214   : > { %v3598_v54 = vrot.slane %v9500_v49, 4  ;;  %v9518_v10 = vpop.eup %8134  ;;  %v3587_v47 = vmax.f32 %v9496_v32, %v3586_v44  ;;  %v3610_v5 = vrot.slane %v9506_v26, 4 }
 0x215   : > { %v3604_v57 = vrot.slane %v9502_v58, 4  ;;  %v9526_v3 = vpop.eup %8136  ;;  %v4835_v63 = vadd.f32 %v9504_v22, %v4834_v52  ;;  %v4840_v6 = vrot.slane %v9518_v10, 4  ;;  %v9531_v60 = vmax.f32 %v9498_v41, %v3592_v56 }
 0x216   : > { %v9534_v50 = vmax.f32 %v9500_v49, %v3598_v54  ;;  %v9536_v17 = vpop.eup %8138  ;;  %v4846_v27 = vrot.slane %v9526_v3, 4  ;;  %v3588_v1 = vrot.slane %v3587_v47, 2  ;;  %v9543_v55 = vmax.f32 %v9506_v26, %v3610_v5 }
 0x217   : > { %v9540_v23 = vmax.f32 %v9502_v58, %v3604_v57  ;;  %v9545_v42 = vpop.eup %8140  ;;  %v4836_v31 = vrot.slane %v4835_v63, 2  ;;  %v4841_v8 = vadd.f32 %v9518_v10, %v4840_v6  ;;  %v4852_v62 = vrot.slane %v9536_v17, 4  ;;  %v9566_v6 = vpop.f32.mrf.mxu0 }
 0x218   : > { %v3594_v46 = vrot.slane %v9531_v60, 2  ;;  %v9550_v35 = vpop.eup %8142  ;;  %v4847_v40 = vadd.f32 %v9526_v3, %v4846_v27  ;;  %v4858_v61 = vrot.slane %v9545_v42, 4  ;;  %v3589_v4 = vmax.f32 %v3587_v47, %v3588_v1  ;;  %12374 = vst [vmem:[#allocation165_spill] sm:$0xff] %v9566_v6 }
 0x219   : > { %v3600_v21 = vrot.slane %v9534_v50, 2  ;;  %v9557_v29 = vpop.eup %8144  ;;  %v4837_v45 = vadd.f32 %v4836_v31, %v4835_v63  ;;  %v4842_v13 = vrot.slane %v4841_v8, 2  ;;  %v4853_v24 = vadd.f32 %v9536_v17, %v4852_v62  ;;  %v9571_v6 = vpop.f32.mrf.mxu0 }
 0x21a   : > { %v4864_v59 = vrot.slane %v9550_v35, 4  ;;  %v9561_v30 = vpop.eup %8146  ;;  %v4848_v34 = vrot.slane %v4847_v40, 2  ;;  %v4859_v44 = vadd.f32 %v9545_v42, %v4858_v61  ;;  %v4870_v52 = vrot.slane %v9557_v29, 4  ;;  %12375 = vst [vmem:[#allocation166_spill] sm:$0xff] %v9571_v6 }
 0x21b   : > { %v3590_v56 = vrot.slane %v3589_v4, 1  ;;  %v4838_v54 = vrot.slane %v4837_v45, 1  ;;  %v4843_v47 = vadd.f32 %v4842_v13, %v4841_v8  ;;  %v4854_v57 = vrot.slane %v4853_v24, 2 }
 0x21c   : > { %v4865_v5 = vadd.f32 %v9550_v35, %v4864_v59  ;;  %v4849_v63 = vadd.f32 %v4848_v34, %v4847_v40  ;;  %v4860_v27 = vrot.slane %v4859_v44, 2  ;;  %v4871_v1 = vadd.f32 %v9557_v29, %v4870_v52 }
 0x21d   : > { %v4876_v31 = vrot.slane %v9561_v30, 4  ;;  %v4839_v62 = vadd.f32 %v4838_v54, %v4837_v45  ;;  %v4844_v14 = vrot.slane %v4843_v47, 1  ;;  %v4855_v28 = vadd.f32 %v4854_v57, %v4853_v24 }
 0x21e   : > { %v4866_v61 = vrot.slane %v4865_v5, 2  ;;  %v4850_v7 = vrot.slane %v4849_v63, 1  ;;  %v4861_v20 = vadd.f32 %v4860_v27, %v4859_v44  ;;  %v4872_v48 = vrot.slane %v4871_v1, 2 }
 0x21f   : > { %v4877_v8 = vadd.f32 %v9561_v30, %v4876_v31  ;;  %v4845_v13 = vadd.f32 %v4844_v14, %v4843_v47  ;;  %v4856_v16 = vrot.slane %v4855_v28, 1  ;;  %8148 = vrcp.f32 %v4839_v62 }
 0x220   : > { %v4867_v59 = vadd.f32 %v4866_v61, %v4865_v5  ;;  %v4851_v40 = vadd.f32 %v4850_v7, %v4849_v63  ;;  %v4862_v34 = vrot.slane %v4861_v20, 1  ;;  %v4873_v52 = vadd.f32 %v4872_v48, %v4871_v1  ;;  %v9575_v5 = vpop.f32.mrf.mxu0 }
 0x221   : > { %v4878_v38 = vrot.slane %v4877_v8, 2  ;;  %v4857_v0 = vadd.f32 %v4856_v16, %v4855_v28  ;;  %8150 = vrcp.f32 %v4845_v13  ;;  %v3591_v24 = vmax.f32 %v3589_v4, %v3590_v56 }
 0x222   : > { %v4868_v45 = vrot.slane %v4867_v59, 1  ;;  %v4863_v54 = vadd.f32 %v4862_v34, %v4861_v20  ;;  %v4874_v57 = vrot.slane %v4873_v52, 1  ;;  %8152 = vrcp.f32 %v4851_v40  ;;  %v9585_v1 = vpop.f32.mrf.mxu0 }
 0x223   : > { %v4879_v44 = vadd.f32 %v4878_v38, %v4877_v8  ;;  %8154 = vrcp.f32 %v4857_v0  ;;  %v3595_v14 = vmax.f32 %v9531_v60, %v3594_v46  ;;  %v3601_v47 = vmax.f32 %v9534_v50, %v3600_v21  ;;  %12377 = vst [vmem:[#allocation167_spill] sm:$0xff] %v9585_v1  ;;  %v12432_v1 = vld [vmem:[#allocation160_spill] sm:$0xff] }
 0x224   : > { %v4869_v27 = vadd.f32 %v4868_v45, %v4867_v59  ;;  %v4875_v7 = vadd.f32 %v4874_v57, %v4873_v52  ;;  %8156 = vrcp.f32 %v4863_v54  ;;  %v3606_v16 = vrot.slane %v9540_v23, 2 }
 0x225   : > { %v4880_v63 = vrot.slane %v4879_v44, 1  ;;  %v3596_v48 = vrot.slane %v3595_v14, 1  ;;  %v3602_v28 = vrot.slane %v3601_v47, 1  ;;  %v3612_v20 = vrot.slane %v9543_v55, 2 }
 0x226   : > { %8158 = vrcp.f32 %v4869_v27  ;;  %v3607_v0 = vmax.f32 %v9540_v23, %v3606_v16  ;;  %v12376_v60 = vrot.slane %v9508_v12, 4  ;;  %v3622_v56 = vrot.slane %v9510_v36, 4 }
 0x227   : > { %v4881_v38 = vadd.f32 %v4880_v63, %v4879_v44  ;;  %8160 = vrcp.f32 %v4875_v7  ;;  %v3597_v46 = vmax.f32 %v3595_v14, %v3596_v48  ;;  %v3603_v4 = vmax.f32 %v3601_v47, %v3602_v28  ;;  %v9593_v14 = vpop.f32.mrf.mxu0 }
 0x228   : > { %v3617_v50 = vmax.f32 %v9508_v12, %v12376_v60  ;;  %v3613_v21 = vmax.f32 %v9543_v55, %v3612_v20  ;;  %v3608_v31 = vrot.slane %v3607_v0, 1  ;;  %v3628_v61 = vrot.slane %v9514_v19, 4 }
 0x229   : > { %8162 = vrcp.f32 %v4881_v38  ;;  %v3623_v23 = vmax.f32 %v9510_v36, %v3622_v56  ;;  %v4354_v13 = vsub.f32 %v9496_v32, %v3591_v24  ;;  %v4355_v59 = vsub.f32 %v9498_v41, %v3597_v46  ;;  %v9602_v46 = vpop.f32.mrf.mxu0 }
 0x22a   : > { %v3618_v62 = vrot.slane %v3617_v50, 2  ;;  %v3614_v8 = vrot.slane %v3613_v21, 1  ;;  %v3609_v40 = vmax.f32 %v3607_v0, %v3608_v31  ;;  %v3629_v55 = vmax.f32 %v9514_v19, %v3628_v61  ;;  %12378 = vst [vmem:[#allocation168_spill] sm:$0xff] %v9602_v46 }
 0x22b   : > { %v4356_v52 = vsub.f32 %v9500_v49, %v3603_v4  ;;  %v3624_v54 = vrot.slane %v3623_v23, 2  ;;  %v4482_v57 = vmul.f32 1.442695, %v4354_v13  ;;  %v4484_v44 = vmul.f32 1.442695, %v4355_v59 }
 0x22c   : > { %v3619_v34 = vmax.f32 %v3617_v50, %v3618_v62  ;;  %v3615_v45 = vmax.f32 %v3613_v21, %v3614_v8  ;;  %v8149_v27 = vpop.eup %8148  ;;  %v3630_v7 = vrot.slane %v3629_v55, 2  ;;  %v4357_v63 = vsub.f32 %v9502_v58, %v3609_v40 }
 0x22d   : > { %v4486_v32 = vmul.f32 1.442695, %v4356_v52  ;;  %v5650_v41 = vmul.f32 %v8149_v27, %v9504_v22  ;;  %v3625_v24 = vmax.f32 %v3623_v23, %v3624_v54  ;;  %8164 = vpow2.f32 %v4482_v57 }
 0x22e   : > { %v3620_v47 = vrot.slane %v3619_v34, 1  ;;  %v4358_v16 = vsub.f32 %v9506_v26, %v3615_v45  ;;  %v8151_v48 = vpop.eup %8150  ;;  %v3631_v28 = vmax.f32 %v3629_v55, %v3630_v7  ;;  %8166 = vpow2.f32 %v4484_v44 }
 0x22f   : > { %v4488_v20 = vmul.f32 1.442695, %v4357_v63  ;;  %v8153_v38 = vpop.eup %8152  ;;  %v5651_v0 = vmul.f32 %v8151_v48, %v9518_v10  ;;  %v5778_v60 = vmul.f32 %v5650_v41, %v9242_v33  ;;  %v3626_v50 = vrot.slane %v3625_v24, 1 }
 0x230   : > { %v9598_v49 = vmax.f32 %v3619_v34, %v3620_v47  ;;  %8168 = vpow2.f32 %v4486_v32  ;;  %v8155_v58 = vpop.eup %8154  ;;  %v5652_v22 = vmul.f32 %v8153_v38, %v9526_v3  ;;  %v3632_v26 = vrot.slane %v3631_v28, 1 }
 0x231   : > { %8170 = vpow2.f32 %v4488_v20  ;;  %v8157_v21 = vpop.eup %8156  ;;  %v5653_v56 = vmul.f32 %v8155_v58, %v9536_v17  ;;  %v5779_v31 = vmul.f32 %v5651_v0, %v9254_v51  ;;  %v5986_v10 = vrot.slane %v5778_v60, 4  ;;  %v9619_v51 = vpop.f32.mrf.mxu0 }
 0x232   : > { %v4359_v4 = vsub.f32 %v9508_v12, %v9598_v49  ;;  %v9609_v62 = vmax.f32 %v3625_v24, %v3626_v50  ;;  %v5654_v61 = vmul.f32 %v8157_v21, %v9545_v42  ;;  %v5780_v8 = vmul.f32 %v5652_v22, %v9266_v37 }
 0x233   : > { %v8159_v33 = vpop.eup %8158  ;;  %v9613_v23 = vmax.f32 %v3631_v28, %v3632_v26  ;;  %v9615_v3 = vmul.f32 1.442695, %v4358_v16  ;;  %v5781_v40 = vmul.f32 %v5653_v56, %v9278_v53  ;;  %v5987_v17 = vadd.f32 %v5986_v10, %v5778_v60  ;;  %v9628_v41 = vpop.f32.mrf.mxu0 }
 0x234   : > { %v8161_v13 = vpop.eup %8160  ;;  %v5655_v59 = vmul.f32 %v8159_v33, %v9550_v35  ;;  %v5992_v34 = vrot.slane %v5779_v31, 4  ;;  %v5782_v52 = vmul.f32 %v5654_v61, %v9290_v2  ;;  %v5998_v42 = vrot.slane %v5780_v8, 4  ;;  %12379 = vst [vmem:[#allocation169_spill] sm:$0xff] %v9628_v41 }
 0x235   : > { %v5656_v55 = vmul.f32 %v8161_v13, %v9557_v29  ;;  %v4360_v37 = vsub.f32 %v9510_v36, %v9609_v62  ;;  %v5988_v57 = vrot.slane %v5987_v17, 2  ;;  %v6004_v35 = vrot.slane %v5781_v40, 4  ;;  %v9637_v10 = vpop.f32.mrf.mxu0 }
 0x236   : > { %v8163_v45 = vpop.eup %8162  ;;  %v5783_v54 = vmul.f32 %v5655_v59, %v9302_v9  ;;  %v5993_v44 = vadd.f32 %v5992_v34, %v5779_v31  ;;  %v5999_v47 = vadd.f32 %v5998_v42, %v5780_v8  ;;  %v6010_v7 = vrot.slane %v5782_v52, 4 }
 0x237   : > { %v5657_v53 = vmul.f32 %v8163_v45, %v9561_v30  ;;  %v5784_v27 = vmul.f32 %v5656_v55, %v9314_v39  ;;  %v5989_v63 = vadd.f32 %v5988_v57, %v5987_v17  ;;  %v6005_v32 = vadd.f32 %v6004_v35, %v5781_v40 }
 0x238   : > { %v5994_v29 = vrot.slane %v5993_v44, 2  ;;  %v6016_v2 = vrot.slane %v5783_v54, 4  ;;  %v6000_v16 = vrot.slane %v5999_v47, 2  ;;  %v6011_v48 = vadd.f32 %v6010_v7, %v5782_v52 }
 0x239   : > { %v5785_v24 = vmul.f32 %v5657_v53, %v9326_v11  ;;  %v6022_v9 = vrot.slane %v5784_v27, 4  ;;  %v5990_v28 = vrot.slane %v5989_v63, 1  ;;  %v6006_v38 = vrot.slane %v6005_v32, 2 }
 0x23a   : > { %v5995_v20 = vadd.f32 %v5994_v29, %v5993_v44  ;;  %v6017_v30 = vadd.f32 %v6016_v2, %v5783_v54  ;;  %v9631_v39 = vpop.eup %8164  ;;  %v6001_v0 = vadd.f32 %v6000_v16, %v5999_v47  ;;  %v6012_v60 = vrot.slane %v6011_v48, 2 }
 0x23b   : > { %v6023_v50 = vadd.f32 %v6022_v9, %v5784_v27  ;;  %v6028_v58 = vrot.slane %v5785_v24, 4  ;;  %v9633_v22 = vpop.eup %8166  ;;  %v5991_v26 = vadd.f32 %v5990_v28, %v5989_v63  ;;  %v6007_v21 = vadd.f32 %v6006_v38, %v6005_v32  ;;  %v9641_v27 = vpop.f32.mrf.mxu0 }
 0x23c   : > { %v5996_v11 = vrot.slane %v5995_v20, 1  ;;  %v6018_v56 = vrot.slane %v6017_v30, 2  ;;  %v6002_v33 = vrot.slane %v6001_v0, 1  ;;  %v6013_v61 = vadd.f32 %v6012_v60, %v6011_v48  ;;  %12380 = vst [vmem:[#allocation170_spill] sm:$0xff] %v9641_v27 }
 0x23d   : > { %v9635_v31 = vpop.eup %8168  ;;  %v6024_v8 = vrot.slane %v6023_v50, 2  ;;  %v6029_v13 = vadd.f32 %v6028_v58, %v5785_v24  ;;  %v6008_v17 = vrot.slane %v6007_v21, 1  ;;  %v7808_v55 = vpack.c.bf16 %v5991_v26, %v5991_v26  ;;  %v9647_v60 = vpop.f32.mrf.mxu0 }
 0x23e   : > { %v9639_v59 = vpop.eup %8170  ;;  %v5997_v40 = vadd.f32 %v5996_v11, %v5995_v20  ;;  %v6019_v34 = vadd.f32 %v6018_v56, %v6017_v30  ;;  %v6003_v52 = vadd.f32 %v6002_v33, %v6001_v0  ;;  %v6014_v42 = vrot.slane %v6013_v61, 1 }
 0x23f   : > { %v6025_v45 = vadd.f32 %v6024_v8, %v6023_v50  ;;  %v6030_v54 = vrot.slane %v6029_v13, 2  ;;  %v6009_v57 = vadd.f32 %v6008_v17, %v6007_v21  ;;  %v7186_v53 = vunpack.c.l.b16 %v7808_v55  ;;  %v9664_v12 = vpop.f32.mrf.mxu0 }
 0x240   : > { %v6020_v44 = vrot.slane %v6019_v34, 1  ;;  %v7809_v35 = vpack.c.bf16 %v5997_v40, %v5997_v40  ;;  %v6015_v47 = vadd.f32 %v6014_v42, %v6013_v61  ;;  %v7810_v29 = vpack.c.bf16 %v6003_v52, %v6003_v52  ;;  %12381 = vst [vmem:[#allocation171_spill] sm:$0xff] %v9664_v12 }
 0x241   : > { %v6026_v7 = vrot.slane %v6025_v45, 1  ;;  %v6031_v63 = vadd.f32 %v6030_v54, %v6029_v13  ;;  %v7811_v2 = vpack.c.bf16 %v6009_v57, %v6009_v57  ;;  %v4361_v16 = vsub.f32 %v9514_v19, %v9613_v23 }
 0x242   : > { %v6021_v32 = vadd.f32 %v6020_v44, %v6019_v34  ;;  %v7187_v24 = vunpack.c.l.b16 %v7809_v35  ;;  %v7812_v28 = vpack.c.bf16 %v6015_v47, %v6015_v47  ;;  %v7188_v20 = vunpack.c.l.b16 %v7810_v29  ;;  %v9680_v47 = vpop.f32.mrf.mxu0 }
 0x243   : > { %v6027_v48 = vadd.f32 %v6026_v7, %v6025_v45  ;;  %v6032_v9 = vrot.slane %v6031_v63, 1  ;;  %v7189_v30 = vunpack.c.l.b16 %v7811_v2  ;;  %8172 = vpow2.f32 %v9615_v3 }
 0x244   : > { %v7813_v38 = vpack.c.bf16 %v6021_v32, %v6021_v32  ;;  %v7319_v0 = vsel %vm7298_vm0, %v7187_v24, %v7186_v53  ;;  %v7190_v26 = vunpack.c.l.b16 %v7812_v28  ;;  %v4492_v21 = vmul.f32 1.442695, %v4359_v4 }
 0x245   : > { %v6033_v50 = vadd.f32 %v6032_v9, %v6031_v63  ;;  %v7814_v58 = vpack.c.bf16 %v6027_v48, %v6027_v48  ;;  %v7320_v11 = vsel %vm7300_vm1, %v7188_v20, %v7319_v0  ;;  %v4494_v56 = vmul.f32 1.442695, %v4360_v37 }
 0x246   : > { %v7191_v19 = vunpack.c.l.b16 %v7813_v38  ;;  %v7321_v23 = vsel %vm7302_vm2, %v7189_v30, %v7320_v11  ;;  %v4496_v8 = vmul.f32 1.442695, %v4361_v16  ;;  %8174 = vpow2.f32 %v4492_v21 }
 0x247   : > { %v7815_v3 = vpack.c.bf16 %v6033_v50, %v6033_v50  ;;  %v7192_v33 = vunpack.c.l.b16 %v7814_v58  ;;  %v7322_v61 = vsel %vm7304_vm3, %v7190_v26, %v7321_v23  ;;  %v4738_v40 = vrot.slane %v9631_v39, 4  ;;  %v9691_v26 = vpop.f32.mrf.mxu0 }
 0x248   : > { %v7323_v13 = vsel %vm7306_vm4, %v7191_v19, %v7322_v61  ;;  %v4744_v17 = vrot.slane %v9633_v22, 4  ;;  %8176 = vpow2.f32 %v4494_v56  ;;  %v4750_v4 = vrot.slane %v9635_v31, 4  ;;  %12383 = vst [vmem:[#allocation172_spill] sm:$0xff] %v9691_v26 }
 0x249   : > { %v7193_v49 = vunpack.c.l.b16 %v7815_v3  ;;  %v7324_v36 = vsel %vm7308_vm5, %v7192_v33, %v7323_v13  ;;  %8178 = vpow2.f32 %v4496_v8  ;;  %v4739_v62 = vadd.f32 %v9631_v39, %v4738_v40 }
 0x24a   : > { %v4745_v37 = vadd.f32 %v9633_v22, %v4744_v17  ;;  %v4756_v34 = vrot.slane %v9639_v59, 4  ;;  %v4751_v52 = vadd.f32 %v9635_v31, %v4750_v4  ;;  %v1932_v42 = vrot.slane %v9373_v18, %v9361_v25 }
 0x24b   : > { %v7325_v55 = vsel %vm7310_vm6, %v7193_v49, %v7324_v36  ;;  %v12382_v45 = vcombine.high %v9373_v18, %v9373_v18  ;;  %v4740_v44 = vrot.slane %v4739_v62, 2 }
 0x24c   : > { %v7419_v57 = vpack.c.b16 %v7325_v55, %v7325_v55  ;;  %v4746_v35 = vrot.slane %v4745_v37, 2  ;;  %v4757_v53 = vadd.f32 %v9639_v59, %v4756_v34  ;;  %v4752_v7 = vrot.slane %v4751_v52, 2 }
 0x24d   : > { %v1939_v54 = vrot.slane %v12382_v45, %v9361_v25  ;;  %v1940_v63 = vcombine.high %v1932_v42, %v1932_v42  ;;  %v1948_v32 = vrot.slane %v1932_v42, %v9361_v25  ;;  %v4741_v2 = vadd.f32 %v4740_v44, %v4739_v62 }
 0x24e   : > { %7451 = vst [vmem:[%s9683_s26 + $0x8] sm:$0xf] %v7419_v57  ;;  %v4747_v24 = vadd.f32 %v4746_v35, %v4745_v37  ;;  %v4758_v18 = vrot.slane %v4757_v53, 2  ;;  %v4753_v48 = vadd.f32 %v4752_v7, %v4751_v52  ;;  %v9702_v37 = vpop.f32.mrf.mxu0  ;;  %v12384_v57 = vld [vmem:[#allocation146_spill] sm:$0xff]  ;;  %v12385_v7 = vld [vmem:[#allocation152_spill] sm:$0xff] }
 0x24f   : > { %v1941_v29 = vcombine.high %v1939_v54, %v1939_v54  ;;  %v1955_v16 = vrot.slane %v1939_v54, %v9361_v25  ;;  %v1962_v9 = vrot.slane %v1940_v63, %v9361_v25  ;;  %v1970_v20 = vcombine.high %v1948_v32, %v1948_v32 }
 0x250   : > { %v4742_v38 = vrot.slane %v4741_v2, 1  ;;  %v4748_v30 = vrot.slane %v4747_v24, 1  ;;  %v4759_v0 = vadd.f32 %v4758_v18, %v4757_v53  ;;  %v9689_v58 = vpop.eup %8172  ;;  %v4754_v11 = vrot.slane %v4753_v48, 1 }
 0x251   : > { %v1969_v28 = vrot.slane %v1941_v29, %v9361_v25  ;;  %v1971_v50 = vcombine.high %v1955_v16, %v1955_v16  ;;  %v1972_v19 = vcombine.high %v1962_v9, %v1962_v9  ;;  %v2661_v21 = vrot.slane %v1948_v32, %v9366_v15  ;;  %v12386_v29 = vld [vmem:[#allocation154_spill] sm:$0xff] }
 0x252   : > { %v4743_v56 = vadd.f32 %v4742_v38, %v4741_v2  ;;  %v4749_v3 = vadd.f32 %v4748_v30, %v4747_v24  ;;  %v4760_v33 = vrot.slane %v4759_v0, 1  ;;  %v4762_v61 = vrot.slane %v9689_v58, 4  ;;  %v12389_v38 = vld [vmem:[#allocation158_spill] sm:$0xff] }
 0x253   : > { %v1973_v23 = vcombine.high %v1969_v28, %v1969_v28  ;;  %v4755_v8 = vadd.f32 %v4754_v11, %v4753_v48  ;;  %v2665_v13 = vrot.slane %v1962_v9, %v9366_v15  ;;  %v2669_v40 = vrot.slane %v1970_v20, %v9366_v15  ;;  %v9700_v62 = vpop.eup %8174  ;;  %v1702_v9 = vpop.f32.mrf.mxu1 }
 0x254   : > { %v2673_v17 = vrot.slane %v1972_v19, %v9366_v15  ;;  %v4761_v49 = vadd.f32 %v4760_v33, %v4759_v0  ;;  %v4763_v36 = vadd.f32 %v9689_v58, %v4762_v61  ;;  %8180 = vrcp.f32 %v4743_v56  ;;  %v12391_v56 = vld [vmem:[#allocation163_spill] sm:$0xff] }
 0x255   : > { %v2677_v4 = vrot.slane %v1955_v16, %v9366_v15  ;;  %8182 = vrcp.f32 %v4749_v3  ;;  %v2681_v34 = vrot.slane %v1969_v28, %v9366_v15  ;;  %v2685_v55 = vrot.slane %v1971_v50, %v9366_v15  ;;  %v9707_v42 = vpop.eup %8176  ;;  %v12387_v16 = vld [vmem:[#allocation156_spill] sm:$0xff]  ;;  %v9719_v28 = vpop.f32.mrf.mxu0  ;;  %v12390_v50 = vld [vmem:[#allocation161_spill] sm:$0xff] }
 0x256   : > { %v2689_v52 = vrot.slane %v1973_v23, %v9366_v15  ;;  %v4764_v45 = vrot.slane %v4763_v36, 2  ;;  %v4768_v54 = vrot.slane %v9700_v62, 4  ;;  %8184 = vrcp.f32 %v4755_v8  ;;  %v9711_v35 = vpop.eup %8178  ;;  %12388 = vst [vmem:[#allocation146_spill] sm:$0xff] %v9719_v28 }
 0x257   : > { %v3226_v44 = vadd.f32 %v2661_v21, %v12384_v57  ;;  %v4774_v53 = vrot.slane %v9707_v42, 4  ;;  %8186 = vrcp.f32 %v4761_v49  ;;  %v3227_v63 = vadd.f32 %v2665_v13, %v12385_v7  ;;  %v9730_v13 = vld [vmem:[%s12208_s4] ss:$0 sm:$0xff] }
 0x258   : > { %v3228_v32 = vadd.f32 %v2669_v40, %v12386_v29  ;;  %v4765_v2 = vadd.f32 %v4764_v45, %v4763_v36  ;;  %v4769_v24 = vadd.f32 %v9700_v62, %v4768_v54  ;;  %v4780_v18 = vrot.slane %v9711_v35, 4 }
 0x259   : > { %v3229_v48 = vadd.f32 %v2673_v17, %v12387_v16  ;;  %v4775_v20 = vadd.f32 %v9707_v42, %v4774_v53  ;;  %v3230_v30 = vadd.f32 %v2677_v4, %v12389_v38  ;;  %v3231_v0 = vadd.f32 %v2681_v34, %v9453_v43  ;;  %v9735_v4 = vpop.f32.mrf.mxu0 }
 0x25a   : > { %v3232_v11 = vadd.f32 %v2685_v55, %v12390_v50  ;;  %v4766_v19 = vrot.slane %v4765_v2, 1  ;;  %v4770_v23 = vrot.slane %v4769_v24, 2  ;;  %v4781_v21 = vadd.f32 %v9711_v35, %v4780_v18  ;;  %12392 = vst [vmem:[#allocation152_spill] sm:$0xff] %v9735_v4 }
 0x25b   : > { %v3233_v3 = vadd.f32 %v2689_v52, %v12391_v56  ;;  %v4776_v33 = vrot.slane %v4775_v20, 2  ;;  %v3354_v61 = vmul.f32 0.01, %v3226_v44  ;;  %v3355_v8 = vmul.f32 0.01, %v3227_v63  ;;  %v9745_v50 = vpop.f32.mrf.mxu0 }
 0x25c   : > { %v9733_v40 = vadd.f32 %v9730_v13, %v1702_v9  ;;  %v4767_v43 = vadd.f32 %v4766_v19, %v4765_v2  ;;  %v4771_v17 = vadd.f32 %v4770_v23, %v4769_v24  ;;  %v4782_v49 = vrot.slane %v4781_v21, 2  ;;  %12393 = vst [vmem:[#allocation154_spill] sm:$0xff] %v9745_v50 }
 0x25d   : > { %v3356_v36 = vmul.f32 0.01, %v3228_v32  ;;  %v4777_v34 = vadd.f32 %v4776_v33, %v4775_v20  ;;  %v3357_v55 = vmul.f32 0.01, %v3229_v48  ;;  %v3358_v52 = vmul.f32 0.01, %v3230_v30 }
 0x25e   : > { %v3359_v45 = vmul.f32 0.01, %v3231_v0  ;;  %v4772_v54 = vrot.slane %v4771_v17, 1  ;;  %v4783_v57 = vadd.f32 %v4782_v49, %v4781_v21  ;;  %8188 = vrcp.f32 %v4767_v43 }
 0x25f   : > { %v3360_v53 = vmul.f32 0.01, %v3232_v11  ;;  %v4778_v7 = vrot.slane %v4777_v34, 1  ;;  %v3361_v29 = vmul.f32 0.01, %v3233_v3  ;;  %v9737_v18 = vmax.f32 %v3226_v44, %v3354_v61 }
 0x260   : > { %v9739_v16 = vmax.f32 %v3227_v63, %v3355_v8  ;;  %v4773_v2 = vadd.f32 %v4772_v54, %v4771_v17  ;;  %v4784_v24 = vrot.slane %v4783_v57, 1  ;;  %v9741_v9 = vmax.f32 %v3228_v32, %v3356_v36  ;;  %v9762_v36 = vpop.f32.mrf.mxu0 }
 0x261   : > { %v9743_v38 = vmax.f32 %v3229_v48, %v3357_v55  ;;  %v8181_v20 = vpop.eup %8180  ;;  %v4779_v19 = vadd.f32 %v4778_v7, %v4777_v34  ;;  %v9747_v23 = vmax.f32 %v3230_v30, %v3358_v52  ;;  %v9749_v21 = vmax.f32 %v3231_v0, %v3359_v45  ;;  %12395 = vst [vmem:[#allocation156_spill] sm:$0xff] %v9762_v36  ;;  %v12397_v52 = vld [vmem:[#allocation11_spill] sm:$0xff] }
 0x262   : > { %v9751_v56 = vmax.f32 %v3232_v11, %v3360_v53  ;;  %v8183_v44 = vpop.eup %8182  ;;  %v4785_v33 = vadd.f32 %v4784_v24, %v4783_v57  ;;  %8190 = vrcp.f32 %v4773_v2  ;;  %v5634_v63 = vmul.f32 %v8181_v20, %v9631_v39  ;;  %v12394_v11 = vld [vmem:[#allocation5_spill] sm:$0xff]  ;;  %v12398_v53 = vld [vmem:[#allocation14_spill] sm:$0xff] }
 0x263   : > { %v9754_v61 = vmax.f32 %v3233_v3, %v3361_v29  ;;  %v8185_v32 = vpop.eup %8184  ;;  %8192 = vrcp.f32 %v4779_v19  ;;  %v5635_v48 = vmul.f32 %v8183_v44, %v9633_v22  ;;  %v3730_v8 = vrot.slane %v9737_v18, 4  ;;  %v12396_v3 = vld [vmem:[#allocation8_spill] sm:$0xff] }
 0x264   : > { %v3736_v30 = vrot.slane %v9739_v16, 4  ;;  %v8187_v43 = vpop.eup %8186  ;;  %8194 = vrcp.f32 %v4785_v33  ;;  %v5636_v0 = vmul.f32 %v8185_v32, %v9635_v31  ;;  %v5762_v17 = vmul.f32 %v5634_v63, %v12394_v11  ;;  %v9773_v33 = vpop.f32.mrf.mxu0 }
 0x265   : > { %v3742_v49 = vrot.slane %v9741_v9, 4  ;;  %v5637_v39 = vmul.f32 %v8187_v43, %v9639_v59  ;;  %v5763_v34 = vmul.f32 %v5635_v48, %v12396_v3  ;;  %v3731_v22 = vmax.f32 %v9737_v18, %v3730_v8  ;;  %12399 = vst [vmem:[#allocation158_spill] sm:$0xff] %v9773_v33 }
 0x266   : > { %v3737_v55 = vmax.f32 %v9739_v16, %v3736_v30  ;;  %v5764_v45 = vmul.f32 %v5636_v0, %v12397_v52  ;;  %v5890_v54 = vrot.slane %v5762_v17, 4  ;;  %v3748_v31 = vrot.slane %v9743_v38, 4  ;;  %v9776_v28 = vpop.f32.mrf.mxu0 }
 0x267   : > { %v3743_v57 = vmax.f32 %v9741_v9, %v3742_v49  ;;  %v5765_v7 = vmul.f32 %v5637_v39, %v12398_v53  ;;  %v5896_v29 = vrot.slane %v5763_v34, 4  ;;  %v3732_v2 = vrot.slane %v3731_v22, 2  ;;  %12400 = vst [vmem:[#allocation161_spill] sm:$0xff] %v9776_v28 }
 0x268   : > { %v3738_v24 = vrot.slane %v3737_v55, 2  ;;  %v5891_v20 = vadd.f32 %v5890_v54, %v5762_v17  ;;  %v5902_v59 = vrot.slane %v5764_v45, 4  ;;  %v3749_v44 = vmax.f32 %v9743_v38, %v3748_v31 }
 0x269   : > { %v3744_v19 = vrot.slane %v3743_v57, 2  ;;  %v5897_v63 = vadd.f32 %v5896_v29, %v5763_v34  ;;  %v5908_v32 = vrot.slane %v5765_v7, 4  ;;  %v3733_v48 = vmax.f32 %v3731_v22, %v3732_v2 }
 0x26a   : > { %v3739_v8 = vmax.f32 %v3737_v55, %v3738_v24  ;;  %v5892_v30 = vrot.slane %v5891_v20, 2  ;;  %v5903_v43 = vadd.f32 %v5902_v59, %v5764_v45  ;;  %v3750_v11 = vrot.slane %v3749_v44, 2  ;;  %v12401_v45 = vld [vmem:[#allocation17_spill] sm:$0xff] }
 0x26b   : > { %v3745_v0 = vmax.f32 %v3743_v57, %v3744_v19  ;;  %v8189_v49 = vpop.eup %8188  ;;  %v5898_v39 = vrot.slane %v5897_v63, 2  ;;  %v5909_v3 = vadd.f32 %v5908_v32, %v5765_v7  ;;  %v3734_v52 = vrot.slane %v3733_v48, 1 }
 0x26c   : > { %v3740_v53 = vrot.slane %v3739_v8, 1  ;;  %v5638_v17 = vmul.f32 %v8189_v49, %v9689_v58  ;;  %v5893_v54 = vadd.f32 %v5892_v30, %v5891_v20  ;;  %v5904_v50 = vrot.slane %v5903_v43, 2 }
 0x26d   : > { %v3746_v31 = vrot.slane %v3745_v0, 1  ;;  %v5899_v34 = vadd.f32 %v5898_v39, %v5897_v63  ;;  %v5910_v29 = vrot.slane %v5909_v3, 2  ;;  %v9778_v22 = vmax.f32 %v3733_v48, %v3734_v52  ;;  %v9787_v52 = vpop.f32.mrf.mxu0 }
 0x26e   : > { %v9780_v55 = vmax.f32 %v3739_v8, %v3740_v53  ;;  %v5766_v57 = vmul.f32 %v5638_v17, %v12401_v45  ;;  %v5894_v2 = vrot.slane %v5893_v54, 1  ;;  %v5905_v24 = vadd.f32 %v5904_v50, %v5903_v43  ;;  %12402 = vst [vmem:[#allocation163_spill] sm:$0xff] %v9787_v52 }
 0x26f   : > { %v9783_v7 = vmax.f32 %v3745_v0, %v3746_v31  ;;  %v8191_v59 = vpop.eup %8190  ;;  %v5900_v19 = vrot.slane %v5899_v34, 1  ;;  %v5911_v58 = vadd.f32 %v5910_v29, %v5909_v3  ;;  %v3751_v20 = vmax.f32 %v3749_v44, %v3750_v11  ;;  %v12403_v3 = vld [vmem:[#allocation20_spill] sm:$0xff]  ;;  %v12404_v29 = vld [vmem:[#allocation25_spill] sm:$0xff] }
 0x270   : > { %v3754_v32 = vrot.slane %v9747_v23, 4  ;;  %v8193_v30 = vpop.eup %8192  ;;  %v5639_v63 = vmul.f32 %v8191_v59, %v9700_v62  ;;  %v5895_v49 = vadd.f32 %v5894_v2, %v5893_v54  ;;  %v5906_v48 = vrot.slane %v5905_v24, 1  ;;  %v12405_v59 = vld [vmem:[#allocation30_spill] sm:$0xff] }
 0x271   : > { %v5914_v39 = vrot.slane %v5766_v57, 4  ;;  %v8195_v8 = vpop.eup %8194  ;;  %v5640_v53 = vmul.f32 %v8193_v30, %v9707_v42  ;;  %v5901_v50 = vadd.f32 %v5900_v19, %v5899_v34  ;;  %v5912_v43 = vrot.slane %v5911_v58, 1  ;;  %v9794_v42 = vpop.f32.mrf.mxu0 }
 0x272   : > { %v3752_v0 = vrot.slane %v3751_v20, 1  ;;  %v5641_v17 = vmul.f32 %v8195_v8, %v9711_v35  ;;  %v5767_v44 = vmul.f32 %v5639_v63, %v12403_v3  ;;  %v5907_v11 = vadd.f32 %v5906_v48, %v5905_v24  ;;  %12406 = vst [vmem:[#allocation5_spill] sm:$0xff] %v9794_v42 }
 0x273   : > { %v5915_v31 = vadd.f32 %v5914_v39, %v5766_v57  ;;  %v5768_v45 = vmul.f32 %v5640_v53, %v12404_v29  ;;  %v5913_v62 = vadd.f32 %v5912_v43, %v5911_v58  ;;  %v7792_v54 = vpack.c.bf16 %v5895_v49, %v5895_v49  ;;  %v9800_v3 = vpop.f32.mrf.mxu0 }
 0x274   : > { %v7793_v2 = vpack.c.bf16 %v5901_v50, %v5901_v50  ;;  %v5769_v33 = vmul.f32 %v5641_v17, %v12405_v59  ;;  %v5920_v52 = vrot.slane %v5767_v44, 4  ;;  %v7794_v36 = vpack.c.bf16 %v5907_v11, %v5907_v11  ;;  %12407 = vst [vmem:[#allocation8_spill] sm:$0xff] %v9800_v3 }
 0x275   : > { %v5916_v28 = vrot.slane %v5915_v31, 2  ;;  %v5926_v34 = vrot.slane %v5768_v45, 4  ;;  %v7795_v19 = vpack.c.bf16 %v5913_v62, %v5913_v62  ;;  %v7170_v30 = vunpack.c.l.b16 %v7792_v54 }
 0x276   : > { %v7171_v35 = vunpack.c.l.b16 %v7793_v2  ;;  %v5921_v63 = vadd.f32 %v5920_v52, %v5767_v44  ;;  %v5932_v24 = vrot.slane %v5769_v33, 4  ;;  %v7172_v57 = vunpack.c.l.b16 %v7794_v36 }
 0x277   : > { %v5917_v8 = vadd.f32 %v5916_v28, %v5915_v31  ;;  %v5927_v48 = vadd.f32 %v5926_v34, %v5768_v45  ;;  %v7173_v39 = vunpack.c.l.b16 %v7795_v19  ;;  %v9797_v49 = vmax.f32 %v3751_v20, %v3752_v0  ;;  %v9809_v19 = vpop.f32.mrf.mxu0 }
 0x278   : > { %v7299_v58 = vsel %vm7298_vm0, %v7171_v35, %v7170_v30  ;;  %v5922_v50 = vrot.slane %v5921_v63, 2  ;;  %v5933_v43 = vadd.f32 %v5932_v24, %v5769_v33  ;;  %v3755_v28 = vmax.f32 %v9747_v23, %v3754_v32  ;;  %12408 = vst [vmem:[#allocation11_spill] sm:$0xff] %v9809_v19 }
 0x279   : > { %v5918_v53 = vrot.slane %v5917_v8, 1  ;;  %v7301_v17 = vsel %vm7300_vm1, %v7172_v57, %v7299_v58  ;;  %v5928_v11 = vrot.slane %v5927_v48, 2  ;;  %v3760_v36 = vrot.slane %v9749_v21, 4 }
 0x27a   : > { %v7303_v29 = vsel %vm7302_vm2, %v7173_v39, %v7301_v17  ;;  %v5923_v44 = vadd.f32 %v5922_v50, %v5921_v63  ;;  %v5934_v31 = vrot.slane %v5933_v43, 2  ;;  %v3766_v20 = vrot.slane %v9751_v56, 4 }
 0x27b   : > { %v5919_v52 = vadd.f32 %v5918_v53, %v5917_v8  ;;  %v5929_v0 = vadd.f32 %v5928_v11, %v5927_v48  ;;  %v3756_v45 = vrot.slane %v3755_v28, 2  ;;  %v3761_v33 = vmax.f32 %v9749_v21, %v3760_v36 }
 0x27c   : > { %v3772_v62 = vrot.slane %v9754_v61, 4  ;;  %v5924_v54 = vrot.slane %v5923_v44, 1  ;;  %v5935_v2 = vadd.f32 %v5934_v31, %v5933_v43  ;;  %v3767_v34 = vmax.f32 %v9751_v56, %v3766_v20 }
 0x27d   : > { %v7796_v59 = vpack.c.bf16 %v5919_v52, %v5919_v52  ;;  %v5930_v32 = vrot.slane %v5929_v0, 1  ;;  %v3757_v30 = vmax.f32 %v3755_v28, %v3756_v45  ;;  %v3762_v35 = vrot.slane %v3761_v33, 2  ;;  %v9813_v52 = vpop.f32.mrf.mxu0 }
 0x27e   : > { %v3773_v8 = vmax.f32 %v9754_v61, %v3772_v62  ;;  %v5925_v63 = vadd.f32 %v5924_v54, %v5923_v44  ;;  %v5936_v24 = vrot.slane %v5935_v2, 1  ;;  %v3768_v48 = vrot.slane %v3767_v34, 2  ;;  %12409 = vst [vmem:[#allocation14_spill] sm:$0xff] %v9813_v52 }
 0x27f   : > { %v7174_v57 = vunpack.c.l.b16 %v7796_v59  ;;  %v5931_v39 = vadd.f32 %v5930_v32, %v5929_v0  ;;  %v3758_v58 = vrot.slane %v3757_v30, 1  ;;  %v3763_v53 = vmax.f32 %v3761_v33, %v3762_v35 }
 0x280   : > { %v3774_v50 = vrot.slane %v3773_v8, 2  ;;  %v5937_v17 = vadd.f32 %v5936_v24, %v5935_v2  ;;  %v7797_v43 = vpack.c.bf16 %v5925_v63, %v5925_v63  ;;  %v3769_v36 = vmax.f32 %v3767_v34, %v3768_v48  ;;  %v9822_v63 = vpop.f32.mrf.mxu0 }
 0x281   : > { %v7305_v11 = vsel %vm7304_vm3, %v7174_v57, %v7303_v29  ;;  %v7798_v31 = vpack.c.bf16 %v5931_v39, %v5931_v39  ;;  %v3759_v28 = vmax.f32 %v3757_v30, %v3758_v58  ;;  %v3764_v20 = vrot.slane %v3763_v53, 1  ;;  %12410 = vst [vmem:[#allocation17_spill] sm:$0xff] %v9822_v63 }
 0x282   : > { %v3775_v45 = vmax.f32 %v3773_v8, %v3774_v50  ;;  %v7799_v62 = vpack.c.bf16 %v5937_v17, %v5937_v17  ;;  %v7175_v44 = vunpack.c.l.b16 %v7797_v43  ;;  %v3770_v54 = vrot.slane %v3769_v36, 1  ;;  %v7959_v8 = vpop.f32.mrf.mxu1 }
 0x283   : > { %v4378_v0 = vsub.f32 %v9737_v18, %v9778_v22  ;;  %v7176_v59 = vunpack.c.l.b16 %v7798_v31  ;;  %v3765_v33 = vmax.f32 %v3763_v53, %v3764_v20  ;;  %v4379_v2 = vsub.f32 %v9739_v16, %v9780_v55 }
 0x284   : > { %v3776_v32 = vrot.slane %v3775_v45, 1  ;;  %v7177_v29 = vunpack.c.l.b16 %v7799_v62  ;;  %v7307_v34 = vsel %vm7306_vm4, %v7175_v44, %v7305_v11  ;;  %v3771_v35 = vmax.f32 %v3769_v36, %v3770_v54  ;;  %v1715_v43 = vpop.f32.mrf.mxu1  ;;  %v9832_v11 = vpop.f32.mrf.mxu0 }
 0x285   : > { %v4380_v30 = vsub.f32 %v9741_v9, %v9783_v7  ;;  %v7309_v24 = vsel %vm7308_vm5, %v7176_v59, %v7307_v34  ;;  %v4381_v18 = vsub.f32 %v9743_v38, %v9797_v49  ;;  %v4382_v22 = vsub.f32 %v9747_v23, %v3759_v28  ;;  %12411 = vst [vmem:[#allocation20_spill] sm:$0xff] %v9832_v11 }
 0x286   : > { %v3777_v57 = vmax.f32 %v3775_v45, %v3776_v32  ;;  %v7311_v16 = vsel %vm7310_vm6, %v7177_v29, %v7309_v24  ;;  %v4383_v55 = vsub.f32 %v9749_v21, %v3765_v33  ;;  %v4384_v48 = vsub.f32 %v9751_v56, %v3771_v35  ;;  %v9849_v62 = vpop.f32.mrf.mxu0 }
 0x287   : > { %v4530_v39 = vmul.f32 1.442695, %v4378_v0  ;;  %v7417_v9 = vpack.c.b16 %v7311_v16, %v7311_v16  ;;  %v4532_v58 = vmul.f32 1.442695, %v4379_v2  ;;  %v4534_v53 = vmul.f32 1.442695, %v4380_v30 }
 0x288   : > { %v4385_v7 = vsub.f32 %v9754_v61, %v3777_v57  ;;  %v4536_v50 = vmul.f32 1.442695, %v4381_v18  ;;  %v4538_v17 = vmul.f32 1.442695, %v4382_v22  ;;  %v4540_v38 = vmul.f32 1.442695, %v4383_v55  ;;  %v9863_v24 = vpop.f32.mrf.mxu0 }
 0x289   : > { %8196 = vpow2.f32 %v4530_v39  ;;  %7449 = vst [vmem:[%s9683_s26] sm:$0xf] %v7417_v9  ;;  %v1827_v23 = vcombine.high %v9733_v40, %v9733_v40  ;;  %v4542_v21 = vmul.f32 1.442695, %v4384_v48  ;;  %v1834_v56 = vrot.slane %v9733_v40, %v9361_v25  ;;  %12412 = vst [vmem:[#allocation25_spill] sm:$0xff] %v9849_v62  ;;  %v12413_v30 = vld [vmem:[#allocation38_spill] sm:$0xff]  ;;  %v12416_v39 = vld [vmem:[#allocation44_spill] sm:$0xff] }
 0x28a   : > { %8198 = vpow2.f32 %v4532_v58  ;;  %v9840_v61 = vadd.f32 %v9730_v13, %v7959_v8  ;;  %v4544_v49 = vmul.f32 1.442695, %v4385_v7  ;;  %v9844_v31 = vadd.f32 %v9730_v13, %v1715_v43  ;;  %12414 = vst [vmem:[#allocation30_spill] sm:$0xff] %v9863_v24  ;;  %v12415_v16 = vld [vmem:[#allocation90_spill] sm:$0xff] }
 0x28b   : > { %8200 = vpow2.f32 %v4534_v53  ;;  %v1841_v36 = vrot.slane %v1827_v23, %v9361_v25  ;;  %v1842_v28 = vcombine.high %v1834_v56, %v1834_v56  ;;  %v1850_v20 = vrot.slane %v1834_v56, %v9361_v25  ;;  %v12417_v7 = vld [vmem:[#allocation50_spill] sm:$0xff]  ;;  %v12420_v56 = vld [vmem:[#allocation56_spill] sm:$0xff] }
 0x28c   : > { %8202 = vpow2.f32 %v4536_v50  ;;  %v9854_v54 = vrot.slane %v9840_v61, %v9361_v25 }
 0x28d   : > { %8204 = vpow2.f32 %v4538_v17  ;;  %v1843_v40 = vcombine.high %v1841_v36, %v1841_v36  ;;  %v1857_v44 = vrot.slane %v1841_v36, %v9361_v25  ;;  %v1864_v13 = vrot.slane %v1842_v28, %v9361_v25  ;;  %v12418_v17 = vld [vmem:[#allocation96_spill] sm:$0xff] }
 0x28e   : > { %8206 = vpow2.f32 %v4540_v38  ;;  %v1872_v0 = vcombine.high %v1850_v20, %v1850_v20  ;;  %v2597_v59 = vrot.slane %v1850_v20, %v9366_v15  ;;  %v12419_v38 = vld [vmem:[#allocation102_spill] sm:$0xff] }
 0x28f   : > { %8208 = vpow2.f32 %v4542_v21  ;;  %v1871_v33 = vrot.slane %v1843_v40, %v9361_v25  ;;  %v1873_v32 = vcombine.high %v1857_v44, %v1857_v44  ;;  %v2613_v2 = vrot.slane %v1857_v44, %v9366_v15  ;;  %v9879_v44 = vpop.f32.mrf.mxu0 }
 0x290   : > { %8210 = vpow2.f32 %v4544_v49  ;;  %v1874_v29 = vcombine.high %v1864_v13, %v1864_v13  ;;  %v2601_v34 = vrot.slane %v1864_v13, %v9366_v15  ;;  %v2605_v35 = vrot.slane %v1872_v0, %v9366_v15  ;;  %12421 = vst [vmem:[#allocation38_spill] sm:$0xff] %v9879_v44  ;;  %v12422_v13 = vld [vmem:[#allocation108_spill] sm:$0xff] }
 0x291   : > { %v3210_v8 = vadd.f32 %v2597_v59, %v12413_v30  ;;  %v1875_v57 = vcombine.high %v1871_v33, %v1871_v33  ;;  %v2617_v18 = vrot.slane %v1871_v33, %v9366_v15  ;;  %v2621_v22 = vrot.slane %v1873_v32, %v9366_v15 }
 0x292   : > { %v3214_v55 = vadd.f32 %v2613_v2, %v12415_v16  ;;  %v2609_v48 = vrot.slane %v1874_v29, %v9366_v15  ;;  %v3211_v9 = vadd.f32 %v2601_v34, %v12416_v39  ;;  %v3212_v58 = vadd.f32 %v2605_v35, %v12417_v7 }
 0x293   : > { %v3338_v53 = vmul.f32 0.01, %v3210_v8  ;;  %v2625_v50 = vrot.slane %v1875_v57, %v9366_v15  ;;  %v3215_v43 = vadd.f32 %v2617_v18, %v12418_v17  ;;  %v3216_v23 = vadd.f32 %v2621_v22, %v12419_v38 }
 0x294   : > { %v3342_v21 = vmul.f32 0.01, %v3214_v55  ;;  %v3213_v49 = vadd.f32 %v2609_v48, %v12420_v56  ;;  %v3339_v36 = vmul.f32 0.01, %v3211_v9  ;;  %v3340_v28 = vmul.f32 0.01, %v3212_v58 }
 0x295   : > { %v9875_v20 = vmax.f32 %v3210_v8, %v3338_v53  ;;  %v3217_v0 = vadd.f32 %v2625_v50, %v12422_v13  ;;  %v3343_v59 = vmul.f32 0.01, %v3215_v43  ;;  %v3344_v33 = vmul.f32 0.01, %v3216_v23  ;;  %v9907_v53 = vpop.f32.mrf.mxu0 }
 0x296   : > { %v9877_v40 = vpop.eup %8196  ;;  %v9882_v32 = vmax.f32 %v3214_v55, %v3342_v21  ;;  %v3341_v34 = vmul.f32 0.01, %v3213_v49  ;;  %v9887_v35 = vmax.f32 %v3211_v9, %v3339_v36  ;;  %v9889_v30 = vmax.f32 %v3212_v58, %v3340_v28 }
 0x297   : > { %v9884_v2 = vpop.eup %8198  ;;  %v4882_v29 = vrot.slane %v9877_v40, 4  ;;  %v3345_v18 = vmul.f32 0.01, %v3217_v0  ;;  %v9894_v22 = vmax.f32 %v3215_v43, %v3343_v59  ;;  %v9896_v16 = vmax.f32 %v3216_v23, %v3344_v33  ;;  %v9928_v45 = vpop.f32.mrf.mxu0 }
 0x298   : > { %v9891_v8 = vpop.eup %8200  ;;  %v4888_v57 = vrot.slane %v9884_v2, 4  ;;  %v9902_v7 = vmax.f32 %v3213_v49, %v3341_v34  ;;  %v3634_v9 = vrot.slane %v9875_v20, 4  ;;  %v3640_v38 = vrot.slane %v9887_v35, 4 }
 0x299   : > { %v9898_v55 = vpop.eup %8202  ;;  %v4883_v48 = vadd.f32 %v9877_v40, %v4882_v29  ;;  %v4894_v39 = vrot.slane %v9891_v8, 4  ;;  %v9911_v43 = vmax.f32 %v3217_v0, %v3345_v18 }
 0x29a   : > { %v9905_v58 = vpop.eup %8204  ;;  %v4889_v50 = vadd.f32 %v9884_v2, %v4888_v57  ;;  %v4900_v17 = vrot.slane %v9898_v55, 4  ;;  %v3635_v36 = vmax.f32 %v9875_v20, %v3634_v9  ;;  %v3641_v0 = vmax.f32 %v9887_v35, %v3640_v38 }
 0x29b   : > { %v9914_v23 = vpop.eup %8206  ;;  %v4884_v21 = vrot.slane %v4883_v48, 2  ;;  %v4895_v56 = vadd.f32 %v9891_v8, %v4894_v39  ;;  %v4906_v49 = vrot.slane %v9905_v58, 4 }
 0x29c   : > { %v9919_v28 = vpop.eup %8208  ;;  %v4890_v13 = vrot.slane %v4889_v50, 2  ;;  %v4901_v59 = vadd.f32 %v9898_v55, %v4900_v17  ;;  %v4912_v33 = vrot.slane %v9914_v23, 4 }
 0x29d   : > { %v9924_v29 = vpop.eup %8210  ;;  %v4885_v34 = vadd.f32 %v4884_v21, %v4883_v48  ;;  %v4896_v57 = vrot.slane %v4895_v56, 2  ;;  %v4907_v18 = vadd.f32 %v9905_v58, %v4906_v49  ;;  %v4918_v39 = vrot.slane %v9919_v28, 4 }
 0x29e   : > { %v4891_v9 = vadd.f32 %v4890_v13, %v4889_v50  ;;  %v4902_v24 = vrot.slane %v4901_v59, 2  ;;  %v4913_v11 = vadd.f32 %v9914_v23, %v4912_v33  ;;  %v4924_v17 = vrot.slane %v9924_v29, 4  ;;  %v9934_v50 = vpop.f32.mrf.mxu0 }
 0x29f   : > { %v4886_v52 = vrot.slane %v4885_v34, 1  ;;  %v4897_v3 = vadd.f32 %v4896_v57, %v4895_v56  ;;  %v4908_v44 = vrot.slane %v4907_v18, 2  ;;  %v4919_v38 = vadd.f32 %v9919_v28, %v4918_v39  ;;  %12423 = vst [vmem:[#allocation90_spill] sm:$0xff] %v9934_v50 }
 0x2a0   : > { %v4892_v62 = vrot.slane %v4891_v9, 1  ;;  %v4903_v48 = vadd.f32 %v4902_v24, %v4901_v59  ;;  %v4914_v21 = vrot.slane %v4913_v11, 2  ;;  %v4925_v49 = vadd.f32 %v9924_v29, %v4924_v17 }
 0x2a1   : > { %v4887_v63 = vadd.f32 %v4886_v52, %v4885_v34  ;;  %v4898_v19 = vrot.slane %v4897_v3, 1  ;;  %v4909_v42 = vadd.f32 %v4908_v44, %v4907_v18  ;;  %v4920_v4 = vrot.slane %v4919_v38, 2  ;;  %v9936_v44 = vpop.f32.mrf.mxu0 }
 0x2a2   : > { %v4893_v13 = vadd.f32 %v4892_v62, %v4891_v9  ;;  %v4904_v33 = vrot.slane %v4903_v48, 1  ;;  %v4915_v26 = vadd.f32 %v4914_v21, %v4913_v11  ;;  %v4926_v12 = vrot.slane %v4925_v49, 2 }
 0x2a3   : > { %v4899_v27 = vadd.f32 %v4898_v19, %v4897_v3  ;;  %v4910_v56 = vrot.slane %v4909_v42, 1  ;;  %v4921_v57 = vadd.f32 %v4920_v4, %v4919_v38  ;;  %8212 = vrcp.f32 %v4887_v63 }
 0x2a4   : > { %v4905_v39 = vadd.f32 %v4904_v33, %v4903_v48  ;;  %v4916_v41 = vrot.slane %v4915_v26, 1  ;;  %v4927_v24 = vadd.f32 %v4926_v12, %v4925_v49  ;;  %8214 = vrcp.f32 %v4893_v13 }
 0x2a5   : > { %v4911_v59 = vadd.f32 %v4910_v56, %v4909_v42  ;;  %v4922_v17 = vrot.slane %v4921_v57, 1  ;;  %8216 = vrcp.f32 %v4899_v27  ;;  %v3636_v52 = vrot.slane %v3635_v36, 2 }
 0x2a6   : > { %v4917_v34 = vadd.f32 %v4916_v41, %v4915_v26  ;;  %v4928_v18 = vrot.slane %v4927_v24, 1  ;;  %8218 = vrcp.f32 %v4905_v39  ;;  %v3642_v62 = vrot.slane %v3641_v0, 2  ;;  %v9942_v41 = vpop.f32.mrf.mxu0 }
 0x2a7   : > { %v4923_v11 = vadd.f32 %v4922_v17, %v4921_v57  ;;  %8220 = vrcp.f32 %v4911_v59  ;;  %v3637_v3 = vmax.f32 %v3635_v36, %v3636_v52  ;;  %v3646_v4 = vrot.slane %v9889_v30, 4  ;;  %12424 = vst [vmem:[#allocation44_spill] sm:$0xff] %v9942_v41 }
 0x2a8   : > { %v4929_v19 = vadd.f32 %v4928_v18, %v4927_v24  ;;  %8222 = vrcp.f32 %v4917_v34  ;;  %v3643_v63 = vmax.f32 %v3641_v0, %v3642_v62  ;;  %v3652_v12 = vrot.slane %v9902_v7, 4  ;;  %v9952_v52 = vpop.f32.mrf.mxu0 }
 0x2a9   : > { %8224 = vrcp.f32 %v4923_v11  ;;  %v3638_v42 = vrot.slane %v3637_v3, 1  ;;  %v3647_v27 = vmax.f32 %v9889_v30, %v3646_v4  ;;  %v3658_v9 = vrot.slane %v9882_v32, 4 }
 0x2aa   : > { %8226 = vrcp.f32 %v4929_v19  ;;  %v3644_v26 = vrot.slane %v3643_v63, 1  ;;  %v3653_v38 = vmax.f32 %v9902_v7, %v3652_v12  ;;  %v3664_v36 = vrot.slane %v9894_v22, 4 }
 0x2ab   : > { %v3639_v48 = vmax.f32 %v3637_v3, %v3638_v42  ;;  %v3648_v21 = vrot.slane %v3647_v27, 2  ;;  %v3659_v0 = vmax.f32 %v9882_v32, %v3658_v9  ;;  %v3670_v49 = vrot.slane %v9896_v16, 4 }
 0x2ac   : > { %v3645_v13 = vmax.f32 %v3643_v63, %v3644_v26  ;;  %v3654_v33 = vrot.slane %v3653_v38, 2  ;;  %v3665_v56 = vmax.f32 %v9894_v22, %v3664_v36  ;;  %v3676_v57 = vrot.slane %v9911_v43, 4 }
 0x2ad   : > { %v3649_v39 = vmax.f32 %v3647_v27, %v3648_v21  ;;  %v3660_v24 = vrot.slane %v3659_v0, 2  ;;  %v3671_v59 = vmax.f32 %v9896_v16, %v3670_v49  ;;  %v4362_v17 = vsub.f32 %v9875_v20, %v3639_v48 }
 0x2ae   : > { %v3655_v34 = vmax.f32 %v3653_v38, %v3654_v33  ;;  %v3666_v18 = vrot.slane %v3665_v56, 2  ;;  %v3677_v62 = vmax.f32 %v9911_v43, %v3676_v57  ;;  %v4363_v11 = vsub.f32 %v9887_v35, %v3645_v13  ;;  %v9963_v35 = vpop.f32.mrf.mxu0 }
 0x2af   : > { %v3650_v3 = vrot.slane %v3649_v39, 1  ;;  %v3661_v4 = vmax.f32 %v3659_v0, %v3660_v24  ;;  %v3672_v19 = vrot.slane %v3671_v59, 2  ;;  %v9956_v63 = vmul.f32 1.442695, %v4362_v17  ;;  %12425 = vst [vmem:[#allocation50_spill] sm:$0xff] %v9963_v35  ;;  %v12426_v17 = vld [vmem:[#allocation143_spill] sm:$0xff] }
 0x2b0   : > { %v8213_v12 = vpop.eup %8212  ;;  %v3656_v42 = vrot.slane %v3655_v34, 1  ;;  %v3667_v27 = vmax.f32 %v3665_v56, %v3666_v18  ;;  %v3678_v9 = vrot.slane %v3677_v62, 2  ;;  %v9958_v26 = vmul.f32 1.442695, %v4363_v11 }
 0x2b1   : > { %v8215_v20 = vpop.eup %8214  ;;  %v5658_v36 = vmul.f32 %v8213_v12, %v9877_v40  ;;  %v9961_v38 = vmax.f32 %v3649_v39, %v3650_v3  ;;  %v3662_v48 = vrot.slane %v3661_v4, 1  ;;  %v3673_v21 = vmax.f32 %v3671_v59, %v3672_v19  ;;  %v12427_v3 = vld [vmem:[#allocation149_spill] sm:$0xff] }
 0x2b2   : > { %v8217_v49 = vpop.eup %8216  ;;  %v5659_v0 = vmul.f32 %v8215_v20, %v9884_v2  ;;  %v9966_v13 = vmax.f32 %v3655_v34, %v3656_v42  ;;  %v3668_v33 = vrot.slane %v3667_v27, 1  ;;  %v3679_v57 = vmax.f32 %v3677_v62, %v3678_v9  ;;  %v12428_v62 = vld [vmem:[#allocation153_spill] sm:$0xff] }
 0x2b3   : > { %v8219_v56 = vpop.eup %8218  ;;  %v5660_v24 = vmul.f32 %v8217_v49, %v9891_v8  ;;  %v5786_v18 = vmul.f32 %v5658_v36, %v12426_v17  ;;  %v9970_v11 = vmax.f32 %v3661_v4, %v3662_v48  ;;  %v3674_v40 = vrot.slane %v3673_v21, 1  ;;  %v9980_v4 = vpop.f32.mrf.mxu0  ;;  %v12429_v49 = vld [vmem:[#allocation155_spill] sm:$0xff]  ;;  %v12430_v17 = vld [vmem:[#allocation157_spill] sm:$0xff] }
 0x2b4   : > { %v8221_v39 = vpop.eup %8220  ;;  %v5661_v59 = vmul.f32 %v8219_v56, %v9898_v55  ;;  %v5787_v19 = vmul.f32 %v5659_v0, %v12427_v3  ;;  %v9974_v12 = vmax.f32 %v3667_v27, %v3668_v33  ;;  %v3680_v2 = vrot.slane %v3679_v57, 1 }
 0x2b5   : > { %v8223_v34 = vpop.eup %8222  ;;  %v5662_v42 = vmul.f32 %v8221_v39, %v9905_v58  ;;  %v5788_v9 = vmul.f32 %v5660_v24, %v12428_v62  ;;  %v6034_v20 = vrot.slane %v5786_v18, 4  ;;  %v9978_v8 = vmax.f32 %v3673_v21, %v3674_v40  ;;  %v12431_v40 = vld [vmem:[#allocation159_spill] sm:$0xff] }
 0x2b6   : > { %v8225_v36 = vpop.eup %8224  ;;  %v5663_v48 = vmul.f32 %v8223_v34, %v9914_v23  ;;  %v5789_v55 = vmul.f32 %v5661_v59, %v12429_v49  ;;  %v6040_v56 = vrot.slane %v5787_v19, 4  ;;  %v9984_v0 = vmax.f32 %v3679_v57, %v3680_v2  ;;  %v9991_v57 = vpop.f32.mrf.mxu0  ;;  %v12434_v2 = vld [vmem:[#allocation162_spill] sm:$0xff] }
 0x2b7   : > { %v8227_v27 = vpop.eup %8226  ;;  %v5664_v33 = vmul.f32 %v8225_v36, %v9919_v28  ;;  %v5790_v58 = vmul.f32 %v5662_v42, %v12430_v17  ;;  %v6035_v39 = vadd.f32 %v6034_v20, %v5786_v18  ;;  %v6046_v24 = vrot.slane %v5788_v9, 4  ;;  %12433 = vst [vmem:[#allocation96_spill] sm:$0xff] %v9991_v57 }
 0x2b8   : > { %v5665_v21 = vmul.f32 %v8227_v27, %v9924_v29  ;;  %v5791_v3 = vmul.f32 %v5663_v48, %v12431_v40  ;;  %v6041_v62 = vadd.f32 %v6040_v56, %v5787_v19  ;;  %v6052_v46 = vrot.slane %v5789_v55, 4 }
 0x2b9   : > { %v5792_v23 = vmul.f32 %v5664_v33, %v12432_v1  ;;  %v6036_v34 = vrot.slane %v6035_v39, 2  ;;  %v6047_v59 = vadd.f32 %v6046_v24, %v5788_v9  ;;  %v6058_v49 = vrot.slane %v5790_v58, 4  ;;  %v9994_v24 = vpop.f32.mrf.mxu0 }
 0x2ba   : > { %v5793_v6 = vmul.f32 %v5665_v21, %v12434_v2  ;;  %v6042_v28 = vrot.slane %v6041_v62, 2  ;;  %v6053_v36 = vadd.f32 %v6052_v46, %v5789_v55  ;;  %v6064_v42 = vrot.slane %v5791_v3, 4 }
 0x2bb   : > { %v6037_v18 = vadd.f32 %v6036_v34, %v6035_v39  ;;  %v6048_v20 = vrot.slane %v6047_v59, 2  ;;  %v6059_v17 = vadd.f32 %v6058_v49, %v5790_v58  ;;  %v6070_v29 = vrot.slane %v5792_v23, 4 }
 0x2bc   : > { %v6043_v27 = vadd.f32 %v6042_v28, %v6041_v62  ;;  %v6054_v48 = vrot.slane %v6053_v36, 2  ;;  %v6065_v19 = vadd.f32 %v6064_v42, %v5791_v3  ;;  %v6076_v56 = vrot.slane %v5793_v6, 4 }
 0x2bd   : > { %v6038_v40 = vrot.slane %v6037_v18, 1  ;;  %v6049_v1 = vadd.f32 %v6048_v20, %v6047_v59  ;;  %v6060_v33 = vrot.slane %v6059_v17, 2  ;;  %v6071_v9 = vadd.f32 %v6070_v29, %v5792_v23  ;;  %v9996_v20 = vpop.f32.mrf.mxu0 }
 0x2be   : > { %v6044_v57 = vrot.slane %v6043_v27, 1  ;;  %v6055_v35 = vadd.f32 %v6054_v48, %v6053_v36  ;;  %v6066_v21 = vrot.slane %v6065_v19, 2  ;;  %v6077_v2 = vadd.f32 %v6076_v56, %v5793_v6 }
 0x2bf   : > { %v6039_v46 = vadd.f32 %v6038_v40, %v6037_v18  ;;  %v6050_v55 = vrot.slane %v6049_v1, 1  ;;  %v6061_v39 = vadd.f32 %v6060_v33, %v6059_v17  ;;  %v6072_v34 = vrot.slane %v6071_v9, 2 }
 0x2c0   : > { %v6045_v58 = vadd.f32 %v6044_v57, %v6043_v27  ;;  %v6056_v49 = vrot.slane %v6055_v35, 1  ;;  %v6067_v62 = vadd.f32 %v6066_v21, %v6065_v19  ;;  %v6078_v28 = vrot.slane %v6077_v2, 2  ;;  %v10000_v21 = vpop.f32.mrf.mxu0 }
 0x2c1   : > { %v6051_v3 = vadd.f32 %v6050_v55, %v6049_v1  ;;  %v6062_v42 = vrot.slane %v6061_v39, 1  ;;  %v6073_v41 = vadd.f32 %v6072_v34, %v6071_v9  ;;  %v7816_v59 = vpack.c.bf16 %v6039_v46, %v6039_v46 }
 0x2c2   : > { %v6057_v23 = vadd.f32 %v6056_v49, %v6055_v35  ;;  %v6068_v29 = vrot.slane %v6067_v62, 1  ;;  %v6079_v50 = vadd.f32 %v6078_v28, %v6077_v2  ;;  %v7817_v36 = vpack.c.bf16 %v6045_v58, %v6045_v58 }
 0x2c3   : > { %v6063_v48 = vadd.f32 %v6062_v42, %v6061_v39  ;;  %v6074_v6 = vrot.slane %v6073_v41, 1  ;;  %v7818_v18 = vpack.c.bf16 %v6051_v3, %v6051_v3  ;;  %v7194_v56 = vunpack.c.l.b16 %v7816_v59  ;;  %v10014_v59 = vpop.f32.mrf.mxu0 }
 0x2c4   : > { %v6069_v17 = vadd.f32 %v6068_v29, %v6067_v62  ;;  %v6080_v40 = vrot.slane %v6079_v50, 1  ;;  %v7819_v57 = vpack.c.bf16 %v6057_v23, %v6057_v23  ;;  %v7195_v27 = vunpack.c.l.b16 %v7817_v36 }
 0x2c5   : > { %v6075_v19 = vadd.f32 %v6074_v6, %v6073_v41  ;;  %v7820_v33 = vpack.c.bf16 %v6063_v48, %v6063_v48  ;;  %v7196_v1 = vunpack.c.l.b16 %v7818_v18  ;;  %v4364_v9 = vsub.f32 %v9889_v30, %v9961_v38 }
 0x2c6   : > { %v6081_v35 = vadd.f32 %v6080_v40, %v6079_v50  ;;  %v7821_v46 = vpack.c.bf16 %v6069_v17, %v6069_v17  ;;  %v7197_v2 = vunpack.c.l.b16 %v7819_v57  ;;  %v7326_v55 = vsel %vm7298_vm0, %v7195_v27, %v7194_v56 }
 0x2c7   : > { %v7822_v39 = vpack.c.bf16 %v6075_v19, %v6075_v19  ;;  %v7198_v34 = vunpack.c.l.b16 %v7820_v33  ;;  %v7327_v58 = vsel %vm7300_vm1, %v7196_v1, %v7326_v55  ;;  %v4365_v49 = vsub.f32 %v9902_v7, %v9966_v13 }
 0x2c8   : > { %v7823_v41 = vpack.c.bf16 %v6081_v35, %v6081_v35  ;;  %v7199_v62 = vunpack.c.l.b16 %v7821_v46  ;;  %v7328_v28 = vsel %vm7302_vm2, %v7197_v2, %v7327_v58  ;;  %v4366_v30 = vsub.f32 %v9882_v32, %v9970_v11 }
 0x2c9   : > { %v7200_v38 = vunpack.c.l.b16 %v7822_v39  ;;  %v7329_v50 = vsel %vm7304_vm3, %v7198_v34, %v7328_v28  ;;  %v4367_v3 = vsub.f32 %v9894_v22, %v9974_v12  ;;  %v4368_v42 = vsub.f32 %v9896_v16, %v9978_v8 }
 0x2ca   : > { %v7201_v23 = vunpack.c.l.b16 %v7823_v41  ;;  %v7330_v7 = vsel %vm7306_vm4, %v7199_v62, %v7329_v50  ;;  %v4369_v13 = vsub.f32 %v9911_v43, %v9984_v0  ;;  %8228 = vpow2.f32 %v9956_v63  ;;  %v1163_v0 = vpop.f32.mrf.mxu0 }
 0x2cb   : > { %v7331_v32 = vsel %vm7308_vm5, %v7200_v38, %v7330_v7  ;;  %8230 = vpow2.f32 %v9958_v26  ;;  %v4502_v11 = vmul.f32 1.442695, %v4364_v9  ;;  %v4504_v22 = vmul.f32 1.442695, %v4365_v49 }
 0x2cc   : > { %v7332_v12 = vsel %vm7310_vm6, %v7201_v23, %v7331_v32  ;;  %v4506_v16 = vmul.f32 1.442695, %v4366_v30  ;;  %v4508_v8 = vmul.f32 1.442695, %v4367_v3  ;;  %v4510_v29 = vmul.f32 1.442695, %v4368_v42  ;;  %v10043_v1 = vpop.f32.mrf.mxu0 }
 0x2cd   : > { %v7420_v36 = vpack.c.b16 %v7332_v12, %v7332_v12  ;;  %8232 = vpow2.f32 %v4502_v11  ;;  %v4512_v48 = vmul.f32 1.442695, %v4369_v13  ;;  %v12435_v43 = vcombine.high %v9840_v61, %v9840_v61 }
 0x2ce   : > { %8234 = vpow2.f32 %v4504_v22  ;;  %v2087_v26 = vcombine.high %v9854_v54, %v9854_v54  ;;  %v2095_v6 = vrot.slane %v9854_v54, %v9361_v25  ;;  %v10037_v61 = vrot.slane %v9844_v31, %v9361_v25  ;;  %v1167_v3 = vpop.f32.mrf.mxu0 }
 0x2cf   : > { %v2086_v63 = vrot.slane %v12435_v43, %v9361_v25  ;;  %7452 = vst [vmem:[%s9683_s26 + $0xc] sm:$0xf] %v7420_v36  ;;  %8236 = vpow2.f32 %v4506_v16 }
 0x2d0   : > { %8238 = vpow2.f32 %v4508_v8  ;;  %v2109_v40 = vrot.slane %v2087_v26, %v9361_v25  ;;  %v2117_v57 = vcombine.high %v2095_v6, %v2095_v6  ;;  %v2757_v27 = vrot.slane %v2095_v6, %v9366_v15 }
 0x2d1   : > { %v2088_v56 = vcombine.high %v2086_v63, %v2086_v63  ;;  %v2102_v17 = vrot.slane %v2086_v63, %v9361_v25  ;;  %8240 = vpow2.f32 %v4510_v29 }
 0x2d2   : > { %8242 = vpow2.f32 %v4512_v48  ;;  %v2119_v9 = vcombine.high %v2109_v40, %v2109_v40  ;;  %v2761_v35 = vrot.slane %v2109_v40, %v9366_v15  ;;  %v2765_v46 = vrot.slane %v2117_v57, %v9366_v15 }
 0x2d3   : > { %v2116_v54 = vrot.slane %v2088_v56, %v9361_v25  ;;  %v2118_v19 = vcombine.high %v2102_v17, %v2102_v17  ;;  %v2773_v33 = vrot.slane %v2102_v17, %v9366_v15  ;;  %v3250_v34 = vadd.f32 %v2757_v27, %v9928_v45 }
 0x2d4   : > { %v2769_v58 = vrot.slane %v2119_v9, %v9366_v15  ;;  %v3251_v49 = vadd.f32 %v2761_v35, %v9936_v44  ;;  %v3252_v41 = vadd.f32 %v2765_v46, %v9952_v52 }
 0x2d5   : > { %v2120_v2 = vcombine.high %v2116_v54, %v2116_v54  ;;  %v2777_v55 = vrot.slane %v2116_v54, %v9366_v15  ;;  %v2781_v39 = vrot.slane %v2118_v19, %v9366_v15  ;;  %v3254_v62 = vadd.f32 %v2773_v33, %v9994_v24 }
 0x2d6   : > { %v3378_v50 = vmul.f32 0.01, %v3250_v34  ;;  %v3253_v42 = vadd.f32 %v2769_v58, %v9980_v4  ;;  %v3379_v23 = vmul.f32 0.01, %v3251_v49  ;;  %v3380_v7 = vmul.f32 0.01, %v3252_v41 }
 0x2d7   : > { %v2785_v28 = vrot.slane %v2120_v2, %v9366_v15  ;;  %v3255_v30 = vadd.f32 %v2777_v55, %v10000_v21  ;;  %v3256_v38 = vadd.f32 %v2781_v39, %v1163_v0  ;;  %v3382_v45 = vmul.f32 0.01, %v3254_v62  ;;  %v10057_v13 = vpop.eup %8228 }
 0x2d8   : > { %v10059_v52 = vmax.f32 %v3250_v34, %v3378_v50  ;;  %v10061_v24 = vpop.eup %8230  ;;  %v4786_v22 = vrot.slane %v10057_v13, 4  ;;  %v3381_v21 = vmul.f32 0.01, %v3253_v42  ;;  %v10064_v12 = vmax.f32 %v3251_v49, %v3379_v23 }
 0x2d9   : > { %v3257_v32 = vadd.f32 %v2785_v28, %v1167_v3  ;;  %v3383_v44 = vmul.f32 0.01, %v3255_v30  ;;  %v3384_v11 = vmul.f32 0.01, %v3256_v38  ;;  %v10066_v16 = vmax.f32 %v3252_v41, %v3380_v7 }
 0x2da   : > { %v4792_v4 = vrot.slane %v10061_v24, 4  ;;  %v10069_v29 = vmax.f32 %v3254_v62, %v3382_v45  ;;  %v10073_v48 = vpop.eup %8232  ;;  %v4787_v43 = vadd.f32 %v10057_v13, %v4786_v22  ;;  %v10076_v63 = vmax.f32 %v3253_v42, %v3381_v21 }
 0x2db   : > { %v3385_v8 = vmul.f32 0.01, %v3257_v32  ;;  %v10071_v36 = vmax.f32 %v3255_v30, %v3383_v44  ;;  %v10078_v0 = vmax.f32 %v3256_v38, %v3384_v11  ;;  %v3874_v26 = vrot.slane %v10059_v52, 4  ;;  %v10081_v6 = vpop.eup %8234 }
 0x2dc   : > { %v4793_v56 = vadd.f32 %v10061_v24, %v4792_v4  ;;  %v4798_v17 = vrot.slane %v10073_v48, 4  ;;  %v3880_v57 = vrot.slane %v10064_v12, 4  ;;  %v10088_v27 = vpop.eup %8236  ;;  %v4788_v54 = vrot.slane %v4787_v43, 2 }
 0x2dd   : > { %v10085_v40 = vmax.f32 %v3257_v32, %v3385_v8  ;;  %v4804_v19 = vrot.slane %v10081_v6, 4  ;;  %v3875_v33 = vmax.f32 %v10059_v52, %v3874_v26  ;;  %v3886_v9 = vrot.slane %v10066_v16, 4  ;;  %v10093_v35 = vpop.eup %8238 }
 0x2de   : > { %v4794_v46 = vrot.slane %v4793_v56, 2  ;;  %v4799_v2 = vadd.f32 %v10073_v48, %v4798_v17  ;;  %v4810_v55 = vrot.slane %v10088_v27, 4  ;;  %v3881_v39 = vmax.f32 %v10064_v12, %v3880_v57  ;;  %v10098_v34 = vpop.eup %8240 }
 0x2df   : > { %v4789_v58 = vadd.f32 %v4788_v54, %v4787_v43  ;;  %v4805_v49 = vadd.f32 %v10081_v6, %v4804_v19  ;;  %v4816_v41 = vrot.slane %v10093_v35, 4  ;;  %v3876_v62 = vrot.slane %v3875_v33, 2  ;;  %v10102_v28 = vpop.eup %8242 }
 0x2e0   : > { %v4795_v30 = vadd.f32 %v4794_v46, %v4793_v56  ;;  %v4800_v38 = vrot.slane %v4799_v2, 2  ;;  %v4811_v50 = vadd.f32 %v10088_v27, %v4810_v55  ;;  %v4822_v3 = vrot.slane %v10098_v34, 4 }
 0x2e1   : > { %v4790_v42 = vrot.slane %v4789_v58, 1  ;;  %v4806_v23 = vrot.slane %v4805_v49, 2  ;;  %v4817_v7 = vadd.f32 %v10093_v35, %v4816_v41  ;;  %v4828_v45 = vrot.slane %v10102_v28, 4 }
 0x2e2   : > { %v4796_v32 = vrot.slane %v4795_v30, 1  ;;  %v4801_v44 = vadd.f32 %v4800_v38, %v4799_v2  ;;  %v4812_v11 = vrot.slane %v4811_v50, 2  ;;  %v4823_v22 = vadd.f32 %v10098_v34, %v4822_v3 }
 0x2e3   : > { %v4791_v21 = vadd.f32 %v4790_v42, %v4789_v58  ;;  %v4807_v4 = vadd.f32 %v4806_v23, %v4805_v49  ;;  %v4818_v8 = vrot.slane %v4817_v7, 2  ;;  %v4829_v43 = vadd.f32 %v10102_v28, %v4828_v45 }
 0x2e4   : > { %v4797_v26 = vadd.f32 %v4796_v32, %v4795_v30  ;;  %v4802_v56 = vrot.slane %v4801_v44, 1  ;;  %v4813_v17 = vadd.f32 %v4812_v11, %v4811_v50  ;;  %v4824_v57 = vrot.slane %v4823_v22, 2 }
 0x2e5   : > { %v4808_v54 = vrot.slane %v4807_v4, 1  ;;  %v4819_v19 = vadd.f32 %v4818_v8, %v4817_v7  ;;  %v4830_v46 = vrot.slane %v4829_v43, 2  ;;  %8244 = vrcp.f32 %v4791_v21 }
 0x2e6   : > { %v4803_v55 = vadd.f32 %v4802_v56, %v4801_v44  ;;  %v4814_v41 = vrot.slane %v4813_v17, 1  ;;  %v4825_v18 = vadd.f32 %v4824_v57, %v4823_v22  ;;  %8246 = vrcp.f32 %v4797_v26 }
 0x2e7   : > { %v4809_v2 = vadd.f32 %v4808_v54, %v4807_v4  ;;  %v4820_v38 = vrot.slane %v4819_v19, 1  ;;  %v4831_v3 = vadd.f32 %v4830_v46, %v4829_v43  ;;  %v3877_v58 = vmax.f32 %v3875_v33, %v3876_v62 }
 0x2e8   : > { %v4815_v49 = vadd.f32 %v4814_v41, %v4813_v17  ;;  %v4826_v42 = vrot.slane %v4825_v18, 1  ;;  %8248 = vrcp.f32 %v4803_v55  ;;  %v3882_v23 = vrot.slane %v3881_v39, 2 }
 0x2e9   : > { %v4821_v30 = vadd.f32 %v4820_v38, %v4819_v19  ;;  %v4832_v45 = vrot.slane %v4831_v3, 1  ;;  %8250 = vrcp.f32 %v4809_v2  ;;  %v3878_v50 = vrot.slane %v3877_v58, 1 }
 0x2ea   : > { %v4827_v32 = vadd.f32 %v4826_v42, %v4825_v18  ;;  %8252 = vrcp.f32 %v4815_v49  ;;  %v3883_v7 = vmax.f32 %v3881_v39, %v3882_v23  ;;  %v3887_v44 = vmax.f32 %v10066_v16, %v3886_v9 }
 0x2eb   : > { %v4833_v11 = vadd.f32 %v4832_v45, %v4831_v3  ;;  %8254 = vrcp.f32 %v4821_v30  ;;  %v3879_v22 = vmax.f32 %v3877_v58, %v3878_v50  ;;  %v3892_v21 = vrot.slane %v10076_v63, 4 }
 0x2ec   : > { %8256 = vrcp.f32 %v4827_v32  ;;  %v3884_v33 = vrot.slane %v3883_v7, 1  ;;  %v3888_v62 = vrot.slane %v3887_v44, 2  ;;  %v3898_v4 = vrot.slane %v10069_v29, 4 }
 0x2ed   : > { %8258 = vrcp.f32 %v4833_v11  ;;  %v3893_v8 = vmax.f32 %v10076_v63, %v3892_v21  ;;  %v3904_v43 = vrot.slane %v10071_v36, 4  ;;  %v3910_v18 = vrot.slane %v10078_v0, 4 }
 0x2ee   : > { %v3885_v39 = vmax.f32 %v3883_v7, %v3884_v33  ;;  %v3889_v26 = vmax.f32 %v3887_v44, %v3888_v62  ;;  %v3899_v9 = vmax.f32 %v10069_v29, %v3898_v4  ;;  %v3916_v56 = vrot.slane %v10085_v40, 4  ;;  %v12436_v4 = vld [vmem:[#allocation35_spill] sm:$0xff] }
 0x2ef   : > { %v3894_v17 = vrot.slane %v3893_v8, 2  ;;  %v3905_v57 = vmax.f32 %v10071_v36, %v3904_v43  ;;  %v3911_v54 = vmax.f32 %v10078_v0, %v3910_v18  ;;  %v4402_v19 = vsub.f32 %v10059_v52, %v3879_v22 }
 0x2f0   : > { %v3890_v46 = vrot.slane %v3889_v26, 1  ;;  %v3900_v55 = vrot.slane %v3899_v9, 2  ;;  %v3917_v41 = vmax.f32 %v10085_v40, %v3916_v56  ;;  %v4403_v2 = vsub.f32 %v10064_v12, %v3885_v39 }
 0x2f1   : > { %v3895_v38 = vmax.f32 %v3893_v8, %v3894_v17  ;;  %v3906_v3 = vrot.slane %v3905_v57, 2  ;;  %v3912_v58 = vrot.slane %v3911_v54, 2  ;;  %v10123_v49 = vmul.f32 1.442695, %v4402_v19 }
 0x2f2   : > { %v8245_v42 = vpop.eup %8244  ;;  %v10125_v23 = vmax.f32 %v3889_v26, %v3890_v46  ;;  %v3901_v30 = vmax.f32 %v3899_v9, %v3900_v55  ;;  %v3918_v45 = vrot.slane %v3917_v41, 2  ;;  %v10127_v50 = vmul.f32 1.442695, %v4403_v2  ;;  %v12437_v9 = vld [vmem:[#allocation41_spill] sm:$0xff] }
 0x2f3   : > { %v8247_v32 = vpop.eup %8246  ;;  %v5642_v52 = vmul.f32 %v8245_v42, %v10057_v13  ;;  %v3896_v7 = vrot.slane %v3895_v38, 1  ;;  %v3907_v44 = vmax.f32 %v3905_v57, %v3906_v3  ;;  %v3913_v11 = vmax.f32 %v3911_v54, %v3912_v58 }
 0x2f4   : > { %v5643_v12 = vmul.f32 %v8247_v32, %v10061_v24  ;;  %v3902_v22 = vrot.slane %v3901_v30, 1  ;;  %v3919_v21 = vmax.f32 %v3917_v41, %v3918_v45  ;;  %v4404_v33 = vsub.f32 %v10066_v16, %v10125_v23  ;;  %v12439_v45 = vld [vmem:[#allocation53_spill] sm:$0xff] }
 0x2f5   : > { %v8249_v62 = vpop.eup %8248  ;;  %v5770_v8 = vmul.f32 %v5642_v52, %v12436_v4  ;;  %v10134_v43 = vmax.f32 %v3895_v38, %v3896_v7  ;;  %v3908_v18 = vrot.slane %v3907_v44, 1  ;;  %v3914_v39 = vrot.slane %v3913_v11, 1  ;;  %v12438_v38 = vld [vmem:[#allocation47_spill] sm:$0xff] }
 0x2f6   : > { %v8251_v26 = vpop.eup %8250  ;;  %v5644_v13 = vmul.f32 %v8249_v62, %v10073_v48  ;;  %v5771_v56 = vmul.f32 %v5643_v12, %v12437_v9  ;;  %v10138_v17 = vmax.f32 %v3901_v30, %v3902_v22  ;;  %v3920_v24 = vrot.slane %v3919_v21, 1 }
 0x2f7   : > { %v8253_v57 = vpop.eup %8252  ;;  %v5645_v54 = vmul.f32 %v8251_v26, %v10081_v6  ;;  %v5938_v19 = vrot.slane %v5770_v8, 4  ;;  %v10141_v46 = vmax.f32 %v3907_v44, %v3908_v18  ;;  %v10143_v55 = vmax.f32 %v3913_v11, %v3914_v39  ;;  %v12440_v11 = vld [vmem:[#allocation87_spill] sm:$0xff] }
 0x2f8   : > { %v8255_v41 = vpop.eup %8254  ;;  %v5646_v2 = vmul.f32 %v8253_v57, %v10088_v27  ;;  %v5772_v3 = vmul.f32 %v5644_v13, %v12438_v38  ;;  %v5944_v58 = vrot.slane %v5771_v56, 4  ;;  %v10147_v48 = vmax.f32 %v3919_v21, %v3920_v24  ;;  %v12441_v21 = vld [vmem:[#allocation93_spill] sm:$0xff] }
 0x2f9   : > { %v8257_v42 = vpop.eup %8256  ;;  %v5647_v30 = vmul.f32 %v8255_v41, %v10093_v35  ;;  %v5773_v32 = vmul.f32 %v5645_v54, %v12439_v45  ;;  %v5939_v52 = vadd.f32 %v5938_v19, %v5770_v8  ;;  %v12442_v35 = vld [vmem:[#allocation99_spill] sm:$0xff]  ;;  %v12443_v24 = vld [vmem:[#allocation105_spill] sm:$0xff]  ;;  %8260 = vpow2.f32 %v10123_v49 }
 0x2fa   : > { %v8259_v7 = vpop.eup %8258  ;;  %v5648_v44 = vmul.f32 %v8257_v42, %v10098_v34  ;;  %v5774_v12 = vmul.f32 %v5646_v2, %v12440_v11  ;;  %v5945_v27 = vadd.f32 %v5944_v58, %v5771_v56  ;;  %v5950_v22 = vrot.slane %v5772_v3, 4 }
 0x2fb   : > { %v5649_v62 = vmul.f32 %v8259_v7, %v10102_v28  ;;  %v5775_v4 = vmul.f32 %v5647_v30, %v12441_v21  ;;  %v5940_v18 = vrot.slane %v5939_v52, 2  ;;  %v5956_v39 = vrot.slane %v5773_v32, 4 }
 0x2fc   : > { %v5776_v26 = vmul.f32 %v5648_v44, %v12442_v35  ;;  %v5946_v13 = vrot.slane %v5945_v27, 2  ;;  %v5951_v8 = vadd.f32 %v5950_v22, %v5772_v3  ;;  %v5962_v9 = vrot.slane %v5774_v12, 4 }
 0x2fd   : > { %v5777_v57 = vmul.f32 %v5649_v62, %v12443_v24  ;;  %v5941_v54 = vadd.f32 %v5940_v18, %v5939_v52  ;;  %v5957_v19 = vadd.f32 %v5956_v39, %v5773_v32  ;;  %v5968_v34 = vrot.slane %v5775_v4, 4 }
 0x2fe   : > { %v5947_v41 = vadd.f32 %v5946_v13, %v5945_v27  ;;  %v5952_v2 = vrot.slane %v5951_v8, 2  ;;  %v5963_v56 = vadd.f32 %v5962_v9, %v5774_v12  ;;  %v5974_v38 = vrot.slane %v5776_v26, 4 }
 0x2ff   : > { %v5942_v58 = vrot.slane %v5941_v54, 1  ;;  %v5958_v28 = vrot.slane %v5957_v19, 2  ;;  %v5969_v42 = vadd.f32 %v5968_v34, %v5775_v4  ;;  %v5980_v30 = vrot.slane %v5777_v57, 4 }
 0x300   : > { %v5948_v45 = vrot.slane %v5947_v41, 1  ;;  %v5953_v7 = vadd.f32 %v5952_v2, %v5951_v8  ;;  %v5964_v11 = vrot.slane %v5963_v56, 2  ;;  %v5975_v44 = vadd.f32 %v5974_v38, %v5776_v26 }
 0x301   : > { %v5943_v21 = vadd.f32 %v5942_v58, %v5941_v54  ;;  %v5959_v3 = vadd.f32 %v5958_v28, %v5957_v19  ;;  %v5970_v22 = vrot.slane %v5969_v42, 2  ;;  %v5981_v35 = vadd.f32 %v5980_v30, %v5777_v57 }
 0x302   : > { %v5949_v62 = vadd.f32 %v5948_v45, %v5947_v41  ;;  %v5954_v52 = vrot.slane %v5953_v7, 1  ;;  %v5965_v32 = vadd.f32 %v5964_v11, %v5963_v56  ;;  %v5976_v18 = vrot.slane %v5975_v44, 2 }
 0x303   : > { %v5960_v27 = vrot.slane %v5959_v3, 1  ;;  %v5971_v39 = vadd.f32 %v5970_v22, %v5969_v42  ;;  %v5982_v12 = vrot.slane %v5981_v35, 2  ;;  %v7800_v13 = vpack.c.bf16 %v5943_v21, %v5943_v21 }
 0x304   : > { %v5955_v9 = vadd.f32 %v5954_v52, %v5953_v7  ;;  %v5966_v24 = vrot.slane %v5965_v32, 1  ;;  %v5977_v4 = vadd.f32 %v5976_v18, %v5975_v44  ;;  %v7801_v34 = vpack.c.bf16 %v5949_v62, %v5949_v62  ;;  %v7960_v52 = vpop.f32.mrf.mxu1 }
 0x305   : > { %v5961_v6 = vadd.f32 %v5960_v27, %v5959_v3  ;;  %v5972_v8 = vrot.slane %v5971_v39, 1  ;;  %v5983_v2 = vadd.f32 %v5982_v12, %v5981_v35  ;;  %v7178_v26 = vunpack.c.l.b16 %v7800_v13 }
 0x306   : > { %v5967_v54 = vadd.f32 %v5966_v24, %v5965_v32  ;;  %v5978_v19 = vrot.slane %v5977_v4, 1  ;;  %v7802_v38 = vpack.c.bf16 %v5955_v9, %v5955_v9  ;;  %v7179_v57 = vunpack.c.l.b16 %v7801_v34  ;;  %v1718_v49 = vpop.f32.mrf.mxu1 }
 0x307   : > { %v5973_v41 = vadd.f32 %v5972_v8, %v5971_v39  ;;  %v5984_v58 = vrot.slane %v5983_v2, 1  ;;  %v7803_v56 = vpack.c.bf16 %v5961_v6, %v5961_v6  ;;  %v4406_v28 = vsub.f32 %v10069_v29, %v10138_v17 }
 0x308   : > { %v5979_v42 = vadd.f32 %v5978_v19, %v5977_v4  ;;  %v7804_v30 = vpack.c.bf16 %v5967_v54, %v5967_v54  ;;  %v7180_v45 = vunpack.c.l.b16 %v7802_v38  ;;  %v7312_v7 = vsel %vm7298_vm0, %v7179_v57, %v7178_v26  ;;  %v8645_v4 = vld [vmem:[%s12208_s4] ss:$0 sm:$0xff] }
 0x309   : > { %v5985_v11 = vadd.f32 %v5984_v58, %v5983_v2  ;;  %v7805_v44 = vpack.c.bf16 %v5973_v41, %v5973_v41  ;;  %v7181_v21 = vunpack.c.l.b16 %v7803_v56  ;;  %v4407_v3 = vsub.f32 %v10071_v36, %v10141_v46 }
 0x30a   : > { %v7806_v22 = vpack.c.bf16 %v5979_v42, %v5979_v42  ;;  %v7182_v35 = vunpack.c.l.b16 %v7804_v30  ;;  %v7313_v62 = vsel %vm7300_vm1, %v7180_v45, %v7312_v7  ;;  %v4408_v6 = vsub.f32 %v10078_v0, %v10143_v55  ;;  %v12446_v42 = vld [vmem:[#allocation165_spill] sm:$0xff] }
 0x30b   : > { %v7807_v29 = vpack.c.bf16 %v5985_v11, %v5985_v11  ;;  %v7183_v17 = vunpack.c.l.b16 %v7805_v44  ;;  %v7314_v32 = vsel %vm7302_vm2, %v7181_v21, %v7313_v62  ;;  %v4409_v18 = vsub.f32 %v10085_v40, %v10147_v48 }
 0x30c   : > { %v7184_v27 = vunpack.c.l.b16 %v7806_v22  ;;  %v7315_v39 = vsel %vm7304_vm3, %v7182_v35, %v7314_v32  ;;  %v4582_v36 = vmul.f32 1.442695, %v4404_v33  ;;  %8262 = vpow2.f32 %v10127_v50  ;;  %v10222_v32 = vpop.eup %8260 }
 0x30d   : > { %v7185_v46 = vunpack.c.l.b16 %v7807_v29  ;;  %v7316_v0 = vsel %vm7306_vm4, %v7183_v17, %v7315_v39  ;;  %v12444_v55 = vsub.f32 %v10076_v63, %v10134_v43  ;;  %v4586_v48 = vmul.f32 1.442695, %v4406_v28 }
 0x30e   : > { %v7317_v40 = vsel %vm7308_vm5, %v7184_v27, %v7316_v0  ;;  %8264 = vpow2.f32 %v4582_v36  ;;  %v4588_v13 = vmul.f32 1.442695, %v4407_v3  ;;  %v4590_v16 = vmul.f32 1.442695, %v4408_v6 }
 0x30f   : > { %v4584_v12 = vmul.f32 1.442695, %v12444_v55  ;;  %v7318_v9 = vsel %vm7310_vm6, %v7185_v46, %v7317_v40  ;;  %v4592_v23 = vmul.f32 1.442695, %v4409_v18  ;;  %v12445_v50 = vcombine.high %v9844_v31, %v9844_v31 }
 0x310   : > { %v7418_v33 = vpack.c.b16 %v7318_v9, %v7318_v9  ;;  %v1989_v43 = vcombine.high %v10037_v61, %v10037_v61  ;;  %v1997_v24 = vrot.slane %v10037_v61, %v9361_v25  ;;  %v10193_v34 = vadd.f32 %v8645_v4, %v7960_v52 }
 0x311   : > { %8266 = vpow2.f32 %v4584_v12  ;;  %v1988_v63 = vrot.slane %v12445_v50, %v9361_v25  ;;  %v10195_v8 = vadd.f32 %v8645_v4, %v1718_v49 }
 0x312   : > { %8268 = vpow2.f32 %v4586_v48  ;;  %7450 = vst [vmem:[%s9683_s26 + $0x4] sm:$0xf] %v7418_v33  ;;  %v2011_v26 = vrot.slane %v1989_v43, %v9361_v25  ;;  %v2019_v54 = vcombine.high %v1997_v24, %v1997_v24  ;;  %v2693_v19 = vrot.slane %v1997_v24, %v9366_v15 }
 0x313   : > { %8270 = vpow2.f32 %v4588_v13  ;;  %v1990_v2 = vcombine.high %v1988_v63, %v1988_v63  ;;  %v2004_v31 = vrot.slane %v1988_v63, %v9361_v25  ;;  %v2121_v61 = vcombine.high %v10193_v34, %v10193_v34 }
 0x314   : > { %8272 = vpow2.f32 %v4590_v16  ;;  %v2021_v41 = vcombine.high %v2011_v26, %v2011_v26  ;;  %v2697_v58 = vrot.slane %v2011_v26, %v9366_v15  ;;  %v2701_v56 = vrot.slane %v2019_v54, %v9366_v15 }
 0x315   : > { %8274 = vpow2.f32 %v4592_v23  ;;  %v2018_v38 = vrot.slane %v1990_v2, %v9361_v25  ;;  %v2020_v57 = vcombine.high %v2004_v31, %v2004_v31  ;;  %v2709_v28 = vrot.slane %v2004_v31, %v9366_v15 }
 0x316   : > { %v3234_v30 = vadd.f32 %v2693_v19, %v12446_v42  ;;  %v10210_v45 = vrot.slane %v10193_v34, %v9361_v25  ;;  %v2705_v11 = vrot.slane %v2021_v41, %v9366_v15  ;;  %v3235_v3 = vadd.f32 %v2697_v58, %v9575_v5 }
 0x317   : > { %v2022_v7 = vcombine.high %v2018_v38, %v2018_v38  ;;  %v2713_v44 = vrot.slane %v2018_v38, %v9366_v15  ;;  %v2717_v21 = vrot.slane %v2020_v57, %v9366_v15  ;;  %v3236_v22 = vadd.f32 %v2701_v56, %v9593_v14 }
 0x318   : > { %v3238_v35 = vadd.f32 %v2709_v28, %v9637_v10  ;;  %v3362_v62 = vmul.f32 0.01, %v3234_v30  ;;  %v3237_v52 = vadd.f32 %v2705_v11, %v9619_v51  ;;  %v3363_v18 = vmul.f32 0.01, %v3235_v3 }
 0x319   : > { %v2721_v6 = vrot.slane %v2022_v7, %v9366_v15  ;;  %v3239_v29 = vadd.f32 %v2713_v44, %v9647_v60  ;;  %v3240_v17 = vadd.f32 %v2717_v21, %v9680_v47  ;;  %v3364_v27 = vmul.f32 0.01, %v3236_v22  ;;  %v10226_v5 = vpop.eup %8262 }
 0x31a   : > { %v3366_v39 = vmul.f32 0.01, %v3238_v35  ;;  %v10224_v36 = vmax.f32 %v3234_v30, %v3362_v62  ;;  %v5026_v14 = vrot.slane %v10222_v32, 4  ;;  %v3365_v46 = vmul.f32 0.01, %v3237_v52 }
 0x31b   : > { %v3241_v10 = vadd.f32 %v2721_v6, %v9702_v37  ;;  %v3367_v0 = vmul.f32 0.01, %v3239_v29  ;;  %v10230_v51 = vpop.eup %8264  ;;  %v5032_v60 = vrot.slane %v10226_v5, 4  ;;  %v3368_v47 = vmul.f32 0.01, %v3240_v17 }
 0x31c   : > { %v10233_v55 = vmax.f32 %v3235_v3, %v3363_v18  ;;  %v10235_v12 = vmax.f32 %v3236_v22, %v3364_v27  ;;  %v5027_v48 = vadd.f32 %v10222_v32, %v5026_v14  ;;  %v5038_v13 = vrot.slane %v10230_v51, 4 }
 0x31d   : > { %v3369_v49 = vmul.f32 0.01, %v3241_v10  ;;  %v10241_v9 = vmax.f32 %v3237_v52, %v3365_v46  ;;  %v5033_v16 = vadd.f32 %v10226_v5, %v5032_v60  ;;  %v10247_v33 = vmax.f32 %v3238_v35, %v3366_v39 }
 0x31e   : > { %v10237_v40 = vpop.eup %8266  ;;  %v10249_v50 = vmax.f32 %v3239_v29, %v3367_v0  ;;  %v5028_v43 = vrot.slane %v5027_v48, 2  ;;  %v5039_v24 = vadd.f32 %v10230_v51, %v5038_v13  ;;  %v10255_v2 = vmax.f32 %v3240_v17, %v3368_v47  ;;  %v10271_v29 = vpop.f32.mrf.mxu0 }
 0x31f   : > { %v10243_v37 = vpop.eup %8268  ;;  %v5044_v23 = vrot.slane %v10237_v40, 4  ;;  %v5034_v26 = vrot.slane %v5033_v16, 2  ;;  %v10261_v38 = vmax.f32 %v3241_v10, %v3369_v49 }
 0x320   : > { %v10251_v63 = vpop.eup %8270  ;;  %v5050_v4 = vrot.slane %v10243_v37, 4  ;;  %v5029_v41 = vadd.f32 %v5028_v43, %v5027_v48  ;;  %v5040_v58 = vrot.slane %v5039_v24, 2 }
 0x321   : > { %v10257_v31 = vpop.eup %8272  ;;  %v5045_v54 = vadd.f32 %v10237_v40, %v5044_v23  ;;  %v5056_v19 = vrot.slane %v10251_v63, 4  ;;  %v5035_v42 = vadd.f32 %v5034_v26, %v5033_v16  ;;  %v10273_v23 = vpop.f32.mrf.mxu0 }
 0x322   : > { %v10263_v57 = vpop.eup %8274  ;;  %v5051_v56 = vadd.f32 %v10243_v37, %v5050_v4  ;;  %v5062_v28 = vrot.slane %v10257_v31, 4  ;;  %v5030_v44 = vrot.slane %v5029_v41, 1  ;;  %v5041_v21 = vadd.f32 %v5040_v58, %v5039_v24 }
 0x323   : > { %v5046_v30 = vrot.slane %v5045_v54, 2  ;;  %v5057_v7 = vadd.f32 %v10251_v63, %v5056_v19  ;;  %v5068_v11 = vrot.slane %v10263_v57, 4  ;;  %v5036_v35 = vrot.slane %v5035_v42, 1 }
 0x324   : > { %v5052_v3 = vrot.slane %v5051_v56, 2  ;;  %v5063_v22 = vadd.f32 %v10257_v31, %v5062_v28  ;;  %v5031_v17 = vadd.f32 %v5030_v44, %v5029_v41  ;;  %v5042_v18 = vrot.slane %v5041_v21, 1 }
 0x325   : > { %v5047_v62 = vadd.f32 %v5046_v30, %v5045_v54  ;;  %v5058_v6 = vrot.slane %v5057_v7, 2  ;;  %v5069_v52 = vadd.f32 %v10263_v57, %v5068_v11  ;;  %v5037_v14 = vadd.f32 %v5036_v35, %v5035_v42 }
 0x326   : > { %v5053_v27 = vadd.f32 %v5052_v3, %v5051_v56  ;;  %v5064_v39 = vrot.slane %v5063_v22, 2  ;;  %v5043_v60 = vadd.f32 %v5042_v18, %v5041_v21  ;;  %8276 = vrcp.f32 %v5031_v17 }
 0x327   : > { %v5048_v10 = vrot.slane %v5047_v62, 1  ;;  %v5059_v46 = vadd.f32 %v5058_v6, %v5057_v7  ;;  %v5070_v0 = vrot.slane %v5069_v52, 2  ;;  %8278 = vrcp.f32 %v5037_v14  ;;  %v10281_v7 = vpop.f32.mrf.mxu0 }
 0x328   : > { %v5054_v47 = vrot.slane %v5053_v27, 1  ;;  %v5065_v48 = vadd.f32 %v5064_v39, %v5063_v22  ;;  %8280 = vrcp.f32 %v5043_v60  ;;  %v3778_v4 = vrot.slane %v10224_v36, 4 }
 0x329   : > { %v5049_v13 = vadd.f32 %v5048_v10, %v5047_v62  ;;  %v5060_v49 = vrot.slane %v5059_v46, 1  ;;  %v5071_v16 = vadd.f32 %v5070_v0, %v5069_v52  ;;  %v3784_v19 = vrot.slane %v10233_v55, 4  ;;  %v10291_v10 = vpop.f32.mrf.mxu0 }
 0x32a   : > { %v5055_v43 = vadd.f32 %v5054_v47, %v5053_v27  ;;  %v5066_v24 = vrot.slane %v5065_v48, 1  ;;  %v3779_v58 = vmax.f32 %v10224_v36, %v3778_v4  ;;  %v3790_v56 = vrot.slane %v10235_v12, 4 }
 0x32b   : > { %v5061_v26 = vadd.f32 %v5060_v49, %v5059_v46  ;;  %v5072_v54 = vrot.slane %v5071_v16, 1  ;;  %8282 = vrcp.f32 %v5049_v13  ;;  %v3785_v42 = vmax.f32 %v10233_v55, %v3784_v19 }
 0x32c   : > { %v5067_v41 = vadd.f32 %v5066_v24, %v5065_v48  ;;  %8284 = vrcp.f32 %v5055_v43  ;;  %v3796_v30 = vrot.slane %v10241_v9, 4  ;;  %v3780_v11 = vrot.slane %v3779_v58, 2 }
 0x32d   : > { %v5073_v28 = vadd.f32 %v5072_v54, %v5071_v16  ;;  %8286 = vrcp.f32 %v5061_v26  ;;  %v3791_v44 = vmax.f32 %v10235_v12, %v3790_v56  ;;  %v3802_v21 = vrot.slane %v10247_v33, 4 }
 0x32e   : > { %8288 = vrcp.f32 %v5067_v41  ;;  %v3786_v3 = vrot.slane %v3785_v42, 2  ;;  %v3797_v22 = vmax.f32 %v10241_v9, %v3796_v30  ;;  %v3808_v35 = vrot.slane %v10249_v50, 4 }
 0x32f   : > { %8290 = vrcp.f32 %v5073_v28  ;;  %v3781_v62 = vmax.f32 %v3779_v58, %v3780_v11  ;;  %v3792_v6 = vrot.slane %v3791_v44, 2  ;;  %v3803_v52 = vmax.f32 %v10247_v33, %v3802_v21 }
 0x330   : > { %v3814_v17 = vrot.slane %v10255_v2, 4  ;;  %v3787_v18 = vmax.f32 %v3785_v42, %v3786_v3  ;;  %v3798_v27 = vrot.slane %v3797_v22, 2  ;;  %v3809_v39 = vmax.f32 %v10249_v50, %v3808_v35  ;;  %v10299_v42 = vpop.f32.mrf.mxu0 }
 0x331   : > { %v3820_v14 = vrot.slane %v10261_v38, 4  ;;  %v3782_v46 = vrot.slane %v3781_v62, 1  ;;  %v3793_v0 = vmax.f32 %v3791_v44, %v3792_v6  ;;  %v3804_v60 = vrot.slane %v3803_v52, 2 }
 0x332   : > { %v3815_v47 = vmax.f32 %v10255_v2, %v3814_v17  ;;  %v3788_v48 = vrot.slane %v3787_v18, 1  ;;  %v3799_v13 = vmax.f32 %v3797_v22, %v3798_v27  ;;  %v3810_v49 = vrot.slane %v3809_v39, 2 }
 0x333   : > { %v3821_v16 = vmax.f32 %v10261_v38, %v3820_v14  ;;  %v10295_v43 = vmax.f32 %v3781_v62, %v3782_v46  ;;  %v3794_v24 = vrot.slane %v3793_v0, 1  ;;  %v3805_v4 = vmax.f32 %v3803_v52, %v3804_v60  ;;  %v8277_v54 = vpop.eup %8276  ;;  %v12447_v46 = vld [vmem:[#allocation90_spill] sm:$0xff] }
 0x334   : > { %v3816_v26 = vrot.slane %v3815_v47, 2  ;;  %v10297_v19 = vmax.f32 %v3787_v18, %v3788_v48  ;;  %v3800_v41 = vrot.slane %v3799_v13, 1  ;;  %v3811_v58 = vmax.f32 %v3809_v39, %v3810_v49  ;;  %v8279_v28 = vpop.eup %8278  ;;  %v10315_v48 = vpop.f32.mrf.mxu0  ;;  %v12448_v49 = vld [vmem:[#allocation44_spill] sm:$0xff] }
 0x335   : > { %v3822_v56 = vrot.slane %v3821_v16, 2  ;;  %v5682_v30 = vmul.f32 %v8277_v54, %v10222_v32  ;;  %v10302_v11 = vmax.f32 %v3793_v0, %v3794_v24  ;;  %v3806_v44 = vrot.slane %v3805_v4, 1  ;;  %v8281_v3 = vpop.eup %8280 }
 0x336   : > { %v3817_v21 = vmax.f32 %v3815_v47, %v3816_v26  ;;  %v5683_v22 = vmul.f32 %v8279_v28, %v10226_v5  ;;  %v10305_v35 = vmax.f32 %v3799_v13, %v3800_v41  ;;  %v3812_v62 = vrot.slane %v3811_v58, 1  ;;  %v12449_v26 = vld [vmem:[#allocation50_spill] sm:$0xff]  ;;  %v12450_v28 = vld [vmem:[#allocation96_spill] sm:$0xff] }
 0x337   : > { %v3823_v6 = vmax.f32 %v3821_v16, %v3822_v56  ;;  %v5684_v17 = vmul.f32 %v8281_v3, %v10230_v51  ;;  %v5810_v18 = vmul.f32 %v5682_v30, %v9907_v53  ;;  %v10309_v27 = vmax.f32 %v3805_v4, %v3806_v44 }
 0x338   : > { %v8283_v52 = vpop.eup %8282  ;;  %v3818_v39 = vrot.slane %v3817_v21, 1  ;;  %v5811_v0 = vmul.f32 %v5683_v22, %v12447_v46  ;;  %v10313_v60 = vmax.f32 %v3811_v58, %v3812_v62 }
 0x339   : > { %v8285_v32 = vpop.eup %8284  ;;  %v5685_v14 = vmul.f32 %v8283_v52, %v10237_v40  ;;  %v3824_v5 = vrot.slane %v3823_v6, 1  ;;  %v5812_v51 = vmul.f32 %v5684_v17, %v12448_v49  ;;  %v6178_v16 = vrot.slane %v5810_v18, 4  ;;  %v10329_v52 = vpop.f32.mrf.mxu0 }
 0x33a   : > { %v8287_v47 = vpop.eup %8286  ;;  %v5686_v13 = vmul.f32 %v8285_v32, %v10243_v37  ;;  %v10319_v53 = vmax.f32 %v3817_v21, %v3818_v39  ;;  %v6184_v54 = vrot.slane %v5811_v0, 4 }
 0x33b   : > { %v8289_v24 = vpop.eup %8288  ;;  %v5687_v4 = vmul.f32 %v8287_v47, %v10251_v63  ;;  %v5813_v40 = vmul.f32 %v5685_v14, %v12449_v26  ;;  %v10323_v41 = vmax.f32 %v3823_v6, %v3824_v5  ;;  %v6179_v44 = vadd.f32 %v6178_v16, %v5810_v18  ;;  %v10333_v16 = vpop.f32.mrf.mxu0 }
 0x33c   : > { %v8291_v58 = vpop.eup %8290  ;;  %v5688_v56 = vmul.f32 %v8289_v24, %v10257_v31  ;;  %v5814_v30 = vmul.f32 %v5686_v13, %v12450_v28  ;;  %v6190_v37 = vrot.slane %v5812_v51, 4  ;;  %v6185_v22 = vadd.f32 %v6184_v54, %v5811_v0 }
 0x33d   : > { %v5689_v3 = vmul.f32 %v8291_v58, %v10263_v57  ;;  %v5815_v21 = vmul.f32 %v5687_v4, %v9996_v20  ;;  %v6196_v62 = vrot.slane %v5813_v40, 4  ;;  %v6180_v17 = vrot.slane %v6179_v44, 2 }
 0x33e   : > { %v5816_v63 = vmul.f32 %v5688_v56, %v10014_v59  ;;  %v6191_v6 = vadd.f32 %v6190_v37, %v5812_v51  ;;  %v6202_v39 = vrot.slane %v5814_v30, 4  ;;  %v6186_v31 = vrot.slane %v6185_v22, 2 }
 0x33f   : > { %v5817_v32 = vmul.f32 %v5689_v3, %v10043_v1  ;;  %v6197_v14 = vadd.f32 %v6196_v62, %v5813_v40  ;;  %v6208_v46 = vrot.slane %v5815_v21, 4  ;;  %v6181_v18 = vadd.f32 %v6180_v17, %v6179_v44 }
 0x340   : > { %v6192_v5 = vrot.slane %v6191_v6, 2  ;;  %v6203_v47 = vadd.f32 %v6202_v39, %v5814_v30  ;;  %v6214_v57 = vrot.slane %v5816_v63, 4  ;;  %v6187_v13 = vadd.f32 %v6186_v31, %v6185_v22 }
 0x341   : > { %v6198_v20 = vrot.slane %v6197_v14, 2  ;;  %v6209_v0 = vadd.f32 %v6208_v46, %v5815_v21  ;;  %v6220_v49 = vrot.slane %v5817_v32, 4  ;;  %v6182_v24 = vrot.slane %v6181_v18, 1  ;;  %v10335_v21 = vpop.f32.mrf.mxu0 }
 0x342   : > { %v6193_v59 = vadd.f32 %v6192_v5, %v6191_v6  ;;  %v6204_v4 = vrot.slane %v6203_v47, 2  ;;  %v6215_v51 = vadd.f32 %v6214_v57, %v5816_v63  ;;  %v6188_v26 = vrot.slane %v6187_v13, 1 }
 0x343   : > { %v6199_v54 = vadd.f32 %v6198_v20, %v6197_v14  ;;  %v6210_v1 = vrot.slane %v6209_v0, 2  ;;  %v6221_v58 = vadd.f32 %v6220_v49, %v5817_v32  ;;  %v6183_v40 = vadd.f32 %v6182_v24, %v6181_v18 }
 0x344   : > { %v6194_v56 = vrot.slane %v6193_v59, 1  ;;  %v6205_v28 = vadd.f32 %v6204_v4, %v6203_v47  ;;  %v6216_v44 = vrot.slane %v6215_v51, 2  ;;  %v6189_v30 = vadd.f32 %v6188_v26, %v6187_v13 }
 0x345   : > { %v6200_v37 = vrot.slane %v6199_v54, 1  ;;  %v6211_v3 = vadd.f32 %v6210_v1, %v6209_v0  ;;  %v6222_v22 = vrot.slane %v6221_v58, 2  ;;  %v7840_v6 = vpack.c.bf16 %v6183_v40, %v6183_v40  ;;  %v10337_v0 = vpop.f32.mrf.mxu0 }
 0x346   : > { %v6195_v62 = vadd.f32 %v6194_v56, %v6193_v59  ;;  %v6206_v17 = vrot.slane %v6205_v28, 1  ;;  %v6217_v39 = vadd.f32 %v6216_v44, %v6215_v51  ;;  %v7841_v14 = vpack.c.bf16 %v6189_v30, %v6189_v30 }
 0x347   : > { %v6201_v31 = vadd.f32 %v6200_v37, %v6199_v54  ;;  %v6212_v63 = vrot.slane %v6211_v3, 1  ;;  %v6223_v46 = vadd.f32 %v6222_v22, %v6221_v58  ;;  %v7218_v57 = vunpack.c.l.b16 %v7840_v6 }
 0x348   : > { %v6207_v5 = vadd.f32 %v6206_v17, %v6205_v28  ;;  %v6218_v32 = vrot.slane %v6217_v39, 1  ;;  %v7842_v18 = vpack.c.bf16 %v6195_v62, %v6195_v62  ;;  %v7219_v49 = vunpack.c.l.b16 %v7841_v14 }
 0x349   : > { %v6213_v47 = vadd.f32 %v6212_v63, %v6211_v3  ;;  %v6224_v20 = vrot.slane %v6223_v46, 1  ;;  %v7843_v13 = vpack.c.bf16 %v6201_v31, %v6201_v31  ;;  %v4386_v51 = vsub.f32 %v10224_v36, %v10295_v43  ;;  %v10348_v36 = vpop.f32.mrf.mxu0 }
 0x34a   : > { %v6219_v24 = vadd.f32 %v6218_v32, %v6217_v39  ;;  %v7844_v4 = vpack.c.bf16 %v6207_v5, %v6207_v5  ;;  %v7220_v59 = vunpack.c.l.b16 %v7842_v18  ;;  %v7347_v58 = vsel %vm7298_vm0, %v7219_v49, %v7218_v57 }
 0x34b   : > { %v6225_v26 = vadd.f32 %v6224_v20, %v6223_v46  ;;  %v7845_v54 = vpack.c.bf16 %v6213_v47, %v6213_v47  ;;  %v7221_v1 = vunpack.c.l.b16 %v7843_v13  ;;  %v4387_v44 = vsub.f32 %v10233_v55, %v10297_v19  ;;  %v1197_v14 = vpop.f32.mrf.mxu0 }
 0x34c   : > { %v7846_v40 = vpack.c.bf16 %v6219_v24, %v6219_v24  ;;  %v7222_v56 = vunpack.c.l.b16 %v7844_v4  ;;  %v7348_v28 = vsel %vm7300_vm1, %v7220_v59, %v7347_v58  ;;  %v4388_v22 = vsub.f32 %v10235_v12, %v10302_v11 }
 0x34d   : > { %v7847_v30 = vpack.c.bf16 %v6225_v26, %v6225_v26  ;;  %v7223_v37 = vunpack.c.l.b16 %v7845_v54  ;;  %v7349_v3 = vsel %vm7302_vm2, %v7221_v1, %v7348_v28  ;;  %v4389_v17 = vsub.f32 %v10241_v9, %v10305_v35  ;;  %v10381_v47 = vpop.f32.mrf.mxu0 }
 0x34e   : > { %v7224_v43 = vunpack.c.l.b16 %v7846_v40  ;;  %v7350_v62 = vsel %vm7304_vm3, %v7222_v56, %v7349_v3  ;;  %v4390_v39 = vsub.f32 %v10247_v33, %v10309_v27  ;;  %v4391_v19 = vsub.f32 %v10249_v50, %v10313_v60 }
 0x34f   : > { %v7225_v6 = vunpack.c.l.b16 %v7847_v30  ;;  %v7351_v55 = vsel %vm7306_vm4, %v7223_v37, %v7350_v62  ;;  %v4392_v12 = vsub.f32 %v10255_v2, %v10319_v53  ;;  %v4393_v31 = vsub.f32 %v10261_v38, %v10323_v41  ;;  %v1203_v58 = vpop.f32.mrf.mxu0 }
 0x350   : > { %v7352_v11 = vsel %vm7308_vm5, %v7224_v43, %v7351_v55  ;;  %v4546_v63 = vmul.f32 1.442695, %v4386_v51  ;;  %v4548_v9 = vmul.f32 1.442695, %v4387_v44  ;;  %v4550_v33 = vmul.f32 1.442695, %v4388_v22 }
 0x351   : > { %v7353_v35 = vsel %vm7310_vm6, %v7225_v6, %v7352_v11  ;;  %v4552_v27 = vmul.f32 1.442695, %v4389_v17  ;;  %v4554_v46 = vmul.f32 1.442695, %v4390_v39  ;;  %v4556_v50 = vmul.f32 1.442695, %v4391_v19 }
 0x352   : > { %v7423_v5 = vpack.c.b16 %v7353_v35, %v7353_v35  ;;  %8292 = vpow2.f32 %v4546_v63  ;;  %v4558_v60 = vmul.f32 1.442695, %v4392_v12  ;;  %v4560_v2 = vmul.f32 1.442695, %v4393_v31 }
 0x353   : > { %8294 = vpow2.f32 %v4548_v9  ;;  %v2135_v38 = vrot.slane %v2121_v61, %v9361_v25  ;;  %v2136_v53 = vcombine.high %v10210_v45, %v10210_v45  ;;  %v2144_v41 = vrot.slane %v10210_v45, %v9361_v25 }
 0x354   : > { %7455 = vst [vmem:[%s9683_s26 + $0x18] sm:$0xf] %v7423_v5  ;;  %8296 = vpow2.f32 %v4550_v33  ;;  %v2023_v32 = vcombine.high %v10195_v8, %v10195_v8  ;;  %v10377_v18 = vrot.slane %v10195_v8, %v9361_v25 }
 0x355   : > { %8298 = vpow2.f32 %v4552_v27  ;;  %v2137_v57 = vcombine.high %v2135_v38, %v2135_v38  ;;  %v2151_v34 = vrot.slane %v2135_v38, %v9361_v25  ;;  %v2158_v61 = vrot.slane %v2136_v53, %v9361_v25 }
 0x356   : > { %8300 = vpow2.f32 %v4554_v46  ;;  %v2166_v20 = vcombine.high %v2144_v41, %v2144_v41  ;;  %v2789_v13 = vrot.slane %v2144_v41, %v9366_v15  ;;  %v10385_v45 = vrot.slane %v2023_v32, %v9361_v25 }
 0x357   : > { %8302 = vpow2.f32 %v4556_v50  ;;  %v2167_v49 = vcombine.high %v2151_v34, %v2151_v34  ;;  %v2168_v24 = vcombine.high %v2158_v61, %v2158_v61  ;;  %v2793_v8 = vrot.slane %v2158_v61, %v9366_v15 }
 0x358   : > { %8304 = vpow2.f32 %v4558_v60  ;;  %v2797_v4 = vrot.slane %v2166_v20, %v9366_v15  ;;  %v2805_v59 = vrot.slane %v2151_v34, %v9366_v15  ;;  %v3258_v51 = vadd.f32 %v2789_v13, %v10273_v23 }
 0x359   : > { %8306 = vpow2.f32 %v4560_v2  ;;  %v2801_v26 = vrot.slane %v2168_v24, %v9366_v15  ;;  %v2813_v54 = vrot.slane %v2167_v49, %v9366_v15  ;;  %v3259_v1 = vadd.f32 %v2793_v8, %v10291_v10 }
 0x35a   : > { %v3260_v40 = vadd.f32 %v2797_v4, %v10315_v48  ;;  %v3262_v56 = vadd.f32 %v2805_v59, %v10337_v0  ;;  %v3386_v28 = vmul.f32 0.01, %v3258_v51  ;;  %v2165_v44 = vrot.slane %v2137_v57, %v9361_v25 }
 0x35b   : > { %v3261_v30 = vadd.f32 %v2801_v26, %v10333_v16  ;;  %v3264_v37 = vadd.f32 %v2813_v54, %v1203_v58  ;;  %v3387_v3 = vmul.f32 0.01, %v3259_v1  ;;  %v2038_v23 = vcombine.high %v10377_v18, %v10377_v18 }
 0x35c   : > { %v3388_v22 = vmul.f32 0.01, %v3260_v40  ;;  %v3390_v43 = vmul.f32 0.01, %v3262_v56  ;;  %v10400_v62 = vmax.f32 %v3258_v51, %v3386_v28  ;;  %v2169_v10 = vcombine.high %v2165_v44, %v2165_v44 }
 0x35d   : > { %v3389_v17 = vmul.f32 0.01, %v3261_v30  ;;  %v3392_v39 = vmul.f32 0.01, %v3264_v37  ;;  %v10402_v48 = vmax.f32 %v3259_v1, %v3387_v3  ;;  %v2809_v0 = vrot.slane %v2165_v44, %v9366_v15 }
 0x35e   : > { %v10405_v6 = vmax.f32 %v3260_v40, %v3388_v22  ;;  %v10407_v55 = vmax.f32 %v3262_v56, %v3390_v43  ;;  %v3922_v16 = vrot.slane %v10400_v62, 4  ;;  %v10411_v19 = vrot.slane %v2169_v10, %v9366_v15 }
 0x35f   : > { %v10413_v12 = vpop.eup %8292  ;;  %v10415_v11 = vmax.f32 %v3261_v30, %v3389_v17  ;;  %v10417_v31 = vmax.f32 %v3264_v37, %v3392_v39  ;;  %v3928_v63 = vrot.slane %v10402_v48, 4  ;;  %v10420_v9 = vadd.f32 %v2809_v0, %v1197_v14 }
 0x360   : > { %v10422_v35 = vpop.eup %8294  ;;  %v4930_v33 = vrot.slane %v10413_v12, 4  ;;  %v3923_v27 = vmax.f32 %v10400_v62, %v3922_v16  ;;  %v3934_v46 = vrot.slane %v10405_v6, 4  ;;  %v3946_v5 = vrot.slane %v10407_v55, 4 }
 0x361   : > { %v10428_v50 = vpop.eup %8296  ;;  %v4936_v60 = vrot.slane %v10422_v35, 4  ;;  %v3929_v2 = vmax.f32 %v10402_v48, %v3928_v63  ;;  %v3940_v38 = vrot.slane %v10415_v11, 4  ;;  %v3958_v14 = vrot.slane %v10417_v31, 4 }
 0x362   : > { %v10434_v53 = vpop.eup %8298  ;;  %v4931_v41 = vadd.f32 %v10413_v12, %v4930_v33  ;;  %v4942_v32 = vrot.slane %v10428_v50, 4  ;;  %v3924_v57 = vrot.slane %v3923_v27, 2  ;;  %v10439_v34 = vmax.f32 %v10405_v6, %v3934_v46 }
 0x363   : > { %v10441_v61 = vpop.eup %8300  ;;  %v4937_v20 = vadd.f32 %v10422_v35, %v4936_v60  ;;  %v4948_v13 = vrot.slane %v10434_v53, 4  ;;  %v3930_v49 = vrot.slane %v3929_v2, 2  ;;  %v10446_v24 = vmax.f32 %v10415_v11, %v3940_v38 }
 0x364   : > { %v10448_v8 = vpop.eup %8302  ;;  %v4932_v4 = vrot.slane %v4931_v41, 2  ;;  %v4943_v59 = vadd.f32 %v10428_v50, %v4942_v32  ;;  %v4954_v51 = vrot.slane %v10441_v61, 4  ;;  %v3925_v26 = vmax.f32 %v3923_v27, %v3924_v57 }
 0x365   : > { %v10452_v54 = vpop.eup %8304  ;;  %v4938_v1 = vrot.slane %v4937_v20, 2  ;;  %v4949_v58 = vadd.f32 %v10434_v53, %v4948_v13  ;;  %v4960_v40 = vrot.slane %v10448_v8, 4  ;;  %v3931_v56 = vmax.f32 %v3929_v2, %v3930_v49 }
 0x366   : > { %v10456_v28 = vpop.eup %8306  ;;  %v4933_v44 = vadd.f32 %v4932_v4, %v4931_v41  ;;  %v4944_v30 = vrot.slane %v4943_v59, 2  ;;  %v4955_v37 = vadd.f32 %v10441_v61, %v4954_v51  ;;  %v4966_v3 = vrot.slane %v10452_v54, 4 }
 0x367   : > { %v4939_v22 = vadd.f32 %v4938_v1, %v4937_v20  ;;  %v4950_v43 = vrot.slane %v4949_v58, 2  ;;  %v4961_v10 = vadd.f32 %v10448_v8, %v4960_v40  ;;  %v4972_v17 = vrot.slane %v10456_v28, 4 }
 0x368   : > { %v4934_v39 = vrot.slane %v4933_v44, 1  ;;  %v4945_v0 = vadd.f32 %v4944_v30, %v4943_v59  ;;  %v4956_v16 = vrot.slane %v4955_v37, 2  ;;  %v4967_v63 = vadd.f32 %v10452_v54, %v4966_v3 }
 0x369   : > { %v4940_v33 = vrot.slane %v4939_v22, 1  ;;  %v4951_v27 = vadd.f32 %v4950_v43, %v4949_v58  ;;  %v4962_v46 = vrot.slane %v4961_v10, 2  ;;  %v4973_v60 = vadd.f32 %v10456_v28, %v4972_v17 }
 0x36a   : > { %v4935_v2 = vadd.f32 %v4934_v39, %v4933_v44  ;;  %v4946_v38 = vrot.slane %v4945_v0, 1  ;;  %v4957_v41 = vadd.f32 %v4956_v16, %v4955_v37  ;;  %v4968_v32 = vrot.slane %v4967_v63, 2  ;;  %v10464_v37 = vpop.f32.mrf.mxu0 }
 0x36b   : > { %v4941_v57 = vadd.f32 %v4940_v33, %v4939_v22  ;;  %v4952_v20 = vrot.slane %v4951_v27, 1  ;;  %v4963_v13 = vadd.f32 %v4962_v46, %v4961_v10  ;;  %v4974_v49 = vrot.slane %v4973_v60, 2 }
 0x36c   : > { %v4947_v4 = vadd.f32 %v4946_v38, %v4945_v0  ;;  %v4958_v51 = vrot.slane %v4957_v41, 1  ;;  %v4969_v1 = vadd.f32 %v4968_v32, %v4967_v63  ;;  %8308 = vrcp.f32 %v4935_v2  ;;  %v1207_v38 = vpop.f32.mrf.mxu0 }
 0x36d   : > { %v4953_v59 = vadd.f32 %v4952_v20, %v4951_v27  ;;  %v4964_v40 = vrot.slane %v4963_v13, 1  ;;  %v4975_v30 = vadd.f32 %v4974_v49, %v4973_v60  ;;  %8310 = vrcp.f32 %v4941_v57 }
 0x36e   : > { %v4959_v58 = vadd.f32 %v4958_v51, %v4957_v41  ;;  %v4970_v3 = vrot.slane %v4969_v1, 1  ;;  %8312 = vrcp.f32 %v4947_v4  ;;  %v3926_v43 = vrot.slane %v3925_v26, 1 }
 0x36f   : > { %v4965_v44 = vadd.f32 %v4964_v40, %v4963_v13  ;;  %v4976_v17 = vrot.slane %v4975_v30, 1  ;;  %8314 = vrcp.f32 %v4953_v59  ;;  %v3932_v22 = vrot.slane %v3931_v56, 1 }
 0x370   : > { %v4971_v10 = vadd.f32 %v4970_v3, %v4969_v1  ;;  %8316 = vrcp.f32 %v4959_v58  ;;  %v3927_v39 = vmax.f32 %v3925_v26, %v3926_v43  ;;  %v3936_v0 = vrot.slane %v10439_v34, 2 }
 0x371   : > { %v4977_v16 = vadd.f32 %v4976_v17, %v4975_v30  ;;  %8318 = vrcp.f32 %v4965_v44  ;;  %v3933_v63 = vmax.f32 %v3931_v56, %v3932_v22  ;;  %v3942_v33 = vrot.slane %v10446_v24, 2 }
 0x372   : > { %8320 = vrcp.f32 %v4971_v10  ;;  %v3937_v27 = vmax.f32 %v10439_v34, %v3936_v0  ;;  %v3947_v46 = vmax.f32 %v10407_v55, %v3946_v5  ;;  %v3959_v60 = vmax.f32 %v10417_v31, %v3958_v14 }
 0x373   : > { %8322 = vrcp.f32 %v4977_v16  ;;  %v3943_v26 = vmax.f32 %v10446_v24, %v3942_v33  ;;  %v4410_v2 = vsub.f32 %v10400_v62, %v3927_v39  ;;  %v4411_v56 = vsub.f32 %v10402_v48, %v3933_v63 }
 0x374   : > { %v3938_v41 = vrot.slane %v3937_v27, 1  ;;  %v3948_v32 = vrot.slane %v3947_v46, 2  ;;  %v3960_v57 = vrot.slane %v3959_v60, 2  ;;  %v3265_v34 = vadd.f32 %v10411_v19, %v1207_v38  ;;  %v12452_v38 = vld [vmem:[#allocation166_spill] sm:$0xff] }
 0x375   : > { %v3944_v20 = vrot.slane %v3943_v26, 1  ;;  %v4594_v13 = vmul.f32 1.442695, %v4410_v2  ;;  %v4596_v5 = vmul.f32 1.442695, %v4411_v56  ;;  %v2039_v49 = vcombine.high %v10385_v45, %v10385_v45 }
 0x376   : > { %v3939_v14 = vmax.f32 %v3937_v27, %v3938_v41  ;;  %v3949_v4 = vmax.f32 %v3947_v46, %v3948_v32  ;;  %v3961_v51 = vmax.f32 %v3959_v60, %v3960_v57  ;;  %v3391_v24 = vmul.f32 0.01, %v10420_v9  ;;  %v12451_v46 = vld [vmem:[#allocation164_spill] sm:$0xff] }
 0x377   : > { %v3945_v62 = vmax.f32 %v3943_v26, %v3944_v20  ;;  %8324 = vpow2.f32 %v4594_v13  ;;  %v3393_v48 = vmul.f32 0.01, %v3265_v34  ;;  %v10484_v1 = vrot.slane %v10377_v18, %v9361_v25 }
 0x378   : > { %v3950_v59 = vrot.slane %v3949_v4, 1  ;;  %v3962_v19 = vrot.slane %v3961_v51, 1  ;;  %v4412_v40 = vsub.f32 %v10405_v6, %v3939_v14  ;;  %8326 = vpow2.f32 %v4596_v5  ;;  %v12454_v5 = vld [vmem:[#allocation168_spill] sm:$0xff] }
 0x379   : > { %v8309_v30 = vpop.eup %8308  ;;  %v4413_v58 = vsub.f32 %v10415_v11, %v3945_v62  ;;  %v10489_v3 = vmax.f32 %v10420_v9, %v3391_v24  ;;  %v10491_v43 = vmax.f32 %v3265_v34, %v3393_v48  ;;  %v10495_v44 = vrot.slane %v10385_v45, %v9361_v25  ;;  %v12455_v62 = vld [vmem:[#allocation169_spill] sm:$0xff] }
 0x37a   : > { %v8311_v17 = vpop.eup %8310  ;;  %v5666_v22 = vmul.f32 %v8309_v30, %v10413_v12  ;;  %v3951_v10 = vmax.f32 %v3949_v4, %v3950_v59  ;;  %v10498_v39 = vmax.f32 %v3961_v51, %v3962_v19  ;;  %v4598_v6 = vmul.f32 1.442695, %v4412_v40  ;;  %v12456_v40 = vld [vmem:[#allocation170_spill] sm:$0xff] }
 0x37b   : > { %v8313_v0 = vpop.eup %8312  ;;  %v5667_v16 = vmul.f32 %v8311_v17, %v10422_v35  ;;  %v4600_v11 = vmul.f32 1.442695, %v4413_v58  ;;  %v3952_v9 = vrot.slane %v10489_v3, 4  ;;  %v3964_v63 = vrot.slane %v10491_v43, 4 }
 0x37c   : > { %v8315_v33 = vpop.eup %8314  ;;  %v5668_v27 = vmul.f32 %v8313_v0, %v10428_v50  ;;  %v5794_v60 = vmul.f32 %v5666_v22, %v12451_v46  ;;  %v4414_v26 = vsub.f32 %v10407_v55, %v3951_v10  ;;  %v4416_v12 = vsub.f32 %v10417_v31, %v10498_v39  ;;  %v12453_v50 = vld [vmem:[#allocation167_spill] sm:$0xff] }
 0x37d   : > { %v8317_v2 = vpop.eup %8316  ;;  %v5669_v56 = vmul.f32 %v8315_v33, %v10434_v53  ;;  %v5795_v35 = vmul.f32 %v5667_v16, %v12452_v38  ;;  %8328 = vpow2.f32 %v4598_v6  ;;  %v10511_v41 = vmax.f32 %v10489_v3, %v3952_v9  ;;  %v12457_v22 = vld [vmem:[#allocation171_spill] sm:$0xff]  ;;  %v12458_v16 = vld [vmem:[#allocation172_spill] sm:$0xff] }
 0x37e   : > { %v8319_v32 = vpop.eup %8318  ;;  %v5670_v57 = vmul.f32 %v8317_v2, %v10441_v61  ;;  %v5796_v34 = vmul.f32 %v5668_v27, %v12453_v50  ;;  %v6082_v20 = vrot.slane %v5794_v60, 4  ;;  %8330 = vpow2.f32 %v4600_v11 }
 0x37f   : > { %v8321_v55 = vpop.eup %8320  ;;  %v5671_v13 = vmul.f32 %v8319_v32, %v10448_v8  ;;  %v5797_v14 = vmul.f32 %v5669_v56, %v12454_v5  ;;  %v6088_v4 = vrot.slane %v5795_v35, 4  ;;  %v10517_v53 = vmul.f32 1.442695, %v4414_v26 }
 0x380   : > { %v8323_v51 = vpop.eup %8322  ;;  %v5672_v24 = vmul.f32 %v8321_v55, %v10452_v54  ;;  %v5798_v48 = vmul.f32 %v5670_v57, %v12455_v62  ;;  %v6083_v59 = vadd.f32 %v6082_v20, %v5794_v60  ;;  %v6094_v19 = vrot.slane %v5796_v34, 4 }
 0x381   : > { %v5673_v61 = vmul.f32 %v8323_v51, %v10456_v28  ;;  %v5799_v30 = vmul.f32 %v5671_v13, %v12456_v40  ;;  %v6089_v58 = vadd.f32 %v6088_v4, %v5795_v35  ;;  %v6100_v17 = vrot.slane %v5797_v14, 4 }
 0x382   : > { %v5800_v8 = vmul.f32 %v5672_v24, %v12457_v22  ;;  %v6084_v10 = vrot.slane %v6083_v59, 2  ;;  %v6095_v6 = vadd.f32 %v6094_v19, %v5796_v34  ;;  %v6106_v0 = vrot.slane %v5798_v48, 4 }
 0x383   : > { %v5801_v11 = vmul.f32 %v5673_v61, %v12458_v16  ;;  %v6090_v9 = vrot.slane %v6089_v58, 2  ;;  %v6101_v33 = vadd.f32 %v6100_v17, %v5797_v14  ;;  %v6112_v54 = vrot.slane %v5799_v30, 4 }
 0x384   : > { %v10525_v27 = vpop.eup %8324  ;;  %v6085_v46 = vadd.f32 %v6084_v10, %v6083_v59  ;;  %v6096_v60 = vrot.slane %v6095_v6, 2  ;;  %v6107_v26 = vadd.f32 %v6106_v0, %v5798_v48  ;;  %v6118_v28 = vrot.slane %v5800_v8, 4 }
 0x385   : > { %v10527_v2 = vpop.eup %8326  ;;  %v6091_v56 = vadd.f32 %v6090_v9, %v6089_v58  ;;  %v6102_v38 = vrot.slane %v6101_v33, 2  ;;  %v6113_v35 = vadd.f32 %v6112_v54, %v5799_v30  ;;  %v6124_v32 = vrot.slane %v5801_v11, 4 }
 0x386   : > { %v6086_v57 = vrot.slane %v6085_v46, 1  ;;  %v6097_v50 = vadd.f32 %v6096_v60, %v6095_v6  ;;  %v6108_v34 = vrot.slane %v6107_v26, 2  ;;  %v6119_v20 = vadd.f32 %v6118_v28, %v5800_v8 }
 0x387   : > { %v6092_v55 = vrot.slane %v6091_v56, 1  ;;  %v6103_v13 = vadd.f32 %v6102_v38, %v6101_v33  ;;  %v6114_v5 = vrot.slane %v6113_v35, 2  ;;  %v6125_v14 = vadd.f32 %v6124_v32, %v5801_v11 }
 0x388   : > { %v6087_v4 = vadd.f32 %v6086_v57, %v6085_v46  ;;  %v6098_v51 = vrot.slane %v6097_v50, 1  ;;  %v6109_v24 = vadd.f32 %v6108_v34, %v6107_v26  ;;  %v6120_v62 = vrot.slane %v6119_v20, 2 }
 0x389   : > { %v6093_v48 = vadd.f32 %v6092_v55, %v6091_v56  ;;  %v6104_v59 = vrot.slane %v6103_v13, 1  ;;  %v6115_v19 = vadd.f32 %v6114_v5, %v6113_v35  ;;  %v6126_v61 = vrot.slane %v6125_v14, 2 }
 0x38a   : > { %v10529_v40 = vpop.eup %8328  ;;  %v6099_v30 = vadd.f32 %v6098_v51, %v6097_v50  ;;  %v6110_v58 = vrot.slane %v6109_v24, 1  ;;  %v6121_v17 = vadd.f32 %v6120_v62, %v6119_v20  ;;  %v7824_v22 = vpack.c.bf16 %v6087_v4, %v6087_v4 }
 0x38b   : > { %v10531_v10 = vpop.eup %8330  ;;  %v6105_v8 = vadd.f32 %v6104_v59, %v6103_v13  ;;  %v6116_v6 = vrot.slane %v6115_v19, 1  ;;  %v6127_v0 = vadd.f32 %v6126_v61, %v6125_v14  ;;  %v7825_v16 = vpack.c.bf16 %v6093_v48, %v6093_v48 }
 0x38c   : > { %v6111_v11 = vadd.f32 %v6110_v58, %v6109_v24  ;;  %v6122_v9 = vrot.slane %v6121_v17, 1  ;;  %v7826_v33 = vpack.c.bf16 %v6099_v30, %v6099_v30  ;;  %v7202_v54 = vunpack.c.l.b16 %v7824_v22 }
 0x38d   : > { %v6117_v46 = vadd.f32 %v6116_v6, %v6115_v19  ;;  %v6128_v60 = vrot.slane %v6127_v0, 1  ;;  %v7827_v26 = vpack.c.bf16 %v6105_v8, %v6105_v8  ;;  %v7203_v28 = vunpack.c.l.b16 %v7825_v16 }
 0x38e   : > { %v6123_v56 = vadd.f32 %v6122_v9, %v6121_v17  ;;  %v7828_v38 = vpack.c.bf16 %v6111_v11, %v6111_v11  ;;  %v7204_v35 = vunpack.c.l.b16 %v7826_v33  ;;  %8332 = vpow2.f32 %v10517_v53 }
 0x38f   : > { %v6129_v32 = vadd.f32 %v6128_v60, %v6127_v0  ;;  %v7829_v57 = vpack.c.bf16 %v6117_v46, %v6117_v46  ;;  %v7205_v50 = vunpack.c.l.b16 %v7827_v26  ;;  %v7333_v34 = vsel %vm7298_vm0, %v7203_v28, %v7202_v54 }
 0x390   : > { %v7830_v20 = vpack.c.bf16 %v6123_v56, %v6123_v56  ;;  %v7206_v55 = vunpack.c.l.b16 %v7828_v38  ;;  %v7334_v13 = vsel %vm7300_vm1, %v7204_v35, %v7333_v34  ;;  %v4606_v5 = vmul.f32 1.442695, %v4416_v12 }
 0x391   : > { %v7831_v14 = vpack.c.bf16 %v6129_v32, %v6129_v32  ;;  %v7207_v4 = vunpack.c.l.b16 %v7829_v57  ;;  %v7335_v51 = vsel %vm7302_vm2, %v7205_v50, %v7334_v13  ;;  %v5074_v24 = vrot.slane %v10525_v27, 4 }
 0x392   : > { %v7208_v53 = vunpack.c.l.b16 %v7830_v20  ;;  %v7336_v62 = vsel %vm7304_vm3, %v7206_v55, %v7335_v51  ;;  %8334 = vpow2.f32 %v4606_v5  ;;  %v5080_v48 = vrot.slane %v10527_v2, 4 }
 0x393   : > { %v7209_v59 = vunpack.c.l.b16 %v7831_v14  ;;  %v7337_v19 = vsel %vm7306_vm4, %v7207_v4, %v7336_v62  ;;  %v5075_v61 = vadd.f32 %v10525_v27, %v5074_v24  ;;  %v5086_v31 = vrot.slane %v10529_v40, 4 }
 0x394   : > { %v7338_v39 = vsel %vm7308_vm5, %v7208_v53, %v7337_v19  ;;  %v5081_v12 = vadd.f32 %v10527_v2, %v5080_v48  ;;  %v5092_v30 = vrot.slane %v10531_v10, 4  ;;  %v3954_v58 = vrot.slane %v10511_v41, 2 }
 0x395   : > { %v7339_v17 = vsel %vm7310_vm6, %v7209_v59, %v7338_v39  ;;  %v5076_v22 = vrot.slane %v5075_v61, 2  ;;  %v5087_v8 = vadd.f32 %v10529_v40, %v5086_v31  ;;  %v3965_v6 = vmax.f32 %v10491_v43, %v3964_v63 }
 0x396   : > { %v7421_v0 = vpack.c.b16 %v7339_v17, %v7339_v17  ;;  %v5082_v16 = vrot.slane %v5081_v12, 2  ;;  %v5093_v11 = vadd.f32 %v10531_v10, %v5092_v30  ;;  %v3955_v9 = vmax.f32 %v10511_v41, %v3954_v58 }
 0x397   : > { %v5077_v33 = vadd.f32 %v5076_v22, %v5075_v61  ;;  %v5088_v54 = vrot.slane %v5087_v8, 2  ;;  %v3966_v46 = vrot.slane %v3965_v6, 2  ;;  %v2060_v60 = vrot.slane %v2038_v23, %v9361_v25 }
 0x398   : > { %7453 = vst [vmem:[%s9683_s26 + $0x10] sm:$0xf] %v7421_v0  ;;  %v5083_v26 = vadd.f32 %v5082_v16, %v5081_v12  ;;  %v5094_v28 = vrot.slane %v5093_v11, 2  ;;  %v3956_v56 = vrot.slane %v3955_v9, 1  ;;  %v2067_v63 = vrot.slane %v2039_v49, %v9361_v25  ;;  %v12459_v16 = vld [vmem:[#allocation152_spill] sm:$0xff] }
 0x399   : > { %v5078_v38 = vrot.slane %v5077_v33, 1  ;;  %v5089_v35 = vadd.f32 %v5088_v54, %v5087_v8  ;;  %v3967_v41 = vmax.f32 %v3965_v6, %v3966_v46  ;;  %v2068_v32 = vcombine.high %v10484_v1, %v10484_v1 }
 0x39a   : > { %v5084_v57 = vrot.slane %v5083_v26, 1  ;;  %v5095_v50 = vadd.f32 %v5094_v28, %v5093_v11  ;;  %v3957_v34 = vmax.f32 %v3955_v9, %v3956_v56  ;;  %v2069_v18 = vcombine.high %v10495_v44, %v10495_v44  ;;  %v12460_v9 = vld [vmem:[#allocation156_spill] sm:$0xff]  ;;  %v12462_v28 = vld [vmem:[#allocation5_spill] sm:$0xff]  ;;  %v7963_v56 = vpop.f32.mrf.mxu1 }
 0x39b   : > { %v10570_v23 = vpop.eup %8332  ;;  %v5079_v20 = vadd.f32 %v5078_v38, %v5077_v33  ;;  %v5090_v55 = vrot.slane %v5089_v35, 1  ;;  %v3968_v13 = vrot.slane %v3967_v41, 1  ;;  %v2070_v5 = vcombine.high %v2060_v60, %v2060_v60  ;;  %v12463_v38 = vld [vmem:[#allocation11_spill] sm:$0xff] }
 0x39c   : > { %v5085_v45 = vadd.f32 %v5084_v57, %v5083_v26  ;;  %v5096_v49 = vrot.slane %v5095_v50, 1  ;;  %v5098_v14 = vrot.slane %v10570_v23, 4  ;;  %v4415_v4 = vsub.f32 %v10489_v3, %v3957_v34 }
 0x39d   : > { %v5091_v51 = vadd.f32 %v5090_v55, %v5089_v35  ;;  %8336 = vrcp.f32 %v5079_v20  ;;  %v3969_v24 = vmax.f32 %v3967_v41, %v3968_v13  ;;  %v2071_v53 = vcombine.high %v2067_v63, %v2067_v63  ;;  %v12464_v41 = vld [vmem:[#allocation17_spill] sm:$0xff] }
 0x39e   : > { %v5097_v62 = vadd.f32 %v5096_v49, %v5095_v50  ;;  %v5099_v48 = vadd.f32 %v10570_v23, %v5098_v14  ;;  %8338 = vrcp.f32 %v5085_v45  ;;  %v4604_v59 = vmul.f32 1.442695, %v4415_v4  ;;  %v12466_v50 = vld [vmem:[#allocation38_spill] sm:$0xff]  ;;  %v10601_v14 = vld [vmem:[%s12208_s4] ss:$0 sm:$0xff] }
 0x39f   : > { %v10575_v19 = vpop.eup %8334  ;;  %8340 = vrcp.f32 %v5091_v51  ;;  %v4417_v61 = vsub.f32 %v10491_v43, %v3969_v24  ;;  %v2725_v31 = vrot.slane %v10484_v1, %v9366_v15  ;;  %v2729_v39 = vrot.slane %v2060_v60, %v9366_v15  ;;  %v12461_v60 = vld [vmem:[#allocation161_spill] sm:$0xff] }
 0x3a0   : > { %v5100_v3 = vrot.slane %v5099_v48, 2  ;;  %v5110_v12 = vrot.slane %v10575_v19, 4  ;;  %8342 = vrcp.f32 %v5097_v62  ;;  %v2733_v30 = vrot.slane %v2068_v32, %v9366_v15  ;;  %v12465_v32 = vld [vmem:[#allocation25_spill] sm:$0xff] }
 0x3a1   : > { %8344 = vpow2.f32 %v4604_v59  ;;  %v4608_v58 = vmul.f32 1.442695, %v4417_v61  ;;  %v2737_v17 = vrot.slane %v2070_v5, %v9366_v15  ;;  %v2741_v22 = vrot.slane %v10495_v44, %v9366_v15 }
 0x3a2   : > { %v5101_v8 = vadd.f32 %v5100_v3, %v5099_v48  ;;  %v5111_v43 = vadd.f32 %v10575_v19, %v5110_v12  ;;  %v2745_v1 = vrot.slane %v2067_v63, %v9366_v15  ;;  %v2749_v6 = vrot.slane %v2069_v18, %v9366_v15 }
 0x3a3   : > { %8346 = vpow2.f32 %v4608_v58  ;;  %v2753_v0 = vrot.slane %v2071_v53, %v9366_v15  ;;  %v3242_v11 = vadd.f32 %v2725_v31, %v12459_v16  ;;  %v3243_v33 = vadd.f32 %v2729_v39, %v12460_v9 }
 0x3a4   : > { %v5102_v54 = vrot.slane %v5101_v8, 1  ;;  %v5112_v46 = vrot.slane %v5111_v43, 2  ;;  %v3244_v26 = vadd.f32 %v2733_v30, %v12461_v60  ;;  %v3245_v44 = vadd.f32 %v2737_v17, %v12462_v28 }
 0x3a5   : > { %v3246_v35 = vadd.f32 %v2741_v22, %v12463_v38  ;;  %v3247_v63 = vadd.f32 %v2745_v1, %v12464_v41  ;;  %v3248_v57 = vadd.f32 %v2749_v6, %v12465_v32  ;;  %v3249_v34 = vadd.f32 %v2753_v0, %v12466_v50 }
 0x3a6   : > { %v5103_v18 = vadd.f32 %v5102_v54, %v5101_v8  ;;  %v5113_v20 = vadd.f32 %v5112_v46, %v5111_v43  ;;  %v3370_v55 = vmul.f32 0.01, %v3242_v11  ;;  %v3371_v13 = vmul.f32 0.01, %v3243_v33 }
 0x3a7   : > { %v3372_v5 = vmul.f32 0.01, %v3244_v26  ;;  %v3373_v45 = vmul.f32 0.01, %v3245_v44  ;;  %v3374_v49 = vmul.f32 0.01, %v3246_v35  ;;  %v10604_v4 = vadd.f32 %v10601_v14, %v7963_v56 }
 0x3a8   : > { %v5114_v51 = vrot.slane %v5113_v20, 1  ;;  %8348 = vrcp.f32 %v5103_v18  ;;  %v3375_v24 = vmul.f32 0.01, %v3247_v63  ;;  %v3376_v53 = vmul.f32 0.01, %v3248_v57 }
 0x3a9   : > { %v3377_v62 = vmul.f32 0.01, %v3249_v34  ;;  %v10606_v48 = vmax.f32 %v3242_v11, %v3370_v55  ;;  %v10608_v59 = vmax.f32 %v3243_v33, %v3371_v13  ;;  %v10610_v61 = vmax.f32 %v3244_v26, %v3372_v5 }
 0x3aa   : > { %v8337_v31 = vpop.eup %8336  ;;  %v5115_v39 = vadd.f32 %v5114_v51, %v5113_v20  ;;  %v10612_v3 = vmax.f32 %v3245_v44, %v3373_v45  ;;  %v10614_v12 = vmax.f32 %v3246_v35, %v3374_v49  ;;  %v10616_v30 = vmax.f32 %v3247_v63, %v3375_v24 }
 0x3ab   : > { %v8339_v58 = vpop.eup %8338  ;;  %v5690_v17 = vmul.f32 %v8337_v31, %v10525_v27  ;;  %v10619_v22 = vmax.f32 %v3248_v57, %v3376_v53  ;;  %v10621_v8 = vmax.f32 %v3249_v34, %v3377_v62  ;;  %v3826_v43 = vrot.slane %v10606_v48, 4 }
 0x3ac   : > { %v8341_v1 = vpop.eup %8340  ;;  %8350 = vrcp.f32 %v5115_v39  ;;  %v5691_v6 = vmul.f32 %v8339_v58, %v10527_v2  ;;  %v3832_v0 = vrot.slane %v10608_v59, 4  ;;  %v3838_v16 = vrot.slane %v10610_v61, 4 }
 0x3ad   : > { %v8343_v11 = vpop.eup %8342  ;;  %v5692_v9 = vmul.f32 %v8341_v1, %v10529_v40  ;;  %v5818_v33 = vmul.f32 %v5690_v17, %v10271_v29  ;;  %v3827_v27 = vmax.f32 %v10606_v48, %v3826_v43  ;;  %v3844_v54 = vrot.slane %v10612_v3, 4 }
 0x3ae   : > { %v10631_v46 = vpop.eup %8344  ;;  %v5693_v60 = vmul.f32 %v8343_v11, %v10531_v10  ;;  %v5819_v26 = vmul.f32 %v5691_v6, %v10281_v7  ;;  %v3833_v2 = vmax.f32 %v10608_v59, %v3832_v0  ;;  %v10637_v28 = vmax.f32 %v10610_v61, %v3838_v16 }
 0x3af   : > { %v5820_v44 = vmul.f32 %v5692_v9, %v10299_v42  ;;  %v6226_v40 = vrot.slane %v5818_v33, 4  ;;  %v5104_v29 = vrot.slane %v10631_v46, 4  ;;  %v3828_v56 = vrot.slane %v3827_v27, 2 }
 0x3b0   : > { %v10641_v38 = vpop.eup %8346  ;;  %v5821_v35 = vmul.f32 %v5693_v60, %v10329_v52  ;;  %v6232_v41 = vrot.slane %v5819_v26, 4  ;;  %v3834_v63 = vrot.slane %v3833_v2, 2  ;;  %v3840_v10 = vrot.slane %v10637_v28, 2 }
 0x3b1   : > { %v6227_v7 = vadd.f32 %v6226_v40, %v5818_v33  ;;  %v6238_v32 = vrot.slane %v5820_v44, 4  ;;  %v5105_v57 = vadd.f32 %v10631_v46, %v5104_v29  ;;  %v5116_v50 = vrot.slane %v10641_v38, 4 }
 0x3b2   : > { %v6233_v34 = vadd.f32 %v6232_v41, %v5819_v26  ;;  %v6244_v42 = vrot.slane %v5821_v35, 4  ;;  %v3829_v18 = vmax.f32 %v3827_v27, %v3828_v56  ;;  %v3835_v20 = vmax.f32 %v3833_v2, %v3834_v63 }
 0x3b3   : > { %v6228_v55 = vrot.slane %v6227_v7, 2  ;;  %v6239_v13 = vadd.f32 %v6238_v32, %v5820_v44  ;;  %v5106_v5 = vrot.slane %v5105_v57, 2  ;;  %v5117_v45 = vadd.f32 %v10641_v38, %v5116_v50 }
 0x3b4   : > { %v6234_v52 = vrot.slane %v6233_v34, 2  ;;  %v6245_v49 = vadd.f32 %v6244_v42, %v5821_v35  ;;  %v3830_v51 = vrot.slane %v3829_v18, 1  ;;  %v3836_v24 = vrot.slane %v3835_v20, 1 }
 0x3b5   : > { %v8349_v53 = vpop.eup %8348  ;;  %v6229_v62 = vadd.f32 %v6228_v55, %v6227_v7  ;;  %v6240_v31 = vrot.slane %v6239_v13, 2  ;;  %v5107_v39 = vadd.f32 %v5106_v5, %v5105_v57  ;;  %v5118_v58 = vrot.slane %v5117_v45, 2 }
 0x3b6   : > { %v5694_v17 = vmul.f32 %v8349_v53, %v10570_v23  ;;  %v6235_v43 = vadd.f32 %v6234_v52, %v6233_v34  ;;  %v6246_v1 = vrot.slane %v6245_v49, 2  ;;  %v10649_v6 = vmax.f32 %v3829_v18, %v3830_v51 }
 0x3b7   : > { %v6230_v0 = vrot.slane %v6229_v62, 1  ;;  %v6241_v16 = vadd.f32 %v6240_v31, %v6239_v13  ;;  %v5108_v11 = vrot.slane %v5107_v39, 1  ;;  %v5119_v9 = vadd.f32 %v5118_v58, %v5117_v45 }
 0x3b8   : > { %v5822_v33 = vmul.f32 %v5694_v17, %v10335_v21  ;;  %v6236_v27 = vrot.slane %v6235_v43, 1  ;;  %v6247_v60 = vadd.f32 %v6246_v1, %v6245_v49  ;;  %v10652_v26 = vmax.f32 %v3835_v20, %v3836_v24 }
 0x3b9   : > { %v8351_v2 = vpop.eup %8350  ;;  %v6231_v44 = vadd.f32 %v6230_v0, %v6229_v62  ;;  %v6242_v40 = vrot.slane %v6241_v16, 1  ;;  %v5109_v29 = vadd.f32 %v5108_v11, %v5107_v39  ;;  %v5120_v56 = vrot.slane %v5119_v9, 1 }
 0x3ba   : > { %v5696_v23 = vmul.f32 %v8351_v2, %v10575_v19  ;;  %v6237_v35 = vadd.f32 %v6236_v27, %v6235_v43  ;;  %v6248_v41 = vrot.slane %v6247_v60, 1  ;;  %v6250_v63 = vrot.slane %v5822_v33, 4 }
 0x3bb   : > { %v6243_v7 = vadd.f32 %v6242_v40, %v6241_v16  ;;  %v7848_v32 = vpack.c.bf16 %v6231_v44, %v6231_v44  ;;  %v5121_v57 = vadd.f32 %v5120_v56, %v5119_v9  ;;  %8352 = vrcp.f32 %v5109_v29 }
 0x3bc   : > { %v5824_v21 = vmul.f32 %v5696_v23, %v10381_v47  ;;  %v6249_v50 = vadd.f32 %v6248_v41, %v6247_v60  ;;  %v6251_v34 = vadd.f32 %v6250_v63, %v5822_v33  ;;  %v7849_v42 = vpack.c.bf16 %v6237_v35, %v6237_v35 }
 0x3bd   : > { %v7850_v18 = vpack.c.bf16 %v6243_v7, %v6243_v7  ;;  %v7226_v20 = vunpack.c.l.b16 %v7848_v32  ;;  %8354 = vrcp.f32 %v5121_v57  ;;  %v3841_v55 = vmax.f32 %v10637_v28, %v3840_v10 }
 0x3be   : > { %v6252_v13 = vrot.slane %v6251_v34, 2  ;;  %v6262_v5 = vrot.slane %v5824_v21, 4  ;;  %v7851_v19 = vpack.c.bf16 %v6249_v50, %v6249_v50  ;;  %v7227_v45 = vunpack.c.l.b16 %v7849_v42 }
 0x3bf   : > { %v7228_v52 = vunpack.c.l.b16 %v7850_v18  ;;  %v3842_v49 = vrot.slane %v3841_v55, 1  ;;  %v3845_v51 = vmax.f32 %v10612_v3, %v3844_v54  ;;  %v3850_v47 = vrot.slane %v10614_v12, 4 }
 0x3c0   : > { %v6253_v24 = vadd.f32 %v6252_v13, %v6251_v34  ;;  %v6263_v53 = vadd.f32 %v6262_v5, %v5824_v21  ;;  %v7229_v62 = vunpack.c.l.b16 %v7851_v19  ;;  %v7354_v31 = vsel %vm7298_vm0, %v7227_v45, %v7226_v20 }
 0x3c1   : > { %v7355_v39 = vsel %vm7300_vm1, %v7228_v52, %v7354_v31  ;;  %v3843_v28 = vmax.f32 %v3841_v55, %v3842_v49  ;;  %v3846_v10 = vrot.slane %v3845_v51, 2  ;;  %v3851_v58 = vmax.f32 %v10614_v12, %v3850_v47 }
 0x3c2   : > { %v6254_v17 = vrot.slane %v6253_v24, 1  ;;  %v6264_v43 = vrot.slane %v6263_v53, 2  ;;  %v7356_v1 = vsel %vm7302_vm2, %v7229_v62, %v7355_v39  ;;  %v3856_v0 = vrot.slane %v10616_v30, 4 }
 0x3c3   : > { %v3847_v54 = vmax.f32 %v3845_v51, %v3846_v10  ;;  %v3852_v16 = vrot.slane %v3851_v58, 2  ;;  %v3862_v11 = vrot.slane %v10619_v22, 4  ;;  %v3868_v9 = vrot.slane %v10621_v8, 4 }
 0x3c4   : > { %v6255_v33 = vadd.f32 %v6254_v17, %v6253_v24  ;;  %v6265_v27 = vadd.f32 %v6264_v43, %v6263_v53  ;;  %v3857_v60 = vmax.f32 %v10616_v30, %v3856_v0  ;;  %v4394_v2 = vsub.f32 %v10606_v48, %v10649_v6 }
 0x3c5   : > { %v3848_v44 = vrot.slane %v3847_v54, 1  ;;  %v3853_v40 = vmax.f32 %v3851_v58, %v3852_v16  ;;  %v3863_v29 = vmax.f32 %v10619_v22, %v3862_v11  ;;  %v3869_v56 = vmax.f32 %v10621_v8, %v3868_v9 }
 0x3c6   : > { %v6266_v23 = vrot.slane %v6265_v27, 1  ;;  %v7852_v35 = vpack.c.bf16 %v6255_v33, %v6255_v33  ;;  %v3858_v41 = vrot.slane %v3857_v60, 2  ;;  %v4395_v63 = vsub.f32 %v10608_v59, %v10652_v26 }
 0x3c7   : > { %v3849_v7 = vmax.f32 %v3847_v54, %v3848_v44  ;;  %v3854_v32 = vrot.slane %v3853_v40, 1  ;;  %v3864_v57 = vrot.slane %v3863_v29, 2  ;;  %v3870_v21 = vrot.slane %v3869_v56, 2  ;;  %v1731_v54 = vpop.f32.mrf.mxu1 }
 0x3c8   : > { %v8353_v50 = vpop.eup %8352  ;;  %v6267_v34 = vadd.f32 %v6266_v23, %v6265_v27  ;;  %v7230_v42 = vunpack.c.l.b16 %v7852_v35  ;;  %v3859_v48 = vmax.f32 %v3857_v60, %v3858_v41  ;;  %v4396_v6 = vsub.f32 %v10610_v61, %v3843_v28 }
 0x3c9   : > { %v5695_v18 = vmul.f32 %v8353_v50, %v10631_v46  ;;  %v3855_v20 = vmax.f32 %v3853_v40, %v3854_v32  ;;  %v3865_v55 = vmax.f32 %v3863_v29, %v3864_v57  ;;  %v3871_v13 = vmax.f32 %v3869_v56, %v3870_v21 }
 0x3ca   : > { %v8355_v5 = vpop.eup %8354  ;;  %v7854_v19 = vpack.c.bf16 %v6267_v34, %v6267_v34  ;;  %v10678_v45 = vsel %vm7304_vm3, %v7230_v42, %v7356_v1  ;;  %v3860_v59 = vrot.slane %v3859_v48, 1  ;;  %v4397_v26 = vsub.f32 %v10612_v3, %v3849_v7 }
 0x3cb   : > { %v5697_v52 = vmul.f32 %v8355_v5, %v10641_v38  ;;  %v5823_v49 = vmul.f32 %v5695_v18, %v10348_v36  ;;  %v3866_v51 = vrot.slane %v3865_v55, 1  ;;  %v3872_v47 = vrot.slane %v3871_v13, 1 }
 0x3cc   : > { %v10683_v61 = vunpack.c.l.b16 %v7854_v19  ;;  %v3861_v46 = vmax.f32 %v3859_v48, %v3860_v59  ;;  %v4398_v24 = vsub.f32 %v10614_v12, %v3855_v20  ;;  %v4562_v53 = vmul.f32 1.442695, %v4394_v2 }
 0x3cd   : > { %v5825_v62 = vmul.f32 %v5697_v52, %v10464_v37  ;;  %v6256_v31 = vrot.slane %v5823_v49, 4  ;;  %v3867_v39 = vmax.f32 %v3865_v55, %v3866_v51  ;;  %v3873_v28 = vmax.f32 %v3871_v13, %v3872_v47  ;;  %v12467_v52 = vld [vmem:[#allocation40_spill] sm:$0xff]  ;;  %v12468_v51 = vld [vmem:[#allocation43_spill] sm:$0xff] }
 0x3ce   : > { %v4399_v10 = vsub.f32 %v10616_v30, %v3861_v46  ;;  %8356 = vpow2.f32 %v4562_v53  ;;  %v4564_v3 = vmul.f32 1.442695, %v4395_v63  ;;  %v4566_v38 = vmul.f32 1.442695, %v4396_v6  ;;  %v12469_v53 = vld [vmem:[#allocation46_spill] sm:$0xff] }
 0x3cf   : > { %v6257_v58 = vadd.f32 %v6256_v31, %v5823_v49  ;;  %v6268_v36 = vrot.slane %v5825_v62, 4  ;;  %v4400_v17 = vsub.f32 %v10619_v22, %v3867_v39  ;;  %v4401_v43 = vsub.f32 %v10621_v8, %v3873_v28  ;;  %v12470_v31 = vld [vmem:[#allocation49_spill] sm:$0xff] }
 0x3d0   : > { %8358 = vpow2.f32 %v4564_v3  ;;  %v4568_v1 = vmul.f32 1.442695, %v4397_v26  ;;  %v4570_v12 = vmul.f32 1.442695, %v4398_v24  ;;  %v4572_v0 = vmul.f32 1.442695, %v4399_v10 }
 0x3d1   : > { %v6258_v37 = vrot.slane %v6257_v58, 2  ;;  %v6269_v16 = vadd.f32 %v6268_v36, %v5825_v62  ;;  %8360 = vpow2.f32 %v4566_v38  ;;  %v4574_v11 = vmul.f32 1.442695, %v4400_v17  ;;  %v12471_v38 = vld [vmem:[#allocation52_spill] sm:$0xff]  ;;  %v12472_v36 = vld [vmem:[#allocation55_spill] sm:$0xff] }
 0x3d2   : > { %8362 = vpow2.f32 %v4568_v1  ;;  %v4576_v30 = vmul.f32 1.442695, %v4401_v43  ;;  %v2268_v9 = vcombine.high %v10604_v4, %v10604_v4  ;;  %v2275_v33 = vrot.slane %v10604_v4, %v9361_v25 }
 0x3d3   : > { %v6259_v22 = vadd.f32 %v6258_v37, %v6257_v58  ;;  %v6270_v27 = vrot.slane %v6269_v16, 2  ;;  %8364 = vpow2.f32 %v4570_v12  ;;  %v10695_v8 = vadd.f32 %v10601_v14, %v1731_v54  ;;  %v12473_v54 = vld [vmem:[#allocation58_spill] sm:$0xff] }
 0x3d4   : > { %8366 = vpow2.f32 %v4572_v0  ;;  %v2282_v60 = vrot.slane %v2268_v9, %v9361_v25  ;;  %v2283_v2 = vcombine.high %v2275_v33, %v2275_v33  ;;  %v2291_v44 = vrot.slane %v2275_v33, %v9361_v25 }
 0x3d5   : > { %v6260_v40 = vrot.slane %v6259_v22, 1  ;;  %v6271_v29 = vadd.f32 %v6270_v27, %v6269_v16  ;;  %8368 = vpow2.f32 %v4574_v11  ;;  %v2170_v56 = vcombine.high %v10695_v8, %v10695_v8 }
 0x3d6   : > { %8370 = vpow2.f32 %v4576_v30  ;;  %v2284_v4 = vcombine.high %v2282_v60, %v2282_v60  ;;  %v2298_v23 = vrot.slane %v2282_v60, %v9361_v25  ;;  %v2305_v35 = vrot.slane %v2283_v2, %v9361_v25  ;;  %v12474_v30 = vld [vmem:[#allocation60_spill] sm:$0xff] }
 0x3d7   : > { %v6261_v41 = vadd.f32 %v6260_v40, %v6259_v22  ;;  %v6272_v63 = vrot.slane %v6271_v29, 1  ;;  %v2313_v7 = vcombine.high %v2291_v44, %v2291_v44  ;;  %v2885_v32 = vrot.slane %v2291_v44, %v9366_v15 }
 0x3d8   : > { %v2312_v57 = vrot.slane %v2284_v4, %v9361_v25  ;;  %v2314_v21 = vcombine.high %v2298_v23, %v2298_v23  ;;  %v2315_v50 = vcombine.high %v2305_v35, %v2305_v35  ;;  %v2889_v34 = vrot.slane %v2305_v35, %v9366_v15 }
 0x3d9   : > { %v6273_v42 = vadd.f32 %v6272_v63, %v6271_v29  ;;  %v7853_v48 = vpack.c.bf16 %v6261_v41, %v6261_v41  ;;  %v2893_v6 = vrot.slane %v2313_v7, %v9366_v15  ;;  %v2901_v18 = vrot.slane %v2298_v23, %v9366_v15 }
 0x3da   : > { %v2316_v20 = vcombine.high %v2312_v57, %v2312_v57  ;;  %v2897_v55 = vrot.slane %v2315_v50, %v9366_v15  ;;  %v2905_v13 = vrot.slane %v2312_v57, %v9366_v15  ;;  %v2909_v5 = vrot.slane %v2314_v21, %v9366_v15 }
 0x3db   : > { %v10711_v19 = vpop.eup %8356  ;;  %v7855_v59 = vpack.c.bf16 %v6273_v42, %v6273_v42  ;;  %v7231_v26 = vunpack.c.l.b16 %v7853_v48  ;;  %v10714_v49 = vadd.f32 %v2885_v32, %v12467_v52  ;;  %v10717_v47 = vadd.f32 %v2889_v34, %v12468_v51 }
 0x3dc   : > { %v4978_v46 = vrot.slane %v10711_v19, 4  ;;  %v2913_v24 = vrot.slane %v2316_v20, %v9366_v15  ;;  %v10722_v62 = vadd.f32 %v2893_v6, %v12469_v53  ;;  %v10725_v39 = vadd.f32 %v2897_v55, %v12470_v31 }
 0x3dd   : > { %v10727_v28 = vpop.eup %8358  ;;  %v7233_v10 = vunpack.c.l.b16 %v7855_v59  ;;  %v7358_v3 = vsel %vm7306_vm4, %v7231_v26, %v10678_v45  ;;  %v10732_v58 = vadd.f32 %v2901_v18, %v12471_v38  ;;  %v10735_v17 = vadd.f32 %v2905_v13, %v12472_v36 }
 0x3de   : > { %v10737_v43 = vpop.eup %8360  ;;  %v7359_v1 = vsel %vm7308_vm5, %v10683_v61, %v7358_v3  ;;  %v4979_v12 = vadd.f32 %v10711_v19, %v4978_v46  ;;  %v4984_v0 = vrot.slane %v10727_v28, 4  ;;  %v10744_v37 = vadd.f32 %v2909_v5, %v12473_v54 }
 0x3df   : > { %v10746_v16 = vpop.eup %8362  ;;  %v7360_v45 = vsel %vm7310_vm6, %v7233_v10, %v7359_v1  ;;  %v4990_v11 = vrot.slane %v10737_v43, 4  ;;  %v10751_v9 = vadd.f32 %v2913_v24, %v12474_v30  ;;  %v10754_v33 = vmul.f32 0.01, %v10714_v49 }
 0x3e0   : > { %v10756_v61 = vpop.eup %8364  ;;  %v7424_v22 = vpack.c.b16 %v7360_v45, %v7360_v45  ;;  %v4980_v27 = vrot.slane %v4979_v12, 2  ;;  %v4985_v60 = vadd.f32 %v10727_v28, %v4984_v0  ;;  %v4996_v2 = vrot.slane %v10746_v16, 4 }
 0x3e1   : > { %v10760_v44 = vpop.eup %8366  ;;  %v4991_v40 = vadd.f32 %v10737_v43, %v4990_v11  ;;  %v5002_v29 = vrot.slane %v10756_v61, 4  ;;  %v3411_v4 = vmul.f32 0.01, %v10717_v47  ;;  %v3412_v23 = vmul.f32 0.01, %v10722_v62 }
 0x3e2   : > { %v10766_v35 = vpop.eup %8368  ;;  %7456 = vst [vmem:[%s9683_s26 + $0x1c] sm:$0xf] %v7424_v22  ;;  %v4981_v41 = vadd.f32 %v4980_v27, %v4979_v12  ;;  %v4986_v63 = vrot.slane %v4985_v60, 2  ;;  %v4997_v7 = vadd.f32 %v10746_v16, %v4996_v2  ;;  %v5008_v32 = vrot.slane %v10760_v44, 4 }
 0x3e3   : > { %v10771_v57 = vpop.eup %8370  ;;  %v4992_v21 = vrot.slane %v4991_v40, 2  ;;  %v5003_v50 = vadd.f32 %v10756_v61, %v5002_v29  ;;  %v5014_v34 = vrot.slane %v10766_v35, 4  ;;  %v3413_v42 = vmul.f32 0.01, %v10725_v39 }
 0x3e4   : > { %v4982_v48 = vrot.slane %v4981_v41, 1  ;;  %v4987_v6 = vadd.f32 %v4986_v63, %v4985_v60  ;;  %v4998_v18 = vrot.slane %v4997_v7, 2  ;;  %v5009_v20 = vadd.f32 %v10760_v44, %v5008_v32 }
 0x3e5   : > { %v4993_v55 = vadd.f32 %v4992_v21, %v4991_v40  ;;  %v5004_v13 = vrot.slane %v5003_v50, 2  ;;  %v5015_v5 = vadd.f32 %v10766_v35, %v5014_v34  ;;  %v5020_v59 = vrot.slane %v10771_v57, 4 }
 0x3e6   : > { %v4983_v26 = vadd.f32 %v4982_v48, %v4981_v41  ;;  %v4988_v52 = vrot.slane %v4987_v6, 1  ;;  %v4999_v51 = vadd.f32 %v4998_v18, %v4997_v7  ;;  %v5010_v46 = vrot.slane %v5009_v20, 2 }
 0x3e7   : > { %v4994_v24 = vrot.slane %v4993_v55, 1  ;;  %v5005_v53 = vadd.f32 %v5004_v13, %v5003_v50  ;;  %v5016_v31 = vrot.slane %v5015_v5, 2  ;;  %v5021_v10 = vadd.f32 %v10771_v57, %v5020_v59 }
 0x3e8   : > { %v4989_v3 = vadd.f32 %v4988_v52, %v4987_v6  ;;  %v5000_v38 = vrot.slane %v4999_v51, 1  ;;  %v5011_v36 = vadd.f32 %v5010_v46, %v5009_v20  ;;  %8372 = vrcp.f32 %v4983_v26 }
 0x3e9   : > { %v4995_v1 = vadd.f32 %v4994_v24, %v4993_v55  ;;  %v5006_v12 = vrot.slane %v5005_v53, 1  ;;  %v5017_v0 = vadd.f32 %v5016_v31, %v5015_v5  ;;  %v5022_v54 = vrot.slane %v5021_v10, 2 }
 0x3ea   : > { %v5001_v45 = vadd.f32 %v5000_v38, %v4999_v51  ;;  %v5012_v11 = vrot.slane %v5011_v36, 1  ;;  %8374 = vrcp.f32 %v4989_v3  ;;  %v3414_v30 = vmul.f32 0.01, %v10732_v58 }
 0x3eb   : > { %v5007_v22 = vadd.f32 %v5006_v12, %v5005_v53  ;;  %v5018_v27 = vrot.slane %v5017_v0, 1  ;;  %v5023_v60 = vadd.f32 %v5022_v54, %v5021_v10  ;;  %8376 = vrcp.f32 %v4995_v1 }
 0x3ec   : > { %v5013_v2 = vadd.f32 %v5012_v11, %v5011_v36  ;;  %8378 = vrcp.f32 %v5001_v45  ;;  %v3415_v40 = vmul.f32 0.01, %v10735_v17  ;;  %v3416_v29 = vmul.f32 0.01, %v10744_v37 }
 0x3ed   : > { %v5019_v41 = vadd.f32 %v5018_v27, %v5017_v0  ;;  %v5024_v63 = vrot.slane %v5023_v60, 1  ;;  %8380 = vrcp.f32 %v5007_v22  ;;  %v3417_v7 = vmul.f32 0.01, %v10751_v9 }
 0x3ee   : > { %8382 = vrcp.f32 %v5013_v2  ;;  %v10786_v32 = vmax.f32 %v10714_v49, %v10754_v33  ;;  %v10789_v21 = vmax.f32 %v10717_v47, %v3411_v4  ;;  %v10792_v50 = vmax.f32 %v10722_v62, %v3412_v23 }
 0x3ef   : > { %v5025_v34 = vadd.f32 %v5024_v63, %v5023_v60  ;;  %8384 = vrcp.f32 %v5019_v41  ;;  %v10795_v48 = vmax.f32 %v10725_v39, %v3413_v42  ;;  %v10798_v6 = vmax.f32 %v10732_v58, %v3414_v30  ;;  %v12475_v30 = vld [vmem:[#allocation146_spill] sm:$0xff] }
 0x3f0   : > { %v10801_v18 = vmax.f32 %v10735_v17, %v3415_v40  ;;  %v10804_v49 = vmax.f32 %v10744_v37, %v3416_v29  ;;  %v10807_v47 = vmax.f32 %v10751_v9, %v3417_v7  ;;  %v4066_v62 = vrot.slane %v10786_v32, 4 }
 0x3f1   : > { %8386 = vrcp.f32 %v5025_v34  ;;  %v4072_v33 = vrot.slane %v10789_v21, 4  ;;  %v4078_v39 = vrot.slane %v10792_v50, 4  ;;  %v4084_v4 = vrot.slane %v10795_v48, 4  ;;  %v12476_v34 = vld [vmem:[#allocation154_spill] sm:$0xff] }
 0x3f2   : > { %v4067_v58 = vmax.f32 %v10786_v32, %v4066_v62  ;;  %v4090_v17 = vrot.slane %v10798_v6, 4  ;;  %v4096_v23 = vrot.slane %v10801_v18, 4  ;;  %v4102_v37 = vrot.slane %v10804_v49, 4 }
 0x3f3   : > { %v4073_v9 = vmax.f32 %v10789_v21, %v4072_v33  ;;  %v4079_v42 = vmax.f32 %v10792_v50, %v4078_v39  ;;  %v4085_v20 = vmax.f32 %v10795_v48, %v4084_v4  ;;  %v4108_v55 = vrot.slane %v10807_v47, 4 }
 0x3f4   : > { %v4068_v13 = vrot.slane %v4067_v58, 2  ;;  %v4091_v5 = vmax.f32 %v10798_v6, %v4090_v17  ;;  %v10823_v59 = vmax.f32 %v10801_v18, %v4096_v23  ;;  %v10826_v26 = vmax.f32 %v10804_v49, %v4102_v37 }
 0x3f5   : > { %v8373_v52 = vpop.eup %8372  ;;  %v4074_v51 = vrot.slane %v4073_v9, 2  ;;  %v4080_v46 = vrot.slane %v4079_v42, 2  ;;  %v4086_v24 = vrot.slane %v4085_v20, 2  ;;  %v10829_v53 = vmax.f32 %v10807_v47, %v4108_v55 }
 0x3f6   : > { %v5674_v31 = vmul.f32 %v8373_v52, %v10711_v19  ;;  %v4069_v10 = vmax.f32 %v4067_v58, %v4068_v13  ;;  %v4092_v3 = vrot.slane %v4091_v5, 2  ;;  %v4098_v38 = vrot.slane %v10823_v59, 2  ;;  %v12477_v58 = vld [vmem:[#allocation158_spill] sm:$0xff] }
 0x3f7   : > { %v8375_v36 = vpop.eup %8374  ;;  %v4075_v1 = vmax.f32 %v4073_v9, %v4074_v51  ;;  %v4081_v12 = vmax.f32 %v4079_v42, %v4080_v46  ;;  %v4087_v0 = vmax.f32 %v4085_v20, %v4086_v24  ;;  %v4104_v54 = vrot.slane %v10826_v26, 2  ;;  %v12478_v42 = vld [vmem:[#allocation163_spill] sm:$0xff]  ;;  %v12480_v24 = vld [vmem:[#allocation14_spill] sm:$0xff] }
 0x3f8   : > { %v8377_v45 = vpop.eup %8376  ;;  %v5675_v11 = vmul.f32 %v8375_v36, %v10727_v28  ;;  %v5802_v22 = vmul.f32 %v5674_v31, %v12475_v30  ;;  %v4070_v27 = vrot.slane %v4069_v10, 1  ;;  %v10836_v60 = vmax.f32 %v4091_v5, %v4092_v3  ;;  %v12479_v5 = vld [vmem:[#allocation8_spill] sm:$0xff] }
 0x3f9   : > { %v8379_v2 = vpop.eup %8378  ;;  %v5676_v19 = vmul.f32 %v8377_v45, %v10737_v43  ;;  %v4076_v40 = vrot.slane %v4075_v1, 1  ;;  %v4082_v29 = vrot.slane %v4081_v12, 1  ;;  %v4088_v41 = vrot.slane %v4087_v0, 1 }
 0x3fa   : > { %v8381_v63 = vpop.eup %8380  ;;  %v5677_v7 = vmul.f32 %v8379_v2, %v10746_v16  ;;  %v5803_v62 = vmul.f32 %v5675_v11, %v12476_v34  ;;  %v6130_v33 = vrot.slane %v5802_v22, 4  ;;  %v10841_v39 = vmax.f32 %v4069_v10, %v4070_v27  ;;  %v12482_v2 = vld [vmem:[#allocation30_spill] sm:$0xff] }
 0x3fb   : > { %v8383_v28 = vpop.eup %8382  ;;  %v5678_v4 = vmul.f32 %v8381_v63, %v10756_v61  ;;  %v5804_v17 = vmul.f32 %v5676_v19, %v12477_v58  ;;  %v10845_v23 = vmax.f32 %v4075_v1, %v4076_v40  ;;  %v10847_v37 = vmax.f32 %v4081_v12, %v4082_v29 }
 0x3fc   : > { %v8385_v43 = vpop.eup %8384  ;;  %v5679_v9 = vmul.f32 %v8383_v28, %v10760_v44  ;;  %v5805_v20 = vmul.f32 %v5677_v7, %v12478_v42  ;;  %v6131_v16 = vadd.f32 %v6130_v33, %v5802_v22  ;;  %v6136_v55 = vrot.slane %v5803_v62, 4  ;;  %v12481_v44 = vld [vmem:[#allocation20_spill] sm:$0xff] }
 0x3fd   : > { %v5680_v13 = vmul.f32 %v8385_v43, %v10766_v35  ;;  %v5806_v52 = vmul.f32 %v5678_v4, %v12479_v5  ;;  %v6142_v51 = vrot.slane %v5804_v17, 4  ;;  %v10853_v46 = vmax.f32 %v4087_v0, %v4088_v41 }
 0x3fe   : > { %v8387_v61 = vpop.eup %8386  ;;  %v5807_v31 = vmul.f32 %v5679_v9, %v12480_v24  ;;  %v6132_v10 = vrot.slane %v6131_v16, 2  ;;  %v6137_v3 = vadd.f32 %v6136_v55, %v5803_v62  ;;  %v6148_v36 = vrot.slane %v5805_v20, 4 }
 0x3ff   : > { %v5681_v1 = vmul.f32 %v8387_v61, %v10771_v57  ;;  %v5808_v12 = vmul.f32 %v5680_v13, %v12481_v44  ;;  %v6143_v45 = vadd.f32 %v6142_v51, %v5804_v17  ;;  %v6154_v11 = vrot.slane %v5806_v52, 4 }
 0x400   : > { %v6133_v30 = vadd.f32 %v6132_v10, %v6131_v16  ;;  %v6138_v22 = vrot.slane %v6137_v3, 2  ;;  %v6149_v35 = vadd.f32 %v6148_v36, %v5805_v20  ;;  %v6160_v27 = vrot.slane %v5807_v31, 4 }
 0x401   : > { %v5809_v19 = vmul.f32 %v5681_v1, %v12482_v2  ;;  %v6144_v0 = vrot.slane %v6143_v45, 2  ;;  %v6155_v40 = vadd.f32 %v6154_v11, %v5806_v52  ;;  %v6166_v29 = vrot.slane %v5808_v12, 4 }
 0x402   : > { %v6134_v41 = vrot.slane %v6133_v30, 1  ;;  %v6139_v63 = vadd.f32 %v6138_v22, %v6137_v3  ;;  %v6150_v7 = vrot.slane %v6149_v35, 2  ;;  %v6161_v34 = vadd.f32 %v6160_v27, %v5807_v31 }
 0x403   : > { %v6145_v62 = vadd.f32 %v6144_v0, %v6143_v45  ;;  %v6156_v33 = vrot.slane %v6155_v40, 2  ;;  %v6167_v57 = vadd.f32 %v6166_v29, %v5808_v12  ;;  %v6172_v28 = vrot.slane %v5809_v19, 4 }
 0x404   : > { %v6135_v4 = vadd.f32 %v6134_v41, %v6133_v30  ;;  %v6140_v58 = vrot.slane %v6139_v63, 1  ;;  %v6151_v17 = vadd.f32 %v6150_v7, %v6149_v35  ;;  %v6162_v43 = vrot.slane %v6161_v34, 2 }
 0x405   : > { %v6146_v9 = vrot.slane %v6145_v62, 1  ;;  %v6157_v42 = vadd.f32 %v6156_v33, %v6155_v40  ;;  %v6168_v20 = vrot.slane %v6167_v57, 2  ;;  %v6173_v16 = vadd.f32 %v6172_v28, %v5809_v19 }
 0x406   : > { %v6141_v55 = vadd.f32 %v6140_v58, %v6139_v63  ;;  %v6152_v13 = vrot.slane %v6151_v17, 1  ;;  %v6163_v5 = vadd.f32 %v6162_v43, %v6161_v34  ;;  %v7832_v52 = vpack.c.bf16 %v6135_v4, %v6135_v4 }
 0x407   : > { %v6147_v51 = vadd.f32 %v6146_v9, %v6145_v62  ;;  %v6158_v61 = vrot.slane %v6157_v42, 1  ;;  %v6169_v24 = vadd.f32 %v6168_v20, %v6167_v57  ;;  %v6174_v31 = vrot.slane %v6173_v16, 2 }
 0x408   : > { %v6153_v10 = vadd.f32 %v6152_v13, %v6151_v17  ;;  %v6164_v3 = vrot.slane %v6163_v5, 1  ;;  %v7833_v36 = vpack.c.bf16 %v6141_v55, %v6141_v55  ;;  %v7210_v1 = vunpack.c.l.b16 %v7832_v52 }
 0x409   : > { %v6159_v44 = vadd.f32 %v6158_v61, %v6157_v42  ;;  %v6170_v12 = vrot.slane %v6169_v24, 1  ;;  %v6175_v45 = vadd.f32 %v6174_v31, %v6173_v16  ;;  %v7834_v11 = vpack.c.bf16 %v6147_v51, %v6147_v51 }
 0x40a   : > { %v6165_v30 = vadd.f32 %v6164_v3, %v6163_v5  ;;  %v7835_v22 = vpack.c.bf16 %v6153_v10, %v6153_v10  ;;  %v7211_v35 = vunpack.c.l.b16 %v7833_v36  ;;  %v4094_v27 = vrot.slane %v10836_v60, 1 }
 0x40b   : > { %v6171_v2 = vadd.f32 %v6170_v12, %v6169_v24  ;;  %v6176_v19 = vrot.slane %v6175_v45, 1  ;;  %v7836_v0 = vpack.c.bf16 %v6159_v44, %v6159_v44  ;;  %v7212_v40 = vunpack.c.l.b16 %v7834_v11  ;;  %v10898_v12 = vpop.f32.mrf.mxu0 }
 0x40c   : > { %v7837_v29 = vpack.c.bf16 %v6165_v30, %v6165_v30  ;;  %v7213_v41 = vunpack.c.l.b16 %v7835_v22  ;;  %v7340_v63 = vsel %vm7298_vm0, %v7211_v35, %v7210_v1  ;;  %v4095_v7 = vmax.f32 %v10836_v60, %v4094_v27 }
 0x40d   : > { %v6177_v34 = vadd.f32 %v6176_v19, %v6175_v45  ;;  %v7838_v62 = vpack.c.bf16 %v6171_v2, %v6171_v2  ;;  %v7214_v33 = vunpack.c.l.b16 %v7836_v0  ;;  %v7341_v57 = vsel %vm7300_vm1, %v7212_v40, %v7340_v63  ;;  %v1213_v19 = vpop.f32.mrf.mxu0 }
 0x40e   : > { %v7215_v28 = vunpack.c.l.b16 %v7837_v29  ;;  %v7342_v4 = vsel %vm7302_vm2, %v7213_v41, %v7341_v57  ;;  %v4099_v58 = vmax.f32 %v10823_v59, %v4098_v38  ;;  %v4105_v17 = vmax.f32 %v10826_v26, %v4104_v54 }
 0x40f   : > { %v7839_v43 = vpack.c.bf16 %v6177_v34, %v6177_v34  ;;  %v7216_v9 = vunpack.c.l.b16 %v7838_v62  ;;  %v7343_v60 = vsel %vm7304_vm3, %v7214_v33, %v7342_v4  ;;  %v4110_v42 = vrot.slane %v10829_v53, 2  ;;  %v12483_v34 = vld [vmem:[#allocation7_spill] sm:$0xff] }
 0x410   : > { %v7344_v20 = vsel %vm7306_vm4, %v7215_v28, %v7343_v60  ;;  %v4100_v16 = vrot.slane %v4099_v58, 1  ;;  %v4106_v55 = vrot.slane %v4105_v17, 1  ;;  %v4434_v13 = vsub.f32 %v10786_v32, %v10841_v39  ;;  %v12484_v28 = vld [vmem:[#allocation10_spill] sm:$0xff] }
 0x411   : > { %v7217_v5 = vunpack.c.l.b16 %v7839_v43  ;;  %v7345_v59 = vsel %vm7308_vm5, %v7216_v9, %v7344_v20  ;;  %v4111_v38 = vmax.f32 %v10829_v53, %v4110_v42  ;;  %v4435_v26 = vsub.f32 %v10789_v21, %v10845_v23  ;;  %v12485_v43 = vld [vmem:[#allocation13_spill] sm:$0xff] }
 0x412   : > { %v4101_v54 = vmax.f32 %v4099_v58, %v4100_v16  ;;  %v4107_v52 = vmax.f32 %v4105_v17, %v4106_v55  ;;  %v4436_v51 = vsub.f32 %v10792_v50, %v10847_v37  ;;  %v4437_v61 = vsub.f32 %v10795_v48, %v10853_v46  ;;  %v7964_v50 = vpop.f32.mrf.mxu1  ;;  %v12486_v16 = vld [vmem:[#allocation16_spill] sm:$0xff] }
 0x413   : > { %v7346_v24 = vsel %vm7310_vm6, %v7217_v5, %v7345_v59  ;;  %v4112_v32 = vrot.slane %v4111_v38, 1  ;;  %v4438_v39 = vsub.f32 %v10798_v6, %v4095_v7  ;;  %v4642_v31 = vmul.f32 1.442695, %v4434_v13 }
 0x414   : > { %v7422_v10 = vpack.c.b16 %v7346_v24, %v7346_v24  ;;  %v4439_v53 = vsub.f32 %v10801_v18, %v4101_v54  ;;  %v4440_v21 = vsub.f32 %v10804_v49, %v4107_v52  ;;  %v4644_v23 = vmul.f32 1.442695, %v4435_v26 }
 0x415   : > { %v4113_v3 = vmax.f32 %v4111_v38, %v4112_v32  ;;  %8388 = vpow2.f32 %v4642_v31  ;;  %v4646_v36 = vmul.f32 1.442695, %v4436_v51  ;;  %v4648_v1 = vmul.f32 1.442695, %v4437_v61 }
 0x416   : > { %7454 = vst [vmem:[%s9683_s26 + $0x14] sm:$0xf] %v7422_v10  ;;  %8390 = vpow2.f32 %v4644_v23  ;;  %v4650_v48 = vmul.f32 1.442695, %v4438_v39  ;;  %v4652_v37 = vmul.f32 1.442695, %v4439_v53  ;;  %v10891_v6 = vrot.slane %v10695_v8, %v9361_v25 }
 0x417   : > { %v4654_v46 = vmul.f32 1.442695, %v4440_v21  ;;  %v4441_v44 = vsub.f32 %v10807_v47, %v4113_v3  ;;  %8392 = vpow2.f32 %v4646_v36  ;;  %v2184_v18 = vrot.slane %v2170_v56, %v9361_v25 }
 0x418   : > { %8394 = vpow2.f32 %v4648_v1  ;;  %v1743_v49 = vadd.f32 %v10601_v14, %v7964_v50  ;;  %v10902_v47 = vrot.slane %v10891_v6, %v9361_v25  ;;  %v2185_v8 = vcombine.high %v10891_v6, %v10891_v6 }
 0x419   : > { %8396 = vpow2.f32 %v4650_v48  ;;  %v4656_v45 = vmul.f32 1.442695, %v4441_v44  ;;  %v2186_v11 = vcombine.high %v2184_v18, %v2184_v18  ;;  %v2200_v30 = vrot.slane %v2184_v18, %v9361_v25 }
 0x41a   : > { %8398 = vpow2.f32 %v4652_v37  ;;  %v2317_v22 = vcombine.high %v1743_v49, %v1743_v49  ;;  %v2324_v14 = vrot.slane %v1743_v49, %v9361_v25  ;;  %v2821_v27 = vrot.slane %v10902_v47, %v9366_v15 }
 0x41b   : > { %8400 = vpow2.f32 %v4654_v46  ;;  %v2214_v56 = vrot.slane %v2186_v11, %v9361_v25  ;;  %v2216_v35 = vcombine.high %v2200_v30, %v2200_v30  ;;  %v2837_v2 = vrot.slane %v2200_v30, %v9366_v15 }
 0x41c   : > { %8402 = vpow2.f32 %v4656_v45  ;;  %v2331_v29 = vrot.slane %v2317_v22, %v9361_v25  ;;  %v2332_v41 = vcombine.high %v2324_v14, %v2324_v14  ;;  %v3266_v7 = vadd.f32 %v2821_v27, %v1213_v19 }
 0x41d   : > { %v2218_v0 = vcombine.high %v2214_v56, %v2214_v56  ;;  %v2841_v40 = vrot.slane %v2214_v56, %v9366_v15  ;;  %v2845_v63 = vrot.slane %v2216_v35, %v9366_v15  ;;  %v3270_v62 = vadd.f32 %v2837_v2, %v12483_v34 }
 0x41e   : > { %v10917_v33 = vrot.slane %v2324_v14, %v9361_v25  ;;  %v2333_v58 = vcombine.high %v2331_v29, %v2331_v29  ;;  %v10922_v17 = vrot.slane %v2331_v29, %v9361_v25  ;;  %v3394_v60 = vmul.f32 0.01, %v3266_v7 }
 0x41f   : > { %v2849_v57 = vrot.slane %v2218_v0, %v9366_v15  ;;  %v3271_v4 = vadd.f32 %v2841_v40, %v12484_v28  ;;  %v3272_v9 = vadd.f32 %v2845_v63, %v12485_v43  ;;  %v3398_v42 = vmul.f32 0.01, %v3270_v62 }
 0x420   : > { %v10926_v20 = vrot.slane %v2332_v41, %v9361_v25  ;;  %v10930_v5 = vrot.slane %v2333_v58, %v9361_v25  ;;  %v2362_v59 = vcombine.high %v10917_v33, %v10917_v33  ;;  %v10936_v54 = vmax.f32 %v3266_v7, %v3394_v60 }
 0x421   : > { %v3273_v55 = vadd.f32 %v2849_v57, %v12486_v16  ;;  %v3399_v13 = vmul.f32 0.01, %v3271_v4  ;;  %v3400_v26 = vmul.f32 0.01, %v3272_v9  ;;  %v10938_v52 = vmax.f32 %v3270_v62, %v3398_v42 }
 0x422   : > { %v10934_v38 = vpop.eup %8388  ;;  %v2363_v51 = vcombine.high %v10922_v17, %v10922_v17  ;;  %v2364_v31 = vcombine.high %v10926_v20, %v10926_v20  ;;  %v3970_v23 = vrot.slane %v10936_v54, 4 }
 0x423   : > { %v10942_v61 = vpop.eup %8390  ;;  %v5218_v24 = vrot.slane %v10934_v38, 4  ;;  %v3401_v32 = vmul.f32 0.01, %v3273_v55  ;;  %v10945_v39 = vmax.f32 %v3271_v4, %v3399_v13  ;;  %v10952_v21 = vmax.f32 %v3272_v9, %v3400_v26 }
 0x424   : > { %v10949_v10 = vpop.eup %8392  ;;  %v5224_v53 = vrot.slane %v10942_v61, 4  ;;  %v3994_v3 = vrot.slane %v10938_v52, 4  ;;  %v3971_v49 = vmax.f32 %v10936_v54, %v3970_v23 }
 0x425   : > { %v10956_v36 = vpop.eup %8394  ;;  %v5219_v1 = vadd.f32 %v10934_v38, %v5218_v24  ;;  %v5230_v50 = vrot.slane %v10949_v10, 4  ;;  %v10960_v48 = vmax.f32 %v3273_v55, %v3401_v32  ;;  %v4000_v37 = vrot.slane %v10945_v39, 4 }
 0x426   : > { %v10963_v46 = vpop.eup %8396  ;;  %v5225_v44 = vadd.f32 %v10942_v61, %v5224_v53  ;;  %v5236_v18 = vrot.slane %v10956_v36, 4  ;;  %v3995_v45 = vmax.f32 %v10938_v52, %v3994_v3  ;;  %v3972_v0 = vrot.slane %v3971_v49, 2 }
 0x427   : > { %v10969_v11 = vpop.eup %8398  ;;  %v5220_v30 = vrot.slane %v5219_v1, 2  ;;  %v5231_v22 = vadd.f32 %v10949_v10, %v5230_v50  ;;  %v5242_v56 = vrot.slane %v10963_v46, 4  ;;  %v4001_v14 = vmax.f32 %v10945_v39, %v4000_v37 }
 0x428   : > { %v10974_v35 = vpop.eup %8400  ;;  %v5226_v27 = vrot.slane %v5225_v44, 2  ;;  %v5237_v2 = vadd.f32 %v10956_v36, %v5236_v18  ;;  %v5248_v19 = vrot.slane %v10969_v11, 4 }
 0x429   : > { %v10978_v40 = vpop.eup %8402  ;;  %v5221_v29 = vadd.f32 %v5220_v30, %v5219_v1  ;;  %v5232_v41 = vrot.slane %v5231_v22, 2  ;;  %v5243_v63 = vadd.f32 %v10963_v46, %v5242_v56  ;;  %v5254_v7 = vrot.slane %v10974_v35, 4 }
 0x42a   : > { %v5227_v34 = vadd.f32 %v5226_v27, %v5225_v44  ;;  %v5238_v62 = vrot.slane %v5237_v2, 2  ;;  %v5249_v57 = vadd.f32 %v10969_v11, %v5248_v19  ;;  %v5260_v28 = vrot.slane %v10978_v40, 4 }
 0x42b   : > { %v5222_v4 = vrot.slane %v5221_v29, 1  ;;  %v5233_v58 = vadd.f32 %v5232_v41, %v5231_v22  ;;  %v5244_v43 = vrot.slane %v5243_v63, 2  ;;  %v5255_v9 = vadd.f32 %v10974_v35, %v5254_v7 }
 0x42c   : > { %v5228_v60 = vrot.slane %v5227_v34, 1  ;;  %v5239_v42 = vadd.f32 %v5238_v62, %v5237_v2  ;;  %v5250_v16 = vrot.slane %v5249_v57, 2  ;;  %v5261_v55 = vadd.f32 %v10978_v40, %v5260_v28 }
 0x42d   : > { %v5223_v13 = vadd.f32 %v5222_v4, %v5221_v29  ;;  %v5234_v26 = vrot.slane %v5233_v58, 1  ;;  %v5245_v24 = vadd.f32 %v5244_v43, %v5243_v63  ;;  %v5256_v32 = vrot.slane %v5255_v9, 2 }
 0x42e   : > { %v5229_v53 = vadd.f32 %v5228_v60, %v5227_v34  ;;  %v5240_v23 = vrot.slane %v5239_v42, 1  ;;  %v5251_v3 = vadd.f32 %v5250_v16, %v5249_v57  ;;  %v5262_v1 = vrot.slane %v5261_v55, 2 }
 0x42f   : > { %v5235_v50 = vadd.f32 %v5234_v26, %v5233_v58  ;;  %v5246_v37 = vrot.slane %v5245_v24, 1  ;;  %v5257_v44 = vadd.f32 %v5256_v32, %v5255_v9  ;;  %8404 = vrcp.f32 %v5223_v13 }
 0x430   : > { %v5241_v18 = vadd.f32 %v5240_v23, %v5239_v42  ;;  %v5252_v30 = vrot.slane %v5251_v3, 1  ;;  %v5263_v22 = vadd.f32 %v5262_v1, %v5261_v55  ;;  %8406 = vrcp.f32 %v5229_v53 }
 0x431   : > { %v5247_v56 = vadd.f32 %v5246_v37, %v5245_v24  ;;  %v5258_v27 = vrot.slane %v5257_v44, 1  ;;  %8408 = vrcp.f32 %v5235_v50  ;;  %v3973_v2 = vmax.f32 %v3971_v49, %v3972_v0 }
 0x432   : > { %v5253_v19 = vadd.f32 %v5252_v30, %v5251_v3  ;;  %v5264_v29 = vrot.slane %v5263_v22, 1  ;;  %8410 = vrcp.f32 %v5241_v18  ;;  %v3996_v41 = vrot.slane %v3995_v45, 2  ;;  %v12487_v18 = vld [vmem:[#allocation62_spill] sm:$0xff] }
 0x433   : > { %v5259_v63 = vadd.f32 %v5258_v27, %v5257_v44  ;;  %8412 = vrcp.f32 %v5247_v56  ;;  %v3974_v7 = vrot.slane %v3973_v2, 1  ;;  %v4002_v34 = vrot.slane %v4001_v14, 2 }
 0x434   : > { %v5265_v62 = vadd.f32 %v5264_v29, %v5263_v22  ;;  %8414 = vrcp.f32 %v5253_v19  ;;  %v3997_v57 = vmax.f32 %v3995_v45, %v3996_v41  ;;  %v4006_v28 = vrot.slane %v10952_v21, 4 }
 0x435   : > { %8416 = vrcp.f32 %v5259_v63  ;;  %v3975_v4 = vmax.f32 %v3973_v2, %v3974_v7  ;;  %v4003_v58 = vmax.f32 %v4001_v14, %v4002_v34  ;;  %v4012_v43 = vrot.slane %v10960_v48, 4  ;;  %v12488_v2 = vld [vmem:[#allocation64_spill] sm:$0xff]  ;;  %v12489_v63 = vld [vmem:[#allocation66_spill] sm:$0xff] }
 0x436   : > { %8418 = vrcp.f32 %v5265_v62  ;;  %v3998_v49 = vrot.slane %v3997_v57, 1  ;;  %v4007_v0 = vmax.f32 %v10952_v21, %v4006_v28  ;;  %v2365_v9 = vcombine.high %v10930_v5, %v10930_v5 }
 0x437   : > { %v4004_v60 = vrot.slane %v4003_v58, 1  ;;  %v4013_v42 = vmax.f32 %v10960_v48, %v4012_v43  ;;  %v4418_v16 = vsub.f32 %v10936_v54, %v3975_v4  ;;  %v2917_v45 = vrot.slane %v10917_v33, %v9366_v15  ;;  %v12491_v43 = vld [vmem:[#allocation42_spill] sm:$0xff] }
 0x438   : > { %v3999_v55 = vmax.f32 %v3997_v57, %v3998_v49  ;;  %v4008_v13 = vrot.slane %v4007_v0, 2  ;;  %v2921_v14 = vrot.slane %v10926_v20, %v9366_v15  ;;  %v2925_v26 = vrot.slane %v2362_v59, %v9366_v15  ;;  %v12490_v57 = vld [vmem:[#allocation39_spill] sm:$0xff] }
 0x439   : > { %v4005_v24 = vmax.f32 %v4003_v58, %v4004_v60  ;;  %v4014_v32 = vrot.slane %v4013_v42, 2  ;;  %v4610_v53 = vmul.f32 1.442695, %v4418_v16  ;;  %v2929_v54 = vrot.slane %v2364_v31, %v9366_v15  ;;  %v12493_v16 = vld [vmem:[#allocation45_spill] sm:$0xff] }
 0x43a   : > { %v4009_v23 = vmax.f32 %v4007_v0, %v4008_v13  ;;  %v4422_v3 = vsub.f32 %v10938_v52, %v3999_v55  ;;  %v2933_v1 = vrot.slane %v10922_v17, %v9366_v15  ;;  %v2937_v50 = vrot.slane %v10930_v5, %v9366_v15  ;;  %v12492_v0 = vld [vmem:[#allocation68_spill] sm:$0xff] }
 0x43b   : > { %v4015_v37 = vmax.f32 %v4013_v42, %v4014_v32  ;;  %v4423_v33 = vsub.f32 %v10945_v39, %v4005_v24  ;;  %8420 = vpow2.f32 %v4610_v53  ;;  %v11015_v59 = vrot.slane %v2363_v51, %v9366_v15 }
 0x43c   : > { %v8405_v20 = vpop.eup %8404  ;;  %v4010_v31 = vrot.slane %v4009_v23, 1  ;;  %v4618_v44 = vmul.f32 1.442695, %v4422_v3  ;;  %v11018_v52 = vrot.slane %v2365_v9, %v9366_v15  ;;  %v11021_v30 = vadd.f32 %v2917_v45, %v12487_v18  ;;  %v12497_v18 = vld [vmem:[#allocation57_spill] sm:$0xff] }
 0x43d   : > { %v8407_v22 = vpop.eup %8406  ;;  %v5714_v56 = vmul.f32 %v8405_v20, %v10934_v38  ;;  %v4016_v39 = vrot.slane %v4015_v37, 1  ;;  %v4620_v27 = vmul.f32 1.442695, %v4423_v33  ;;  %v11025_v19 = vadd.f32 %v2921_v14, %v12488_v2  ;;  %v12496_v33 = vld [vmem:[#allocation54_spill] sm:$0xff] }
 0x43e   : > { %v8409_v29 = vpop.eup %8408  ;;  %v5715_v51 = vmul.f32 %v8407_v22, %v10942_v61  ;;  %v4011_v41 = vmax.f32 %v4009_v23, %v4010_v31  ;;  %8422 = vpow2.f32 %v4618_v44  ;;  %v11029_v7 = vadd.f32 %v2925_v26, %v12489_v63 }
 0x43f   : > { %v8411_v34 = vpop.eup %8410  ;;  %v5716_v62 = vmul.f32 %v8409_v29, %v10949_v10  ;;  %v5842_v28 = vmul.f32 %v5714_v56, %v12490_v57  ;;  %v11033_v4 = vmax.f32 %v4015_v37, %v4016_v39  ;;  %8424 = vpow2.f32 %v4620_v27  ;;  %v12498_v27 = vld [vmem:[#allocation59_spill] sm:$0xff] }
 0x440   : > { %v8413_v38 = vpop.eup %8412  ;;  %v5717_v58 = vmul.f32 %v8411_v34, %v10956_v36  ;;  %v5843_v49 = vmul.f32 %v5715_v51, %v12491_v43  ;;  %v4424_v61 = vsub.f32 %v10952_v21, %v4011_v41  ;;  %v11039_v9 = vadd.f32 %v2929_v54, %v12492_v0  ;;  %v12494_v36 = vld [vmem:[#allocation48_spill] sm:$0xff]  ;;  %v12495_v54 = vld [vmem:[#allocation51_spill] sm:$0xff] }
 0x441   : > { %v8415_v60 = vpop.eup %8414  ;;  %v5718_v42 = vmul.f32 %v8413_v38, %v10963_v46  ;;  %v5844_v10 = vmul.f32 %v5716_v62, %v12493_v16  ;;  %v6370_v45 = vrot.slane %v5842_v28, 4  ;;  %v4425_v55 = vsub.f32 %v10960_v48, %v11033_v4 }
 0x442   : > { %v8417_v13 = vpop.eup %8416  ;;  %v5719_v14 = vmul.f32 %v8415_v60, %v10969_v11  ;;  %v5845_v26 = vmul.f32 %v5717_v58, %v12494_v36  ;;  %v6376_v24 = vrot.slane %v5843_v49, 4  ;;  %v11047_v32 = vmul.f32 1.442695, %v4424_v61 }
 0x443   : > { %v8419_v21 = vpop.eup %8418  ;;  %v5720_v53 = vmul.f32 %v8417_v13, %v10974_v35  ;;  %v5846_v23 = vmul.f32 %v5718_v42, %v12495_v54  ;;  %v6371_v46 = vadd.f32 %v6370_v45, %v5842_v28  ;;  %v6382_v3 = vrot.slane %v5844_v10, 4 }
 0x444   : > { %v5721_v37 = vmul.f32 %v8419_v21, %v10978_v40  ;;  %v5847_v20 = vmul.f32 %v5719_v14, %v12496_v33  ;;  %v6377_v31 = vadd.f32 %v6376_v24, %v5843_v49  ;;  %v6388_v44 = vrot.slane %v5845_v26, 4 }
 0x445   : > { %v5848_v11 = vmul.f32 %v5720_v53, %v12497_v18  ;;  %v6372_v22 = vrot.slane %v6371_v46, 2  ;;  %v6383_v56 = vadd.f32 %v6382_v3, %v5844_v10  ;;  %v6394_v39 = vrot.slane %v5846_v23, 4 }
 0x446   : > { %v5849_v2 = vmul.f32 %v5721_v37, %v12498_v27  ;;  %v6378_v29 = vrot.slane %v6377_v31, 2  ;;  %v6389_v51 = vadd.f32 %v6388_v44, %v5845_v26  ;;  %v6400_v35 = vrot.slane %v5847_v20, 4 }
 0x447   : > { %v6373_v41 = vadd.f32 %v6372_v22, %v6371_v46  ;;  %v6384_v63 = vrot.slane %v6383_v56, 2  ;;  %v6395_v34 = vadd.f32 %v6394_v39, %v5846_v23  ;;  %v6406_v62 = vrot.slane %v5848_v11, 4 }
 0x448   : > { %v11055_v57 = vpop.eup %8420  ;;  %v6379_v40 = vadd.f32 %v6378_v29, %v6377_v31  ;;  %v6390_v28 = vrot.slane %v6389_v51, 2  ;;  %v6401_v38 = vadd.f32 %v6400_v35, %v5847_v20  ;;  %v6412_v58 = vrot.slane %v5849_v2, 4 }
 0x449   : > { %v6374_v43 = vrot.slane %v6373_v41, 1  ;;  %v6385_v49 = vadd.f32 %v6384_v63, %v6383_v56  ;;  %v6396_v61 = vrot.slane %v6395_v34, 2  ;;  %v6407_v0 = vadd.f32 %v6406_v62, %v5848_v11 }
 0x44a   : > { %v6380_v60 = vrot.slane %v6379_v40, 1  ;;  %v6391_v42 = vadd.f32 %v6390_v28, %v6389_v51  ;;  %v6402_v16 = vrot.slane %v6401_v38, 2  ;;  %v6413_v10 = vadd.f32 %v6412_v58, %v5849_v2 }
 0x44b   : > { %v11057_v45 = vpop.eup %8422  ;;  %v6375_v13 = vadd.f32 %v6374_v43, %v6373_v41  ;;  %v6386_v14 = vrot.slane %v6385_v49, 1  ;;  %v6397_v36 = vadd.f32 %v6396_v61, %v6395_v34  ;;  %v6408_v26 = vrot.slane %v6407_v0, 2 }
 0x44c   : > { %v11059_v24 = vpop.eup %8424  ;;  %v6381_v21 = vadd.f32 %v6380_v60, %v6379_v40  ;;  %v6392_v53 = vrot.slane %v6391_v42, 1  ;;  %v6403_v54 = vadd.f32 %v6402_v16, %v6401_v38  ;;  %v6414_v23 = vrot.slane %v6413_v10, 2 }
 0x44d   : > { %v6387_v46 = vadd.f32 %v6386_v14, %v6385_v49  ;;  %v6398_v3 = vrot.slane %v6397_v36, 1  ;;  %v6409_v37 = vadd.f32 %v6408_v26, %v6407_v0  ;;  %v7872_v33 = vpack.c.bf16 %v6375_v13, %v6375_v13  ;;  %v12499_v26 = vld [vmem:[#allocation70_spill] sm:$0xff] }
 0x44e   : > { %v6393_v20 = vadd.f32 %v6392_v53, %v6391_v42  ;;  %v6404_v31 = vrot.slane %v6403_v54, 1  ;;  %v6415_v44 = vadd.f32 %v6414_v23, %v6413_v10  ;;  %v7873_v18 = vpack.c.bf16 %v6381_v21, %v6381_v21  ;;  %v12500_v53 = vld [vmem:[#allocation72_spill] sm:$0xff] }
 0x44f   : > { %v6399_v11 = vadd.f32 %v6398_v3, %v6397_v36  ;;  %v6410_v22 = vrot.slane %v6409_v37, 1  ;;  %v7874_v56 = vpack.c.bf16 %v6387_v46, %v6387_v46  ;;  %v7250_v39 = vunpack.c.l.b16 %v7872_v33 }
 0x450   : > { %v6405_v27 = vadd.f32 %v6404_v31, %v6403_v54  ;;  %v6416_v2 = vrot.slane %v6415_v44, 1  ;;  %v7875_v29 = vpack.c.bf16 %v6393_v20, %v6393_v20  ;;  %v7251_v51 = vunpack.c.l.b16 %v7873_v18 }
 0x451   : > { %v6411_v35 = vadd.f32 %v6410_v22, %v6409_v37  ;;  %v7876_v41 = vpack.c.bf16 %v6399_v11, %v6399_v11  ;;  %v7252_v63 = vunpack.c.l.b16 %v7874_v56  ;;  %8426 = vpow2.f32 %v11047_v32  ;;  %v12501_v37 = vld [vmem:[#allocation74_spill] sm:$0xff] }
 0x452   : > { %v6417_v34 = vadd.f32 %v6416_v2, %v6415_v44  ;;  %v7877_v62 = vpack.c.bf16 %v6405_v27, %v6405_v27  ;;  %v7253_v40 = vunpack.c.l.b16 %v7875_v29  ;;  %v7375_v28 = vsel %vm7298_vm0, %v7251_v51, %v7250_v39  ;;  %v12502_v44 = vld [vmem:[#allocation76_spill] sm:$0xff] }
 0x453   : > { %v7878_v38 = vpack.c.bf16 %v6411_v35, %v6411_v35  ;;  %v7254_v58 = vunpack.c.l.b16 %v7876_v41  ;;  %v7376_v43 = vsel %vm7300_vm1, %v7252_v63, %v7375_v28  ;;  %v4624_v49 = vmul.f32 1.442695, %v4425_v55 }
 0x454   : > { %v7879_v61 = vpack.c.bf16 %v6417_v34, %v6417_v34  ;;  %v7255_v0 = vunpack.c.l.b16 %v7877_v62  ;;  %v7377_v60 = vsel %vm7302_vm2, %v7253_v40, %v7376_v43  ;;  %v5122_v42 = vrot.slane %v11055_v57, 4 }
 0x455   : > { %v7256_v32 = vunpack.c.l.b16 %v7878_v38  ;;  %v7378_v16 = vsel %vm7304_vm3, %v7254_v58, %v7377_v60  ;;  %8428 = vpow2.f32 %v4624_v49  ;;  %v5146_v10 = vrot.slane %v11057_v45, 4 }
 0x456   : > { %v7257_v13 = vunpack.c.l.b16 %v7879_v61  ;;  %v7379_v14 = vsel %vm7306_vm4, %v7255_v0, %v7378_v16  ;;  %v5123_v36 = vadd.f32 %v11055_v57, %v5122_v42  ;;  %v5152_v48 = vrot.slane %v11059_v24, 4 }
 0x457   : > { %v7380_v4 = vsel %vm7308_vm5, %v7256_v32, %v7379_v14  ;;  %v5147_v55 = vadd.f32 %v11057_v45, %v5146_v10  ;;  %v3294_v21 = vadd.f32 %v2933_v1, %v12499_v26  ;;  %v3295_v54 = vadd.f32 %v2937_v50, %v12500_v53 }
 0x458   : > { %v7381_v23 = vsel %vm7310_vm6, %v7257_v13, %v7380_v4  ;;  %v5124_v46 = vrot.slane %v5123_v36, 2  ;;  %v5153_v3 = vadd.f32 %v11059_v24, %v5152_v48  ;;  %v3296_v33 = vadd.f32 %v11015_v59, %v12501_v37 }
 0x459   : > { %v7427_v20 = vpack.c.b16 %v7381_v23, %v7381_v23  ;;  %v5148_v31 = vrot.slane %v5147_v55, 2  ;;  %v3297_v18 = vadd.f32 %v11018_v52, %v12502_v44  ;;  %v3418_v17 = vmul.f32 0.01, %v11021_v30 }
 0x45a   : > { %v5125_v1 = vadd.f32 %v5124_v46, %v5123_v36  ;;  %v5154_v11 = vrot.slane %v5153_v3, 2  ;;  %v3419_v5 = vmul.f32 0.01, %v11025_v19  ;;  %v3420_v50 = vmul.f32 0.01, %v11029_v7 }
 0x45b   : > { %7459 = vst [vmem:[%s9683_s26 + $0x28] sm:$0xf] %v7427_v20  ;;  %v5149_v22 = vadd.f32 %v5148_v31, %v5147_v55  ;;  %v3421_v56 = vmul.f32 0.01, %v11039_v9  ;;  %v3422_v39 = vmul.f32 0.01, %v3294_v21  ;;  %v11096_v52 = vmax.f32 %v11021_v30, %v3418_v17 }
 0x45c   : > { %v3423_v27 = vmul.f32 0.01, %v3295_v54  ;;  %v5126_v59 = vrot.slane %v5125_v1, 1  ;;  %v5155_v2 = vadd.f32 %v5154_v11, %v5153_v3  ;;  %v3424_v29 = vmul.f32 0.01, %v3296_v33 }
 0x45d   : > { %v3425_v51 = vmul.f32 0.01, %v3297_v18  ;;  %v5150_v35 = vrot.slane %v5149_v22, 1  ;;  %v11099_v41 = vmax.f32 %v11025_v19, %v3419_v5  ;;  %v11102_v63 = vmax.f32 %v11029_v7, %v3420_v50 }
 0x45e   : > { %v11104_v34 = vpop.eup %8426  ;;  %v5127_v62 = vadd.f32 %v5126_v59, %v5125_v1  ;;  %v5156_v40 = vrot.slane %v5155_v2, 1  ;;  %v11107_v28 = vmax.f32 %v11039_v9, %v3421_v56  ;;  %v11109_v38 = vmax.f32 %v3294_v21, %v3422_v39 }
 0x45f   : > { %v5151_v58 = vadd.f32 %v5150_v35, %v5149_v22  ;;  %v5158_v43 = vrot.slane %v11104_v34, 4  ;;  %v11112_v30 = vmax.f32 %v3295_v54, %v3423_v27  ;;  %v11114_v49 = vmax.f32 %v3296_v33, %v3424_v29 }
 0x460   : > { %v5157_v19 = vadd.f32 %v5156_v40, %v5155_v2  ;;  %8430 = vrcp.f32 %v5127_v62  ;;  %v11116_v7 = vmax.f32 %v3297_v18, %v3425_v51  ;;  %v4114_v61 = vrot.slane %v11096_v52, 4 }
 0x461   : > { %v5159_v0 = vadd.f32 %v11104_v34, %v5158_v43  ;;  %8432 = vrcp.f32 %v5151_v58  ;;  %v4120_v9 = vrot.slane %v11099_v41, 4  ;;  %v4126_v60 = vrot.slane %v11102_v63, 4 }
 0x462   : > { %v11122_v42 = vpop.eup %8428  ;;  %8434 = vrcp.f32 %v5157_v19  ;;  %v4115_v32 = vmax.f32 %v11096_v52, %v4114_v61  ;;  %v4132_v16 = vrot.slane %v11107_v28, 4  ;;  %v4138_v10 = vrot.slane %v11109_v38, 4 }
 0x463   : > { %v5160_v13 = vrot.slane %v5159_v0, 2  ;;  %v5164_v14 = vrot.slane %v11122_v42, 4  ;;  %v4121_v36 = vmax.f32 %v11099_v41, %v4120_v9  ;;  %v4127_v48 = vmax.f32 %v11102_v63, %v4126_v60 }
 0x464   : > { %v4116_v4 = vrot.slane %v4115_v32, 2  ;;  %v4133_v55 = vmax.f32 %v11107_v28, %v4132_v16  ;;  %v4139_v26 = vmax.f32 %v11109_v38, %v4138_v10  ;;  %v4144_v21 = vrot.slane %v11112_v30, 4 }
 0x465   : > { %v5161_v53 = vadd.f32 %v5160_v13, %v5159_v0  ;;  %v5165_v54 = vadd.f32 %v11122_v42, %v5164_v14  ;;  %v4122_v23 = vrot.slane %v4121_v36, 2  ;;  %v4128_v46 = vrot.slane %v4127_v48, 2 }
 0x466   : > { %v4117_v3 = vmax.f32 %v4115_v32, %v4116_v4  ;;  %v4134_v37 = vrot.slane %v4133_v55, 2  ;;  %v4140_v33 = vrot.slane %v4139_v26, 2  ;;  %v4145_v20 = vmax.f32 %v11112_v30, %v4144_v21 }
 0x467   : > { %v5162_v31 = vrot.slane %v5161_v53, 1  ;;  %v5166_v44 = vrot.slane %v5165_v54, 2  ;;  %v4123_v18 = vmax.f32 %v4121_v36, %v4122_v23  ;;  %v4129_v17 = vmax.f32 %v4127_v48, %v4128_v46 }
 0x468   : > { %v4118_v1 = vrot.slane %v4117_v3, 1  ;;  %v4135_v11 = vmax.f32 %v4133_v55, %v4134_v37  ;;  %v4141_v5 = vmax.f32 %v4139_v26, %v4140_v33  ;;  %v4146_v50 = vrot.slane %v4145_v20, 2  ;;  %v12504_v37 = vld [vmem:[#allocation9_spill] sm:$0xff] }
 0x469   : > { %v5163_v22 = vadd.f32 %v5162_v31, %v5161_v53  ;;  %v5167_v56 = vadd.f32 %v5166_v44, %v5165_v54  ;;  %v4124_v39 = vrot.slane %v4123_v18, 1  ;;  %v4130_v27 = vrot.slane %v4129_v17, 1  ;;  %v12503_v54 = vld [vmem:[#allocation6_spill] sm:$0xff] }
 0x46a   : > { %v4119_v59 = vmax.f32 %v4117_v3, %v4118_v1  ;;  %v4136_v2 = vrot.slane %v4135_v11, 1  ;;  %v4142_v29 = vrot.slane %v4141_v5, 1  ;;  %v4147_v51 = vmax.f32 %v4145_v20, %v4146_v50 }
 0x46b   : > { %v5168_v35 = vrot.slane %v5167_v56, 1  ;;  %8436 = vrcp.f32 %v5163_v22  ;;  %v4125_v62 = vmax.f32 %v4123_v18, %v4124_v39  ;;  %v4131_v40 = vmax.f32 %v4129_v17, %v4130_v27  ;;  %v11157_v39 = vpop.f32.mrf.mxu0 }
 0x46c   : > { %v4137_v58 = vmax.f32 %v4135_v11, %v4136_v2  ;;  %v4143_v43 = vmax.f32 %v4141_v5, %v4142_v29  ;;  %v4148_v19 = vrot.slane %v4147_v51, 1  ;;  %v4150_v61 = vrot.slane %v11114_v49, 4 }
 0x46d   : > { %v8431_v0 = vpop.eup %8430  ;;  %v5169_v9 = vadd.f32 %v5168_v35, %v5167_v56  ;;  %v4156_v60 = vrot.slane %v11116_v7, 4  ;;  %v4442_v32 = vsub.f32 %v11096_v52, %v4119_v59  ;;  %v4443_v16 = vsub.f32 %v11099_v41, %v4125_v62 }
 0x46e   : > { %v8433_v10 = vpop.eup %8432  ;;  %v5698_v13 = vmul.f32 %v8431_v0, %v11055_v57  ;;  %v4149_v14 = vmax.f32 %v4147_v51, %v4148_v19  ;;  %v4151_v36 = vmax.f32 %v11114_v49, %v4150_v61  ;;  %v4444_v48 = vsub.f32 %v11102_v63, %v4131_v40  ;;  %v1217_v19 = vpop.f32.mrf.mxu0 }
 0x46f   : > { %v8435_v4 = vpop.eup %8434  ;;  %8438 = vrcp.f32 %v5169_v9  ;;  %v5702_v55 = vmul.f32 %v8433_v10, %v11057_v45  ;;  %v4157_v26 = vmax.f32 %v11116_v7, %v4156_v60  ;;  %v4445_v21 = vsub.f32 %v11107_v28, %v4137_v58 }
 0x470   : > { %v5703_v52 = vmul.f32 %v8435_v4, %v11059_v24  ;;  %v5826_v41 = vmul.f32 %v5698_v13, %v10898_v12  ;;  %v4152_v53 = vrot.slane %v4151_v36, 2  ;;  %v4446_v57 = vsub.f32 %v11109_v38, %v4143_v43 }
 0x471   : > { %v5830_v23 = vmul.f32 %v5702_v55, %v12503_v54  ;;  %v4158_v46 = vrot.slane %v4157_v26, 2  ;;  %v4447_v63 = vsub.f32 %v11112_v30, %v4149_v14  ;;  %v4658_v3 = vmul.f32 1.442695, %v4442_v32  ;;  %v1734_v32 = vpop.f32.mrf.mxu1 }
 0x472   : > { %v5831_v33 = vmul.f32 %v5703_v52, %v12504_v37  ;;  %v6274_v45 = vrot.slane %v5826_v41, 4  ;;  %v4153_v20 = vmax.f32 %v4151_v36, %v4152_v53  ;;  %v4660_v31 = vmul.f32 1.442695, %v4443_v16 }
 0x473   : > { %v6298_v44 = vrot.slane %v5830_v23, 4  ;;  %v4159_v28 = vmax.f32 %v4157_v26, %v4158_v46  ;;  %8440 = vpow2.f32 %v4658_v3  ;;  %v4662_v24 = vmul.f32 1.442695, %v4444_v48 }
 0x474   : > { %v6275_v18 = vadd.f32 %v6274_v45, %v5826_v41  ;;  %v6304_v12 = vrot.slane %v5831_v33, 4  ;;  %v4154_v17 = vrot.slane %v4153_v20, 1  ;;  %8442 = vpow2.f32 %v4660_v31 }
 0x475   : > { %v6299_v38 = vadd.f32 %v6298_v44, %v5830_v23  ;;  %v4160_v1 = vrot.slane %v4159_v28, 1  ;;  %8444 = vpow2.f32 %v4662_v24  ;;  %v4664_v11 = vmul.f32 1.442695, %v4445_v21 }
 0x476   : > { %v6305_v5 = vadd.f32 %v6304_v12, %v5831_v33  ;;  %v4155_v30 = vmax.f32 %v4153_v20, %v4154_v17  ;;  %v4666_v50 = vmul.f32 1.442695, %v4446_v57  ;;  %v11155_v22 = vrot.slane %v2185_v8, %v9361_v25  ;;  %v12506_v20 = vld [vmem:[#allocation15_spill] sm:$0xff] }
 0x477   : > { %v6276_v56 = vrot.slane %v6275_v18, 2  ;;  %v4161_v27 = vmax.f32 %v4159_v28, %v4160_v1  ;;  %8446 = vpow2.f32 %v4664_v11  ;;  %v4668_v59 = vmul.f32 1.442695, %v4447_v63 }
 0x478   : > { %v8437_v2 = vpop.eup %8436  ;;  %v6300_v29 = vrot.slane %v6299_v38, 2  ;;  %v6306_v51 = vrot.slane %v6305_v5, 2  ;;  %v4448_v35 = vsub.f32 %v11114_v49, %v4155_v30  ;;  %8448 = vpow2.f32 %v4666_v50  ;;  %v12505_v49 = vld [vmem:[#allocation12_spill] sm:$0xff] }
 0x479   : > { %v4449_v62 = vsub.f32 %v11116_v7, %v4161_v27  ;;  %8450 = vpow2.f32 %v4668_v59  ;;  %v5704_v40 = vmul.f32 %v8437_v2, %v11104_v34  ;;  %v2825_v8 = vrot.slane %v11155_v22, %v9366_v15  ;;  %v11168_v34 = vld [vmem:[%s12208_s4] ss:$0 sm:$0xff] }
 0x47a   : > { %v4670_v6 = vmul.f32 1.442695, %v4448_v35  ;;  %v6277_v58 = vadd.f32 %v6276_v56, %v6275_v18  ;;  %v6301_v0 = vadd.f32 %v6300_v29, %v6299_v38  ;;  %v6307_v9 = vadd.f32 %v6306_v51, %v6305_v5 }
 0x47b   : > { %v4672_v43 = vmul.f32 1.442695, %v4449_v62  ;;  %v3267_v60 = vadd.f32 %v2825_v8, %v1217_v19  ;;  %v5832_v16 = vmul.f32 %v5704_v40, %v12505_v49  ;;  %v1735_v10 = vadd.f32 %v11168_v34, %v1734_v32 }
 0x47c   : > { %v8439_v61 = vpop.eup %8438  ;;  %8452 = vpow2.f32 %v4670_v6  ;;  %v6278_v14 = vrot.slane %v6277_v58, 1  ;;  %v6302_v36 = vrot.slane %v6301_v0, 1  ;;  %v6308_v48 = vrot.slane %v6307_v9, 1 }
 0x47d   : > { %8454 = vpow2.f32 %v4672_v43  ;;  %v3395_v7 = vmul.f32 0.01, %v3267_v60  ;;  %v5705_v55 = vmul.f32 %v8439_v61, %v11122_v42  ;;  %v6310_v41 = vrot.slane %v5832_v16, 4 }
 0x47e   : > { %v2219_v23 = vcombine.high %v1735_v10, %v1735_v10  ;;  %v2226_v46 = vrot.slane %v1735_v10, %v9361_v25  ;;  %v11187_v3 = vadd.f32 %v6278_v14, %v6277_v58  ;;  %v11189_v42 = vadd.f32 %v6302_v36, %v6301_v0 }
 0x47f   : > { %v11177_v21 = vmax.f32 %v3267_v60, %v3395_v7  ;;  %v11191_v37 = vadd.f32 %v6308_v48, %v6307_v9  ;;  %v11197_v31 = vmul.f32 %v5705_v55, %v12506_v20  ;;  %v11203_v12 = vadd.f32 %v6310_v41, %v5832_v16 }
 0x480   : > { %v11171_v13 = vpop.eup %8440  ;;  %v2233_v30 = vrot.slane %v2219_v23, %v9361_v25  ;;  %v2234_v50 = vcombine.high %v2226_v46, %v2226_v46  ;;  %v2242_v60 = vrot.slane %v2226_v46, %v9361_v25 }
 0x481   : > { %v11173_v4 = vpop.eup %8442  ;;  %v5266_v26 = vrot.slane %v11171_v13, 4  ;;  %v3976_v24 = vrot.slane %v11177_v21, 4  ;;  %v6316_v51 = vrot.slane %v11197_v31, 4 }
 0x482   : > { %v11179_v52 = vpop.eup %8444  ;;  %v5272_v53 = vrot.slane %v11173_v4, 4  ;;  %v2235_v9 = vcombine.high %v2233_v30, %v2233_v30 }
 0x483   : > { %v5267_v57 = vadd.f32 %v11171_v13, %v5266_v26  ;;  %v5278_v54 = vrot.slane %v11179_v52, 4  ;;  %v3977_v40 = vmax.f32 %v11177_v21, %v3976_v24  ;;  %v2256_v24 = vrot.slane %v2234_v50, %v9361_v25 }
 0x484   : > { %v11185_v63 = vpop.eup %8446  ;;  %v5273_v33 = vadd.f32 %v11173_v4, %v5272_v53 }
 0x485   : > { %v11194_v45 = vpop.eup %8448  ;;  %v5268_v44 = vrot.slane %v5267_v57, 2  ;;  %v5279_v28 = vadd.f32 %v11179_v52, %v5278_v54  ;;  %v5284_v38 = vrot.slane %v11185_v63, 4  ;;  %v3978_v48 = vrot.slane %v3977_v40, 2 }
 0x486   : > { %v11201_v18 = vpop.eup %8450  ;;  %v5274_v17 = vrot.slane %v5273_v33, 2  ;;  %v5290_v1 = vrot.slane %v11194_v45, 4  ;;  %v2249_v54 = vrot.slane %v2233_v30, %v9361_v25  ;;  %v2857_v50 = vrot.slane %v2256_v24, %v9366_v15 }
 0x487   : > { %v5269_v11 = vadd.f32 %v5268_v44, %v5267_v57  ;;  %v5280_v5 = vrot.slane %v5279_v28, 2  ;;  %v5285_v27 = vadd.f32 %v11185_v63, %v5284_v38  ;;  %v5296_v2 = vrot.slane %v11201_v18, 4 }
 0x488   : > { %v5275_v56 = vadd.f32 %v5274_v17, %v5273_v33  ;;  %v5291_v59 = vadd.f32 %v11194_v45, %v5290_v1  ;;  %v2263_v38 = vrot.slane %v2235_v9, %v9361_v25  ;;  %v2264_v1 = vcombine.high %v2242_v60, %v2242_v60 }
 0x489   : > { %v11211_v29 = vpop.eup %8452  ;;  %v5270_v35 = vrot.slane %v5269_v11, 1  ;;  %v5281_v62 = vadd.f32 %v5280_v5, %v5279_v28  ;;  %v5286_v58 = vrot.slane %v5285_v27, 2  ;;  %v5297_v19 = vadd.f32 %v11201_v18, %v5296_v2 }
 0x48a   : > { %v11215_v6 = vpop.eup %8454  ;;  %v5276_v8 = vrot.slane %v5275_v56, 1  ;;  %v5292_v43 = vrot.slane %v5291_v59, 2  ;;  %v5302_v14 = vrot.slane %v11211_v29, 4  ;;  %v3979_v28 = vmax.f32 %v3977_v40, %v3978_v48 }
 0x48b   : > { %v5271_v61 = vadd.f32 %v5270_v35, %v5269_v11  ;;  %v5282_v0 = vrot.slane %v5281_v62, 1  ;;  %v5287_v49 = vadd.f32 %v5286_v58, %v5285_v27  ;;  %v5298_v7 = vrot.slane %v5297_v19, 2 }
 0x48c   : > { %v5277_v32 = vadd.f32 %v5276_v8, %v5275_v56  ;;  %v5293_v16 = vadd.f32 %v5292_v43, %v5291_v59  ;;  %v5308_v36 = vrot.slane %v11215_v6, 4  ;;  %v5303_v53 = vadd.f32 %v11211_v29, %v5302_v14 }
 0x48d   : > { %v5283_v10 = vadd.f32 %v5282_v0, %v5281_v62  ;;  %v5288_v55 = vrot.slane %v5287_v49, 1  ;;  %v5299_v41 = vadd.f32 %v5298_v7, %v5297_v19  ;;  %8456 = vrcp.f32 %v5271_v61  ;;  %v12508_v7 = vld [vmem:[#allocation22_spill] sm:$0xff] }
 0x48e   : > { %v5294_v26 = vrot.slane %v5293_v16, 1  ;;  %v5309_v57 = vadd.f32 %v11215_v6, %v5308_v36  ;;  %8458 = vrcp.f32 %v5277_v32  ;;  %v5304_v20 = vrot.slane %v5303_v53, 2  ;;  %v12509_v36 = vld [vmem:[#allocation24_spill] sm:$0xff] }
 0x48f   : > { %v5289_v23 = vadd.f32 %v5288_v55, %v5287_v49  ;;  %v5300_v33 = vrot.slane %v5299_v41, 1  ;;  %8460 = vrcp.f32 %v5283_v10  ;;  %v3980_v56 = vrot.slane %v3979_v28, 1  ;;  %v12510_v55 = vld [vmem:[#allocation27_spill] sm:$0xff] }
 0x490   : > { %v5295_v46 = vadd.f32 %v5294_v26, %v5293_v16  ;;  %v5310_v44 = vrot.slane %v5309_v57, 2  ;;  %v5305_v11 = vadd.f32 %v5304_v20, %v5303_v53  ;;  %v2265_v30 = vcombine.high %v2249_v54, %v2249_v54  ;;  %v12507_v16 = vld [vmem:[#allocation19_spill] sm:$0xff] }
 0x491   : > { %v5301_v17 = vadd.f32 %v5300_v33, %v5299_v41  ;;  %8462 = vrcp.f32 %v5289_v23  ;;  %v2266_v27 = vcombine.high %v2256_v24, %v2256_v24  ;;  %v2267_v59 = vcombine.high %v2263_v38, %v2263_v38  ;;  %v12511_v41 = vld [vmem:[#allocation29_spill] sm:$0xff] }
 0x492   : > { %v5311_v5 = vadd.f32 %v5310_v44, %v5309_v57  ;;  %8464 = vrcp.f32 %v5295_v46  ;;  %v5306_v2 = vrot.slane %v5305_v11, 1  ;;  %v3981_v62 = vmax.f32 %v3979_v28, %v3980_v56  ;;  %v12514_v33 = vld [vmem:[#allocation37_spill] sm:$0xff] }
 0x493   : > { %8466 = vrcp.f32 %v5301_v17  ;;  %v2853_v40 = vrot.slane %v2242_v60, %v9366_v15  ;;  %v2861_v8 = vrot.slane %v2264_v1, %v9366_v15  ;;  %v2865_v58 = vrot.slane %v2266_v27, %v9366_v15 }
 0x494   : > { %v5312_v35 = vrot.slane %v5311_v5, 1  ;;  %v2869_v43 = vrot.slane %v2249_v54, %v9366_v15  ;;  %v5307_v19 = vadd.f32 %v5306_v2, %v5305_v11  ;;  %v4419_v0 = vsub.f32 %v11177_v21, %v3981_v62  ;;  %v12512_v21 = vld [vmem:[#allocation32_spill] sm:$0xff]  ;;  %v12513_v54 = vld [vmem:[#allocation34_spill] sm:$0xff] }
 0x495   : > { %v2873_v9 = vrot.slane %v2263_v38, %v9366_v15  ;;  %v2877_v32 = vrot.slane %v2265_v30, %v9366_v15  ;;  %v2881_v49 = vrot.slane %v2267_v59, %v9366_v15  ;;  %v3274_v60 = vadd.f32 %v2853_v40, %v12507_v16 }
 0x496   : > { %v5313_v61 = vadd.f32 %v5312_v35, %v5311_v5  ;;  %v3275_v10 = vadd.f32 %v2857_v50, %v12508_v7  ;;  %8468 = vrcp.f32 %v5307_v19  ;;  %v4612_v14 = vmul.f32 1.442695, %v4419_v0  ;;  %v12515_v35 = vld [vmem:[#allocation61_spill] sm:$0xff] }
 0x497   : > { %v3276_v48 = vadd.f32 %v2861_v8, %v12509_v36  ;;  %v3277_v26 = vadd.f32 %v2865_v58, %v12510_v55  ;;  %v3278_v53 = vadd.f32 %v2869_v43, %v12511_v41  ;;  %v3279_v57 = vadd.f32 %v2873_v9, %v12512_v21  ;;  %v12516_v58 = vld [vmem:[#allocation63_spill] sm:$0xff]  ;;  %v12517_v9 = vld [vmem:[#allocation65_spill] sm:$0xff] }
 0x498   : > { %8470 = vrcp.f32 %v5313_v61  ;;  %v3280_v23 = vadd.f32 %v2877_v32, %v12513_v54  ;;  %v3281_v20 = vadd.f32 %v2881_v49, %v12514_v33  ;;  %v3402_v44 = vmul.f32 0.01, %v3274_v60 }
 0x499   : > { %8472 = vpow2.f32 %v4612_v14  ;;  %v3403_v28 = vmul.f32 0.01, %v3275_v10  ;;  %v3404_v38 = vmul.f32 0.01, %v3276_v48  ;;  %v3405_v1 = vmul.f32 0.01, %v3277_v26 }
 0x49a   : > { %v8457_v46 = vpop.eup %8456  ;;  %v3406_v11 = vmul.f32 0.01, %v3278_v53  ;;  %v3407_v30 = vmul.f32 0.01, %v3279_v57  ;;  %v3408_v27 = vmul.f32 0.01, %v3280_v23  ;;  %v11247_v40 = vmax.f32 %v3274_v60, %v3402_v44 }
 0x49b   : > { %v8459_v24 = vpop.eup %8458  ;;  %v5722_v17 = vmul.f32 %v8457_v46, %v11171_v13  ;;  %v3409_v59 = vmul.f32 0.01, %v3281_v20  ;;  %v11249_v50 = vmax.f32 %v3275_v10, %v3403_v28  ;;  %v11252_v43 = vmax.f32 %v3276_v48, %v3404_v38  ;;  %v12518_v48 = vld [vmem:[#allocation67_spill] sm:$0xff] }
 0x49c   : > { %v8461_v5 = vpop.eup %8460  ;;  %v5723_v56 = vmul.f32 %v8459_v24, %v11173_v4  ;;  %v11254_v19 = vmax.f32 %v3277_v26, %v3405_v1  ;;  %v11256_v61 = vmax.f32 %v3278_v53, %v3406_v11  ;;  %v11260_v49 = vmax.f32 %v3279_v57, %v3407_v30  ;;  %v12520_v46 = vld [vmem:[#allocation71_spill] sm:$0xff] }
 0x49d   : > { %v5724_v2 = vmul.f32 %v8461_v5, %v11179_v52  ;;  %v5850_v62 = vmul.f32 %v5722_v17, %v12515_v35  ;;  %v11263_v10 = vmax.f32 %v3280_v23, %v3408_v27  ;;  %v11265_v14 = vmax.f32 %v3281_v20, %v3409_v59 }
 0x49e   : > { %v8463_v8 = vpop.eup %8462  ;;  %v5851_v13 = vmul.f32 %v5723_v56, %v12516_v58  ;;  %v4018_v57 = vrot.slane %v11247_v40, 4  ;;  %v4024_v54 = vrot.slane %v11249_v50, 4 }
 0x49f   : > { %v8465_v4 = vpop.eup %8464  ;;  %v5725_v0 = vmul.f32 %v8463_v8, %v11185_v63  ;;  %v5852_v52 = vmul.f32 %v5724_v2, %v12517_v9  ;;  %v6418_v32 = vrot.slane %v5850_v62, 4  ;;  %v12519_v63 = vld [vmem:[#allocation69_spill] sm:$0xff] }
 0x4a0   : > { %v8467_v16 = vpop.eup %8466  ;;  %v5726_v60 = vmul.f32 %v8465_v4, %v11194_v45  ;;  %v6424_v7 = vrot.slane %v5851_v13, 4  ;;  %v11275_v24 = vmax.f32 %v11249_v50, %v4024_v54  ;;  %v12521_v4 = vld [vmem:[#allocation73_spill] sm:$0xff] }
 0x4a1   : > { %v5727_v36 = vmul.f32 %v8467_v16, %v11201_v18  ;;  %v5853_v55 = vmul.f32 %v5725_v0, %v12518_v48  ;;  %v6419_v26 = vadd.f32 %v6418_v32, %v5850_v62  ;;  %v6430_v41 = vrot.slane %v5852_v52, 4  ;;  %v12522_v16 = vld [vmem:[#allocation75_spill] sm:$0xff] }
 0x4a2   : > { %v5854_v53 = vmul.f32 %v5726_v60, %v12519_v63  ;;  %v6425_v21 = vadd.f32 %v6424_v7, %v5851_v13  ;;  %v4019_v18 = vmax.f32 %v11247_v40, %v4018_v57 }
 0x4a3   : > { %v5855_v45 = vmul.f32 %v5727_v36, %v12520_v46  ;;  %v6420_v33 = vrot.slane %v6419_v26, 2  ;;  %v6431_v23 = vadd.f32 %v6430_v41, %v5852_v52  ;;  %v6436_v44 = vrot.slane %v5853_v55, 4  ;;  %v8469_v17 = vpop.eup %8468 }
 0x4a4   : > { %v6426_v20 = vrot.slane %v6425_v21, 2  ;;  %v6442_v28 = vrot.slane %v5854_v53, 4  ;;  %v5728_v30 = vmul.f32 %v8469_v17, %v11211_v29  ;;  %v4020_v2 = vrot.slane %v4019_v18, 2 }
 0x4a5   : > { %v6421_v38 = vadd.f32 %v6420_v33, %v6419_v26  ;;  %v6432_v1 = vrot.slane %v6431_v23, 2  ;;  %v6437_v11 = vadd.f32 %v6436_v44, %v5853_v55  ;;  %v6448_v5 = vrot.slane %v5855_v45, 4  ;;  %v8471_v56 = vpop.eup %8470 }
 0x4a6   : > { %v6427_v27 = vadd.f32 %v6426_v20, %v6425_v21  ;;  %v6443_v59 = vadd.f32 %v6442_v28, %v5854_v53  ;;  %v11278_v35 = vpop.eup %8472  ;;  %v5729_v62 = vmul.f32 %v8471_v56, %v11215_v6  ;;  %v5856_v0 = vmul.f32 %v5728_v30, %v12521_v4 }
 0x4a7   : > { %v6422_v8 = vrot.slane %v6421_v38, 1  ;;  %v6433_v58 = vadd.f32 %v6432_v1, %v6431_v23  ;;  %v6438_v13 = vrot.slane %v6437_v11, 2  ;;  %v6449_v32 = vadd.f32 %v6448_v5, %v5855_v45 }
 0x4a8   : > { %v6428_v9 = vrot.slane %v6427_v27, 1  ;;  %v6444_v52 = vrot.slane %v6443_v59, 2  ;;  %v5857_v60 = vmul.f32 %v5729_v62, %v12522_v16  ;;  %v6454_v41 = vrot.slane %v5856_v0, 4 }
 0x4a9   : > { %v6423_v7 = vadd.f32 %v6422_v8, %v6421_v38  ;;  %v6434_v36 = vrot.slane %v6433_v58, 1  ;;  %v6439_v29 = vadd.f32 %v6438_v13, %v6437_v11  ;;  %v6450_v26 = vrot.slane %v6449_v32, 2 }
 0x4aa   : > { %v6429_v48 = vadd.f32 %v6428_v9, %v6427_v27  ;;  %v6445_v55 = vadd.f32 %v6444_v52, %v6443_v59  ;;  %v6460_v6 = vrot.slane %v5857_v60, 4  ;;  %v6455_v46 = vadd.f32 %v6454_v41, %v5856_v0 }
 0x4ab   : > { %v6435_v63 = vadd.f32 %v6434_v36, %v6433_v58  ;;  %v6440_v53 = vrot.slane %v6439_v29, 1  ;;  %v7880_v21 = vpack.c.bf16 %v6423_v7, %v6423_v7  ;;  %v6451_v54 = vadd.f32 %v6450_v26, %v6449_v32 }
 0x4ac   : > { %v6446_v57 = vrot.slane %v6445_v55, 1  ;;  %v7881_v33 = vpack.c.bf16 %v6429_v48, %v6429_v48  ;;  %v6461_v44 = vadd.f32 %v6460_v6, %v5857_v60  ;;  %v6456_v38 = vrot.slane %v6455_v46, 2 }
 0x4ad   : > { %v6441_v23 = vadd.f32 %v6440_v53, %v6439_v29  ;;  %v7882_v45 = vpack.c.bf16 %v6435_v63, %v6435_v63  ;;  %v7258_v20 = vunpack.c.l.b16 %v7880_v21  ;;  %v6452_v17 = vrot.slane %v6451_v54, 1 }
 0x4ae   : > { %v6447_v28 = vadd.f32 %v6446_v57, %v6445_v55  ;;  %v7259_v1 = vunpack.c.l.b16 %v7881_v33  ;;  %v6462_v11 = vrot.slane %v6461_v44, 2  ;;  %v5128_v30 = vrot.slane %v11278_v35, 4 }
 0x4af   : > { %v7883_v5 = vpack.c.bf16 %v6441_v23, %v6441_v23  ;;  %v7260_v56 = vunpack.c.l.b16 %v7882_v45  ;;  %v6453_v27 = vadd.f32 %v6452_v17, %v6451_v54  ;;  %v6457_v59 = vadd.f32 %v6456_v38, %v6455_v46 }
 0x4b0   : > { %v7884_v62 = vpack.c.bf16 %v6447_v28, %v6447_v28  ;;  %v7382_v8 = vsel %vm7298_vm0, %v7259_v1, %v7258_v20  ;;  %v6463_v58 = vadd.f32 %v6462_v11, %v6461_v44  ;;  %v5129_v0 = vadd.f32 %v11278_v35, %v5128_v30 }
 0x4b1   : > { %v7261_v13 = vunpack.c.l.b16 %v7883_v5  ;;  %v7383_v4 = vsel %vm7300_vm1, %v7260_v56, %v7382_v8  ;;  %v6458_v9 = vrot.slane %v6457_v59, 1  ;;  %v7885_v52 = vpack.c.bf16 %v6453_v27, %v6453_v27 }
 0x4b2   : > { %v7262_v32 = vunpack.c.l.b16 %v7884_v62  ;;  %v4021_v16 = vmax.f32 %v4019_v18, %v4020_v2  ;;  %v6464_v60 = vrot.slane %v6463_v58, 1  ;;  %v5130_v36 = vrot.slane %v5129_v0, 2 }
 0x4b3   : > { %v7384_v7 = vsel %vm7302_vm2, %v7261_v13, %v7383_v4  ;;  %v4026_v29 = vrot.slane %v11275_v24, 2  ;;  %v6459_v48 = vadd.f32 %v6458_v9, %v6457_v59  ;;  %v7263_v55 = vunpack.c.l.b16 %v7885_v52 }
 0x4b4   : > { %v7385_v26 = vsel %vm7304_vm3, %v7262_v32, %v7384_v7  ;;  %v4022_v41 = vrot.slane %v4021_v16, 1  ;;  %v6465_v63 = vadd.f32 %v6464_v60, %v6463_v58  ;;  %v5131_v53 = vadd.f32 %v5130_v36, %v5129_v0 }
 0x4b5   : > { %v4027_v6 = vmax.f32 %v11275_v24, %v4026_v29  ;;  %v4030_v21 = vrot.slane %v11252_v43, 4  ;;  %v7886_v57 = vpack.c.bf16 %v6459_v48, %v6459_v48  ;;  %v7386_v18 = vsel %vm7306_vm4, %v7263_v55, %v7385_v26 }
 0x4b6   : > { %v4023_v2 = vmax.f32 %v4021_v16, %v4022_v41  ;;  %v4036_v54 = vrot.slane %v11254_v19, 4  ;;  %v7887_v46 = vpack.c.bf16 %v6465_v63, %v6465_v63  ;;  %v5132_v33 = vrot.slane %v5131_v53, 1 }
 0x4b7   : > { %v4028_v23 = vrot.slane %v4027_v6, 1  ;;  %v4031_v44 = vmax.f32 %v11252_v43, %v4030_v21  ;;  %v7264_v45 = vunpack.c.l.b16 %v7886_v57  ;;  %v4042_v28 = vrot.slane %v11256_v61, 4  ;;  %v7967_v57 = vpop.f32.mrf.mxu1 }
 0x4b8   : > { %v4037_v20 = vmax.f32 %v11254_v19, %v4036_v54  ;;  %v4048_v24 = vrot.slane %v11260_v49, 4  ;;  %v7265_v17 = vunpack.c.l.b16 %v7887_v46  ;;  %v5133_v38 = vadd.f32 %v5132_v33, %v5131_v53 }
 0x4b9   : > { %v4029_v1 = vmax.f32 %v4027_v6, %v4028_v23  ;;  %v4032_v11 = vrot.slane %v4031_v44, 2  ;;  %v7387_v5 = vsel %vm7308_vm5, %v7264_v45, %v7386_v18  ;;  %v4043_v30 = vmax.f32 %v11256_v61, %v4042_v28 }
 0x4ba   : > { %v4038_v56 = vrot.slane %v4037_v20, 2  ;;  %v4049_v27 = vmax.f32 %v11260_v49, %v4048_v24  ;;  %v7388_v59 = vsel %vm7310_vm6, %v7265_v17, %v7387_v5  ;;  %8474 = vrcp.f32 %v5133_v38 }
 0x4bb   : > { %v4033_v62 = vmax.f32 %v4031_v44, %v4032_v11  ;;  %v4054_v8 = vrot.slane %v11263_v10, 4  ;;  %v7428_v58 = vpack.c.b16 %v7388_v59, %v7388_v59  ;;  %v4044_v4 = vrot.slane %v4043_v30, 2 }
 0x4bc   : > { %v4039_v13 = vmax.f32 %v4037_v20, %v4038_v56  ;;  %v4050_v0 = vrot.slane %v4049_v27, 2  ;;  %v4060_v32 = vrot.slane %v11265_v14, 4  ;;  %v4426_v16 = vsub.f32 %v11247_v40, %v4023_v2 }
 0x4bd   : > { %v4034_v9 = vrot.slane %v4033_v62, 1  ;;  %v4055_v52 = vmax.f32 %v11263_v10, %v4054_v8  ;;  %7460 = vst [vmem:[%s9683_s26 + $0x2c] sm:$0xf] %v7428_v58  ;;  %v4045_v7 = vmax.f32 %v4043_v30, %v4044_v4  ;;  %v4427_v29 = vsub.f32 %v11249_v50, %v4029_v1 }
 0x4be   : > { %v4040_v60 = vrot.slane %v4039_v13, 1  ;;  %v4051_v36 = vmax.f32 %v4049_v27, %v4050_v0  ;;  %v4061_v26 = vmax.f32 %v11265_v14, %v4060_v32  ;;  %v4626_v41 = vmul.f32 1.442695, %v4426_v16 }
 0x4bf   : > { %v4035_v48 = vmax.f32 %v4033_v62, %v4034_v9  ;;  %v4056_v55 = vrot.slane %v4055_v52, 2  ;;  %v4046_v53 = vrot.slane %v4045_v7, 1  ;;  %v4628_v21 = vmul.f32 1.442695, %v4427_v29 }
 0x4c0   : > { %v4041_v63 = vmax.f32 %v4039_v13, %v4040_v60  ;;  %v4052_v6 = vrot.slane %v4051_v36, 1  ;;  %v4062_v54 = vrot.slane %v4061_v26, 2  ;;  %8476 = vpow2.f32 %v4626_v41  ;;  %v1747_v41 = vpop.f32.mrf.mxu1 }
 0x4c1   : > { %v4057_v18 = vmax.f32 %v4055_v52, %v4056_v55  ;;  %v4428_v40 = vsub.f32 %v11252_v43, %v4035_v48  ;;  %v4047_v2 = vmax.f32 %v4045_v7, %v4046_v53  ;;  %8478 = vpow2.f32 %v4628_v21 }
 0x4c2   : > { %v4053_v46 = vmax.f32 %v4051_v36, %v4052_v6  ;;  %v4429_v33 = vsub.f32 %v11254_v19, %v4041_v63  ;;  %v4063_v23 = vmax.f32 %v4061_v26, %v4062_v54  ;;  %v1756_v45 = vadd.f32 %v11168_v34, %v7967_v57 }
 0x4c3   : > { %v4058_v50 = vrot.slane %v4057_v18, 1  ;;  %v4630_v44 = vmul.f32 1.442695, %v4428_v40  ;;  %v6317_v20 = vadd.f32 %v6316_v51, %v11197_v31  ;;  %v4430_v28 = vsub.f32 %v11256_v61, %v4047_v2 }
 0x4c4   : > { %v4431_v24 = vsub.f32 %v11260_v49, %v4053_v46  ;;  %v4632_v43 = vmul.f32 1.442695, %v4429_v33  ;;  %v4064_v38 = vrot.slane %v4063_v23, 1  ;;  %v2464_v1 = vcombine.high %v1756_v45, %v1756_v45  ;;  %v12523_v33 = vld [vmem:[#allocation118_spill] sm:$0xff] }
 0x4c5   : > { %v4059_v17 = vmax.f32 %v4057_v18, %v4058_v50  ;;  %8480 = vpow2.f32 %v4630_v44  ;;  %v4634_v19 = vmul.f32 1.442695, %v4430_v28  ;;  %v2471_v5 = vrot.slane %v1756_v45, %v9361_v25 }
 0x4c6   : > { %8482 = vpow2.f32 %v4632_v43  ;;  %v4636_v11 = vmul.f32 1.442695, %v4431_v24  ;;  %v6312_v56 = vrot.slane %v11203_v12, 2  ;;  %v4065_v30 = vmax.f32 %v4063_v23, %v4064_v38  ;;  %v12525_v24 = vld [vmem:[#allocation122_spill] sm:$0xff] }
 0x4c7   : > { %v4432_v27 = vsub.f32 %v11263_v10, %v4059_v17  ;;  %v2478_v31 = vrot.slane %v2464_v1, %v9361_v25  ;;  %v8475_v51 = vpop.eup %8474  ;;  %v6318_v61 = vrot.slane %v6317_v20, 2  ;;  %8484 = vpow2.f32 %v4634_v19  ;;  %v12526_v17 = vld [vmem:[#allocation124_spill] sm:$0xff] }
 0x4c8   : > { %v2479_v49 = vcombine.high %v2471_v5, %v2471_v5  ;;  %v2487_v59 = vrot.slane %v2471_v5, %v9361_v25  ;;  %v5699_v62 = vmul.f32 %v8475_v51, %v11278_v35  ;;  %v4433_v8 = vsub.f32 %v11265_v14, %v4065_v30  ;;  %v12529_v51 = vld [vmem:[#allocation130_spill] sm:$0xff] }
 0x4c9   : > { %8486 = vpow2.f32 %v4636_v11  ;;  %v4638_v58 = vmul.f32 1.442695, %v4432_v27  ;;  %v2480_v13 = vcombine.high %v2478_v31, %v2478_v31  ;;  %v2494_v4 = vrot.slane %v2478_v31, %v9361_v25 }
 0x4ca   : > { %v2501_v0 = vrot.slane %v2479_v49, %v9361_v25  ;;  %v2509_v10 = vcombine.high %v2487_v59, %v2487_v59  ;;  %v11327_v9 = vadd.f32 %v6312_v56, %v11203_v12  ;;  %v5827_v52 = vmul.f32 %v5699_v62, %v11157_v39  ;;  %v12528_v56 = vld [vmem:[#allocation128_spill] sm:$0xff] }
 0x4cb   : > { %8488 = vpow2.f32 %v4638_v58  ;;  %v4640_v32 = vmul.f32 1.442695, %v4433_v8  ;;  %v2508_v16 = vrot.slane %v2480_v13, %v9361_v25  ;;  %v2510_v35 = vcombine.high %v2494_v4, %v2494_v4  ;;  %v12530_v49 = vld [vmem:[#allocation132_spill] sm:$0xff] }
 0x4cc   : > { %v2511_v60 = vcombine.high %v2501_v0, %v2501_v0  ;;  %v2215_v14 = vcombine.high %v10902_v47, %v10902_v47  ;;  %v11333_v7 = vadd.f32 %v6318_v61, %v6317_v20  ;;  %v6280_v36 = vrot.slane %v5827_v52, 4  ;;  %v12524_v20 = vld [vmem:[#allocation120_spill] sm:$0xff] }
 0x4cd   : > { %8490 = vpow2.f32 %v4640_v32  ;;  %v3013_v29 = vrot.slane %v2487_v59, %v9366_v15  ;;  %v11336_v48 = vpop.eup %8476  ;;  %v2512_v12 = vcombine.high %v2508_v16, %v2508_v16  ;;  %v3017_v39 = vrot.slane %v2501_v0, %v9366_v15 }
 0x4ce   : > { %v3021_v55 = vrot.slane %v2509_v10, %v9366_v15  ;;  %v3025_v26 = vrot.slane %v2511_v60, %v9366_v15  ;;  %v11341_v63 = vpop.eup %8478  ;;  %v6281_v53 = vadd.f32 %v6280_v36, %v5827_v52  ;;  %v5170_v47 = vrot.slane %v11336_v48, 4 }
 0x4cf   : > { %v3029_v6 = vrot.slane %v2494_v4, %v9366_v15  ;;  %v3033_v21 = vrot.slane %v2508_v16, %v9366_v15  ;;  %v5176_v57 = vrot.slane %v11341_v63, 4  ;;  %v3037_v18 = vrot.slane %v2510_v35, %v9366_v15 }
 0x4d0   : > { %v3041_v54 = vrot.slane %v2512_v12, %v9366_v15  ;;  %v11350_v40 = vrot.slane %v2215_v14, %v9366_v15  ;;  %v6282_v2 = vrot.slane %v6281_v53, 2  ;;  %v5171_v46 = vadd.f32 %v11336_v48, %v5170_v47 }
 0x4d1   : > { %v11354_v50 = vadd.f32 %v3013_v29, %v12523_v33  ;;  %v11357_v23 = vadd.f32 %v11168_v34, %v1747_v41  ;;  %v5177_v45 = vadd.f32 %v11341_v63, %v5176_v57  ;;  %v11363_v28 = vadd.f32 %v3017_v39, %v12524_v20  ;;  %v12527_v34 = vld [vmem:[#allocation126_spill] sm:$0xff] }
 0x4d2   : > { %v11359_v44 = vpop.eup %8480  ;;  %v11366_v43 = vadd.f32 %v3021_v55, %v12525_v24  ;;  %v11369_v38 = vadd.f32 %v3025_v26, %v12526_v17  ;;  %v5172_v19 = vrot.slane %v5171_v46, 2  ;;  %v11375_v5 = vadd.f32 %v3029_v6, %v12527_v34 }
 0x4d3   : > { %v11371_v1 = vpop.eup %8482  ;;  %v5182_v11 = vrot.slane %v11359_v44, 4  ;;  %v11378_v30 = vadd.f32 %v3033_v21, %v12528_v56  ;;  %v5178_v27 = vrot.slane %v5177_v45, 2  ;;  %v11382_v61 = vadd.f32 %v3037_v18, %v12529_v51 }
 0x4d4   : > { %v5188_v31 = vrot.slane %v11371_v1, 4  ;;  %v11385_v59 = vadd.f32 %v3041_v54, %v12530_v49  ;;  %v11387_v62 = vpop.eup %8484  ;;  %v11389_v8 = vadd.f32 %v6282_v2, %v6281_v53  ;;  %v5173_v58 = vadd.f32 %v5172_v19, %v5171_v46 }
 0x4d5   : > { %v5183_v13 = vadd.f32 %v11359_v44, %v5182_v11  ;;  %v3442_v4 = vmul.f32 0.01, %v11354_v50  ;;  %v5179_v10 = vadd.f32 %v5178_v27, %v5177_v45  ;;  %v5194_v32 = vrot.slane %v11387_v62, 4 }
 0x4d6   : > { %v11393_v0 = vpop.eup %8486  ;;  %v5189_v52 = vadd.f32 %v11371_v1, %v5188_v31  ;;  %v3443_v16 = vmul.f32 0.01, %v11363_v28  ;;  %v5174_v35 = vrot.slane %v5173_v58, 1  ;;  %v3444_v36 = vmul.f32 0.01, %v11366_v43 }
 0x4d7   : > { %v5184_v60 = vrot.slane %v5183_v13, 2  ;;  %v5200_v14 = vrot.slane %v11393_v0, 4  ;;  %v5180_v12 = vrot.slane %v5179_v10, 1  ;;  %v5195_v55 = vadd.f32 %v11387_v62, %v5194_v32 }
 0x4d8   : > { %v11400_v29 = vpop.eup %8488  ;;  %v5190_v39 = vrot.slane %v5189_v52, 2  ;;  %v3445_v26 = vmul.f32 0.01, %v11369_v38  ;;  %v5175_v41 = vadd.f32 %v5174_v35, %v5173_v58  ;;  %v3446_v6 = vmul.f32 0.01, %v11375_v5 }
 0x4d9   : > { %v5185_v53 = vadd.f32 %v5184_v60, %v5183_v13  ;;  %v5201_v47 = vadd.f32 %v11393_v0, %v5200_v14  ;;  %v5181_v57 = vadd.f32 %v5180_v12, %v5179_v10  ;;  %v5196_v54 = vrot.slane %v5195_v55, 2 }
 0x4da   : > { %v11406_v21 = vpop.eup %8490  ;;  %v5191_v18 = vadd.f32 %v5190_v39, %v5189_v52  ;;  %v5206_v2 = vrot.slane %v11400_v29, 4  ;;  %v3447_v20 = vmul.f32 0.01, %v11378_v30  ;;  %8492 = vrcp.f32 %v5175_v41 }
 0x4db   : > { %v5186_v46 = vrot.slane %v5185_v53, 1  ;;  %v5202_v33 = vrot.slane %v5201_v47, 2  ;;  %v5212_v45 = vrot.slane %v11406_v21, 4  ;;  %v5197_v17 = vadd.f32 %v5196_v54, %v5195_v55 }
 0x4dc   : > { %v5192_v24 = vrot.slane %v5191_v18, 1  ;;  %v5207_v19 = vadd.f32 %v11400_v29, %v5206_v2  ;;  %v3448_v27 = vmul.f32 0.01, %v11382_v61  ;;  %8494 = vrcp.f32 %v5181_v57 }
 0x4dd   : > { %v5187_v11 = vadd.f32 %v5186_v46, %v5185_v53  ;;  %v5203_v34 = vadd.f32 %v5202_v33, %v5201_v47  ;;  %v5213_v56 = vadd.f32 %v11406_v21, %v5212_v45  ;;  %v5198_v51 = vrot.slane %v5197_v17, 1 }
 0x4de   : > { %v5193_v31 = vadd.f32 %v5192_v24, %v5191_v18  ;;  %v5208_v49 = vrot.slane %v5207_v19, 2  ;;  %v3449_v10 = vmul.f32 0.01, %v11385_v59  ;;  %v11416_v35 = vmax.f32 %v11354_v50, %v3442_v4 }
 0x4df   : > { %v5204_v58 = vrot.slane %v5203_v34, 1  ;;  %v5214_v13 = vrot.slane %v5213_v56, 2  ;;  %8496 = vrcp.f32 %v5187_v11  ;;  %v5199_v52 = vadd.f32 %v5198_v51, %v5197_v17 }
 0x4e0   : > { %v5209_v32 = vadd.f32 %v5208_v49, %v5207_v19  ;;  %8498 = vrcp.f32 %v5193_v31  ;;  %v11419_v12 = vmax.f32 %v11363_v28, %v3443_v16  ;;  %v11422_v39 = vmax.f32 %v11366_v43, %v3444_v36 }
 0x4e1   : > { %v5205_v60 = vadd.f32 %v5204_v58, %v5203_v34  ;;  %v5215_v14 = vadd.f32 %v5214_v13, %v5213_v56  ;;  %8500 = vrcp.f32 %v5199_v52  ;;  %v11425_v41 = vmax.f32 %v11369_v38, %v3445_v26 }
 0x4e2   : > { %v5210_v55 = vrot.slane %v5209_v32, 1  ;;  %v11428_v53 = vmax.f32 %v11375_v5, %v3446_v6  ;;  %v11431_v50 = vmax.f32 %v11378_v30, %v3447_v20  ;;  %v11434_v4 = vmax.f32 %v11382_v61, %v3448_v27 }
 0x4e3   : > { %v5216_v47 = vrot.slane %v5215_v14, 1  ;;  %8502 = vrcp.f32 %v5205_v60  ;;  %v11437_v43 = vmax.f32 %v11385_v59, %v3449_v10  ;;  %v4258_v16 = vrot.slane %v11416_v35, 4  ;;  %v12531_v60 = vld [vmem:[#allocation18_spill] sm:$0xff] }
 0x4e4   : > { %v5211_v28 = vadd.f32 %v5210_v55, %v5209_v32  ;;  %v4264_v38 = vrot.slane %v11419_v12, 4  ;;  %v4270_v5 = vrot.slane %v11422_v39, 4  ;;  %v4276_v26 = vrot.slane %v11425_v41, 4 }
 0x4e5   : > { %v5217_v36 = vadd.f32 %v5216_v47, %v5215_v14  ;;  %v4282_v6 = vrot.slane %v11428_v53, 4  ;;  %v4259_v30 = vmax.f32 %v11416_v35, %v4258_v16  ;;  %v4288_v57 = vrot.slane %v11431_v50, 4 }
 0x4e6   : > { %8504 = vrcp.f32 %v5211_v28  ;;  %v4265_v61 = vmax.f32 %v11419_v12, %v4264_v38  ;;  %v4271_v59 = vmax.f32 %v11422_v39, %v4270_v5  ;;  %v4277_v18 = vmax.f32 %v11425_v41, %v4276_v26  ;;  %v12532_v26 = vld [vmem:[#allocation21_spill] sm:$0xff] }
 0x4e7   : > { %8506 = vrcp.f32 %v5217_v36  ;;  %v4283_v54 = vmax.f32 %v11428_v53, %v4282_v6  ;;  %v4260_v2 = vrot.slane %v4259_v30, 2  ;;  %v4289_v33 = vmax.f32 %v11431_v50, %v4288_v57  ;;  %v8493_v20 = vpop.eup %8492 }
 0x4e8   : > { %v4266_v46 = vrot.slane %v4265_v61, 2  ;;  %v4294_v45 = vrot.slane %v11434_v4, 4  ;;  %v4272_v24 = vrot.slane %v4271_v59, 2  ;;  %v4278_v17 = vrot.slane %v4277_v18, 2 }
 0x4e9   : > { %v4284_v19 = vrot.slane %v4283_v54, 2  ;;  %v4300_v11 = vrot.slane %v11437_v43, 4  ;;  %v5706_v34 = vmul.f32 %v8493_v20, %v11336_v48  ;;  %v4261_v56 = vmax.f32 %v4259_v30, %v4260_v2  ;;  %v8495_v51 = vpop.eup %8494 }
 0x4ea   : > { %v4267_v27 = vmax.f32 %v4265_v61, %v4266_v46  ;;  %v4290_v31 = vrot.slane %v4289_v33, 2  ;;  %v4273_v49 = vmax.f32 %v4271_v59, %v4272_v24  ;;  %v4279_v58 = vmax.f32 %v4277_v18, %v4278_v17  ;;  %v12533_v59 = vld [vmem:[#allocation23_spill] sm:$0xff] }
 0x4eb   : > { %v4285_v13 = vmax.f32 %v4283_v54, %v4284_v19  ;;  %v11455_v10 = vmax.f32 %v11434_v4, %v4294_v45  ;;  %v5707_v32 = vmul.f32 %v8495_v51, %v11341_v63  ;;  %v5834_v14 = vmul.f32 %v5706_v34, %v12531_v60  ;;  %v12534_v45 = vld [vmem:[#allocation26_spill] sm:$0xff]  ;;  %v12535_v51 = vld [vmem:[#allocation28_spill] sm:$0xff]  ;;  %v12536_v60 = vld [vmem:[#allocation31_spill] sm:$0xff] }
 0x4ec   : > { %v8497_v52 = vpop.eup %8496  ;;  %v4262_v55 = vrot.slane %v4261_v56, 1  ;;  %v4268_v47 = vrot.slane %v4267_v27, 1  ;;  %v4274_v16 = vrot.slane %v4273_v49, 1  ;;  %v4280_v38 = vrot.slane %v4279_v58, 1 }
 0x4ed   : > { %v8499_v28 = vpop.eup %8498  ;;  %v5708_v48 = vmul.f32 %v8497_v52, %v11359_v44  ;;  %v4286_v36 = vrot.slane %v4285_v13, 1  ;;  %v5835_v6 = vmul.f32 %v5707_v32, %v12532_v26  ;;  %v6322_v30 = vrot.slane %v5834_v14, 4 }
 0x4ee   : > { %v5709_v5 = vmul.f32 %v8499_v28, %v11371_v1  ;;  %v11462_v61 = vmax.f32 %v4261_v56, %v4262_v55  ;;  %v8501_v57 = vpop.eup %8500  ;;  %v11465_v18 = vmax.f32 %v4267_v27, %v4268_v47  ;;  %v11467_v54 = vmax.f32 %v4273_v49, %v4274_v16 }
 0x4ef   : > { %v5836_v63 = vmul.f32 %v5708_v48, %v12533_v59  ;;  %v11469_v2 = vmax.f32 %v4279_v58, %v4280_v38  ;;  %v5710_v46 = vmul.f32 %v8501_v57, %v11387_v62  ;;  %v6323_v1 = vadd.f32 %v6322_v30, %v5834_v14  ;;  %v12538_v59 = vld [vmem:[#allocation36_spill] sm:$0xff] }
 0x4f0   : > { %v8503_v44 = vpop.eup %8502  ;;  %v5837_v20 = vmul.f32 %v5709_v5, %v12534_v45  ;;  %v6328_v24 = vrot.slane %v5835_v6, 4  ;;  %v11474_v34 = vmax.f32 %v4285_v13, %v4286_v36  ;;  %v4291_v56 = vmax.f32 %v4289_v33, %v4290_v31  ;;  %v12537_v5 = vld [vmem:[#allocation33_spill] sm:$0xff] }
 0x4f1   : > { %v5711_v17 = vmul.f32 %v8503_v44, %v11393_v0  ;;  %v6334_v19 = vrot.slane %v5836_v63, 4  ;;  %v5838_v27 = vmul.f32 %v5710_v46, %v12535_v51  ;;  %v6324_v52 = vrot.slane %v6323_v1, 2 }
 0x4f2   : > { %v6329_v49 = vadd.f32 %v6328_v24, %v5835_v6  ;;  %v6340_v32 = vrot.slane %v5837_v20, 4  ;;  %v4292_v62 = vrot.slane %v4291_v56, 1  ;;  %v4296_v28 = vrot.slane %v11455_v10, 2 }
 0x4f3   : > { %v8505_v58 = vpop.eup %8504  ;;  %v5839_v55 = vmul.f32 %v5711_v17, %v12536_v60  ;;  %v6335_v47 = vadd.f32 %v6334_v19, %v5836_v63  ;;  %v6325_v0 = vadd.f32 %v6324_v52, %v6323_v1  ;;  %v6346_v38 = vrot.slane %v5838_v27, 4 }
 0x4f4   : > { %v8507_v14 = vpop.eup %8506  ;;  %v5712_v48 = vmul.f32 %v8505_v58, %v11400_v29  ;;  %v6330_v16 = vrot.slane %v6329_v49, 2  ;;  %v6341_v13 = vadd.f32 %v6340_v32, %v5837_v20 }
 0x4f5   : > { %v5713_v33 = vmul.f32 %v8507_v14, %v11406_v21  ;;  %v6336_v31 = vrot.slane %v6335_v47, 2  ;;  %v6352_v36 = vrot.slane %v5839_v55, 4  ;;  %v6326_v6 = vrot.slane %v6325_v0, 1 }
 0x4f6   : > { %v5840_v26 = vmul.f32 %v5712_v48, %v12537_v5  ;;  %v6331_v30 = vadd.f32 %v6330_v16, %v6329_v49  ;;  %v6342_v57 = vrot.slane %v6341_v13, 2  ;;  %v6347_v46 = vadd.f32 %v6346_v38, %v5838_v27 }
 0x4f7   : > { %v5841_v63 = vmul.f32 %v5713_v33, %v12538_v59  ;;  %v6337_v44 = vadd.f32 %v6336_v31, %v6335_v47  ;;  %v6353_v45 = vadd.f32 %v6352_v36, %v5839_v55  ;;  %v6327_v24 = vadd.f32 %v6326_v6, %v6325_v0 }
 0x4f8   : > { %v6332_v29 = vrot.slane %v6331_v30, 1  ;;  %v6343_v1 = vadd.f32 %v6342_v57, %v6341_v13  ;;  %v6358_v17 = vrot.slane %v5840_v26, 4  ;;  %v6348_v19 = vrot.slane %v6347_v46, 2 }
 0x4f9   : > { %v6338_v20 = vrot.slane %v6337_v44, 1  ;;  %v6354_v21 = vrot.slane %v6353_v45, 2  ;;  %v6364_v51 = vrot.slane %v5841_v63, 4  ;;  %v7864_v60 = vpack.c.bf16 %v6327_v24, %v6327_v24 }
 0x4fa   : > { %v6333_v52 = vadd.f32 %v6332_v29, %v6331_v30  ;;  %v6344_v32 = vrot.slane %v6343_v1, 1  ;;  %v6359_v58 = vadd.f32 %v6358_v17, %v5840_v26  ;;  %v6349_v49 = vadd.f32 %v6348_v19, %v6347_v46 }
 0x4fb   : > { %v6339_v14 = vadd.f32 %v6338_v20, %v6337_v44  ;;  %v6355_v48 = vadd.f32 %v6354_v21, %v6353_v45  ;;  %v6365_v16 = vadd.f32 %v6364_v51, %v5841_v63  ;;  %v7242_v55 = vunpack.c.l.b16 %v7864_v60 }
 0x4fc   : > { %v6345_v33 = vadd.f32 %v6344_v32, %v6343_v1  ;;  %v6360_v47 = vrot.slane %v6359_v58, 2  ;;  %v7865_v27 = vpack.c.bf16 %v6333_v52, %v6333_v52  ;;  %v6350_v0 = vrot.slane %v6349_v49, 1 }
 0x4fd   : > { %v6356_v31 = vrot.slane %v6355_v48, 1  ;;  %v6366_v13 = vrot.slane %v6365_v16, 2  ;;  %v7866_v38 = vpack.c.bf16 %v6339_v14, %v6339_v14  ;;  %v4293_v57 = vmax.f32 %v4291_v56, %v4292_v62 }
 0x4fe   : > { %v6361_v36 = vadd.f32 %v6360_v47, %v6359_v58  ;;  %v7867_v5 = vpack.c.bf16 %v6345_v33, %v6345_v33  ;;  %v7243_v6 = vunpack.c.l.b16 %v7865_v27  ;;  %v6351_v30 = vadd.f32 %v6350_v0, %v6349_v49  ;;  %v11500_v27 = vpop.f32.mrf.mxu0 }
 0x4ff   : > { %v6357_v59 = vadd.f32 %v6356_v31, %v6355_v48  ;;  %v6367_v26 = vadd.f32 %v6366_v13, %v6365_v16  ;;  %v7244_v24 = vunpack.c.l.b16 %v7866_v38  ;;  %v4297_v45 = vmax.f32 %v11455_v10, %v4296_v28 }
 0x500   : > { %v6362_v44 = vrot.slane %v6361_v36, 1  ;;  %v7245_v46 = vunpack.c.l.b16 %v7867_v5  ;;  %v7368_v63 = vsel %vm7298_vm0, %v7243_v6, %v7242_v55  ;;  %v7868_v1 = vpack.c.bf16 %v6351_v30, %v6351_v30 }
 0x501   : > { %v6368_v29 = vrot.slane %v6367_v26, 1  ;;  %v7869_v17 = vpack.c.bf16 %v6357_v59, %v6357_v59  ;;  %v7369_v20 = vsel %vm7300_vm1, %v7244_v24, %v7368_v63  ;;  %v4298_v51 = vrot.slane %v4297_v45, 1 }
 0x502   : > { %v6363_v19 = vadd.f32 %v6362_v44, %v6361_v36  ;;  %v7370_v21 = vsel %vm7302_vm2, %v7245_v46, %v7369_v20  ;;  %v4301_v56 = vmax.f32 %v11437_v43, %v4300_v11  ;;  %v7246_v52 = vunpack.c.l.b16 %v7868_v1  ;;  %v7968_v36 = vpop.f32.mrf.mxu1 }
 0x503   : > { %v6369_v62 = vadd.f32 %v6368_v29, %v6367_v26  ;;  %v7247_v32 = vunpack.c.l.b16 %v7869_v17  ;;  %v4466_v58 = vsub.f32 %v11416_v35, %v11462_v61  ;;  %v4299_v28 = vmax.f32 %v4297_v45, %v4298_v51  ;;  %v11518_v26 = vld [vmem:[%s12208_s4] ss:$0 sm:$0xff] }
 0x504   : > { %v7870_v10 = vpack.c.bf16 %v6363_v19, %v6363_v19  ;;  %v4302_v60 = vrot.slane %v4301_v56, 2  ;;  %v4467_v14 = vsub.f32 %v11419_v12, %v11465_v18  ;;  %v7371_v48 = vsel %vm7304_vm3, %v7246_v52, %v7370_v21 }
 0x505   : > { %v7871_v49 = vpack.c.bf16 %v6369_v62, %v6369_v62  ;;  %v4468_v16 = vsub.f32 %v11422_v39, %v11467_v54  ;;  %v4469_v11 = vsub.f32 %v11425_v41, %v11469_v2  ;;  %v7372_v47 = vsel %vm7306_vm4, %v7247_v32, %v7371_v48 }
 0x506   : > { %v7248_v33 = vunpack.c.l.b16 %v7870_v10  ;;  %v4303_v35 = vmax.f32 %v4301_v56, %v4302_v60  ;;  %v4470_v61 = vsub.f32 %v11428_v53, %v11474_v34  ;;  %v4471_v12 = vsub.f32 %v11431_v50, %v4293_v57  ;;  %v1223_v50 = vpop.f32.mrf.mxu0  ;;  %v12539_v10 = vld [vmem:[#allocation78_spill] sm:$0xff] }
 0x507   : > { %v7249_v55 = vunpack.c.l.b16 %v7871_v49  ;;  %v4472_v18 = vsub.f32 %v11434_v4, %v4299_v28  ;;  %v4706_v0 = vmul.f32 1.442695, %v4466_v58  ;;  %v4708_v31 = vmul.f32 1.442695, %v4467_v14 }
 0x508   : > { %v7373_v39 = vsel %vm7308_vm5, %v7248_v33, %v7372_v47  ;;  %v4304_v54 = vrot.slane %v4303_v35, 1  ;;  %v4710_v41 = vmul.f32 1.442695, %v4468_v16  ;;  %v4712_v13 = vmul.f32 1.442695, %v4469_v11  ;;  %v12540_v11 = vld [vmem:[#allocation80_spill] sm:$0xff] }
 0x509   : > { %v7374_v2 = vsel %vm7310_vm6, %v7249_v55, %v7373_v39  ;;  %8508 = vpow2.f32 %v4706_v0  ;;  %v4714_v38 = vmul.f32 1.442695, %v4470_v61  ;;  %v4716_v34 = vmul.f32 1.442695, %v4471_v12  ;;  %v12541_v47 = vld [vmem:[#allocation82_spill] sm:$0xff]  ;;  %v12543_v0 = vld [vmem:[#allocation89_spill] sm:$0xff] }
 0x50a   : > { %v7426_v5 = vpack.c.b16 %v7374_v2, %v7374_v2  ;;  %v4305_v53 = vmax.f32 %v4303_v35, %v4304_v54  ;;  %8510 = vpow2.f32 %v4708_v31  ;;  %v4718_v4 = vmul.f32 1.442695, %v4472_v18  ;;  %v12542_v61 = vld [vmem:[#allocation86_spill] sm:$0xff]  ;;  %v12544_v54 = vld [vmem:[#allocation92_spill] sm:$0xff] }
 0x50b   : > { %8512 = vpow2.f32 %v4710_v41  ;;  %v3268_v6 = vadd.f32 %v11350_v40, %v1223_v50  ;;  %v2366_v57 = vcombine.high %v11357_v23, %v11357_v23  ;;  %v2373_v59 = vrot.slane %v11357_v23, %v9361_v25  ;;  %v12545_v2 = vld [vmem:[#allocation84_spill] sm:$0xff] }
 0x50c   : > { %7458 = vst [vmem:[%s9683_s26 + $0x24] sm:$0xf] %v7426_v5  ;;  %v4473_v30 = vsub.f32 %v11437_v43, %v4305_v53  ;;  %8514 = vpow2.f32 %v4712_v13  ;;  %v11521_v24 = vadd.f32 %v11518_v26, %v7968_v36 }
 0x50d   : > { %8516 = vpow2.f32 %v4714_v38  ;;  %v3396_v40 = vmul.f32 0.01, %v3268_v6  ;;  %v2380_v44 = vrot.slane %v2366_v57, %v9361_v25  ;;  %v2381_v63 = vcombine.high %v2373_v59, %v2373_v59 }
 0x50e   : > { %8518 = vpow2.f32 %v4716_v34  ;;  %v4720_v43 = vmul.f32 1.442695, %v4473_v30  ;;  %v2389_v23 = vrot.slane %v2373_v59, %v9361_v25 }
 0x50f   : > { %8520 = vpow2.f32 %v4718_v4  ;;  %v11527_v45 = vmax.f32 %v3268_v6, %v3396_v40  ;;  %v2382_v29 = vcombine.high %v2380_v44, %v2380_v44  ;;  %v2396_v1 = vrot.slane %v2380_v44, %v9361_v25  ;;  %v12546_v4 = vld [vmem:[#allocation95_spill] sm:$0xff] }
 0x510   : > { %8522 = vpow2.f32 %v4720_v43  ;;  %v2403_v17 = vrot.slane %v2381_v63, %v9361_v25  ;;  %v2411_v20 = vcombine.high %v2389_v23, %v2389_v23  ;;  %v2949_v19 = vrot.slane %v2389_v23, %v9366_v15 }
 0x511   : > { %v3982_v21 = vrot.slane %v11527_v45, 4  ;;  %v2410_v51 = vrot.slane %v2382_v29, %v9361_v25  ;;  %v2412_v56 = vcombine.high %v2396_v1, %v2396_v1  ;;  %v2965_v62 = vrot.slane %v2396_v1, %v9366_v15 }
 0x512   : > { %v2413_v52 = vcombine.high %v2403_v17, %v2403_v17  ;;  %v2953_v32 = vrot.slane %v2403_v17, %v9366_v15  ;;  %v2957_v58 = vrot.slane %v2411_v20, %v9366_v15  ;;  %v3298_v28 = vadd.f32 %v2949_v19, %v12539_v10 }
 0x513   : > { %v3983_v60 = vmax.f32 %v11527_v45, %v3982_v21  ;;  %v2414_v14 = vcombine.high %v2410_v51, %v2410_v51  ;;  %v2969_v49 = vrot.slane %v2410_v51, %v9366_v15  ;;  %v2973_v48 = vrot.slane %v2412_v56, %v9366_v15 }
 0x514   : > { %v2961_v16 = vrot.slane %v2413_v52, %v9366_v15  ;;  %v3299_v33 = vadd.f32 %v2953_v32, %v12540_v11  ;;  %v3300_v35 = vadd.f32 %v2957_v58, %v12541_v47  ;;  %v11545_v55 = vadd.f32 %v2965_v62, %v12542_v61 }
 0x515   : > { %v3984_v12 = vrot.slane %v3983_v60, 2  ;;  %v2977_v18 = vrot.slane %v2414_v14, %v9366_v15  ;;  %v11549_v39 = vadd.f32 %v2969_v49, %v12543_v0  ;;  %v11552_v31 = vadd.f32 %v2973_v48, %v12544_v54 }
 0x516   : > { %v11554_v41 = vpop.eup %8508  ;;  %v11557_v13 = vadd.f32 %v2961_v16, %v12545_v2  ;;  %v3426_v38 = vmul.f32 0.01, %v3298_v28  ;;  %v3427_v36 = vmul.f32 0.01, %v3299_v33  ;;  %v3428_v5 = vmul.f32 0.01, %v3300_v35 }
 0x517   : > { %v11559_v53 = vpop.eup %8510  ;;  %v5410_v34 = vrot.slane %v11554_v41, 4  ;;  %v3985_v50 = vmax.f32 %v3983_v60, %v3984_v12  ;;  %v11563_v6 = vadd.f32 %v2977_v18, %v12546_v4  ;;  %v11566_v57 = vmul.f32 0.01, %v11545_v55 }
 0x518   : > { %v11568_v30 = vpop.eup %8512  ;;  %v5416_v59 = vrot.slane %v11559_v53, 4  ;;  %v11572_v40 = vmul.f32 0.01, %v11557_v13  ;;  %v11575_v44 = vmul.f32 0.01, %v11549_v39  ;;  %v11577_v43 = vmax.f32 %v3298_v28, %v3426_v38 }
 0x519   : > { %v11579_v63 = vpop.eup %8514  ;;  %v5411_v23 = vadd.f32 %v11554_v41, %v5410_v34  ;;  %v5422_v29 = vrot.slane %v11568_v30, 4  ;;  %v3986_v1 = vrot.slane %v3985_v50, 1  ;;  %v11584_v17 = vmul.f32 0.01, %v11552_v31 }
 0x51a   : > { %v11586_v20 = vpop.eup %8516  ;;  %v5417_v19 = vadd.f32 %v11559_v53, %v5416_v59  ;;  %v5428_v21 = vrot.slane %v11579_v63, 4  ;;  %v3433_v51 = vmul.f32 0.01, %v11563_v6  ;;  %v11591_v56 = vmax.f32 %v3299_v33, %v3427_v36 }
 0x51b   : > { %v11593_v62 = vpop.eup %8518  ;;  %v5412_v52 = vrot.slane %v5411_v23, 2  ;;  %v5423_v32 = vadd.f32 %v11568_v30, %v5422_v29  ;;  %v5434_v58 = vrot.slane %v11586_v20, 4  ;;  %v3987_v10 = vmax.f32 %v3985_v50, %v3986_v1 }
 0x51c   : > { %v11597_v28 = vpop.eup %8520  ;;  %v5418_v60 = vrot.slane %v5417_v19, 2  ;;  %v5429_v14 = vadd.f32 %v11579_v63, %v5428_v21  ;;  %v5440_v49 = vrot.slane %v11593_v62, 4  ;;  %v11601_v48 = vmax.f32 %v3300_v35, %v3428_v5 }
 0x51d   : > { %v11603_v16 = vpop.eup %8522  ;;  %v5413_v11 = vadd.f32 %v5412_v52, %v5411_v23  ;;  %v5424_v33 = vrot.slane %v5423_v32, 2  ;;  %v5435_v47 = vadd.f32 %v11586_v20, %v5434_v58  ;;  %v5446_v61 = vrot.slane %v11597_v28, 4 }
 0x51e   : > { %v5419_v12 = vadd.f32 %v5418_v60, %v5417_v19  ;;  %v5430_v18 = vrot.slane %v5429_v14, 2  ;;  %v5441_v0 = vadd.f32 %v11593_v62, %v5440_v49  ;;  %v5452_v54 = vrot.slane %v11603_v16, 4 }
 0x51f   : > { %v5414_v2 = vrot.slane %v5413_v11, 1  ;;  %v5425_v38 = vadd.f32 %v5424_v33, %v5423_v32  ;;  %v5436_v36 = vrot.slane %v5435_v47, 2  ;;  %v5447_v35 = vadd.f32 %v11597_v28, %v5446_v61 }
 0x520   : > { %v5420_v5 = vrot.slane %v5419_v12, 1  ;;  %v5431_v34 = vadd.f32 %v5430_v18, %v5429_v14  ;;  %v5442_v50 = vrot.slane %v5441_v0, 2  ;;  %v5453_v4 = vadd.f32 %v11603_v16, %v5452_v54 }
 0x521   : > { %v5415_v59 = vadd.f32 %v5414_v2, %v5413_v11  ;;  %v5426_v23 = vrot.slane %v5425_v38, 1  ;;  %v5437_v29 = vadd.f32 %v5436_v36, %v5435_v47  ;;  %v5448_v1 = vrot.slane %v5447_v35, 2 }
 0x522   : > { %v5421_v19 = vadd.f32 %v5420_v5, %v5419_v12  ;;  %v5432_v21 = vrot.slane %v5431_v34, 1  ;;  %v5443_v52 = vadd.f32 %v5442_v50, %v5441_v0  ;;  %v5454_v58 = vrot.slane %v5453_v4, 2 }
 0x523   : > { %v5427_v60 = vadd.f32 %v5426_v23, %v5425_v38  ;;  %v5438_v49 = vrot.slane %v5437_v29, 1  ;;  %v5449_v46 = vadd.f32 %v5448_v1, %v5447_v35  ;;  %8524 = vrcp.f32 %v5415_v59 }
 0x524   : > { %v5433_v32 = vadd.f32 %v5432_v21, %v5431_v34  ;;  %v5444_v33 = vrot.slane %v5443_v52, 1  ;;  %v5455_v61 = vadd.f32 %v5454_v58, %v5453_v4  ;;  %8526 = vrcp.f32 %v5421_v19 }
 0x525   : > { %v5439_v14 = vadd.f32 %v5438_v49, %v5437_v29  ;;  %v5450_v18 = vrot.slane %v5449_v46, 1  ;;  %8528 = vrcp.f32 %v5427_v60  ;;  %v4420_v11 = vsub.f32 %v11527_v45, %v3987_v10 }
 0x526   : > { %v5445_v54 = vadd.f32 %v5444_v33, %v5443_v52  ;;  %v5456_v47 = vrot.slane %v5455_v61, 1  ;;  %8530 = vrcp.f32 %v5433_v32  ;;  %v11614_v12 = vmax.f32 %v11557_v13, %v11572_v40 }
 0x527   : > { %v5451_v0 = vadd.f32 %v5450_v18, %v5449_v46  ;;  %8532 = vrcp.f32 %v5439_v14  ;;  %v4614_v2 = vmul.f32 1.442695, %v4420_v11  ;;  %v11618_v38 = vmax.f32 %v11545_v55, %v11566_v57 }
 0x528   : > { %v5457_v36 = vadd.f32 %v5456_v47, %v5455_v61  ;;  %8534 = vrcp.f32 %v5445_v54  ;;  %v11622_v35 = vmax.f32 %v11549_v39, %v11575_v44  ;;  %v11626_v45 = vmax.f32 %v11552_v31, %v11584_v17 }
 0x529   : > { %8536 = vrcp.f32 %v5451_v0  ;;  %v11629_v13 = vmax.f32 %v11563_v6, %v3433_v51  ;;  %v4162_v46 = vrot.slane %v11577_v43, 4  ;;  %v4168_v40 = vrot.slane %v11591_v56, 4 }
 0x52a   : > { %8538 = vrcp.f32 %v5457_v36  ;;  %v4174_v55 = vrot.slane %v11601_v48, 4  ;;  %v4180_v57 = vrot.slane %v11614_v12, 4  ;;  %v4186_v39 = vrot.slane %v11618_v38, 4 }
 0x52b   : > { %8540 = vpow2.f32 %v4614_v2  ;;  %v4163_v44 = vmax.f32 %v11577_v43, %v4162_v46  ;;  %v4169_v31 = vmax.f32 %v11591_v56, %v4168_v40  ;;  %v4192_v17 = vrot.slane %v11622_v35, 4 }
 0x52c   : > { %v4175_v6 = vmax.f32 %v11601_v48, %v4174_v55  ;;  %v4181_v51 = vmax.f32 %v11614_v12, %v4180_v57  ;;  %v4187_v10 = vmax.f32 %v11618_v38, %v4186_v39  ;;  %v4198_v5 = vrot.slane %v11626_v45, 4 }
 0x52d   : > { %v4164_v34 = vrot.slane %v4163_v44, 2  ;;  %v4170_v50 = vrot.slane %v4169_v31, 2  ;;  %v4193_v4 = vmax.f32 %v11622_v35, %v4192_v17  ;;  %v4204_v59 = vrot.slane %v11629_v13, 4 }
 0x52e   : > { %v4176_v23 = vrot.slane %v4175_v6, 2  ;;  %v4182_v29 = vrot.slane %v4181_v51, 2  ;;  %v4188_v1 = vrot.slane %v4187_v10, 2  ;;  %v11646_v19 = vmax.f32 %v11626_v45, %v4198_v5 }
 0x52f   : > { %v4165_v21 = vmax.f32 %v4163_v44, %v4164_v34  ;;  %v4171_v52 = vmax.f32 %v4169_v31, %v4170_v50  ;;  %v4194_v58 = vrot.slane %v4193_v4, 2  ;;  %v11649_v60 = vmax.f32 %v11629_v13, %v4204_v59  ;;  %v12547_v44 = vld [vmem:[#allocation117_spill] sm:$0xff] }
 0x530   : > { %v8525_v49 = vpop.eup %8524  ;;  %v4177_v32 = vmax.f32 %v4175_v6, %v4176_v23  ;;  %v4183_v33 = vmax.f32 %v4181_v51, %v4182_v29  ;;  %v4189_v61 = vmax.f32 %v4187_v10, %v4188_v1  ;;  %v4200_v14 = vrot.slane %v11646_v19, 2  ;;  %v12548_v10 = vld [vmem:[#allocation119_spill] sm:$0xff]  ;;  %v12549_v59 = vld [vmem:[#allocation121_spill] sm:$0xff] }
 0x531   : > { %v8527_v18 = vpop.eup %8526  ;;  %v5746_v11 = vmul.f32 %v8525_v49, %v11554_v41  ;;  %v4166_v54 = vrot.slane %v4165_v21, 1  ;;  %v4172_v47 = vrot.slane %v4171_v52, 1  ;;  %v11653_v0 = vmax.f32 %v4193_v4, %v4194_v58 }
 0x532   : > { %v8529_v2 = vpop.eup %8528  ;;  %v5747_v36 = vmul.f32 %v8527_v18, %v11559_v53  ;;  %v4178_v46 = vrot.slane %v4177_v32, 1  ;;  %v4184_v40 = vrot.slane %v4183_v33, 1  ;;  %v4190_v55 = vrot.slane %v4189_v61, 1  ;;  %v12551_v18 = vld [vmem:[#allocation125_spill] sm:$0xff] }
 0x533   : > { %v8531_v57 = vpop.eup %8530  ;;  %v5748_v39 = vmul.f32 %v8529_v2, %v11568_v30  ;;  %v5874_v31 = vmul.f32 %v5746_v11, %v12547_v44  ;;  %v11658_v17 = vmax.f32 %v4165_v21, %v4166_v54  ;;  %v11660_v6 = vmax.f32 %v4171_v52, %v4172_v47  ;;  %v12550_v52 = vld [vmem:[#allocation123_spill] sm:$0xff] }
 0x534   : > { %v8533_v41 = vpop.eup %8532  ;;  %v5749_v51 = vmul.f32 %v8531_v57, %v11579_v63  ;;  %v5875_v5 = vmul.f32 %v5747_v36, %v12548_v10  ;;  %v11664_v34 = vmax.f32 %v4177_v32, %v4178_v46  ;;  %v11666_v53 = vmax.f32 %v4183_v33, %v4184_v40  ;;  %v12552_v2 = vld [vmem:[#allocation127_spill] sm:$0xff]  ;;  %v12553_v40 = vld [vmem:[#allocation129_spill] sm:$0xff] }
 0x535   : > { %v8535_v50 = vpop.eup %8534  ;;  %v5750_v4 = vmul.f32 %v8533_v41, %v11586_v20  ;;  %v5876_v30 = vmul.f32 %v5748_v39, %v12549_v59  ;;  %v6562_v23 = vrot.slane %v5874_v31, 4  ;;  %v11670_v29 = vmax.f32 %v4189_v61, %v4190_v55  ;;  %v12554_v41 = vld [vmem:[#allocation131_spill] sm:$0xff] }
 0x536   : > { %v8537_v1 = vpop.eup %8536  ;;  %v5751_v21 = vmul.f32 %v8535_v50, %v11593_v62  ;;  %v5877_v58 = vmul.f32 %v5749_v51, %v12550_v52  ;;  %v6568_v63 = vrot.slane %v5875_v5, 4  ;;  %v4196_v49 = vrot.slane %v11653_v0, 1 }
 0x537   : > { %v8539_v32 = vpop.eup %8538  ;;  %v5752_v33 = vmul.f32 %v8537_v1, %v11597_v28  ;;  %v5878_v11 = vmul.f32 %v5750_v4, %v12551_v18  ;;  %v6563_v54 = vadd.f32 %v6562_v23, %v5874_v31  ;;  %v6574_v20 = vrot.slane %v5876_v30, 4 }
 0x538   : > { %v11677_v47 = vpop.eup %8540  ;;  %v5753_v61 = vmul.f32 %v8539_v32, %v11603_v16  ;;  %v5879_v36 = vmul.f32 %v5751_v21, %v12552_v2  ;;  %v6569_v46 = vadd.f32 %v6568_v63, %v5875_v5  ;;  %v6580_v62 = vrot.slane %v5877_v58, 4 }
 0x539   : > { %v5880_v55 = vmul.f32 %v5752_v33, %v12553_v40  ;;  %v6564_v57 = vrot.slane %v6563_v54, 2  ;;  %v6575_v39 = vadd.f32 %v6574_v20, %v5876_v30  ;;  %v6586_v44 = vrot.slane %v5878_v11, 4 }
 0x53a   : > { %v5881_v51 = vmul.f32 %v5753_v61, %v12554_v41  ;;  %v6570_v28 = vrot.slane %v6569_v46, 2  ;;  %v6581_v10 = vadd.f32 %v6580_v62, %v5877_v58  ;;  %v6592_v50 = vrot.slane %v5879_v36, 4 }
 0x53b   : > { %v6565_v31 = vadd.f32 %v6564_v57, %v6563_v54  ;;  %v6576_v4 = vrot.slane %v6575_v39, 2  ;;  %v6587_v59 = vadd.f32 %v6586_v44, %v5878_v11  ;;  %v6598_v23 = vrot.slane %v5880_v55, 4 }
 0x53c   : > { %v6571_v1 = vadd.f32 %v6570_v28, %v6569_v46  ;;  %v6582_v16 = vrot.slane %v6581_v10, 2  ;;  %v6593_v52 = vadd.f32 %v6592_v50, %v5879_v36  ;;  %v6604_v21 = vrot.slane %v5881_v51, 4 }
 0x53d   : > { %v6566_v5 = vrot.slane %v6565_v31, 1  ;;  %v6577_v63 = vadd.f32 %v6576_v4, %v6575_v39  ;;  %v6588_v32 = vrot.slane %v6587_v59, 2  ;;  %v6599_v33 = vadd.f32 %v6598_v23, %v5880_v55 }
 0x53e   : > { %v6572_v18 = vrot.slane %v6571_v1, 1  ;;  %v6583_v30 = vadd.f32 %v6582_v16, %v6581_v10  ;;  %v6594_v20 = vrot.slane %v6593_v52, 2  ;;  %v6605_v2 = vadd.f32 %v6604_v21, %v5881_v51 }
 0x53f   : > { %v6567_v61 = vadd.f32 %v6566_v5, %v6565_v31  ;;  %v6578_v40 = vrot.slane %v6577_v63, 1  ;;  %v6589_v58 = vadd.f32 %v6588_v32, %v6587_v59  ;;  %v6600_v62 = vrot.slane %v6599_v33, 2 }
 0x540   : > { %v6573_v54 = vadd.f32 %v6572_v18, %v6571_v1  ;;  %v6584_v57 = vrot.slane %v6583_v30, 1  ;;  %v6595_v11 = vadd.f32 %v6594_v20, %v6593_v52  ;;  %v6606_v44 = vrot.slane %v6605_v2, 2 }
 0x541   : > { %v6579_v46 = vadd.f32 %v6578_v40, %v6577_v63  ;;  %v6590_v41 = vrot.slane %v6589_v58, 1  ;;  %v6601_v36 = vadd.f32 %v6600_v62, %v6599_v33  ;;  %v7904_v28 = vpack.c.bf16 %v6567_v61, %v6567_v61 }
 0x542   : > { %v6585_v50 = vadd.f32 %v6584_v57, %v6583_v30  ;;  %v6596_v39 = vrot.slane %v6595_v11, 1  ;;  %v6607_v4 = vadd.f32 %v6606_v44, %v6605_v2  ;;  %v7905_v55 = vpack.c.bf16 %v6573_v54, %v6573_v54 }
 0x543   : > { %v6591_v23 = vadd.f32 %v6590_v41, %v6589_v58  ;;  %v6602_v10 = vrot.slane %v6601_v36, 1  ;;  %v7906_v16 = vpack.c.bf16 %v6579_v46, %v6579_v46  ;;  %v7282_v51 = vunpack.c.l.b16 %v7904_v28 }
 0x544   : > { %v6597_v31 = vadd.f32 %v6596_v39, %v6595_v11  ;;  %v6608_v21 = vrot.slane %v6607_v4, 1  ;;  %v7907_v59 = vpack.c.bf16 %v6585_v50, %v6585_v50  ;;  %v7283_v5 = vunpack.c.l.b16 %v7905_v55 }
 0x545   : > { %v6603_v1 = vadd.f32 %v6602_v10, %v6601_v36  ;;  %v7908_v32 = vpack.c.bf16 %v6591_v23, %v6591_v23  ;;  %v7284_v52 = vunpack.c.l.b16 %v7906_v16  ;;  %v5134_v63 = vrot.slane %v11677_v47, 4 }
 0x546   : > { %v6609_v18 = vadd.f32 %v6608_v21, %v6607_v4  ;;  %v7909_v33 = vpack.c.bf16 %v6597_v31, %v6597_v31  ;;  %v7285_v20 = vunpack.c.l.b16 %v7907_v59  ;;  %v7403_v30 = vsel %vm7298_vm0, %v7283_v5, %v7282_v51  ;;  %v11710_v21 = vpop.f32.mrf.mxu0 }
 0x547   : > { %v7910_v2 = vpack.c.bf16 %v6603_v1, %v6603_v1  ;;  %v7286_v61 = vunpack.c.l.b16 %v7908_v32  ;;  %v7404_v40 = vsel %vm7300_vm1, %v7284_v52, %v7403_v30  ;;  %v5135_v58 = vadd.f32 %v11677_v47, %v5134_v63  ;;  %v1750_v63 = vpop.f32.mrf.mxu1 }
 0x548   : > { %v7911_v62 = vpack.c.bf16 %v6609_v18, %v6609_v18  ;;  %v7287_v54 = vunpack.c.l.b16 %v7909_v33  ;;  %v7405_v57 = vsel %vm7302_vm2, %v7285_v20, %v7404_v40  ;;  %v4197_v11 = vmax.f32 %v11653_v0, %v4196_v49  ;;  %v1227_v52 = vpop.f32.mrf.mxu0 }
 0x549   : > { %v7288_v44 = vunpack.c.l.b16 %v7910_v2  ;;  %v7406_v46 = vsel %vm7304_vm3, %v7286_v61, %v7405_v57  ;;  %v5136_v41 = vrot.slane %v5135_v58, 2  ;;  %v4201_v36 = vmax.f32 %v11646_v19, %v4200_v14 }
 0x54a   : > { %v7289_v28 = vunpack.c.l.b16 %v7911_v62  ;;  %v7407_v50 = vsel %vm7306_vm4, %v7287_v54, %v7406_v46  ;;  %v4206_v39 = vrot.slane %v11649_v60, 2  ;;  %v4450_v4 = vsub.f32 %v11577_v43, %v11658_v17 }
 0x54b   : > { %v7408_v55 = vsel %vm7308_vm5, %v7288_v44, %v7407_v50  ;;  %v5137_v23 = vadd.f32 %v5136_v41, %v5135_v58  ;;  %v4202_v0 = vrot.slane %v4201_v36, 1  ;;  %v4451_v49 = vsub.f32 %v11591_v56, %v11660_v6 }
 0x54c   : > { %v7409_v10 = vsel %vm7310_vm6, %v7289_v28, %v7408_v55  ;;  %v4207_v19 = vmax.f32 %v11649_v60, %v4206_v39  ;;  %v4452_v14 = vsub.f32 %v11601_v48, %v11664_v34  ;;  %v4453_v16 = vsub.f32 %v11614_v12, %v11666_v53 }
 0x54d   : > { %v7431_v51 = vpack.c.b16 %v7409_v10, %v7409_v10  ;;  %v5138_v43 = vrot.slane %v5137_v23, 1  ;;  %v4203_v17 = vmax.f32 %v4201_v36, %v4202_v0  ;;  %v4454_v31 = vsub.f32 %v11618_v38, %v11670_v29 }
 0x54e   : > { %v4208_v59 = vrot.slane %v4207_v19, 1  ;;  %v4455_v56 = vsub.f32 %v11622_v35, %v4197_v11  ;;  %v4674_v6 = vmul.f32 1.442695, %v4450_v4  ;;  %v4676_v5 = vmul.f32 1.442695, %v4451_v49  ;;  %v12557_v49 = vld [vmem:[#allocation136_spill] sm:$0xff] }
 0x54f   : > { %v6284_v60 = vrot.slane %v11389_v8, 1  ;;  %7463 = vst [vmem:[%s9683_s26 + $0x38] sm:$0xf] %v7431_v51  ;;  %v5139_v48 = vadd.f32 %v5138_v43, %v5137_v23  ;;  %v4456_v34 = vsub.f32 %v11626_v45, %v4203_v17  ;;  %v4678_v12 = vmul.f32 1.442695, %v4452_v14  ;;  %v12556_v23 = vld [vmem:[#allocation134_spill] sm:$0xff] }
 0x550   : > { %v4209_v53 = vmax.f32 %v4207_v19, %v4208_v59  ;;  %8542 = vpow2.f32 %v4674_v6  ;;  %v4680_v1 = vmul.f32 1.442695, %v4453_v16  ;;  %v4682_v32 = vmul.f32 1.442695, %v4454_v31  ;;  %v12558_v19 = vld [vmem:[#allocation138_spill] sm:$0xff]  ;;  %v12560_v17 = vld [vmem:[#allocation140_spill] sm:$0xff] }
 0x551   : > { %8544 = vrcp.f32 %v5139_v48  ;;  %v4684_v38 = vmul.f32 1.442695, %v4455_v56  ;;  %v2513_v29 = vcombine.high %v11521_v24, %v11521_v24  ;;  %v2520_v35 = vrot.slane %v11521_v24, %v9361_v25  ;;  %v12559_v16 = vld [vmem:[#allocation142_spill] sm:$0xff]  ;;  %v12561_v59 = vld [vmem:[#allocation145_spill] sm:$0xff]  ;;  %v12562_v6 = vld [vmem:[#allocation148_spill] sm:$0xff] }
 0x552   : > { %v4457_v18 = vsub.f32 %v11629_v13, %v4209_v53  ;;  %8546 = vpow2.f32 %v4676_v5  ;;  %v4686_v33 = vmul.f32 1.442695, %v4456_v34  ;;  %v12555_v45 = vcombine.high %v11155_v22, %v11155_v22 }
 0x553   : > { %8548 = vpow2.f32 %v4678_v12  ;;  %v2527_v30 = vrot.slane %v2513_v29, %v9361_v25  ;;  %v2528_v2 = vcombine.high %v2520_v35, %v2520_v35  ;;  %v2536_v61 = vrot.slane %v2520_v35, %v9361_v25 }
 0x554   : > { %v2833_v20 = vrot.slane %v12555_v45, %v9366_v15  ;;  %8550 = vpow2.f32 %v4680_v1  ;;  %v4688_v40 = vmul.f32 1.442695, %v4457_v18  ;;  %v11728_v58 = vadd.f32 %v11518_v26, %v1750_v63 }
 0x555   : > { %8552 = vpow2.f32 %v4682_v32  ;;  %v2529_v13 = vcombine.high %v2527_v30, %v2527_v30  ;;  %v2543_v62 = vrot.slane %v2527_v30, %v9361_v25  ;;  %v2550_v54 = vrot.slane %v2528_v2, %v9361_v25 }
 0x556   : > { %v3269_v24 = vadd.f32 %v2833_v20, %v1227_v52  ;;  %8554 = vpow2.f32 %v4684_v38  ;;  %v2558_v22 = vcombine.high %v2536_v61, %v2536_v61  ;;  %v3045_v57 = vrot.slane %v2536_v61, %v9366_v15  ;;  %v12563_v38 = vld [vmem:[#allocation151_spill] sm:$0xff] }
 0x557   : > { %8556 = vpow2.f32 %v4686_v33  ;;  %v2557_v44 = vrot.slane %v2529_v13, %v9361_v25  ;;  %v2559_v46 = vcombine.high %v2543_v62, %v2543_v62  ;;  %v2560_v41 = vcombine.high %v2550_v54, %v2550_v54 }
 0x558   : > { %v3397_v11 = vmul.f32 0.01, %v3269_v24  ;;  %8558 = vpow2.f32 %v4688_v40  ;;  %v3049_v26 = vrot.slane %v2550_v54, %v9366_v15  ;;  %v3053_v36 = vrot.slane %v2558_v22, %v9366_v15 }
 0x559   : > { %v3061_v28 = vrot.slane %v2543_v62, %v9366_v15  ;;  %v2561_v50 = vcombine.high %v2557_v44, %v2557_v44  ;;  %v3057_v39 = vrot.slane %v2560_v41, %v9366_v15  ;;  %v3065_v4 = vrot.slane %v2557_v44, %v9366_v15 }
 0x55a   : > { %v3069_v55 = vrot.slane %v2559_v46, %v9366_v15  ;;  %v3322_v0 = vadd.f32 %v3045_v57, %v12556_v23  ;;  %v3323_v10 = vadd.f32 %v3049_v26, %v12557_v49  ;;  %v3324_v14 = vadd.f32 %v3053_v36, %v12558_v19 }
 0x55b   : > { %v3326_v51 = vadd.f32 %v3061_v28, %v12559_v16  ;;  %v3073_v43 = vrot.slane %v2561_v50, %v9366_v15  ;;  %v3325_v31 = vadd.f32 %v3057_v39, %v12560_v17  ;;  %v3327_v56 = vadd.f32 %v3065_v4, %v12561_v59 }
 0x55c   : > { %v11748_v5 = vadd.f32 %v3069_v55, %v12562_v6  ;;  %v3450_v12 = vmul.f32 0.01, %v3322_v0  ;;  %v3451_v53 = vmul.f32 0.01, %v3323_v10  ;;  %v3452_v35 = vmul.f32 0.01, %v3324_v14 }
 0x55d   : > { %v11753_v1 = vpop.eup %8542  ;;  %v11757_v29 = vadd.f32 %v3073_v43, %v12563_v38  ;;  %v3453_v52 = vmul.f32 0.01, %v3325_v31  ;;  %v11762_v18 = vadd.f32 %v6284_v60, %v11389_v8  ;;  %v3454_v45 = vmul.f32 0.01, %v3326_v51 }
 0x55e   : > { %v8545_v63 = vpop.eup %8544  ;;  %v5314_v33 = vrot.slane %v11753_v1, 4  ;;  %v3455_v61 = vmul.f32 0.01, %v3327_v56  ;;  %v11771_v40 = vmul.f32 0.01, %v11748_v5  ;;  %v11773_v13 = vmax.f32 %v3269_v24, %v3397_v11 }
 0x55f   : > { %v11767_v30 = vpop.eup %8546  ;;  %v5700_v2 = vmul.f32 %v8545_v63, %v11677_v47  ;;  %v11779_v54 = vmax.f32 %v3322_v0, %v3450_v12  ;;  %v11781_v22 = vmax.f32 %v3323_v10, %v3451_v53  ;;  %v11787_v44 = vmul.f32 0.01, %v11757_v29 }
 0x560   : > { %v11775_v62 = vpop.eup %8548  ;;  %v5315_v8 = vadd.f32 %v11753_v1, %v5314_v33  ;;  %v5320_v60 = vrot.slane %v11767_v30, 4  ;;  %v11789_v46 = vmax.f32 %v3324_v14, %v3452_v35  ;;  %v11791_v24 = vmax.f32 %v3325_v31, %v3453_v52 }
 0x561   : > { %v11783_v57 = vpop.eup %8550  ;;  %v5326_v47 = vrot.slane %v11775_v62, 4  ;;  %v11797_v28 = vmax.f32 %v3326_v51, %v3454_v45  ;;  %v5828_v39 = vmul.f32 %v5700_v2, %v11500_v27  ;;  %v11804_v23 = vmax.f32 %v3327_v56, %v3455_v61 }
 0x562   : > { %v11793_v11 = vpop.eup %8552  ;;  %v5316_v41 = vrot.slane %v5315_v8, 2  ;;  %v5321_v26 = vadd.f32 %v11767_v30, %v5320_v60  ;;  %v5332_v36 = vrot.slane %v11783_v57, 4  ;;  %v4306_v17 = vrot.slane %v11779_v54, 4 }
 0x563   : > { %v11799_v50 = vpop.eup %8554  ;;  %v5327_v4 = vadd.f32 %v11775_v62, %v5326_v47  ;;  %v5338_v55 = vrot.slane %v11793_v11, 4  ;;  %v6286_v12 = vrot.slane %v5828_v39, 4  ;;  %v4312_v60 = vrot.slane %v11781_v22, 4 }
 0x564   : > { %v11806_v0 = vpop.eup %8556  ;;  %v5317_v49 = vadd.f32 %v5316_v41, %v5315_v8  ;;  %v5322_v10 = vrot.slane %v5321_v26, 2  ;;  %v5333_v19 = vadd.f32 %v11783_v57, %v5332_v36  ;;  %v5344_v14 = vrot.slane %v11799_v50, 4 }
 0x565   : > { %v11810_v16 = vpop.eup %8558  ;;  %v5328_v51 = vrot.slane %v5327_v4, 2  ;;  %v5339_v43 = vadd.f32 %v11793_v11, %v5338_v55  ;;  %v5350_v27 = vrot.slane %v11806_v0, 4  ;;  %v6287_v55 = vadd.f32 %v6286_v12, %v5828_v39 }
 0x566   : > { %v5318_v31 = vrot.slane %v5317_v49, 1  ;;  %v5323_v59 = vadd.f32 %v5322_v10, %v5321_v26  ;;  %v5334_v56 = vrot.slane %v5333_v19, 2  ;;  %v5345_v6 = vadd.f32 %v11799_v50, %v5344_v14 }
 0x567   : > { %v5329_v53 = vadd.f32 %v5328_v51, %v5327_v4  ;;  %v5340_v38 = vrot.slane %v5339_v43, 2  ;;  %v5351_v35 = vadd.f32 %v11806_v0, %v5350_v27  ;;  %v5356_v36 = vrot.slane %v11810_v16, 4 }
 0x568   : > { %v5319_v52 = vadd.f32 %v5318_v31, %v5317_v49  ;;  %v5324_v63 = vrot.slane %v5323_v59, 1  ;;  %v5335_v33 = vadd.f32 %v5334_v56, %v5333_v19  ;;  %v5346_v45 = vrot.slane %v5345_v6, 2 }
 0x569   : > { %v5330_v2 = vrot.slane %v5329_v53, 1  ;;  %v5341_v61 = vadd.f32 %v5340_v38, %v5339_v43  ;;  %v5352_v8 = vrot.slane %v5351_v35, 2  ;;  %v5357_v49 = vadd.f32 %v11810_v16, %v5356_v36 }
 0x56a   : > { %v5325_v47 = vadd.f32 %v5324_v63, %v5323_v59  ;;  %v5336_v41 = vrot.slane %v5335_v33, 1  ;;  %v5347_v26 = vadd.f32 %v5346_v45, %v5345_v6  ;;  %8560 = vrcp.f32 %v5319_v52 }
 0x56b   : > { %v5331_v10 = vadd.f32 %v5330_v2, %v5329_v53  ;;  %v5342_v4 = vrot.slane %v5341_v61, 1  ;;  %v5353_v14 = vadd.f32 %v5352_v8, %v5351_v35  ;;  %v11822_v43 = vmax.f32 %v11748_v5, %v11771_v40 }
 0x56c   : > { %v5337_v51 = vadd.f32 %v5336_v41, %v5335_v33  ;;  %v5348_v27 = vrot.slane %v5347_v26, 1  ;;  %8562 = vrcp.f32 %v5325_v47  ;;  %v5358_v56 = vrot.slane %v5357_v49, 2 }
 0x56d   : > { %v5343_v19 = vadd.f32 %v5342_v4, %v5341_v61  ;;  %v5354_v31 = vrot.slane %v5353_v14, 1  ;;  %8564 = vrcp.f32 %v5331_v10  ;;  %v4307_v39 = vmax.f32 %v11779_v54, %v4306_v17 }
 0x56e   : > { %v5349_v59 = vadd.f32 %v5348_v27, %v5347_v26  ;;  %v6288_v6 = vrot.slane %v6287_v55, 2  ;;  %8566 = vrcp.f32 %v5337_v51  ;;  %v4313_v53 = vmax.f32 %v11781_v22, %v4312_v60 }
 0x56f   : > { %v5355_v12 = vadd.f32 %v5354_v31, %v5353_v14  ;;  %v5359_v38 = vadd.f32 %v5358_v56, %v5357_v49  ;;  %8568 = vrcp.f32 %v5343_v19  ;;  %v4308_v35 = vrot.slane %v4307_v39, 2 }
 0x570   : > { %v4318_v52 = vrot.slane %v11789_v46, 4  ;;  %8570 = vrcp.f32 %v5349_v59  ;;  %v11829_v5 = vmax.f32 %v11757_v29, %v11787_v44  ;;  %v4314_v40 = vrot.slane %v4313_v53, 2 }
 0x571   : > { %v4324_v63 = vrot.slane %v11791_v24, 4  ;;  %v5360_v33 = vrot.slane %v5359_v38, 1  ;;  %8572 = vrcp.f32 %v5355_v12  ;;  %v4309_v17 = vmax.f32 %v4307_v39, %v4308_v35 }
 0x572   : > { %v4319_v45 = vmax.f32 %v11789_v46, %v4318_v52  ;;  %v11833_v2 = vadd.f32 %v6288_v6, %v6287_v55  ;;  %v4315_v61 = vmax.f32 %v4313_v53, %v4314_v40  ;;  %v4330_v60 = vrot.slane %v11797_v28, 4 }
 0x573   : > { %v4325_v8 = vmax.f32 %v11791_v24, %v4324_v63  ;;  %v5361_v47 = vadd.f32 %v5360_v33, %v5359_v38  ;;  %v4310_v41 = vrot.slane %v4309_v17, 1  ;;  %v4336_v29 = vrot.slane %v11804_v23, 4 }
 0x574   : > { %v4320_v26 = vrot.slane %v4319_v45, 2  ;;  %v4316_v44 = vrot.slane %v4315_v61, 1  ;;  %v4331_v10 = vmax.f32 %v11797_v28, %v4330_v60  ;;  %v4342_v4 = vrot.slane %v11822_v43, 4 }
 0x575   : > { %v4326_v36 = vrot.slane %v4325_v8, 2  ;;  %8574 = vrcp.f32 %v5361_v47  ;;  %v11840_v14 = vmax.f32 %v4309_v17, %v4310_v41  ;;  %v4337_v51 = vmax.f32 %v11804_v23, %v4336_v29 }
 0x576   : > { %v4321_v55 = vmax.f32 %v4319_v45, %v4320_v26  ;;  %v11843_v27 = vmax.f32 %v4315_v61, %v4316_v44  ;;  %v4332_v19 = vrot.slane %v4331_v10, 2  ;;  %v4343_v31 = vmax.f32 %v11822_v43, %v4342_v4  ;;  %v12564_v44 = vld [vmem:[#allocation77_spill] sm:$0xff] }
 0x577   : > { %v4327_v49 = vmax.f32 %v4325_v8, %v4326_v36  ;;  %v4338_v56 = vrot.slane %v4337_v51, 2  ;;  %v4348_v39 = vrot.slane %v11829_v5, 4  ;;  %v4474_v6 = vsub.f32 %v11779_v54, %v11840_v14  ;;  %v8561_v12 = vpop.eup %8560 }
 0x578   : > { %v4322_v59 = vrot.slane %v4321_v55, 1  ;;  %v4333_v38 = vmax.f32 %v4331_v10, %v4332_v19  ;;  %v4344_v35 = vrot.slane %v4343_v31, 2  ;;  %v4475_v52 = vsub.f32 %v11781_v22, %v11843_v27 }
 0x579   : > { %v4328_v53 = vrot.slane %v4327_v49, 1  ;;  %v8563_v40 = vpop.eup %8562  ;;  %v5730_v63 = vmul.f32 %v8561_v12, %v11753_v1  ;;  %v4339_v17 = vmax.f32 %v4337_v51, %v4338_v56  ;;  %v4349_v45 = vmax.f32 %v11829_v5, %v4348_v39  ;;  %v12565_v51 = vld [vmem:[#allocation79_spill] sm:$0xff]  ;;  %v12566_v39 = vld [vmem:[#allocation81_spill] sm:$0xff] }
 0x57a   : > { %v11852_v33 = vmax.f32 %v4321_v55, %v4322_v59  ;;  %v8565_v61 = vpop.eup %8564  ;;  %v5731_v8 = vmul.f32 %v8563_v40, %v11767_v30  ;;  %v4334_v47 = vrot.slane %v4333_v38, 1  ;;  %v4345_v41 = vmax.f32 %v4343_v31, %v4344_v35  ;;  %v12567_v40 = vld [vmem:[#allocation83_spill] sm:$0xff] }
 0x57b   : > { %v11856_v60 = vmax.f32 %v4327_v49, %v4328_v53  ;;  %v8567_v26 = vpop.eup %8566  ;;  %v5732_v29 = vmul.f32 %v8565_v61, %v11775_v62  ;;  %v5858_v36 = vmul.f32 %v5730_v63, %v12564_v44  ;;  %v4340_v10 = vrot.slane %v4339_v17, 1 }
 0x57c   : > { %v4350_v4 = vrot.slane %v4349_v45, 2  ;;  %v8569_v1 = vpop.eup %8568  ;;  %v5733_v55 = vmul.f32 %v8567_v26, %v11783_v57  ;;  %v5859_v19 = vmul.f32 %v5731_v8, %v12565_v51  ;;  %v11862_v59 = vmax.f32 %v4333_v38, %v4334_v47  ;;  %v12568_v8 = vld [vmem:[#allocation85_spill] sm:$0xff] }
 0x57d   : > { %v4346_v56 = vrot.slane %v4345_v41, 1  ;;  %v8571_v30 = vpop.eup %8570  ;;  %v5734_v49 = vmul.f32 %v8569_v1, %v11793_v11  ;;  %v5860_v31 = vmul.f32 %v5732_v29, %v12566_v39  ;;  %v6466_v12 = vrot.slane %v5858_v36, 4  ;;  %v12569_v11 = vld [vmem:[#allocation88_spill] sm:$0xff] }
 0x57e   : > { %v11866_v53 = vmax.f32 %v4339_v17, %v4340_v10  ;;  %v8573_v62 = vpop.eup %8572  ;;  %v5735_v35 = vmul.f32 %v8571_v30, %v11799_v50  ;;  %v5861_v63 = vmul.f32 %v5733_v55, %v12567_v40  ;;  %v6472_v61 = vrot.slane %v5859_v19, 4  ;;  %v12570_v10 = vld [vmem:[#allocation91_spill] sm:$0xff] }
 0x57f   : > { %v11870_v57 = vmax.f32 %v4345_v41, %v4346_v56  ;;  %v5736_v38 = vmul.f32 %v8573_v62, %v11806_v0  ;;  %v5862_v47 = vmul.f32 %v5734_v49, %v12568_v8  ;;  %v6467_v26 = vadd.f32 %v6466_v12, %v5858_v36 }
 0x580   : > { %v6478_v44 = vrot.slane %v5860_v31, 4  ;;  %v5863_v1 = vmul.f32 %v5735_v35, %v12569_v11  ;;  %v6473_v29 = vadd.f32 %v6472_v61, %v5859_v19  ;;  %v6484_v51 = vrot.slane %v5861_v63, 4 }
 0x581   : > { %v4351_v17 = vmax.f32 %v4349_v45, %v4350_v4  ;;  %v5864_v39 = vmul.f32 %v5736_v38, %v12570_v10  ;;  %v6468_v32 = vrot.slane %v6467_v26, 2  ;;  %v6490_v30 = vrot.slane %v5862_v47, 4  ;;  %v12571_v45 = vld [vmem:[#allocation94_spill] sm:$0xff] }
 0x582   : > { %v6479_v50 = vadd.f32 %v6478_v44, %v5860_v31  ;;  %v8575_v55 = vpop.eup %8574  ;;  %v6474_v40 = vrot.slane %v6473_v29, 2  ;;  %v6485_v41 = vadd.f32 %v6484_v51, %v5861_v63  ;;  %v6496_v56 = vrot.slane %v5863_v1, 4 }
 0x583   : > { %v4352_v48 = vrot.slane %v4351_v17, 1  ;;  %v5737_v0 = vmul.f32 %v8575_v55, %v11810_v16  ;;  %v6469_v49 = vadd.f32 %v6468_v32, %v6467_v26  ;;  %v6491_v12 = vadd.f32 %v6490_v30, %v5862_v47 }
 0x584   : > { %v6480_v36 = vrot.slane %v6479_v50, 2  ;;  %v6475_v62 = vadd.f32 %v6474_v40, %v6473_v29  ;;  %v6486_v35 = vrot.slane %v6485_v41, 2  ;;  %v6497_v19 = vadd.f32 %v6496_v56, %v5863_v1 }
 0x585   : > { %v6502_v61 = vrot.slane %v5864_v39, 4  ;;  %v5865_v4 = vmul.f32 %v5737_v0, %v12571_v45  ;;  %v6470_v38 = vrot.slane %v6469_v49, 1  ;;  %v6492_v31 = vrot.slane %v6491_v12, 2 }
 0x586   : > { %v6481_v8 = vadd.f32 %v6480_v36, %v6479_v50  ;;  %v6476_v44 = vrot.slane %v6475_v62, 1  ;;  %v6487_v11 = vadd.f32 %v6486_v35, %v6485_v41  ;;  %v6498_v10 = vrot.slane %v6497_v19, 2 }
 0x587   : > { %v6503_v63 = vadd.f32 %v6502_v61, %v5864_v39  ;;  %v6471_v51 = vadd.f32 %v6470_v38, %v6469_v49  ;;  %v6493_v20 = vadd.f32 %v6492_v31, %v6491_v12  ;;  %v6508_v16 = vrot.slane %v5865_v4, 4 }
 0x588   : > { %v6482_v34 = vrot.slane %v6481_v8, 1  ;;  %v6477_v32 = vadd.f32 %v6476_v44, %v6475_v62  ;;  %v6488_v26 = vrot.slane %v6487_v11, 1  ;;  %v6499_v47 = vadd.f32 %v6498_v10, %v6497_v19 }
 0x589   : > { %v6504_v29 = vrot.slane %v6503_v63, 2  ;;  %v6494_v1 = vrot.slane %v6493_v20, 1  ;;  %v6509_v55 = vadd.f32 %v6508_v16, %v5865_v4  ;;  %v7888_v40 = vpack.c.bf16 %v6471_v51, %v6471_v51 }
 0x58a   : > { %v6483_v30 = vadd.f32 %v6482_v34, %v6481_v8  ;;  %v6489_v56 = vadd.f32 %v6488_v26, %v6487_v11  ;;  %v6500_v0 = vrot.slane %v6499_v47, 1  ;;  %v7889_v36 = vpack.c.bf16 %v6477_v32, %v6477_v32 }
 0x58b   : > { %v6505_v50 = vadd.f32 %v6504_v29, %v6503_v63  ;;  %v6495_v45 = vadd.f32 %v6494_v1, %v6493_v20  ;;  %v6510_v41 = vrot.slane %v6509_v55, 2  ;;  %v7266_v39 = vunpack.c.l.b16 %v7888_v40 }
 0x58c   : > { %v7890_v35 = vpack.c.bf16 %v6483_v30, %v6483_v30  ;;  %v6501_v49 = vadd.f32 %v6500_v0, %v6499_v47  ;;  %v7891_v12 = vpack.c.bf16 %v6489_v56, %v6489_v56  ;;  %v7267_v38 = vunpack.c.l.b16 %v7889_v36 }
 0x58d   : > { %v6506_v61 = vrot.slane %v6505_v50, 1  ;;  %v6511_v62 = vadd.f32 %v6510_v41, %v6509_v55  ;;  %v7892_v31 = vpack.c.bf16 %v6495_v45, %v6495_v45  ;;  %v4353_v44 = vmax.f32 %v4351_v17, %v4352_v48 }
 0x58e   : > { %v7268_v19 = vunpack.c.l.b16 %v7890_v35  ;;  %v7893_v8 = vpack.c.bf16 %v6501_v49, %v6501_v49  ;;  %v7269_v4 = vunpack.c.l.b16 %v7891_v12  ;;  %v7389_v11 = vsel %vm7298_vm0, %v7267_v38, %v7266_v39 }
 0x58f   : > { %v6507_v34 = vadd.f32 %v6506_v61, %v6505_v50  ;;  %v6512_v10 = vrot.slane %v6511_v62, 1  ;;  %v7270_v63 = vunpack.c.l.b16 %v7892_v31  ;;  %v4476_v51 = vsub.f32 %v11789_v46, %v11852_v33 }
 0x590   : > { %v7390_v20 = vsel %vm7300_vm1, %v7268_v19, %v7389_v11  ;;  %v7271_v32 = vunpack.c.l.b16 %v7893_v8  ;;  %v4477_v47 = vsub.f32 %v11791_v24, %v11856_v60  ;;  %v4478_v29 = vsub.f32 %v11797_v28, %v11862_v59 }
 0x591   : > { %v7894_v16 = vpack.c.bf16 %v6507_v34, %v6507_v34  ;;  %v7391_v26 = vsel %vm7302_vm2, %v7269_v4, %v7390_v20  ;;  %v6513_v48 = vadd.f32 %v6512_v10, %v6511_v62  ;;  %v4479_v30 = vsub.f32 %v11804_v23, %v11866_v53 }
 0x592   : > { %v7392_v17 = vsel %vm7304_vm3, %v7270_v63, %v7391_v26  ;;  %v4480_v46 = vsub.f32 %v11822_v43, %v11870_v57  ;;  %v4481_v33 = vsub.f32 %v11829_v5, %v4353_v44  ;;  %v4722_v24 = vmul.f32 1.442695, %v4474_v6 }
 0x593   : > { %v7272_v1 = vunpack.c.l.b16 %v7894_v16  ;;  %v7393_v55 = vsel %vm7306_vm4, %v7271_v32, %v7392_v17  ;;  %v7895_v40 = vpack.c.bf16 %v6513_v48, %v6513_v48  ;;  %v4724_v28 = vmul.f32 1.442695, %v4475_v52  ;;  %v12574_v32 = vld [vmem:[#allocation101_spill] sm:$0xff] }
 0x594   : > { %v4726_v60 = vmul.f32 1.442695, %v4476_v51  ;;  %v7857_v23 = vpack.c.bf16 %v11762_v18, %v11762_v18  ;;  %v6290_v59 = vrot.slane %v11833_v2, 1  ;;  %v4728_v43 = vmul.f32 1.442695, %v4477_v47  ;;  %v12573_v51 = vld [vmem:[#allocation98_spill] sm:$0xff] }
 0x595   : > { %v7394_v53 = vsel %vm7308_vm5, %v7272_v1, %v7393_v55  ;;  %v7273_v57 = vunpack.c.l.b16 %v7895_v40  ;;  %8576 = vpow2.f32 %v4722_v24  ;;  %v4730_v5 = vmul.f32 1.442695, %v4478_v29  ;;  %v12575_v47 = vld [vmem:[#allocation104_spill] sm:$0xff]  ;;  %v12576_v29 = vld [vmem:[#allocation107_spill] sm:$0xff]  ;;  %v12577_v1 = vld [vmem:[#allocation110_spill] sm:$0xff] }
 0x596   : > { %v4732_v56 = vmul.f32 1.442695, %v4479_v30  ;;  %8578 = vpow2.f32 %v4724_v28  ;;  %v3988_v54 = vrot.slane %v11773_v13, 4  ;;  %v2422_v22 = vrot.slane %v11728_v58, %v9361_v25  ;;  %v12579_v40 = vld [vmem:[#allocation114_spill] sm:$0xff]  ;;  %v12580_v28 = vld [vmem:[#allocation116_spill] sm:$0xff] }
 0x597   : > { %v12572_v14 = vcombine.high %v11728_v58, %v11728_v58  ;;  %v7395_v6 = vsel %vm7310_vm6, %v7273_v57, %v7394_v53  ;;  %8580 = vpow2.f32 %v4726_v60  ;;  %v4734_v52 = vmul.f32 1.442695, %v4480_v46  ;;  %v12578_v46 = vld [vmem:[#allocation112_spill] sm:$0xff] }
 0x598   : > { %v4736_v0 = vmul.f32 1.442695, %v4481_v33  ;;  %v7429_v50 = vpack.c.b16 %v7395_v6, %v7395_v6  ;;  %8582 = vpow2.f32 %v4728_v43  ;;  %v3989_v36 = vmax.f32 %v11773_v13, %v3988_v54 }
 0x599   : > { %v2429_v27 = vrot.slane %v12572_v14, %v9361_v25  ;;  %v2430_v45 = vcombine.high %v2422_v22, %v2422_v22  ;;  %8584 = vpow2.f32 %v4730_v5  ;;  %v2438_v35 = vrot.slane %v2422_v22, %v9361_v25 }
 0x59a   : > { %v11916_v49 = vadd.f32 %v6290_v59, %v11833_v2  ;;  %7461 = vst [vmem:[%s9683_s26 + $0x30] sm:$0xf] %v7429_v50  ;;  %8586 = vpow2.f32 %v4732_v56  ;;  %v3990_v58 = vrot.slane %v3989_v36, 2 }
 0x59b   : > { %v2431_v41 = vcombine.high %v2429_v27, %v2429_v27  ;;  %v2445_v39 = vrot.slane %v2429_v27, %v9361_v25  ;;  %v2452_v61 = vrot.slane %v2430_v45, %v9361_v25  ;;  %8588 = vpow2.f32 %v4734_v52 }
 0x59c   : > { %v2460_v38 = vcombine.high %v2438_v35, %v2438_v35  ;;  %8590 = vpow2.f32 %v4736_v0  ;;  %v3991_v31 = vmax.f32 %v3989_v36, %v3990_v58  ;;  %v2981_v44 = vrot.slane %v2438_v35, %v9366_v15 }
 0x59d   : > { %v2459_v12 = vrot.slane %v2431_v41, %v9361_v25  ;;  %v2461_v62 = vcombine.high %v2445_v39, %v2445_v39  ;;  %v2462_v19 = vcombine.high %v2452_v61, %v2452_v61  ;;  %v2985_v8 = vrot.slane %v2452_v61, %v9366_v15 }
 0x59e   : > { %v2989_v2 = vrot.slane %v2460_v38, %v9366_v15  ;;  %v2997_v4 = vrot.slane %v2445_v39, %v9366_v15  ;;  %v3992_v11 = vrot.slane %v3991_v31, 1  ;;  %v3306_v16 = vadd.f32 %v2981_v44, %v12573_v51 }
 0x59f   : > { %v2463_v34 = vcombine.high %v2459_v12, %v2459_v12  ;;  %v2993_v10 = vrot.slane %v2462_v19, %v9366_v15  ;;  %v3001_v63 = vrot.slane %v2459_v12, %v9366_v15  ;;  %v3005_v25 = vrot.slane %v2461_v62, %v9366_v15 }
 0x5a0   : > { %v3307_v26 = vadd.f32 %v2985_v8, %v12574_v32  ;;  %v3308_v48 = vadd.f32 %v2989_v2, %v12575_v47  ;;  %v3993_v17 = vmax.f32 %v3991_v31, %v3992_v11  ;;  %v3310_v55 = vadd.f32 %v2997_v4, %v12577_v1 }
 0x5a1   : > { %v3009_v20 = vrot.slane %v2463_v34, %v9366_v15  ;;  %v3309_v30 = vadd.f32 %v2993_v10, %v12576_v29  ;;  %v3311_v33 = vadd.f32 %v3001_v63, %v12578_v46  ;;  %v3312_v24 = vadd.f32 %v3005_v25, %v12579_v40 }
 0x5a2   : > { %v3434_v59 = vmul.f32 0.01, %v3306_v16  ;;  %v3435_v15 = vmul.f32 0.01, %v3307_v26  ;;  %v11939_v53 = vpop.eup %8576  ;;  %v4421_v43 = vsub.f32 %v11773_v13, %v3993_v17  ;;  %v3436_v57 = vmul.f32 0.01, %v3308_v48 }
 0x5a3   : > { %v11937_v60 = vadd.f32 %v3009_v20, %v12580_v28  ;;  %v3437_v5 = vmul.f32 0.01, %v3309_v30  ;;  %v3438_v56 = vmul.f32 0.01, %v3310_v55  ;;  %v11942_v54 = vpop.eup %8578  ;;  %v5458_v22 = vrot.slane %v11939_v53, 4 }
 0x5a4   : > { %v3439_v14 = vmul.f32 0.01, %v3311_v33  ;;  %v3440_v27 = vmul.f32 0.01, %v3312_v24  ;;  %v11945_v6 = vmax.f32 %v3306_v16, %v3434_v59  ;;  %v11947_v52 = vpop.eup %8580  ;;  %v5464_v0 = vrot.slane %v11942_v54, 4 }
 0x5a5   : > { %v4616_v50 = vmul.f32 1.442695, %v4421_v43  ;;  %v3441_v36 = vmul.f32 0.01, %v11937_v60  ;;  %v11951_v45 = vmax.f32 %v3307_v26, %v3435_v15  ;;  %v11953_v13 = vpop.eup %8582  ;;  %v5459_v41 = vadd.f32 %v11939_v53, %v5458_v22 }
 0x5a6   : > { %v5470_v35 = vrot.slane %v11947_v52, 4  ;;  %v11957_v39 = vmax.f32 %v3308_v48, %v3436_v57  ;;  %v11959_v58 = vmax.f32 %v3309_v30, %v3437_v5  ;;  %v11961_v61 = vpop.eup %8584  ;;  %v5465_v12 = vadd.f32 %v11942_v54, %v5464_v0 }
 0x5a7   : > { %v5476_v38 = vrot.slane %v11953_v13, 4  ;;  %8592 = vpow2.f32 %v4616_v50  ;;  %v11965_v62 = vmax.f32 %v3310_v55, %v3438_v56  ;;  %v11967_v31 = vpop.eup %8586  ;;  %v5460_v19 = vrot.slane %v5459_v41, 2 }
 0x5a8   : > { %v5471_v44 = vadd.f32 %v11947_v52, %v5470_v35  ;;  %v5482_v34 = vrot.slane %v11961_v61, 4  ;;  %v11971_v8 = vmax.f32 %v3311_v33, %v3439_v14  ;;  %v11973_v2 = vpop.eup %8588  ;;  %v5466_v4 = vrot.slane %v5465_v12, 2 }
 0x5a9   : > { %v5477_v11 = vadd.f32 %v11953_v13, %v5476_v38  ;;  %v5488_v10 = vrot.slane %v11967_v31, 4  ;;  %v11977_v63 = vmax.f32 %v3312_v24, %v3440_v27  ;;  %v11979_v25 = vpop.eup %8590  ;;  %v5461_v20 = vadd.f32 %v5460_v19, %v5459_v41 }
 0x5aa   : > { %v5472_v51 = vrot.slane %v5471_v44, 2  ;;  %v5483_v16 = vadd.f32 %v11961_v61, %v5482_v34  ;;  %v5494_v32 = vrot.slane %v11973_v2, 4  ;;  %v5467_v26 = vadd.f32 %v5466_v4, %v5465_v12 }
 0x5ab   : > { %v5478_v47 = vrot.slane %v5477_v11, 2  ;;  %v5489_v48 = vadd.f32 %v11967_v31, %v5488_v10  ;;  %v5500_v17 = vrot.slane %v11979_v25, 4  ;;  %v5462_v29 = vrot.slane %v5461_v20, 1 }
 0x5ac   : > { %v5473_v30 = vadd.f32 %v5472_v51, %v5471_v44  ;;  %v5484_v1 = vrot.slane %v5483_v16, 2  ;;  %v5495_v55 = vadd.f32 %v11973_v2, %v5494_v32  ;;  %v5468_v46 = vrot.slane %v5467_v26, 1 }
 0x5ad   : > { %v5479_v33 = vadd.f32 %v5478_v47, %v5477_v11  ;;  %v5490_v40 = vrot.slane %v5489_v48, 2  ;;  %v5501_v24 = vadd.f32 %v11979_v25, %v5500_v17  ;;  %v5463_v28 = vadd.f32 %v5462_v29, %v5461_v20 }
 0x5ae   : > { %v5474_v59 = vrot.slane %v5473_v30, 1  ;;  %v5485_v15 = vadd.f32 %v5484_v1, %v5483_v16  ;;  %v5496_v43 = vrot.slane %v5495_v55, 2  ;;  %v5469_v57 = vadd.f32 %v5468_v46, %v5467_v26 }
 0x5af   : > { %v5480_v5 = vrot.slane %v5479_v33, 1  ;;  %v5491_v56 = vadd.f32 %v5490_v40, %v5489_v48  ;;  %v5502_v22 = vrot.slane %v5501_v24, 2  ;;  %8594 = vrcp.f32 %v5463_v28 }
 0x5b0   : > { %v5475_v14 = vadd.f32 %v5474_v59, %v5473_v30  ;;  %v5486_v27 = vrot.slane %v5485_v15, 1  ;;  %v5497_v0 = vadd.f32 %v5496_v43, %v5495_v55  ;;  %8596 = vrcp.f32 %v5469_v57 }
 0x5b1   : > { %v5481_v50 = vadd.f32 %v5480_v5, %v5479_v33  ;;  %v5492_v41 = vrot.slane %v5491_v56, 1  ;;  %v5503_v35 = vadd.f32 %v5502_v22, %v5501_v24  ;;  %v11988_v19 = vmax.f32 %v11937_v60, %v3441_v36 }
 0x5b2   : > { %v5487_v12 = vadd.f32 %v5486_v27, %v5485_v15  ;;  %v5498_v38 = vrot.slane %v5497_v0, 1  ;;  %8598 = vrcp.f32 %v5475_v14  ;;  %v4210_v4 = vrot.slane %v11945_v6, 4 }
 0x5b3   : > { %v5493_v44 = vadd.f32 %v5492_v41, %v5491_v56  ;;  %v5504_v34 = vrot.slane %v5503_v35, 1  ;;  %8600 = vrcp.f32 %v5481_v50  ;;  %v4216_v20 = vrot.slane %v11951_v45, 4 }
 0x5b4   : > { %v11991_v11 = vpop.eup %8592  ;;  %v5499_v10 = vadd.f32 %v5498_v38, %v5497_v0  ;;  %8602 = vrcp.f32 %v5487_v12  ;;  %v4222_v51 = vrot.slane %v11957_v39, 4  ;;  %v4211_v60 = vmax.f32 %v11945_v6, %v4210_v4 }
 0x5b5   : > { %v5505_v16 = vadd.f32 %v5504_v34, %v5503_v35  ;;  %8604 = vrcp.f32 %v5493_v44  ;;  %v5140_v32 = vrot.slane %v11991_v11, 4  ;;  %v4217_v36 = vmax.f32 %v11951_v45, %v4216_v20 }
 0x5b6   : > { %8606 = vrcp.f32 %v5499_v10  ;;  %v4223_v26 = vmax.f32 %v11957_v39, %v4222_v51  ;;  %v4228_v47 = vrot.slane %v11959_v58, 4  ;;  %v4212_v17 = vrot.slane %v4211_v60, 2 }
 0x5b7   : > { %8608 = vrcp.f32 %v5505_v16  ;;  %v5141_v48 = vadd.f32 %v11991_v11, %v5140_v32  ;;  %v4234_v29 = vrot.slane %v11965_v62, 4  ;;  %v4218_v30 = vrot.slane %v4217_v36, 2 }
 0x5b8   : > { %v4224_v1 = vrot.slane %v4223_v26, 2  ;;  %v4229_v55 = vmax.f32 %v11959_v58, %v4228_v47  ;;  %v4240_v46 = vrot.slane %v11971_v8, 4  ;;  %v4213_v40 = vmax.f32 %v4211_v60, %v4212_v17 }
 0x5b9   : > { %v5142_v33 = vrot.slane %v5141_v48, 2  ;;  %v4235_v24 = vmax.f32 %v11965_v62, %v4234_v29  ;;  %v4246_v28 = vrot.slane %v11977_v63, 4  ;;  %v4219_v59 = vmax.f32 %v4217_v36, %v4218_v30  ;;  %v12581_v29 = vld [vmem:[#allocation133_spill] sm:$0xff] }
 0x5ba   : > { %v4225_v15 = vmax.f32 %v4223_v26, %v4224_v1  ;;  %v4230_v43 = vrot.slane %v4229_v55, 2  ;;  %v4241_v57 = vmax.f32 %v11971_v8, %v4240_v46  ;;  %v4214_v56 = vrot.slane %v4213_v40, 1 }
 0x5bb   : > { %v5143_v5 = vadd.f32 %v5142_v33, %v5141_v48  ;;  %v4236_v22 = vrot.slane %v4235_v24, 2  ;;  %v4247_v14 = vmax.f32 %v11977_v63, %v4246_v28  ;;  %v4220_v27 = vrot.slane %v4219_v59, 1  ;;  %v12582_v33 = vld [vmem:[#allocation135_spill] sm:$0xff] }
 0x5bc   : > { %v4226_v0 = vrot.slane %v4225_v15, 1  ;;  %v4231_v50 = vmax.f32 %v4229_v55, %v4230_v43  ;;  %v4242_v41 = vrot.slane %v4241_v57, 2  ;;  %v8595_v35 = vpop.eup %8594  ;;  %v12008_v38 = vmax.f32 %v4213_v40, %v4214_v56  ;;  %v12584_v56 = vld [vmem:[#allocation139_spill] sm:$0xff] }
 0x5bd   : > { %v5144_v12 = vrot.slane %v5143_v5, 1  ;;  %v4237_v44 = vmax.f32 %v4235_v24, %v4236_v22  ;;  %v4248_v34 = vrot.slane %v4247_v14, 2  ;;  %v8597_v4 = vpop.eup %8596  ;;  %v5754_v10 = vmul.f32 %v8595_v35, %v11939_v53 }
 0x5be   : > { %v12011_v20 = vmax.f32 %v4219_v59, %v4220_v27  ;;  %v12013_v51 = vmax.f32 %v4225_v15, %v4226_v0  ;;  %v4232_v16 = vrot.slane %v4231_v50, 1  ;;  %v5755_v60 = vmul.f32 %v8597_v4, %v11942_v54  ;;  %v12583_v59 = vld [vmem:[#allocation137_spill] sm:$0xff] }
 0x5bf   : > { %v8599_v32 = vpop.eup %8598  ;;  %v5145_v36 = vadd.f32 %v5144_v12, %v5143_v5  ;;  %v4238_v26 = vrot.slane %v4237_v44, 1  ;;  %v12016_v47 = vmax.f32 %v4241_v57, %v4242_v41  ;;  %v5882_v30 = vmul.f32 %v5754_v10, %v12581_v29 }
 0x5c0   : > { %v8601_v48 = vpop.eup %8600  ;;  %v5756_v17 = vmul.f32 %v8599_v32, %v11947_v52  ;;  %v12020_v1 = vmax.f32 %v4231_v50, %v4232_v16  ;;  %v12022_v53 = vmax.f32 %v4247_v14, %v4248_v34  ;;  %v5883_v40 = vmul.f32 %v5755_v60, %v12582_v33  ;;  %v12585_v50 = vld [vmem:[#allocation141_spill] sm:$0xff]  ;;  %v12587_v16 = vld [vmem:[#allocation147_spill] sm:$0xff] }
 0x5c1   : > { %v8603_v55 = vpop.eup %8602  ;;  %v5757_v46 = vmul.f32 %v8601_v48, %v11953_v13  ;;  %8610 = vrcp.f32 %v5145_v36  ;;  %v12026_v54 = vmax.f32 %v4237_v44, %v4238_v26  ;;  %v6610_v52 = vrot.slane %v5882_v30, 4  ;;  %v12586_v44 = vld [vmem:[#allocation144_spill] sm:$0xff]  ;;  %v12588_v26 = vld [vmem:[#allocation150_spill] sm:$0xff] }
 0x5c2   : > { %v8605_v24 = vpop.eup %8604  ;;  %v5758_v28 = vmul.f32 %v8603_v55, %v11961_v61  ;;  %v5884_v15 = vmul.f32 %v5756_v17, %v12583_v59  ;;  %v4244_v43 = vrot.slane %v12016_v47, 1  ;;  %v6616_v14 = vrot.slane %v5883_v40, 4 }
 0x5c3   : > { %v8607_v57 = vpop.eup %8606  ;;  %v5759_v5 = vmul.f32 %v8605_v24, %v11967_v31  ;;  %v5885_v22 = vmul.f32 %v5757_v46, %v12584_v56  ;;  %v4250_v13 = vrot.slane %v12022_v53, 1  ;;  %v6611_v35 = vadd.f32 %v6610_v52, %v5882_v30 }
 0x5c4   : > { %v8609_v27 = vpop.eup %8608  ;;  %v5760_v0 = vmul.f32 %v8607_v57, %v11973_v2  ;;  %v5886_v41 = vmul.f32 %v5758_v28, %v12585_v50  ;;  %v6622_v61 = vrot.slane %v5884_v15, 4  ;;  %v6617_v4 = vadd.f32 %v6616_v14, %v5883_v40 }
 0x5c5   : > { %v5761_v12 = vmul.f32 %v8609_v27, %v11979_v25  ;;  %v5887_v34 = vmul.f32 %v5759_v5, %v12586_v44  ;;  %v6628_v10 = vrot.slane %v5885_v22, 4  ;;  %v6612_v32 = vrot.slane %v6611_v35, 2 }
 0x5c6   : > { %v5888_v31 = vmul.f32 %v5760_v0, %v12587_v16  ;;  %v6623_v60 = vadd.f32 %v6622_v61, %v5884_v15  ;;  %v6634_v36 = vrot.slane %v5886_v41, 4  ;;  %v6618_v17 = vrot.slane %v6617_v4, 2 }
 0x5c7   : > { %v5889_v48 = vmul.f32 %v5761_v12, %v12588_v26  ;;  %v6629_v29 = vadd.f32 %v6628_v10, %v5885_v22  ;;  %v6640_v2 = vrot.slane %v5887_v34, 4  ;;  %v6613_v55 = vadd.f32 %v6612_v32, %v6611_v35 }
 0x5c8   : > { %v6624_v46 = vrot.slane %v6623_v60, 2  ;;  %v6635_v30 = vadd.f32 %v6634_v36, %v5886_v41  ;;  %v6646_v33 = vrot.slane %v5888_v31, 4  ;;  %v6619_v24 = vadd.f32 %v6618_v17, %v6617_v4 }
 0x5c9   : > { %v6630_v25 = vrot.slane %v6629_v29, 2  ;;  %v6641_v28 = vadd.f32 %v6640_v2, %v5887_v34  ;;  %v6652_v59 = vrot.slane %v5889_v48, 4  ;;  %v6614_v40 = vrot.slane %v6613_v55, 1 }
 0x5ca   : > { %v6625_v52 = vadd.f32 %v6624_v46, %v6623_v60  ;;  %v6636_v57 = vrot.slane %v6635_v30, 2  ;;  %v6647_v5 = vadd.f32 %v6646_v33, %v5888_v31  ;;  %v6620_v56 = vrot.slane %v6619_v24, 1 }
 0x5cb   : > { %v6631_v15 = vadd.f32 %v6630_v25, %v6629_v29  ;;  %v6642_v14 = vrot.slane %v6641_v28, 2  ;;  %v6653_v27 = vadd.f32 %v6652_v59, %v5889_v48  ;;  %v6615_v0 = vadd.f32 %v6614_v40, %v6613_v55 }
 0x5cc   : > { %v6626_v50 = vrot.slane %v6625_v52, 1  ;;  %v6637_v22 = vadd.f32 %v6636_v57, %v6635_v30  ;;  %v6648_v61 = vrot.slane %v6647_v5, 2  ;;  %v6621_v35 = vadd.f32 %v6620_v56, %v6619_v24 }
 0x5cd   : > { %v6632_v12 = vrot.slane %v6631_v15, 1  ;;  %v6643_v41 = vadd.f32 %v6642_v14, %v6641_v28  ;;  %v6654_v44 = vrot.slane %v6653_v27, 2  ;;  %v7912_v32 = vpack.c.bf16 %v6615_v0, %v6615_v0 }
 0x5ce   : > { %v8611_v4 = vpop.eup %8610  ;;  %v6627_v10 = vadd.f32 %v6626_v50, %v6625_v52  ;;  %v6638_v34 = vrot.slane %v6637_v22, 1  ;;  %v6649_v16 = vadd.f32 %v6648_v61, %v6647_v5  ;;  %v7913_v26 = vpack.c.bf16 %v6621_v35, %v6621_v35 }
 0x5cf   : > { %v6633_v60 = vadd.f32 %v6632_v12, %v6631_v15  ;;  %v6644_v36 = vrot.slane %v6643_v41, 1  ;;  %v6655_v31 = vadd.f32 %v6654_v44, %v6653_v27  ;;  %v7290_v2 = vunpack.c.l.b16 %v7912_v32 }
 0x5d0   : > { %v6639_v17 = vadd.f32 %v6638_v34, %v6637_v22  ;;  %v6650_v29 = vrot.slane %v6649_v16, 1  ;;  %v7914_v48 = vpack.c.bf16 %v6627_v10, %v6627_v10  ;;  %v7291_v33 = vunpack.c.l.b16 %v7913_v26 }
 0x5d1   : > { %v6645_v55 = vadd.f32 %v6644_v36, %v6643_v41  ;;  %v6656_v46 = vrot.slane %v6655_v31, 1  ;;  %v7915_v30 = vpack.c.bf16 %v6633_v60, %v6633_v60  ;;  %v5701_v59 = vmul.f32 %v8611_v4, %v11991_v11 }
 0x5d2   : > { %v6651_v24 = vadd.f32 %v6650_v29, %v6649_v16  ;;  %v7916_v25 = vpack.c.bf16 %v6639_v17, %v6639_v17  ;;  %v7292_v28 = vunpack.c.l.b16 %v7914_v48  ;;  %v7410_v5 = vsel %vm7298_vm0, %v7291_v33, %v7290_v2 }
 0x5d3   : > { %v6657_v40 = vadd.f32 %v6656_v46, %v6655_v31  ;;  %v7917_v52 = vpack.c.bf16 %v6645_v55, %v6645_v55  ;;  %v7293_v57 = vunpack.c.l.b16 %v7915_v30  ;;  %v5829_v27 = vmul.f32 %v5701_v59, %v11710_v21 }
 0x5d4   : > { %v7918_v56 = vpack.c.bf16 %v6651_v24, %v6651_v24  ;;  %v7294_v15 = vunpack.c.l.b16 %v7916_v25  ;;  %v7411_v14 = vsel %vm7300_vm1, %v7292_v28, %v7410_v5  ;;  %v4245_v61 = vmax.f32 %v12016_v47, %v4244_v43 }
 0x5d5   : > { %v7919_v0 = vpack.c.bf16 %v6657_v40, %v6657_v40  ;;  %v7295_v50 = vunpack.c.l.b16 %v7917_v52  ;;  %v7412_v22 = vsel %vm7302_vm2, %v7293_v57, %v7411_v14  ;;  %v6292_v12 = vrot.slane %v5829_v27, 4 }
 0x5d6   : > { %v7296_v11 = vunpack.c.l.b16 %v7918_v56  ;;  %v7413_v35 = vsel %vm7304_vm3, %v7294_v15, %v7412_v22  ;;  %v4251_v41 = vmax.f32 %v12022_v53, %v4250_v13  ;;  %v4252_v21 = vrot.slane %v11988_v19, 4 }
 0x5d7   : > { %v7297_v44 = vunpack.c.l.b16 %v7919_v0  ;;  %v7414_v4 = vsel %vm7306_vm4, %v7295_v50, %v7413_v35  ;;  %v4458_v10 = vsub.f32 %v11945_v6, %v12008_v38  ;;  %v6293_v16 = vadd.f32 %v6292_v12, %v5829_v27 }
 0x5d8   : > { %v7415_v34 = vsel %vm7308_vm5, %v7296_v11, %v7414_v4  ;;  %v4459_v47 = vsub.f32 %v11951_v45, %v12011_v20  ;;  %v4460_v43 = vsub.f32 %v11957_v39, %v12013_v51  ;;  %v4253_v13 = vmax.f32 %v11988_v19, %v4252_v21 }
 0x5d9   : > { %v7416_v53 = vsel %vm7310_vm6, %v7297_v44, %v7415_v34  ;;  %v4461_v32 = vsub.f32 %v11959_v58, %v12020_v1  ;;  %v4462_v6 = vsub.f32 %v11965_v62, %v12026_v54  ;;  %v7858_v38 = vpack.c.bf16 %v11916_v49, %v11916_v49 }
 0x5da   : > { %v7432_v60 = vpack.c.b16 %v7416_v53, %v7416_v53  ;;  %v6294_v36 = vrot.slane %v6293_v16, 2  ;;  %v4463_v45 = vsub.f32 %v11971_v8, %v4245_v61  ;;  %v4254_v20 = vrot.slane %v4253_v13, 2 }
 0x5db   : > { %v4464_v39 = vsub.f32 %v11977_v63, %v4251_v41  ;;  %v4690_v51 = vmul.f32 1.442695, %v4458_v10  ;;  %v4692_v31 = vmul.f32 1.442695, %v4459_v47  ;;  %v7235_v26 = vunpack.c.l.b16 %v7857_v23 }
 0x5dc   : > { %7464 = vst [vmem:[%s9683_s26 + $0x3c] sm:$0xf] %v7432_v60  ;;  %v6295_v58 = vadd.f32 %v6294_v36, %v6293_v16  ;;  %v4694_v1 = vmul.f32 1.442695, %v4460_v43  ;;  %v4696_v62 = vmul.f32 1.442695, %v4461_v32  ;;  %v12589_v49 = vpack.c.bf16 %v11187_v3, %v11187_v3 }
 0x5dd   : > { %v4255_v17 = vmax.f32 %v4253_v13, %v4254_v20  ;;  %8612 = vpow2.f32 %v4690_v51  ;;  %v4698_v8 = vmul.f32 1.442695, %v4462_v6  ;;  %v12590_v63 = vrot.slane %v11327_v9, 1 }
 0x5de   : > { %v7234_v54 = vunpack.c.l.b16 %v12589_v49  ;;  %v6296_v48 = vrot.slane %v6295_v58, 1  ;;  %8614 = vpow2.f32 %v4692_v31  ;;  %v4700_v2 = vmul.f32 1.442695, %v4463_v45 }
 0x5df   : > { %v6315_v29 = vadd.f32 %v12590_v63, %v11327_v9  ;;  %v7236_v18 = vunpack.c.l.b16 %v7858_v38  ;;  %v4256_v23 = vrot.slane %v4255_v17, 1  ;;  %8616 = vpow2.f32 %v4694_v1 }
 0x5e0   : > { %v4702_v55 = vmul.f32 1.442695, %v4464_v39  ;;  %v12591_v46 = vrot.slane %v11333_v7, 1  ;;  %v7361_v3 = vsel %vm7298_vm0, %v7235_v26, %v7234_v54  ;;  %v6297_v33 = vadd.f32 %v6296_v48, %v6295_v58 }
 0x5e1   : > { %8618 = vpow2.f32 %v4696_v62  ;;  %v7860_v24 = vpack.c.bf16 %v11189_v42, %v11189_v42  ;;  %v4257_v25 = vmax.f32 %v4255_v17, %v4256_v23  ;;  %v7861_v9 = vpack.c.bf16 %v11191_v37, %v11191_v37 }
 0x5e2   : > { %v6321_v30 = vadd.f32 %v12591_v46, %v11333_v7  ;;  %8620 = vpow2.f32 %v4698_v8  ;;  %v7859_v28 = vpack.c.bf16 %v6297_v33, %v6297_v33  ;;  %v7862_v59 = vpack.c.bf16 %v6315_v29, %v6315_v29 }
 0x5e3   : > { %8622 = vpow2.f32 %v4700_v2  ;;  %v7362_v40 = vsel %vm7300_vm1, %v7236_v18, %v7361_v3  ;;  %v4465_v52 = vsub.f32 %v11988_v19, %v4257_v25  ;;  %v7238_v5 = vunpack.c.l.b16 %v7860_v24 }
 0x5e4   : > { %8624 = vpow2.f32 %v4702_v55  ;;  %v7863_v7 = vpack.c.bf16 %v6321_v30, %v6321_v30  ;;  %v7237_v57 = vunpack.c.l.b16 %v7859_v28  ;;  %v7239_v15 = vunpack.c.l.b16 %v7861_v9 }
 0x5e5   : > { %v4704_v56 = vmul.f32 1.442695, %v4465_v52  ;;  %v7240_v14 = vunpack.c.l.b16 %v7862_v59 }
 0x5e6   : > { %v7363_v42 = vsel %vm7302_vm2, %v7237_v57, %v7362_v40  ;;  %v7241_v37 = vunpack.c.l.b16 %v7863_v7 }
 0x5e7   : > { %v7364_v27 = vsel %vm7304_vm3, %v7238_v5, %v7363_v42  ;;  %8626 = vpow2.f32 %v4704_v56 }
 0x5e8   : > { %v7365_v0 = vsel %vm7306_vm4, %v7239_v15, %v7364_v27 }
 0x5e9   : > { %v7366_v50 = vsel %vm7308_vm5, %v7240_v14, %v7365_v0 }
 0x5ea   : > { %v12095_v22 = vpop.eup %8612  ;;  %v7367_v19 = vsel %vm7310_vm6, %v7241_v37, %v7366_v50 }
 0x5eb   : > { %v12098_v61 = vpop.eup %8614  ;;  %v7425_v11 = vpack.c.b16 %v7367_v19, %v7367_v19  ;;  %v5362_v35 = vrot.slane %v12095_v22, 4 }
 0x5ec   : > { %v12101_v12 = vpop.eup %8616  ;;  %v5368_v41 = vrot.slane %v12098_v61, 4 }
 0x5ed   : > { %7457 = vst [vmem:[%s9683_s26 + $0x20] sm:$0xf] %v7425_v11  ;;  %v5363_v4 = vadd.f32 %v12095_v22, %v5362_v35  ;;  %v5374_v21 = vrot.slane %v12101_v12, 4  ;;  %v12592_v11 = vld [vmem:[#allocation97_spill] sm:$0xff] }
 0x5ee   : > { %v12104_v44 = vpop.eup %8618  ;;  %v5369_v34 = vadd.f32 %v12098_v61, %v5368_v41 }
 0x5ef   : > { %v12109_v10 = vpop.eup %8620  ;;  %v5380_v16 = vrot.slane %v12104_v44, 4  ;;  %v5364_v43 = vrot.slane %v5363_v4, 2  ;;  %v5375_v53 = vadd.f32 %v12101_v12, %v5374_v21  ;;  %v12593_v21 = vld [vmem:[#allocation100_spill] sm:$0xff] }
 0x5f0   : > { %v12113_v47 = vpop.eup %8622  ;;  %v5386_v13 = vrot.slane %v12109_v10, 4  ;;  %v5370_v6 = vrot.slane %v5369_v34, 2 }
 0x5f1   : > { %v12117_v32 = vpop.eup %8624  ;;  %v5381_v38 = vadd.f32 %v12104_v44, %v5380_v16  ;;  %v5392_v60 = vrot.slane %v12113_v47, 4  ;;  %v5365_v36 = vadd.f32 %v5364_v43, %v5363_v4  ;;  %v5376_v45 = vrot.slane %v5375_v53, 2 }
 0x5f2   : > { %v5387_v20 = vadd.f32 %v12109_v10, %v5386_v13  ;;  %v5398_v39 = vrot.slane %v12117_v32, 4  ;;  %v5371_v51 = vadd.f32 %v5370_v6, %v5369_v34 }
 0x5f3   : > { %v5382_v31 = vrot.slane %v5381_v38, 2  ;;  %v5393_v26 = vadd.f32 %v12113_v47, %v5392_v60  ;;  %v5366_v58 = vrot.slane %v5365_v36, 1  ;;  %v5377_v1 = vadd.f32 %v5376_v45, %v5375_v53  ;;  %v12594_v53 = vld [vmem:[#allocation103_spill] sm:$0xff]  ;;  %v12596_v45 = vld [vmem:[#allocation109_spill] sm:$0xff] }
 0x5f4   : > { %v5388_v62 = vrot.slane %v5387_v20, 2  ;;  %v5399_v49 = vadd.f32 %v12117_v32, %v5398_v39  ;;  %v12125_v54 = vpop.eup %8626  ;;  %v5372_v17 = vrot.slane %v5371_v51, 1 }
 0x5f5   : > { %v5383_v8 = vadd.f32 %v5382_v31, %v5381_v38  ;;  %v5394_v63 = vrot.slane %v5393_v26, 2  ;;  %v5367_v29 = vadd.f32 %v5366_v58, %v5365_v36  ;;  %v5378_v48 = vrot.slane %v5377_v1, 1 }
 0x5f6   : > { %v5389_v2 = vadd.f32 %v5388_v62, %v5387_v20  ;;  %v5400_v18 = vrot.slane %v5399_v49, 2  ;;  %v5373_v23 = vadd.f32 %v5372_v17, %v5371_v51  ;;  %v5404_v30 = vrot.slane %v12125_v54, 4  ;;  %v12597_v51 = vld [vmem:[#allocation111_spill] sm:$0xff] }
 0x5f7   : > { %v5384_v55 = vrot.slane %v5383_v8, 1  ;;  %v5395_v46 = vadd.f32 %v5394_v63, %v5393_v26  ;;  %v5379_v3 = vadd.f32 %v5378_v48, %v5377_v1  ;;  %8628 = vrcp.f32 %v5367_v29 }
 0x5f8   : > { %v5390_v33 = vrot.slane %v5389_v2, 1  ;;  %v5401_v24 = vadd.f32 %v5400_v18, %v5399_v49  ;;  %v5405_v28 = vadd.f32 %v12125_v54, %v5404_v30  ;;  %8630 = vrcp.f32 %v5373_v23 }
 0x5f9   : > { %v5385_v25 = vadd.f32 %v5384_v55, %v5383_v8  ;;  %v5396_v9 = vrot.slane %v5395_v46, 1  ;;  %8632 = vrcp.f32 %v5379_v3 }
 0x5fa   : > { %v5391_v59 = vadd.f32 %v5390_v33, %v5389_v2  ;;  %v5402_v40 = vrot.slane %v5401_v24, 1  ;;  %v5406_v7 = vrot.slane %v5405_v28, 2 }
 0x5fb   : > { %v5397_v52 = vadd.f32 %v5396_v9, %v5395_v46  ;;  %8634 = vrcp.f32 %v5385_v25  ;;  %v12599_v9 = vld [vmem:[#allocation115_spill] sm:$0xff] }
 0x5fc   : > { %v5403_v57 = vadd.f32 %v5402_v40, %v5401_v24  ;;  %8636 = vrcp.f32 %v5391_v59  ;;  %v5407_v5 = vadd.f32 %v5406_v7, %v5405_v28 }
 0x5fd   : > { %8638 = vrcp.f32 %v5397_v52 }
 0x5fe   : > { %8640 = vrcp.f32 %v5403_v57  ;;  %v5408_v56 = vrot.slane %v5407_v5, 1 }
 0x600   : > { %v5409_v15 = vadd.f32 %v5408_v56, %v5407_v5 }
 0x602   : > { %8642 = vrcp.f32 %v5409_v15 }
 0x604   : > { %v8629_v42 = vpop.eup %8628 }
 0x605   : > { %v8631_v14 = vpop.eup %8630  ;;  %v5738_v27 = vmul.f32 %v8629_v42, %v12095_v22 }
 0x606   : > { %v8633_v37 = vpop.eup %8632  ;;  %v5739_v0 = vmul.f32 %v8631_v14, %v12098_v61  ;;  %v12595_v61 = vld [vmem:[#allocation106_spill] sm:$0xff] }
 0x607   : > { %v5740_v19 = vmul.f32 %v8633_v37, %v12101_v12  ;;  %v5866_v35 = vmul.f32 %v5738_v27, %v12592_v11 }
 0x608   : > { %v8635_v50 = vpop.eup %8634  ;;  %v5867_v34 = vmul.f32 %v5739_v0, %v12593_v21 }
 0x609   : > { %v8637_v41 = vpop.eup %8636  ;;  %v5741_v4 = vmul.f32 %v8635_v50, %v12104_v44  ;;  %v5868_v13 = vmul.f32 %v5740_v19, %v12594_v53  ;;  %v6514_v6 = vrot.slane %v5866_v35, 4 }
 0x60a   : > { %v8639_v16 = vpop.eup %8638  ;;  %v5742_v43 = vmul.f32 %v8637_v41, %v12109_v10  ;;  %v6520_v36 = vrot.slane %v5867_v34, 4  ;;  %v12598_v10 = vld [vmem:[#allocation113_spill] sm:$0xff] }
 0x60b   : > { %v8641_v22 = vpop.eup %8640  ;;  %v5743_v38 = vmul.f32 %v8639_v16, %v12113_v47  ;;  %v5869_v60 = vmul.f32 %v5741_v4, %v12595_v61  ;;  %v6515_v39 = vadd.f32 %v6514_v6, %v5866_v35  ;;  %v6526_v44 = vrot.slane %v5868_v13, 4 }
 0x60c   : > { %v5744_v12 = vmul.f32 %v8641_v22, %v12117_v32  ;;  %v5870_v20 = vmul.f32 %v5742_v43, %v12596_v45  ;;  %v6521_v26 = vadd.f32 %v6520_v36, %v5867_v34 }
 0x60d   : > { %v5871_v31 = vmul.f32 %v5743_v38, %v12597_v51  ;;  %v6532_v58 = vrot.slane %v5869_v60, 4  ;;  %v6516_v62 = vrot.slane %v6515_v39, 2  ;;  %v6527_v49 = vadd.f32 %v6526_v44, %v5868_v13 }
 0x60e   : > { %v5872_v1 = vmul.f32 %v5744_v12, %v12598_v10  ;;  %v6538_v17 = vrot.slane %v5870_v20, 4  ;;  %v6522_v8 = vrot.slane %v6521_v26, 2 }
 0x60f   : > { %v6533_v47 = vadd.f32 %v6532_v58, %v5869_v60  ;;  %v6544_v63 = vrot.slane %v5871_v31, 4  ;;  %v8643_v29 = vpop.eup %8642  ;;  %v6517_v48 = vadd.f32 %v6516_v62, %v6515_v39  ;;  %v6528_v2 = vrot.slane %v6527_v49, 2 }
 0x610   : > { %v6539_v32 = vadd.f32 %v6538_v17, %v5870_v20  ;;  %v6550_v18 = vrot.slane %v5872_v1, 4  ;;  %v5745_v23 = vmul.f32 %v8643_v29, %v12125_v54  ;;  %v6523_v55 = vadd.f32 %v6522_v8, %v6521_v26 }
 0x611   : > { %v6534_v46 = vrot.slane %v6533_v47, 2  ;;  %v6545_v30 = vadd.f32 %v6544_v63, %v5871_v31  ;;  %v6518_v3 = vrot.slane %v6517_v48, 1  ;;  %v6529_v33 = vadd.f32 %v6528_v2, %v6527_v49 }
 0x612   : > { %v6540_v24 = vrot.slane %v6539_v32, 2  ;;  %v6551_v25 = vadd.f32 %v6550_v18, %v5872_v1  ;;  %v5873_v28 = vmul.f32 %v5745_v23, %v12599_v9  ;;  %v6524_v59 = vrot.slane %v6523_v55, 1 }
 0x613   : > { %v6535_v40 = vadd.f32 %v6534_v46, %v6533_v47  ;;  %v6546_v52 = vrot.slane %v6545_v30, 2  ;;  %v6519_v7 = vadd.f32 %v6518_v3, %v6517_v48  ;;  %v6530_v57 = vrot.slane %v6529_v33, 1 }
 0x614   : > { %v6541_v5 = vadd.f32 %v6540_v24, %v6539_v32  ;;  %v6552_v56 = vrot.slane %v6551_v25, 2  ;;  %v6525_v15 = vadd.f32 %v6524_v59, %v6523_v55  ;;  %v6556_v54 = vrot.slane %v5873_v28, 4 }
 0x615   : > { %v6536_v42 = vrot.slane %v6535_v40, 1  ;;  %v6547_v14 = vadd.f32 %v6546_v52, %v6545_v30  ;;  %v6531_v27 = vadd.f32 %v6530_v57, %v6529_v33  ;;  %v7896_v50 = vpack.c.bf16 %v6519_v7, %v6519_v7 }
 0x616   : > { %v6542_v37 = vrot.slane %v6541_v5, 1  ;;  %v6553_v0 = vadd.f32 %v6552_v56, %v6551_v25  ;;  %v6557_v35 = vadd.f32 %v6556_v54, %v5873_v28  ;;  %v7897_v41 = vpack.c.bf16 %v6525_v15, %v6525_v15 }
 0x617   : > { %v6537_v19 = vadd.f32 %v6536_v42, %v6535_v40  ;;  %v6548_v11 = vrot.slane %v6547_v14, 1  ;;  %v7898_v34 = vpack.c.bf16 %v6531_v27, %v6531_v27  ;;  %v7274_v16 = vunpack.c.l.b16 %v7896_v50 }
 0x618   : > { %v6543_v4 = vadd.f32 %v6542_v37, %v6541_v5  ;;  %v6554_v21 = vrot.slane %v6553_v0, 1  ;;  %v6558_v53 = vrot.slane %v6557_v35, 2  ;;  %v7275_v6 = vunpack.c.l.b16 %v7897_v41 }
 0x619   : > { %v6549_v43 = vadd.f32 %v6548_v11, %v6547_v14  ;;  %v7899_v13 = vpack.c.bf16 %v6537_v19, %v6537_v19  ;;  %v7276_v61 = vunpack.c.l.b16 %v7898_v34 }
 0x61a   : > { %v6555_v22 = vadd.f32 %v6554_v21, %v6553_v0  ;;  %v7900_v38 = vpack.c.bf16 %v6543_v4, %v6543_v4  ;;  %v6559_v60 = vadd.f32 %v6558_v53, %v6557_v35  ;;  %v7396_v45 = vsel %vm7298_vm0, %v7275_v6, %v7274_v16 }
 0x61b   : > { %v7901_v36 = vpack.c.bf16 %v6549_v43, %v6549_v43  ;;  %v7277_v12 = vunpack.c.l.b16 %v7899_v13  ;;  %v7397_v44 = vsel %vm7300_vm1, %v7276_v61, %v7396_v45 }
 0x61c   : > { %v7902_v20 = vpack.c.bf16 %v6555_v22, %v6555_v22  ;;  %v7278_v39 = vunpack.c.l.b16 %v7900_v38  ;;  %v6560_v51 = vrot.slane %v6559_v60, 1 }
 0x61d   : > { %v7279_v31 = vunpack.c.l.b16 %v7901_v36  ;;  %v7398_v26 = vsel %vm7302_vm2, %v7277_v12, %v7397_v44 }
 0x61e   : > { %v7399_v58 = vsel %vm7304_vm3, %v7278_v39, %v7398_v26  ;;  %v6561_v10 = vadd.f32 %v6560_v51, %v6559_v60  ;;  %v7280_v62 = vunpack.c.l.b16 %v7902_v20 }
 0x61f   : > { %v7400_v1 = vsel %vm7306_vm4, %v7279_v31, %v7399_v58 }
 0x620   : > { %v7903_v49 = vpack.c.bf16 %v6561_v10, %v6561_v10  ;;  %v7401_v17 = vsel %vm7308_vm5, %v7280_v62, %v7400_v1 }
 0x622   : > { %v7281_v8 = vunpack.c.l.b16 %v7903_v49 }
 0x624   : > { %v7402_v47 = vsel %vm7310_vm6, %v7281_v8, %v7401_v17 }
 0x625   : > { %v7430_v63 = vpack.c.b16 %v7402_v47, %v7402_v47 }
 0x627   : > { %7462 = vst [vmem:[%s9683_s26 + $0x34] sm:$0xf] %v7430_v63 }
 0x628   : > { %8662 = shalt.err (!%p8659_p4)
}
 0x629   : > { %s8663_s23 = scalar_lea.hbm %s12157_s30, 1024  ;;  %s8667_s12 = scalar_lea.hbm %s12209_s5, 2048 }
 0x62a   : > { %p8664_p7 = scmp.ne.s32.totalorder %s12157_s30, %s8663_s23  ;;  %p8668_p10 = scmp.lt.s32.totalorder %s12157_s30, %s12209_s5 }
 0x62b   : > { %p8669_p11 = scmp.lt.s32.totalorder %s8667_s12, %s8663_s23 }
 0x62c   : > { %p8665_p8 = pnand %p8664_p7, %p8784_p5 }
 0x62d   : > { %p8670_p12 = por %p8669_p11, %p8668_p10 }
 0x62e   : > { %p8666_p9 = pneg %p8665_p8 }
 0x630   : > { %p8671_p13 = pnand %p8670_p12, %p8666_p9 }
 0x632   : > { %8674 = shalt.err (!%p8671_p13)
}
 0x633   : > { %s8714_s15 = smov 64   ;;  %s8715_s16 = smov 4  }
 0x634   : > { %7985 = dma.vmem_to_hbm [thread:$0]  (%p8784_p5), %s12159_s8, 1024, %s12157_s30, %s12164_s6, %s8714_s15, %s8714_s15, %s8715_s16  }
 0x635 PF: > { %p7991_p0 = scmp.ge.s32.totalorder %s8709_s21, 2  ;;  %s7494_s17 = sand.u32 1, %s8697_s18  }
 0x636   : > { %s7495_s25 = scalar_lea.sflag [#allocation3], %s7494_s17 }
 0x637   : > { %p7988_p1 = pnand %p7991_p0, %p8788_p6 }
 0x639   : > { %p7989_p2 = pneg %p7988_p1 }
 0x63b   : > { %8692 = dma.done.wait (%p7989_p2), %s7495_s25, 1024  }
 0x63c   : > { %8694 = vsyncadd (%p7989_p2), %s7495_s25, 4294966272  ;;  %p15_p3 = scmp.ge.s32.totalorder %s8771_s24, 4   ;;  %s12600_s18 = smov %s8701_s19 }
 0x63d   : > { %s12601_s19 = smov %s8705_s20  ;;  %s12602_s20 = smov %s8782_s27 }
 0x63e   : > { %s12603_s21 = smov %s8771_s24  ;;  %17 = sbr.rel (!%p15_p3) target bundleno = 3 (0x3), region = 78 }
 0x643   :  { %7500 = vsyncpa [#allocation3], 1 }
 0x644   :  { %7502 = vsyncpa [#allocation3 + $0x1], 1 }

</bundles_post_ra>
